<compile_context>
chip_gen: v6e
topology: v6e:2x2x1
jax: 0.10.0
libtpu: 0.0.40
codegen_flags: <defaults>
</compile_context>

<pallas_src>
import jax
import jax.numpy as jnp
from jax.experimental import pallas as pl
from jax.experimental.pallas import tpu as pltpu


# -----------------------------------------------------------------------------
# The fused per-image kernel
# -----------------------------------------------------------------------------
def _cnn_fused_kernel(x_ref, w1_ref, t1_ref, rs1_ref, cs1_ref,
                      w2_ref, t2_ref, rs2_ref, cs2_ref,
                      fw1_ref, fb1_ref, fw2_ref, fb2_ref, fw3_ref, fb3_ref,
                      o_ref):
    def mm(a, b):
        return jnp.dot(a.astype(jnp.bfloat16), b.astype(jnp.bfloat16),
                       preferred_element_type=jnp.float32)

    # ---- conv1 (3x3, pad already applied to the 30x30 input) + BN + ReLU ----
    x = x_ref[0]                                               # (30, 30) bf16
    acc1 = (mm(x[0:28, :], w1_ref[0]) +
            mm(x[1:29, :], w1_ref[1]) +
            mm(x[2:30, :], w1_ref[2]))                         # (28, 896) f32
    c1 = jnp.maximum(acc1 + t1_ref[...], 0.0)                  # rows=y, lanes=x*32+c

    # ---- maxpool 2x2 via one-hot selection matmuls ----
    c1b = c1.astype(jnp.bfloat16)
    v1 = jnp.maximum(mm(rs1_ref[0], c1b), mm(rs1_ref[1], c1b))  # (14, 896)
    m1 = jnp.maximum(mm(v1, cs1_ref[0]), mm(v1, cs1_ref[1]))    # (14, 448)
    m1b = m1.astype(jnp.bfloat16)                               # rows=y, lanes=x*32+c

    # ---- conv2 (3x3, valid) + BN + ReLU ----
    acc2 = (mm(m1b[0:12, :], w2_ref[0]) +
            mm(m1b[1:13, :], w2_ref[1]) +
            mm(m1b[2:14, :], w2_ref[2]))                        # (12, 768) f32
    c2 = jnp.maximum(acc2 + t2_ref[...], 0.0)

    # ---- maxpool 2x2 ----
    c2b = c2.astype(jnp.bfloat16)
    v2 = jnp.maximum(mm(rs2_ref[0], c2b), mm(rs2_ref[1], c2b))  # (6, 768)
    m2 = jnp.maximum(mm(v2, cs2_ref[0]), mm(v2, cs2_ref[1]))    # (6, 384)
    m2b = m2.astype(jnp.bfloat16)                               # rows=y, lanes=x*64+c

    # ---- fc head (feature order = (y, x, c), i.e. NHWC flatten) ----
    h1 = fb1_ref[...]                                           # (1, 600) f32
    for r in range(6):                                          # avoids a lane-crossing flatten
        h1 = h1 + mm(m2b[r:r + 1, :], fw1_ref[r * 384:(r + 1) * 384, :])
    # TODO(synk): Dropout2d(0.25) is the identity in eval/inference mode.
    h2 = mm(h1, fw2_ref[...]) + fb2_ref[...]                    # (1, 120)
    h3 = mm(h2, fw3_ref[...]) + fb3_ref[...]                    # (1, 10)

    # log_softmax along the class dim
    m = jnp.max(h3, axis=-1, keepdims=True)
    z = h3 - m
    lse = jnp.log(jnp.sum(jnp.exp(z), axis=-1, keepdims=True))
    o_ref[0] = z - lse


def fused_cnn_call(xpad, p):
    """xpad: (N, 30, 30) bf16 padded input; p: packed kernel params."""
    N = xpad.shape[0]
    out = pl.pallas_call(
        _cnn_fused_kernel,
        out_shape=jax.ShapeDtypeStruct((N, 1, 10), jnp.float32),
        grid=(N,),
        in_specs=[
            pl.BlockSpec((1, 30, 30), lambda n: (n, 0, 0)),       # x (per image)
            pl.BlockSpec((3, 30, 896), lambda n: (0, 0, 0)),      # conv1 banded W
            pl.BlockSpec((1, 896), lambda n: (0, 0)),             # conv1 folded bias
            pl.BlockSpec((2, 14, 28), lambda n: (0, 0, 0)),       # pool1 row selectors
            pl.BlockSpec((2, 896, 448), lambda n: (0, 0, 0)),     # pool1 col selectors
            pl.BlockSpec((3, 448, 768), lambda n: (0, 0, 0)),     # conv2 banded W
            pl.BlockSpec((1, 768), lambda n: (0, 0)),             # conv2 folded bias
            pl.BlockSpec((2, 6, 12), lambda n: (0, 0, 0)),        # pool2 row selectors
            pl.BlockSpec((2, 768, 384), lambda n: (0, 0, 0)),     # pool2 col selectors
            pl.BlockSpec((2304, 600), lambda n: (0, 0)),          # fc1 W (bf16)
            pl.BlockSpec((1, 600), lambda n: (0, 0)),             # fc1 b
            pl.BlockSpec((600, 120), lambda n: (0, 0)),           # fc2 W
            pl.BlockSpec((1, 120), lambda n: (0, 0)),             # fc2 b
            pl.BlockSpec((120, 10), lambda n: (0, 0)),            # fc3 W
            pl.BlockSpec((1, 10), lambda n: (0, 0)),              # fc3 b
        ],
        out_specs=pl.BlockSpec((1, 1, 10), lambda n: (n, 0, 0)),
        compiler_params=pltpu.CompilerParams(
            dimension_semantics=("parallel",),        # lets v7x shard the batch
            vmem_limit_bytes=32 * 1024 * 1024,        # ~17 MB resident weights + slack
        ),
    )(xpad, p["w1"], p["t1"], p["rs1"], p["cs1"],
      p["w2"], p["t2"], p["rs2"], p["cs2"],
      p["fw1"], p["fb1"], p["fw2"], p["fb2"], p["fw3"], p["fb3"])
    return out.reshape(N, 10)


@jax.jit
def cnn_forward(x_nchw, packed):
    x = x_nchw[:, 0, :, :].astype(jnp.float32)                   # (N, 28, 28), Cin == 1
    xpad = jnp.pad(x, ((0, 0), (1, 1), (1, 1))).astype(jnp.bfloat16)
    return fused_cnn_call(xpad, packed)


# -----------------------------------------------------------------------------
# Glue: BN folding, banded conv matrices, pooling selectors (built once)
# -----------------------------------------------------------------------------
def _band_matrix(w_dy, x_out):
    """w_dy: (kw, cin, cout) taps for one ky.  Returns (x_in*cin, x_out*cout)."""
    kw, cin, cout = w_dy.shape
    x_in = x_out + kw - 1
    xin = jnp.arange(x_in)[:, None]
    xo = jnp.arange(x_out)[None, :]
    W = jnp.zeros((x_in, cin, x_out, cout), jnp.float32)
    for dx in range(kw):
        mask = (xin == xo + dx).astype(jnp.float32)              # (x_in, x_out)
        W = W + mask[:, None, :, None] * w_dy[dx][None, :, None, :]
    return W.reshape(x_in * cin, x_out * cout)


def _row_selector(n_out, n_in, offset):
    r = jnp.arange(n_out)[:, None]
    c = jnp.arange(n_in)[None, :]
    return (c == 2 * r + offset).astype(jnp.float32)


def _col_selector(c_per, n_out, n_in, offset):
    j = jnp.arange(n_in)[:, None]
    k = jnp.arange(n_out)[None, :]
    tgt = (2 * (k // c_per) + offset) * c_per + (k % c_per)
    return (j == tgt).astype(jnp.float32)


def pack_params(raw, eps=1e-5):
    bf16 = jnp.bfloat16
    s1 = raw["g1"] / jnp.sqrt(raw["v1"] + eps)
    t1 = raw["be1"] + (raw["cb1"] - raw["mu1"]) * s1
    s2 = raw["g2"] / jnp.sqrt(raw["v2"] + eps)
    t2 = raw["be2"] + (raw["cb2"] - raw["mu2"]) * s2

    w1f = raw["w1"] * s1[None, None, None, :]                    # (3,3,1,32)  HWIO
    w2f = raw["w2"] * s2[None, None, None, :]                    # (3,3,32,64) HWIO

    W1 = jnp.stack([_band_matrix(w1f[dy], 28) for dy in range(3)]).astype(bf16)   # (3,30,896)
    W2 = jnp.stack([_band_matrix(w2f[dy], 12) for dy in range(3)]).astype(bf16)   # (3,448,768)

    rs1 = jnp.stack([_row_selector(14, 28, 0), _row_selector(14, 28, 1)]).astype(bf16)
    cs1 = jnp.stack([_col_selector(32, 448, 896, 0), _col_selector(32, 448, 896, 1)]).astype(bf16)
    rs2 = jnp.stack([_row_selector(6, 12, 0), _row_selector(6, 12, 1)]).astype(bf16)
    cs2 = jnp.stack([_col_selector(64, 384, 768, 0), _col_selector(64, 384, 768, 1)]).astype(bf16)

    return {
        "w1": W1, "t1": jnp.tile(t1, 28)[None, :],
        "w2": W2, "t2": jnp.tile(t2, 12)[None, :],
        "rs1": rs1, "cs1": cs1, "rs2": rs2, "cs2": cs2,
        "fw1": raw["fw1"].astype(bf16), "fb1": raw["fb1"][None, :],
        "fw2": raw["fw2"].astype(bf16), "fb2": raw["fb2"][None, :],
        "fw3": raw["fw3"].astype(bf16), "fb3": raw["fb3"][None, :],
    }


def init_params(key):
    ks = jax.random.split(key, 16)
    raw = {
        # conv weights in HWIO layout (kh, kw, cin, cout)
        "w1": 0.1 * jax.random.normal(ks[0], (3, 3, 1, 32), jnp.float32),
        "cb1": 0.05 * jax.random.normal(ks[1], (32,), jnp.float32),
        "g1": 0.5 + jax.random.uniform(ks[2], (32,), jnp.float32),
        "be1": 0.1 * jax.random.normal(ks[3], (32,), jnp.float32),
        "mu1": 0.1 * jax.random.normal(ks[4], (32,), jnp.float32),
        "v1": 0.5 + jax.random.uniform(ks[5], (32,), jnp.float32),
        "w2": 0.05 * jax.random.normal(ks[6], (3, 3, 32, 64), jnp.float32),
        "cb2": 0.05 * jax.random.normal(ks[7], (64,), jnp.float32),
        "g2": 0.5 + jax.random.uniform(ks[8], (64,), jnp.float32),
        "be2": 0.1 * jax.random.normal(ks[9], (64,), jnp.float32),
        "mu2": 0.1 * jax.random.normal(ks[10], (64,), jnp.float32),
        "v2": 0.5 + jax.random.uniform(ks[11], (64,), jnp.float32),
        # fc weights stored (in, out); fc1 rows follow the (y, x, c) flatten order
        "fw1": (1.0 / jnp.sqrt(2304.0)) * jax.random.normal(ks[12], (2304, 600), jnp.float32),
        "fb1": jnp.zeros((600,), jnp.float32),
        "fw2": (1.0 / jnp.sqrt(600.0)) * jax.random.normal(ks[13], (600, 120), jnp.float32),
        "fb2": jnp.zeros((120,), jnp.float32),
        "fw3": (1.0 / jnp.sqrt(120.0)) * jax.random.normal(ks[14], (120, 10), jnp.float32),
        "fb3": jnp.zeros((10,), jnp.float32),
    }
    return raw, pack_params(raw)


# -----------------------------------------------------------------------------
# Pure-JAX reference (f32) for validation
# -----------------------------------------------------------------------------
def reference_forward(x_nchw, raw, eps=1e-5):
    x = jnp.transpose(x_nchw, (0, 2, 3, 1)).astype(jnp.float32)  # NHWC

    def block(x, w, cb, g, b, mu, var, pad):
        y = jax.lax.conv_general_dilated(
            x, w, window_strides=(1, 1), padding=pad,
            dimension_numbers=("NHWC", "HWIO", "NHWC"))
        y = (y + cb - mu) / jnp.sqrt(var + eps) * g + b
        y = jnp.maximum(y, 0.0)
        return jax.lax.reduce_window(y, -jnp.inf, jax.lax.max,
                                     (1, 2, 2, 1), (1, 2, 2, 1), "VALID")

    y = block(x, raw["w1"], raw["cb1"], raw["g1"], raw["be1"], raw["mu1"], raw["v1"],
              ((1, 1), (1, 1)))
    y = block(y, raw["w2"], raw["cb2"], raw["g2"], raw["be2"], raw["mu2"], raw["v2"],
              ((0, 0), (0, 0)))
    feat = y.reshape(y.shape[0], -1)                             # (N, 2304) in (y,x,c) order
    h = feat @ raw["fw1"] + raw["fb1"]
    h = h @ raw["fw2"] + raw["fb2"]
    h = h @ raw["fw3"] + raw["fb3"]
    return jax.nn.log_softmax(h, axis=-1)


if __name__ == "__main__":
    key = jax.random.PRNGKey(0)
    kx, kp = jax.random.split(key)
    x = jax.random.normal(kx, (2, 1, 28, 28), jnp.float32)       # NCHW, MNIST-sized
    raw, packed = init_params(kp)

    out = cnn_forward(x, packed)
    out = jax.block_until_ready(out)

    assert out.shape == (2, 10)
    assert bool(jnp.all(jnp.isfinite(out)))
    # log_softmax rows should sum to ~1 in probability space
    assert bool(jnp.allclose(jnp.sum(jnp.exp(out), axis=1), 1.0, atol=1e-3))
    # match the f32 pure-JAX reference (bf16 weights/activations -> loose tol)
    ref = reference_forward(x, raw)
    assert bool(jnp.allclose(out, ref, atol=0.3)), float(jnp.max(jnp.abs(out - ref)))
    print("KERNEL_OK")
</pallas_src>

<mosaic_0001>
module attributes {stable_mosaic.version = 11 : i64} {
  func.func @_cnn_fused_kernel(%arg0: i32, %arg1: memref<1x30x30xbf16, #tpu.memory_space<vmem>>, %arg2: memref<3x30x896xbf16, #tpu.memory_space<vmem>>, %arg3: memref<1x896xf32, #tpu.memory_space<vmem>>, %arg4: memref<2x14x28xbf16, #tpu.memory_space<vmem>>, %arg5: memref<2x896x448xbf16, #tpu.memory_space<vmem>>, %arg6: memref<3x448x768xbf16, #tpu.memory_space<vmem>>, %arg7: memref<1x768xf32, #tpu.memory_space<vmem>>, %arg8: memref<2x6x12xbf16, #tpu.memory_space<vmem>>, %arg9: memref<2x768x384xbf16, #tpu.memory_space<vmem>>, %arg10: memref<2304x600xbf16, #tpu.memory_space<vmem>>, %arg11: memref<1x600xf32, #tpu.memory_space<vmem>>, %arg12: memref<600x120xbf16, #tpu.memory_space<vmem>>, %arg13: memref<1x120xf32, #tpu.memory_space<vmem>>, %arg14: memref<120x10xbf16, #tpu.memory_space<vmem>>, %arg15: memref<1x10xf32, #tpu.memory_space<vmem>>, %arg16: memref<1x1x10xf32, #tpu.memory_space<vmem>>) attributes {dimension_semantics = [#tpu.dimension_semantics<parallel>], iteration_bounds = array<i64: 2>, scalar_prefetch = 0 : i64, scratch_operands = 0 : i64, tpu.core_type = #tpu.core_type<tc>, window_params = [{transform_indices = @transform_0, window_bounds = array<i64: 1, 30, 30>}, {pipeline_mode = #tpu.pipeline_mode<synchronous>, transform_indices = @transform_1, window_bounds = array<i64: 3, 30, 896>}, {pipeline_mode = #tpu.pipeline_mode<synchronous>, transform_indices = @transform_2, window_bounds = array<i64: 1, 896>}, {pipeline_mode = #tpu.pipeline_mode<synchronous>, transform_indices = @transform_3, window_bounds = array<i64: 2, 14, 28>}, {pipeline_mode = #tpu.pipeline_mode<synchronous>, transform_indices = @transform_4, window_bounds = array<i64: 2, 896, 448>}, {pipeline_mode = #tpu.pipeline_mode<synchronous>, transform_indices = @transform_5, window_bounds = array<i64: 3, 448, 768>}, {pipeline_mode = #tpu.pipeline_mode<synchronous>, transform_indices = @transform_6, window_bounds = array<i64: 1, 768>}, {pipeline_mode = #tpu.pipeline_mode<synchronous>, transform_indices = @transform_7, window_bounds = array<i64: 2, 6, 12>}, {pipeline_mode = #tpu.pipeline_mode<synchronous>, transform_indices = @transform_8, window_bounds = array<i64: 2, 768, 384>}, {pipeline_mode = #tpu.pipeline_mode<synchronous>, transform_indices = @transform_9, window_bounds = array<i64: 2304, 600>}, {pipeline_mode = #tpu.pipeline_mode<synchronous>, transform_indices = @transform_10, window_bounds = array<i64: 1, 600>}, {pipeline_mode = #tpu.pipeline_mode<synchronous>, transform_indices = @transform_11, window_bounds = array<i64: 600, 120>}, {pipeline_mode = #tpu.pipeline_mode<synchronous>, transform_indices = @transform_12, window_bounds = array<i64: 1, 120>}, {pipeline_mode = #tpu.pipeline_mode<synchronous>, transform_indices = @transform_13, window_bounds = array<i64: 120, 10>}, {pipeline_mode = #tpu.pipeline_mode<synchronous>, transform_indices = @transform_14, window_bounds = array<i64: 1, 10>}, {transform_indices = @transform_15, window_bounds = array<i64: 1, 1, 10>}]} {
    %c0 = arith.constant 0 : index
    %c0_0 = arith.constant 0 : index
    %c0_1 = arith.constant 0 : index
    %0 = vector.load %arg1[%c0, %c0_0, %c0_1] : memref<1x30x30xbf16, #tpu.memory_space<vmem>>, vector<1x30x30xbf16>
    %1 = vector.shape_cast %0 : vector<1x30x30xbf16> to vector<30x30xbf16>
    %2 = vector.extract_strided_slice %1 {offsets = [0, 0], sizes = [28, 30], strides = [1, 1]} : vector<30x30xbf16> to vector<28x30xbf16>
    %c0_2 = arith.constant 0 : index
    %c0_3 = arith.constant 0 : index
    %c0_4 = arith.constant 0 : index
    %3 = vector.load %arg2[%c0_2, %c0_3, %c0_4] : memref<3x30x896xbf16, #tpu.memory_space<vmem>>, vector<1x30x896xbf16>
    %4 = vector.shape_cast %3 : vector<1x30x896xbf16> to vector<30x896xbf16>
    %cst = arith.constant dense<0.000000e+00> : vector<28x896xf32>
    %5 = tpu.matmul %2, %4, %cst {dimension_numbers = #tpu.dot_dimension_numbers<[1], [0], [0], [1], [0, 0, 1, 1], [], []>} : vector<28x30xbf16>, vector<30x896xbf16>, vector<28x896xf32> -> vector<28x896xf32>
    %6 = vector.extract_strided_slice %1 {offsets = [1, 0], sizes = [28, 30], strides = [1, 1]} : vector<30x30xbf16> to vector<28x30xbf16>
    %c1 = arith.constant 1 : index
    %c0_5 = arith.constant 0 : index
    %c0_6 = arith.constant 0 : index
    %7 = vector.load %arg2[%c1, %c0_5, %c0_6] : memref<3x30x896xbf16, #tpu.memory_space<vmem>>, vector<1x30x896xbf16>
    %8 = vector.shape_cast %7 : vector<1x30x896xbf16> to vector<30x896xbf16>
    %cst_7 = arith.constant dense<0.000000e+00> : vector<28x896xf32>
    %9 = tpu.matmul %6, %8, %cst_7 {dimension_numbers = #tpu.dot_dimension_numbers<[1], [0], [0], [1], [0, 0, 1, 1], [], []>} : vector<28x30xbf16>, vector<30x896xbf16>, vector<28x896xf32> -> vector<28x896xf32>
    %10 = arith.addf %5, %9 : vector<28x896xf32>
    %11 = vector.extract_strided_slice %1 {offsets = [2, 0], sizes = [28, 30], strides = [1, 1]} : vector<30x30xbf16> to vector<28x30xbf16>
    %c2 = arith.constant 2 : index
    %c0_8 = arith.constant 0 : index
    %c0_9 = arith.constant 0 : index
    %12 = vector.load %arg2[%c2, %c0_8, %c0_9] : memref<3x30x896xbf16, #tpu.memory_space<vmem>>, vector<1x30x896xbf16>
    %13 = vector.shape_cast %12 : vector<1x30x896xbf16> to vector<30x896xbf16>
    %cst_10 = arith.constant dense<0.000000e+00> : vector<28x896xf32>
    %14 = tpu.matmul %11, %13, %cst_10 {dimension_numbers = #tpu.dot_dimension_numbers<[1], [0], [0], [1], [0, 0, 1, 1], [], []>} : vector<28x30xbf16>, vector<30x896xbf16>, vector<28x896xf32> -> vector<28x896xf32>
    %15 = arith.addf %10, %14 : vector<28x896xf32>
    %c0_11 = arith.constant 0 : index
    %c0_12 = arith.constant 0 : index
    %16 = vector.load %arg3[%c0_11, %c0_12] : memref<1x896xf32, #tpu.memory_space<vmem>>, vector<1x896xf32>
    %17 = vector.broadcast %16 : vector<1x896xf32> to vector<28x896xf32>
    %18 = arith.addf %15, %17 : vector<28x896xf32>
    %cst_13 = arith.constant 0.000000e+00 : f32
    %19 = vector.broadcast %cst_13 : f32 to vector<28x896xf32>
    %20 = arith.maximumf %18, %19 : vector<28x896xf32>
    %21 = arith.truncf %20 : vector<28x896xf32> to vector<28x896xbf16>
    %c0_14 = arith.constant 0 : index
    %c0_15 = arith.constant 0 : index
    %c0_16 = arith.constant 0 : index
    %22 = vector.load %arg4[%c0_14, %c0_15, %c0_16] : memref<2x14x28xbf16, #tpu.memory_space<vmem>>, vector<1x14x28xbf16>
    %23 = vector.shape_cast %22 : vector<1x14x28xbf16> to vector<14x28xbf16>
    %cst_17 = arith.constant dense<0.000000e+00> : vector<14x896xf32>
    %24 = tpu.matmul %23, %21, %cst_17 {dimension_numbers = #tpu.dot_dimension_numbers<[1], [0], [0], [1], [0, 0, 1, 1], [], []>} : vector<14x28xbf16>, vector<28x896xbf16>, vector<14x896xf32> -> vector<14x896xf32>
    %c1_18 = arith.constant 1 : index
    %c0_19 = arith.constant 0 : index
    %c0_20 = arith.constant 0 : index
    %25 = vector.load %arg4[%c1_18, %c0_19, %c0_20] : memref<2x14x28xbf16, #tpu.memory_space<vmem>>, vector<1x14x28xbf16>
    %26 = vector.shape_cast %25 : vector<1x14x28xbf16> to vector<14x28xbf16>
    %cst_21 = arith.constant dense<0.000000e+00> : vector<14x896xf32>
    %27 = tpu.matmul %26, %21, %cst_21 {dimension_numbers = #tpu.dot_dimension_numbers<[1], [0], [0], [1], [0, 0, 1, 1], [], []>} : vector<14x28xbf16>, vector<28x896xbf16>, vector<14x896xf32> -> vector<14x896xf32>
    %28 = arith.maximumf %24, %27 : vector<14x896xf32>
    %c0_22 = arith.constant 0 : index
    %c0_23 = arith.constant 0 : index
    %c0_24 = arith.constant 0 : index
    %29 = vector.load %arg5[%c0_22, %c0_23, %c0_24] : memref<2x896x448xbf16, #tpu.memory_space<vmem>>, vector<1x896x448xbf16>
    %30 = vector.shape_cast %29 : vector<1x896x448xbf16> to vector<896x448xbf16>
    %31 = arith.truncf %28 : vector<14x896xf32> to vector<14x896xbf16>
    %cst_25 = arith.constant dense<0.000000e+00> : vector<14x448xf32>
    %32 = tpu.matmul %31, %30, %cst_25 {dimension_numbers = #tpu.dot_dimension_numbers<[1], [0], [0], [1], [0, 0, 1, 1], [], []>} : vector<14x896xbf16>, vector<896x448xbf16>, vector<14x448xf32> -> vector<14x448xf32>
    %c1_26 = arith.constant 1 : index
    %c0_27 = arith.constant 0 : index
    %c0_28 = arith.constant 0 : index
    %33 = vector.load %arg5[%c1_26, %c0_27, %c0_28] : memref<2x896x448xbf16, #tpu.memory_space<vmem>>, vector<1x896x448xbf16>
    %34 = vector.shape_cast %33 : vector<1x896x448xbf16> to vector<896x448xbf16>
    %35 = arith.truncf %28 : vector<14x896xf32> to vector<14x896xbf16>
    %cst_29 = arith.constant dense<0.000000e+00> : vector<14x448xf32>
    %36 = tpu.matmul %35, %34, %cst_29 {dimension_numbers = #tpu.dot_dimension_numbers<[1], [0], [0], [1], [0, 0, 1, 1], [], []>} : vector<14x896xbf16>, vector<896x448xbf16>, vector<14x448xf32> -> vector<14x448xf32>
    %37 = arith.maximumf %32, %36 : vector<14x448xf32>
    %38 = arith.truncf %37 : vector<14x448xf32> to vector<14x448xbf16>
    %39 = vector.extract_strided_slice %38 {offsets = [0, 0], sizes = [12, 448], strides = [1, 1]} : vector<14x448xbf16> to vector<12x448xbf16>
    %c0_30 = arith.constant 0 : index
    %c0_31 = arith.constant 0 : index
    %c0_32 = arith.constant 0 : index
    %40 = vector.load %arg6[%c0_30, %c0_31, %c0_32] : memref<3x448x768xbf16, #tpu.memory_space<vmem>>, vector<1x448x768xbf16>
    %41 = vector.shape_cast %40 : vector<1x448x768xbf16> to vector<448x768xbf16>
    %cst_33 = arith.constant dense<0.000000e+00> : vector<12x768xf32>
    %42 = tpu.matmul %39, %41, %cst_33 {dimension_numbers = #tpu.dot_dimension_numbers<[1], [0], [0], [1], [0, 0, 1, 1], [], []>} : vector<12x448xbf16>, vector<448x768xbf16>, vector<12x768xf32> -> vector<12x768xf32>
    %43 = vector.extract_strided_slice %38 {offsets = [1, 0], sizes = [12, 448], strides = [1, 1]} : vector<14x448xbf16> to vector<12x448xbf16>
    %c1_34 = arith.constant 1 : index
    %c0_35 = arith.constant 0 : index
    %c0_36 = arith.constant 0 : index
    %44 = vector.load %arg6[%c1_34, %c0_35, %c0_36] : memref<3x448x768xbf16, #tpu.memory_space<vmem>>, vector<1x448x768xbf16>
    %45 = vector.shape_cast %44 : vector<1x448x768xbf16> to vector<448x768xbf16>
    %cst_37 = arith.constant dense<0.000000e+00> : vector<12x768xf32>
    %46 = tpu.matmul %43, %45, %cst_37 {dimension_numbers = #tpu.dot_dimension_numbers<[1], [0], [0], [1], [0, 0, 1, 1], [], []>} : vector<12x448xbf16>, vector<448x768xbf16>, vector<12x768xf32> -> vector<12x768xf32>
    %47 = arith.addf %42, %46 : vector<12x768xf32>
    %48 = vector.extract_strided_slice %38 {offsets = [2, 0], sizes = [12, 448], strides = [1, 1]} : vector<14x448xbf16> to vector<12x448xbf16>
    %c2_38 = arith.constant 2 : index
    %c0_39 = arith.constant 0 : index
    %c0_40 = arith.constant 0 : index
    %49 = vector.load %arg6[%c2_38, %c0_39, %c0_40] : memref<3x448x768xbf16, #tpu.memory_space<vmem>>, vector<1x448x768xbf16>
    %50 = vector.shape_cast %49 : vector<1x448x768xbf16> to vector<448x768xbf16>
    %cst_41 = arith.constant dense<0.000000e+00> : vector<12x768xf32>
    %51 = tpu.matmul %48, %50, %cst_41 {dimension_numbers = #tpu.dot_dimension_numbers<[1], [0], [0], [1], [0, 0, 1, 1], [], []>} : vector<12x448xbf16>, vector<448x768xbf16>, vector<12x768xf32> -> vector<12x768xf32>
    %52 = arith.addf %47, %51 : vector<12x768xf32>
    %c0_42 = arith.constant 0 : index
    %c0_43 = arith.constant 0 : index
    %53 = vector.load %arg7[%c0_42, %c0_43] : memref<1x768xf32, #tpu.memory_space<vmem>>, vector<1x768xf32>
    %54 = vector.broadcast %53 : vector<1x768xf32> to vector<12x768xf32>
    %55 = arith.addf %52, %54 : vector<12x768xf32>
    %cst_44 = arith.constant 0.000000e+00 : f32
    %56 = vector.broadcast %cst_44 : f32 to vector<12x768xf32>
    %57 = arith.maximumf %55, %56 : vector<12x768xf32>
    %58 = arith.truncf %57 : vector<12x768xf32> to vector<12x768xbf16>
    %c0_45 = arith.constant 0 : index
    %c0_46 = arith.constant 0 : index
    %c0_47 = arith.constant 0 : index
    %59 = vector.load %arg8[%c0_45, %c0_46, %c0_47] : memref<2x6x12xbf16, #tpu.memory_space<vmem>>, vector<1x6x12xbf16>
    %60 = vector.shape_cast %59 : vector<1x6x12xbf16> to vector<6x12xbf16>
    %cst_48 = arith.constant dense<0.000000e+00> : vector<6x768xf32>
    %61 = tpu.matmul %60, %58, %cst_48 {dimension_numbers = #tpu.dot_dimension_numbers<[1], [0], [0], [1], [0, 0, 1, 1], [], []>} : vector<6x12xbf16>, vector<12x768xbf16>, vector<6x768xf32> -> vector<6x768xf32>
    %c1_49 = arith.constant 1 : index
    %c0_50 = arith.constant 0 : index
    %c0_51 = arith.constant 0 : index
    %62 = vector.load %arg8[%c1_49, %c0_50, %c0_51] : memref<2x6x12xbf16, #tpu.memory_space<vmem>>, vector<1x6x12xbf16>
    %63 = vector.shape_cast %62 : vector<1x6x12xbf16> to vector<6x12xbf16>
    %cst_52 = arith.constant dense<0.000000e+00> : vector<6x768xf32>
    %64 = tpu.matmul %63, %58, %cst_52 {dimension_numbers = #tpu.dot_dimension_numbers<[1], [0], [0], [1], [0, 0, 1, 1], [], []>} : vector<6x12xbf16>, vector<12x768xbf16>, vector<6x768xf32> -> vector<6x768xf32>
    %65 = arith.maximumf %61, %64 : vector<6x768xf32>
    %c0_53 = arith.constant 0 : index
    %c0_54 = arith.constant 0 : index
    %c0_55 = arith.constant 0 : index
    %66 = vector.load %arg9[%c0_53, %c0_54, %c0_55] : memref<2x768x384xbf16, #tpu.memory_space<vmem>>, vector<1x768x384xbf16>
    %67 = vector.shape_cast %66 : vector<1x768x384xbf16> to vector<768x384xbf16>
    %68 = arith.truncf %65 : vector<6x768xf32> to vector<6x768xbf16>
    %cst_56 = arith.constant dense<0.000000e+00> : vector<6x384xf32>
    %69 = tpu.matmul %68, %67, %cst_56 {dimension_numbers = #tpu.dot_dimension_numbers<[1], [0], [0], [1], [0, 0, 1, 1], [], []>} : vector<6x768xbf16>, vector<768x384xbf16>, vector<6x384xf32> -> vector<6x384xf32>
    %c1_57 = arith.constant 1 : index
    %c0_58 = arith.constant 0 : index
    %c0_59 = arith.constant 0 : index
    %70 = vector.load %arg9[%c1_57, %c0_58, %c0_59] : memref<2x768x384xbf16, #tpu.memory_space<vmem>>, vector<1x768x384xbf16>
    %71 = vector.shape_cast %70 : vector<1x768x384xbf16> to vector<768x384xbf16>
    %72 = arith.truncf %65 : vector<6x768xf32> to vector<6x768xbf16>
    %cst_60 = arith.constant dense<0.000000e+00> : vector<6x384xf32>
    %73 = tpu.matmul %72, %71, %cst_60 {dimension_numbers = #tpu.dot_dimension_numbers<[1], [0], [0], [1], [0, 0, 1, 1], [], []>} : vector<6x768xbf16>, vector<768x384xbf16>, vector<6x384xf32> -> vector<6x384xf32>
    %74 = arith.maximumf %69, %73 : vector<6x384xf32>
    %75 = arith.truncf %74 : vector<6x384xf32> to vector<6x384xbf16>
    %c0_61 = arith.constant 0 : index
    %c0_62 = arith.constant 0 : index
    %76 = vector.load %arg11[%c0_61, %c0_62] : memref<1x600xf32, #tpu.memory_space<vmem>>, vector<1x600xf32>
    %77 = vector.extract_strided_slice %75 {offsets = [0, 0], sizes = [1, 384], strides = [1, 1]} : vector<6x384xbf16> to vector<1x384xbf16>
    %c0_63 = arith.constant 0 : index
    %c0_64 = arith.constant 0 : index
    %78 = vector.load %arg10[%c0_63, %c0_64] : memref<2304x600xbf16, #tpu.memory_space<vmem>>, vector<384x600xbf16>
    %cst_65 = arith.constant dense<0.000000e+00> : vector<1x600xf32>
    %79 = tpu.matmul %77, %78, %cst_65 {dimension_numbers = #tpu.dot_dimension_numbers<[1], [0], [0], [1], [0, 0, 1, 1], [], []>} : vector<1x384xbf16>, vector<384x600xbf16>, vector<1x600xf32> -> vector<1x600xf32>
    %80 = arith.addf %76, %79 : vector<1x600xf32>
    %81 = vector.extract_strided_slice %75 {offsets = [1, 0], sizes = [1, 384], strides = [1, 1]} : vector<6x384xbf16> to vector<1x384xbf16>
    %c384 = arith.constant 384 : index
    %c0_66 = arith.constant 0 : index
    %82 = vector.load %arg10[%c384, %c0_66] : memref<2304x600xbf16, #tpu.memory_space<vmem>>, vector<384x600xbf16>
    %cst_67 = arith.constant dense<0.000000e+00> : vector<1x600xf32>
    %83 = tpu.matmul %81, %82, %cst_67 {dimension_numbers = #tpu.dot_dimension_numbers<[1], [0], [0], [1], [0, 0, 1, 1], [], []>} : vector<1x384xbf16>, vector<384x600xbf16>, vector<1x600xf32> -> vector<1x600xf32>
    %84 = arith.addf %80, %83 : vector<1x600xf32>
    %85 = vector.extract_strided_slice %75 {offsets = [2, 0], sizes = [1, 384], strides = [1, 1]} : vector<6x384xbf16> to vector<1x384xbf16>
    %c768 = arith.constant 768 : index
    %c0_68 = arith.constant 0 : index
    %86 = vector.load %arg10[%c768, %c0_68] : memref<2304x600xbf16, #tpu.memory_space<vmem>>, vector<384x600xbf16>
    %cst_69 = arith.constant dense<0.000000e+00> : vector<1x600xf32>
    %87 = tpu.matmul %85, %86, %cst_69 {dimension_numbers = #tpu.dot_dimension_numbers<[1], [0], [0], [1], [0, 0, 1, 1], [], []>} : vector<1x384xbf16>, vector<384x600xbf16>, vector<1x600xf32> -> vector<1x600xf32>
    %88 = arith.addf %84, %87 : vector<1x600xf32>
    %89 = vector.extract_strided_slice %75 {offsets = [3, 0], sizes = [1, 384], strides = [1, 1]} : vector<6x384xbf16> to vector<1x384xbf16>
    %c1152 = arith.constant 1152 : index
    %c0_70 = arith.constant 0 : index
    %90 = vector.load %arg10[%c1152, %c0_70] : memref<2304x600xbf16, #tpu.memory_space<vmem>>, vector<384x600xbf16>
    %cst_71 = arith.constant dense<0.000000e+00> : vector<1x600xf32>
    %91 = tpu.matmul %89, %90, %cst_71 {dimension_numbers = #tpu.dot_dimension_numbers<[1], [0], [0], [1], [0, 0, 1, 1], [], []>} : vector<1x384xbf16>, vector<384x600xbf16>, vector<1x600xf32> -> vector<1x600xf32>
    %92 = arith.addf %88, %91 : vector<1x600xf32>
    %93 = vector.extract_strided_slice %75 {offsets = [4, 0], sizes = [1, 384], strides = [1, 1]} : vector<6x384xbf16> to vector<1x384xbf16>
    %c1536 = arith.constant 1536 : index
    %c0_72 = arith.constant 0 : index
    %94 = vector.load %arg10[%c1536, %c0_72] : memref<2304x600xbf16, #tpu.memory_space<vmem>>, vector<384x600xbf16>
    %cst_73 = arith.constant dense<0.000000e+00> : vector<1x600xf32>
    %95 = tpu.matmul %93, %94, %cst_73 {dimension_numbers = #tpu.dot_dimension_numbers<[1], [0], [0], [1], [0, 0, 1, 1], [], []>} : vector<1x384xbf16>, vector<384x600xbf16>, vector<1x600xf32> -> vector<1x600xf32>
    %96 = arith.addf %92, %95 : vector<1x600xf32>
    %97 = vector.extract_strided_slice %75 {offsets = [5, 0], sizes = [1, 384], strides = [1, 1]} : vector<6x384xbf16> to vector<1x384xbf16>
    %c1920 = arith.constant 1920 : index
    %c0_74 = arith.constant 0 : index
    %98 = vector.load %arg10[%c1920, %c0_74] : memref<2304x600xbf16, #tpu.memory_space<vmem>>, vector<384x600xbf16>
    %cst_75 = arith.constant dense<0.000000e+00> : vector<1x600xf32>
    %99 = tpu.matmul %97, %98, %cst_75 {dimension_numbers = #tpu.dot_dimension_numbers<[1], [0], [0], [1], [0, 0, 1, 1], [], []>} : vector<1x384xbf16>, vector<384x600xbf16>, vector<1x600xf32> -> vector<1x600xf32>
    %100 = arith.addf %96, %99 : vector<1x600xf32>
    %c0_76 = arith.constant 0 : index
    %c0_77 = arith.constant 0 : index
    %101 = vector.load %arg12[%c0_76, %c0_77] : memref<600x120xbf16, #tpu.memory_space<vmem>>, vector<600x120xbf16>
    %102 = arith.truncf %100 : vector<1x600xf32> to vector<1x600xbf16>
    %cst_78 = arith.constant dense<0.000000e+00> : vector<1x120xf32>
    %103 = tpu.matmul %102, %101, %cst_78 {dimension_numbers = #tpu.dot_dimension_numbers<[1], [0], [0], [1], [0, 0, 1, 1], [], []>} : vector<1x600xbf16>, vector<600x120xbf16>, vector<1x120xf32> -> vector<1x120xf32>
    %c0_79 = arith.constant 0 : index
    %c0_80 = arith.constant 0 : index
    %104 = vector.load %arg13[%c0_79, %c0_80] : memref<1x120xf32, #tpu.memory_space<vmem>>, vector<1x120xf32>
    %105 = arith.addf %103, %104 : vector<1x120xf32>
    %c0_81 = arith.constant 0 : index
    %c0_82 = arith.constant 0 : index
    %106 = vector.load %arg14[%c0_81, %c0_82] : memref<120x10xbf16, #tpu.memory_space<vmem>>, vector<120x10xbf16>
    %107 = arith.truncf %105 : vector<1x120xf32> to vector<1x120xbf16>
    %cst_83 = arith.constant dense<0.000000e+00> : vector<1x10xf32>
    %108 = tpu.matmul %107, %106, %cst_83 {dimension_numbers = #tpu.dot_dimension_numbers<[1], [0], [0], [1], [0, 0, 1, 1], [], []>} : vector<1x120xbf16>, vector<120x10xbf16>, vector<1x10xf32> -> vector<1x10xf32>
    %c0_84 = arith.constant 0 : index
    %c0_85 = arith.constant 0 : index
    %109 = vector.load %arg15[%c0_84, %c0_85] : memref<1x10xf32, #tpu.memory_space<vmem>>, vector<1x10xf32>
    %110 = arith.addf %108, %109 : vector<1x10xf32>
    %cst_86 = arith.constant dense<0xFF800000> : vector<1xf32>
    %111 = vector.multi_reduction <maximumf>, %110, %cst_86 [1] : vector<1x10xf32> to vector<1xf32>
    %112 = vector.shape_cast %111 : vector<1xf32> to vector<1x1xf32>
    %113 = vector.broadcast %112 : vector<1x1xf32> to vector<1x10xf32>
    %114 = arith.subf %110, %113 : vector<1x10xf32>
    %115 = math.exp %114 : vector<1x10xf32>
    %cst_87 = arith.constant dense<0.000000e+00> : vector<1xf32>
    %116 = vector.multi_reduction <add>, %115, %cst_87 [1] : vector<1x10xf32> to vector<1xf32>
    %117 = vector.shape_cast %116 : vector<1xf32> to vector<1x1xf32>
    %118 = math.log %117 : vector<1x1xf32>
    %119 = vector.broadcast %118 : vector<1x1xf32> to vector<1x10xf32>
    %120 = arith.subf %114, %119 : vector<1x10xf32>
    %c0_88 = arith.constant 0 : index
    %c0_89 = arith.constant 0 : index
    %c0_90 = arith.constant 0 : index
    %121 = vector.load %arg16[%c0_88, %c0_89, %c0_90] : memref<1x1x10xf32, #tpu.memory_space<vmem>>, vector<1x1x10xf32>
    %122 = vector.shape_cast %121 : vector<1x1x10xf32> to vector<1x10xf32>
    %123 = vector.shape_cast %120 : vector<1x10xf32> to vector<1x1x10xf32>
    tpu.vector_store %arg16[%c0_88, %c0_89, %c0_90], %123 {strides = array<i32>} : memref<1x1x10xf32, #tpu.memory_space<vmem>>, vector<1x1x10xf32>,
    return
  }
  func.func @transform_0(%arg0: i32) -> (i32, i32, i32) {
    %c0_i32 = arith.constant 0 : i32
    %c0_i32_0 = arith.constant 0 : i32
    %c0_i32_1 = arith.constant 0 : i32
    return %arg0, %c0_i32, %c0_i32_0 : i32, i32, i32
  }
  func.func @transform_1(%arg0: i32) -> (i32, i32, i32) {
    %c0_i32 = arith.constant 0 : i32
    %c0_i32_0 = arith.constant 0 : i32
    %c0_i32_1 = arith.constant 0 : i32
    %c0_i32_2 = arith.constant 0 : i32
    return %c0_i32, %c0_i32_0, %c0_i32_1 : i32, i32, i32
  }
  func.func @transform_2(%arg0: i32) -> (i32, i32) {
    %c0_i32 = arith.constant 0 : i32
    %c0_i32_0 = arith.constant 0 : i32
    %c0_i32_1 = arith.constant 0 : i32
    return %c0_i32, %c0_i32_0 : i32, i32
  }
  func.func @transform_3(%arg0: i32) -> (i32, i32, i32) {
    %c0_i32 = arith.constant 0 : i32
    %c0_i32_0 = arith.constant 0 : i32
    %c0_i32_1 = arith.constant 0 : i32
    %c0_i32_2 = arith.constant 0 : i32
    return %c0_i32, %c0_i32_0, %c0_i32_1 : i32, i32, i32
  }
  func.func @transform_4(%arg0: i32) -> (i32, i32, i32) {
    %c0_i32 = arith.constant 0 : i32
    %c0_i32_0 = arith.constant 0 : i32
    %c0_i32_1 = arith.constant 0 : i32
    %c0_i32_2 = arith.constant 0 : i32
    return %c0_i32, %c0_i32_0, %c0_i32_1 : i32, i32, i32
  }
  func.func @transform_5(%arg0: i32) -> (i32, i32, i32) {
    %c0_i32 = arith.constant 0 : i32
    %c0_i32_0 = arith.constant 0 : i32
    %c0_i32_1 = arith.constant 0 : i32
    %c0_i32_2 = arith.constant 0 : i32
    return %c0_i32, %c0_i32_0, %c0_i32_1 : i32, i32, i32
  }
  func.func @transform_6(%arg0: i32) -> (i32, i32) {
    %c0_i32 = arith.constant 0 : i32
    %c0_i32_0 = arith.constant 0 : i32
    %c0_i32_1 = arith.constant 0 : i32
    return %c0_i32, %c0_i32_0 : i32, i32
  }
  func.func @transform_7(%arg0: i32) -> (i32, i32, i32) {
    %c0_i32 = arith.constant 0 : i32
    %c0_i32_0 = arith.constant 0 : i32
    %c0_i32_1 = arith.constant 0 : i32
    %c0_i32_2 = arith.constant 0 : i32
    return %c0_i32, %c0_i32_0, %c0_i32_1 : i32, i32, i32
  }
  func.func @transform_8(%arg0: i32) -> (i32, i32, i32) {
    %c0_i32 = arith.constant 0 : i32
    %c0_i32_0 = arith.constant 0 : i32
    %c0_i32_1 = arith.constant 0 : i32
    %c0_i32_2 = arith.constant 0 : i32
    return %c0_i32, %c0_i32_0, %c0_i32_1 : i32, i32, i32
  }
  func.func @transform_9(%arg0: i32) -> (i32, i32) {
    %c0_i32 = arith.constant 0 : i32
    %c0_i32_0 = arith.constant 0 : i32
    %c0_i32_1 = arith.constant 0 : i32
    return %c0_i32, %c0_i32_0 : i32, i32
  }
  func.func @transform_10(%arg0: i32) -> (i32, i32) {
    %c0_i32 = arith.constant 0 : i32
    %c0_i32_0 = arith.constant 0 : i32
    %c0_i32_1 = arith.constant 0 : i32
    return %c0_i32, %c0_i32_0 : i32, i32
  }
  func.func @transform_11(%arg0: i32) -> (i32, i32) {
    %c0_i32 = arith.constant 0 : i32
    %c0_i32_0 = arith.constant 0 : i32
    %c0_i32_1 = arith.constant 0 : i32
    return %c0_i32, %c0_i32_0 : i32, i32
  }
  func.func @transform_12(%arg0: i32) -> (i32, i32) {
    %c0_i32 = arith.constant 0 : i32
    %c0_i32_0 = arith.constant 0 : i32
    %c0_i32_1 = arith.constant 0 : i32
    return %c0_i32, %c0_i32_0 : i32, i32
  }
  func.func @transform_13(%arg0: i32) -> (i32, i32) {
    %c0_i32 = arith.constant 0 : i32
    %c0_i32_0 = arith.constant 0 : i32
    %c0_i32_1 = arith.constant 0 : i32
    return %c0_i32, %c0_i32_0 : i32, i32
  }
  func.func @transform_14(%arg0: i32) -> (i32, i32) {
    %c0_i32 = arith.constant 0 : i32
    %c0_i32_0 = arith.constant 0 : i32
    %c0_i32_1 = arith.constant 0 : i32
    return %c0_i32, %c0_i32_0 : i32, i32
  }
  func.func @transform_15(%arg0: i32) -> (i32, i32, i32) {
    %c0_i32 = arith.constant 0 : i32
    %c0_i32_0 = arith.constant 0 : i32
    %c0_i32_1 = arith.constant 0 : i32
    return %arg0, %c0_i32, %c0_i32_0 : i32, i32, i32
  }
}

</mosaic_0001>

<bundles_post_ra>
// kernel: cnn_forward.1
= control target key start
LH: loop header
LB: loop body
LE: loop exit
PB: predicated region body
PF: predicated region fallthrough
CT: control target
= control target key end

     0   :  { %s33084_s0 = inlined_call_operand.vmem [shape: bf16[2,30,30], index: 0, kind: input, shape index: {}]   ;;  %s33085_s1 = inlined_call_operand.vmem [shape: bf16[3,30,896], index: 1, kind: input, shape index: {}]   ;;  %s33086_s2 = inlined_call_operand.vmem [shape: f32[1,896], index: 2, kind: input, shape index: {}]   ;;  %s33087_s3 = inlined_call_operand.vmem [shape: bf16[2,14,28], index: 3, kind: input, shape index: {}]   ;;  %s33088_s4 = inlined_call_operand.vmem [shape: bf16[2,896,448], index: 4, kind: input, shape index: {}]   ;;  %s33089_s5 = inlined_call_operand.vmem [shape: bf16[3,448,768], index: 5, kind: input, shape index: {}]   ;;  %s33090_s6 = inlined_call_operand.vmem [shape: f32[1,768], index: 6, kind: input, shape index: {}]   ;;  %s33091_s7 = inlined_call_operand.vmem [shape: bf16[2,6,12], index: 7, kind: input, shape index: {}]   ;;  %s33092_s8 = inlined_call_operand.vmem [shape: bf16[2,768,384], index: 8, kind: input, shape index: {}]   ;;  %s33093_s9 = inlined_call_operand.vmem [shape: bf16[2304,600], index: 9, kind: input, shape index: {}]   ;;  %s33094_s10 = inlined_call_operand.vmem [shape: f32[1,600], index: 10, kind: input, shape index: {}]   ;;  %s33095_s11 = inlined_call_operand.vmem [shape: bf16[600,120], index: 11, kind: input, shape index: {}]   ;;  %s33096_s12 = inlined_call_operand.vmem [shape: f32[1,120], index: 12, kind: input, shape index: {}]   ;;  %s33097_s13 = inlined_call_operand.vmem [shape: bf16[120,10], index: 13, kind: input, shape index: {}]   ;;  %s33098_s14 = inlined_call_operand.vmem [shape: f32[1,10], index: 14, kind: input, shape index: {}]   ;;  %s33099_s15 = inlined_call_operand.hbm [shape: f32[2,1,10], index: 15, kind: output, shape index: {}]  }
   0x1   :  { %33118 = sst [smem:[#allocation28_spill]] %s33084_s0 }
   0x2   :  { %20 = vsyncpa [#allocation3], 0 }
   0x3   :  { %22 = vsyncpa [#allocation3 + $0x1], 0  ;;  %s25711_s18 = smov 0   ;;  %s25713_s19 = smov 0  }
   0x4   :  { %s25715_s20 = smov 0   ;;  %s25717_s21 = smov 0  }
   0x5 LB: > { %33119 = sst [smem:[#allocation5_spill]] %s25612_s18  ;;  %s25732_s22 = sadd.s32 4294967295, %s25624_s21   ;;  %s25624_s21 = sphi %s25717_s21, %s33168_s21   ;;  %s25620_s20 = sphi %s25715_s20, %s33170_s20   ;;  %s25616_s19 = sphi %s25713_s19, %s33172_s19   ;;  %s25612_s18 = sphi %s25711_s18, %s33171_s18  }
   0x6   : > { %33120 = sst [smem:[#allocation6_spill]] %s25620_s20  ;;  %s19069_s23 = sadd.s32 4294967294, %s25624_s21  }
   0x7   : > { %s25736_s24 = sadd.s32 1, %s25624_s21   ;;  %s355_s25 = sadd.s32 1, %s25620_s20 }
   0x8   : > { %33121 = sst [smem:[#allocation7_spill]] %s25736_s24  ;;  %s352_s26 = ssub.s32 %s25624_s21, %s25736_s24 }
   0x9   : > { %p365_p0 = scmp.ne.s32.totalorder %s25620_s20, %s25616_s19  ;;  %p353_p1 = scmp.eq.s32.totalorder %s352_s26, 0 }
   0xa   : > { %p366_p2 = scmp.eq.s32.totalorder %s25732_s22, 1  ;;  %p371_p3 = scmp.ne.s32.totalorder %s25616_s19, %s25612_s18 }
   0xb   : > { %p372_p4 = scmp.eq.s32.totalorder %s19069_s23, 1  ;;  %p19072_p7 = scmp.ge.s32.totalorder %s25624_s21, 1 }
   0xc   : > { %s25747_s27 = scalar_select %p353_p1, %s25620_s20, %s355_s25  }
   0xd   : > { %p25749_p5 = por %p366_p2, %p365_p0  ;;  %p25753_p6 = por %p372_p4, %p371_p3 }
   0xe   : > { %33122 = sst [smem:[#allocation8_spill]] %s25747_s27  ;;  %p440_p8 = scmp.lt.s32.totalorder %s25624_s21, 3 }
   0xf   : > { %s33124_s29 = scalar_select %p25753_p6, 1, 0 }
  0x10   : > { %p441_p9 = pnand %p19072_p7, %p440_p8 }
  0x11   : > { %33125 = sst [smem:[#allocation9_spill]] %s33124_s29 }
  0x12   : > { %444 = sbr.rel (%p441_p9) target bundleno = 4126 (0x101e), region = 80 }
  0x17   : > { %v22630_v0 = vld [vmem:[%s33085_s1 + $0xac] ss:$28 sps:$4 sm:$0x7f]   ;;  %vm628_vm0 = vcmask 1046528   ;;  %v22633_v2 = vld [vmem:[%s33085_s1 + $0x74] ss:$28 sps:$4 sm:$0xff]  }
  0x18   : > { %v22632_v1 = vld [vmem:[%s33085_s1 + $0xa8] ss:$28 sps:$4 sm:$0x7f]   ;;  %22580 = vmatprep.subr.msk.bf16.mxu1 %vm628_vm0, %v22630_v0  ;;  %19107 = vmatprep.subr.msk.bf16.mxu0 %vm628_vm0, %v22630_v0  ;;  %p487_p10 = scmp.lt.s32.totalorder %s25732_s22, 1  ;;  %v33105_v4 = vmov 0   ;;  %s33126_s0 = sld [smem:[#allocation28_spill]] }
  0x19   : > { %v630_v3 = vsel %vm628_vm0, %v22632_v1, 0  ;;  %692 = vmatprep.mubr.bf16.mxu1 %v33105_v4  ;;  %682 = vmatprep.mubr.bf16.mxu0 %v33105_v4  ;;  %v22635_v5 = vld [vmem:[%s33085_s1 + $0x70] ss:$28 sps:$4 sm:$0xff]   ;;  %v22641_v7 = vld [vmem:[%s33085_s1 + $0xbc] ss:$28 sps:$4 sm:$0x7f]  }
  0x1a   : > { %22582 = vmatpush1.bf16.msra.mxu1 %v630_v3  ;;  %663 = vmatpush1.bf16.msra.mxu0 %v630_v3  ;;  %s488_s17 = scalar_select %p487_p10, %s25732_s22, 1  ;;  %v22637_v6 = vld [vmem:[%s33085_s1 + $0xb4] ss:$28 sps:$4 sm:$0x7f]   ;;  %vm621_vm1 = vcmask 244736   ;;  %vm1623_vm3 = vcmask 1045504  }
  0x1b   : > { %22581 = vmatprep.subr.bf16.mxu1 %v22633_v2  ;;  %664 = vmatprep.subr.bf16.mxu0 %v22633_v2  ;;  %v22640_v9 = vld [vmem:[%s33085_s1 + $0xb0] ss:$28 sps:$4 sm:$0x7f]   ;;  %v22643_v15 = vld [vmem:[%s33085_s1 + $0xb8] ss:$28 sps:$4 sm:$0x7f]  }
  0x1c   : > { %s21987_s26 = sshll.u32 %s488_s17, 4  ;;  %vm540_vm2 = vsmask.f32 7424  ;;  %v636_v19 = vsel %vm628_vm0, %v22640_v9, 0  ;;  %v22646_v20 = vld [vmem:[%s33085_s1 + $0x7c] ss:$28 sps:$4 sm:$0xff]  }
  0x1d   : > { %v642_v22 = vsel %vm628_vm0, %v22643_v15, 0  ;;  %v22644_v23 = vld [vmem:[%s33085_s1 + $0x78] ss:$28 sps:$4 sm:$0xff]   ;;  %v22649_v24 = vld [vmem:[%s33085_s1 + $0x84] ss:$28 sps:$4 sm:$0xff]   ;;  %vm1619_vm4 = vcmask 228352  }
  0x1e   : > { %s491_s18 = scalar_lea.vmem %s33126_s0, %s21987_s26  ;;  %22583 = vmatpush1.bf16.msra.mxu1 %v22635_v5  ;;  %665 = vmatpush1.bf16.msra.mxu0 %v22635_v5  ;;  %v22650_v26 = vld [vmem:[%s33085_s1 + $0xc0] ss:$28 sps:$4 sm:$0x7f]   ;;  %v22654_v31 = vld [vmem:[%s33085_s1 + $0x88] ss:$28 sps:$4 sm:$0xff]   ;;  %vm25628_vm5 = vmmov 0  }
  0x1f   : > { %v25787_v8 = vld [vmem:[%s491_s18 + $0x8] sm:$0x7f]   ;;  %19110 = vmatprep.subr.msk.bf16.mxu1 %vm628_vm0, %v22637_v6  ;;  %v25793_v10 = vld [vmem:[%s491_s18] sm:$0xff]   ;;  %19113 = vmatprep.subr.msk.bf16.mxu0 %vm628_vm0, %v22641_v7  ;;  %v648_v30 = vsel %vm628_vm0, %v22650_v26, 0  ;;  %v22665_v40 = vld [vmem:[%s33085_s1 + $0x18] ss:$28 sps:$4 sm:$0xff]  }
  0x20   : > { %v549_v11 = vshll.u32 %v25787_v8, 16  ;;  %v553_v12 = vshrl.u32 %v25787_v8, 16  ;;  %v542_v13 = vshrl.u32 %v25793_v10, 16  ;;  %v544_v14 = vshll.u32 %v25793_v10, 16  ;;  %v22647_v28 = vld [vmem:[%s33085_s1 + $0x80] ss:$28 sps:$4 sm:$0xff]  }
  0x21   : > { %v22651_v27 = vld [vmem:[%s33085_s1 + $0x44] ss:$28 sps:$4 sm:$0x7f]   ;;  %v22657_v33 = vld [vmem:[%s33085_s1 + $0xc] ss:$28 sps:$4 sm:$0xff]   ;;  %v1174_v57 = vrot.slane %v25793_v10, 1 }
  0x22   : > { %v551_v16 = vrot.slane %v549_v11, 1  ;;  %v546_v17 = vrot.slane %v544_v14, 1  ;;  %v22653_v29 = vld [vmem:[%s33085_s1 + $0x40] ss:$28 sps:$4 sm:$0x7f]   ;;  %v1175_v58 = vrot.slane %v25787_v8, 1 }
  0x23   : > { %v934_v32 = vsel %vm628_vm0, %v22653_v29, 0  ;;  %v22658_v34 = vld [vmem:[%s33085_s1 + $0x3c] ss:$28 sps:$4 sm:$0x7f]   ;;  %v22655_v35 = vld [vmem:[%s33085_s1 + $0x8] ss:$28 sps:$4 sm:$0xff]  }
  0x24   : > { %v555_v18 = vor.u32 %v553_v12, %v551_v16  ;;  %v547_v21 = vor.u32 %v546_v17, %v542_v13  ;;  %v22664_v36 = vld [vmem:[%s33085_s1 + $0x50] ss:$28 sps:$4 sm:$0x7f]   ;;  %v22660_v37 = vld [vmem:[%s33085_s1 + $0x38] ss:$28 sps:$4 sm:$0x7f]   ;;  %v1176_v62 = vsel %vm628_vm0, %v1174_v57, %v1175_v58 }
  0x25   : > { %v22663_v38 = vld [vmem:[%s33085_s1 + $0x4] ss:$28 sps:$4 sm:$0xff]   ;;  %v928_v39 = vsel %vm628_vm0, %v22660_v37, 0  ;;  %v946_v42 = vsel %vm628_vm0, %v22664_v36, 0  ;;  %v22674_v46 = vld [vmem:[%s33085_s1 + $0x14] ss:$28 sps:$4 sm:$0xff]  }
  0x26   : > { %19109 = vmatmul.mubr.msk.bf16.vlgmr.msra.gmra.mxu1 %vm621_vm1, %v555_v18  ;;  %v552_v25 = vsel %vm540_vm2, %v547_v21, %v551_v16  ;;  %v22661_v41 = vld [vmem:[%s33085_s1] ss:$28 sps:$4 sm:$0xff]   ;;  %v22666_v43 = vld [vmem:[%s33085_s1 + $0x4c] ss:$28 sps:$4 sm:$0x7f]   ;;  %vm6614_vm6 = vcmask 523264  }
  0x27   : > { %716 = vmatpush1.bf16.msra.mxu1 %v636_v19  ;;  %735 = vmatprep.mubr.bf16.mxu1 %v33105_v4  ;;  %v22668_v44 = vld [vmem:[%s33085_s1 + $0x48] ss:$28 sps:$4 sm:$0x7f]   ;;  %v22669_v45 = vld [vmem:[%s33085_s1 + $0x11c] ss:$28 sps:$4 sm:$0x7f]  }
  0x28   : > { %19108 = vmatmul.mubr.msk.bf16.vlgmr.msra.gmra.mxu0 %vm621_vm1, %v552_v25  ;;  %717 = vmatprep.subr.bf16.mxu1 %v22646_v20  ;;  %v940_v47 = vsel %vm628_vm0, %v22668_v44, 0  ;;  %v22672_v48 = vld [vmem:[%s33085_s1 + $0x10] ss:$28 sps:$4 sm:$0xff]   ;;  %v22678_v49 = vld [vmem:[%s33085_s1 + $0x124] ss:$28 sps:$4 sm:$0x7f]  }
  0x29   : > { %769 = vmatpush1.bf16.msra.mxu0 %v642_v22  ;;  %788 = vmatprep.mubr.bf16.mxu0 %v33105_v4  ;;  %v22671_v50 = vld [vmem:[%s33085_s1 + $0x118] ss:$28 sps:$4 sm:$0x7f]   ;;  %v22677_v51 = vld [vmem:[%s33085_s1 + $0xe4] ss:$28 sps:$4 sm:$0xff]   ;;  %vm9332_vm7 = vcmask 97280  }
  0x2a   : > { %770 = vmatprep.subr.bf16.mxu0 %v22649_v24  ;;  %v1249_v52 = vsel %vm628_vm0, %v22671_v50, 0  ;;  %v22680_v53 = vld [vmem:[%s33085_s1 + $0x120] ss:$28 sps:$4 sm:$0x7f]   ;;  %v22686_v59 = vld [vmem:[%s33085_s1 + $0xec] ss:$28 sps:$4 sm:$0xff]  }
  0x2b   : > { %718 = vmatpush1.bf16.msra.mxu1 %v22644_v23  ;;  %v22675_v54 = vld [vmem:[%s33085_s1 + $0xe0] ss:$28 sps:$4 sm:$0xff]   ;;  %v22681_v55 = vld [vmem:[%s33085_s1 + $0x12c] ss:$28 sps:$4 sm:$0x7f]   ;;  %v1255_v60 = vsel %vm628_vm0, %v22680_v53, 0 }
  0x2c   : > { %22584 = vmatprep.subr.msk.bf16.mxu1 %vm628_vm0, %v22650_v26  ;;  %v22683_v56 = vld [vmem:[%s33085_s1 + $0x128] ss:$28 sps:$4 sm:$0x7f]   ;;  %v22689_v61 = vld [vmem:[%s33085_s1 + $0xf4] ss:$28 sps:$4 sm:$0xff]   ;;  %vm18754_vm8 = vcmask 1043456  }
  0x2d   : > { %771 = vmatpush1.bf16.msra.mxu0 %v22647_v28  ;;  %v22684_v63 = vld [vmem:[%s33085_s1 + $0xe8] ss:$28 sps:$4 sm:$0xff]   ;;  %v1261_v0 = vsel %vm628_vm0, %v22683_v56, 0  ;;  %v22690_v1 = vld [vmem:[%s33085_s1 + $0x130] ss:$28 sps:$4 sm:$0x7f]  }
  0x2e   : > { %19111 = vmatmul.mubr.msk.bf16.vlgmr.msra.gmra.mxu1 %vm621_vm1, %v552_v25  ;;  %19135 = vmatprep.subr.msk.bf16.mxu0 %vm628_vm0, %v22651_v27  ;;  %v22687_v2 = vld [vmem:[%s33085_s1 + $0xf0] ss:$28 sps:$4 sm:$0xff]   ;;  %v22691_v3 = vld [vmem:[%s33085_s1 + $0xf8] ss:$28 sps:$4 sm:$0xff]   ;;  %v1267_v5 = vsel %vm628_vm0, %v22690_v1, 0  ;;  %vm18750_vm9 = vcmask 719872  }
  0x2f   : > { %745 = vmatprep.mubr.bf16.mxu1 %v33105_v4  ;;  %22385 = vmatpush3.bf16.msra.mxu1 %v648_v30  ;;  %vm18940_vm10 = vcmask 982016   ;;  %vm18987_vm11 = vcmask 73728   ;;  %s485_s26 = sand.u32 1, %s25616_s19   ;;  %s21984_s30 = sshll.u32 %s25732_s22, 4 }
  0x30   : > { %19114 = vmatmul.mubr.msk.bf16.vlgmr.msra.gmra.mxu0 %vm621_vm1, %v552_v25  ;;  %22386 = vmatprep.subr.bf16.mxu1 %v22654_v31  ;;  %s486_s16 = scalar_lea.vmem [#allocation2], %s485_s26  ;;  %s19012_s27 = scalar_lea.hbm %s33099_s15, %s21984_s30 }
  0x31   : > { %798 = vmatprep.mubr.bf16.mxu0 %v33105_v4  ;;  %1014 = vmatpush1.bf16.msra.mxu0 %v934_v32  ;;  %s19014_s20 = sshll.u32 %s486_s16, 4  ;;  %s19002_s29 = scalar_lea.sflag [#allocation3], %s485_s26  ;;  %s19015_s20 = int_to_ptr.vmem [resolvable:$true] %s19014_s20 }
  0x32   : > { %1015 = vmatprep.subr.bf16.mxu0 %v22657_v33  ;;  %s25564_s17 = scalar_lea.vmem %s19015_s20, 16  ;;  %s25630_s23 = smov [#allocation2]  }
  0x33   : > { %22387 = vmatpush3.bf16.msra.mxu1 %v22654_v31  ;;  %p25565_p11 = scmp.ne.s32.totalorder %s19015_s20, %s25564_s17  ;;  %s25568_s25 = sshll.u32 %s25630_s23, 4  ;;  %s25569_s25 = int_to_ptr.vmem [resolvable:$false] %s25568_s25 }
  0x34   : > { %19132 = vmatprep.subr.msk.bf16.mxu1 %vm628_vm0, %v22658_v34  ;;  %s25570_s22 = scalar_lea.vmem %s25569_s25, 32  ;;  %p25571_p0 = scmp.lt.s32.totalorder %s19015_s20, %s25569_s25 }
  0x35   : > { %1016 = vmatpush1.bf16.msra.mxu0 %v22655_v35  ;;  %p25566_p12 = pnand %p25565_p11, %p25749_p5  ;;  %p25572_p1 = scmp.lt.s32.totalorder %s25570_s22, %s25564_s17 }
  0x36   : > { %19112 = vmatmul.mubr.msk.bf16.gmra.mxu1 %vm621_vm1, %v555_v18  ;;  %22585 = vmatprep.subr.msk.bf16.mxu0 %vm628_vm0, %v22664_v36 }
  0x37   : > { %22388 = vmatprep.mubr.msk.bf16.mxu1 %vm621_vm1, %v552_v25  ;;  %p25567_p13 = pneg %p25566_p12  ;;  %p25573_p2 = por %p25572_p1, %p25571_p0 }
  0x38   : > { %19115 = vmatmul.mubr.msk.bf16.gmra.mxu0 %vm621_vm1, %v555_v18 }
  0x39   : > { %1033 = vmatprep.mubr.bf16.mxu0 %v33105_v4  ;;  %p25574_p3 = pnand %p25573_p2, %p25567_p13 }
  0x3e   : > { %22389 = vmatmul.mubr.msk.bf16.vlgmr.msra.gmra.mxu1 %vm621_vm1, %v555_v18 }
  0x3f   : > { %961 = vmatpush1.bf16.msra.mxu1 %v928_v39  ;;  %980 = vmatprep.mubr.bf16.mxu1 %v33105_v4 }
  0x40   : > { %19136 = vmatmul.mubr.msk.bf16.vlgmr.msra.gmra.mxu0 %vm621_vm1, %v25793_v10  ;;  %962 = vmatprep.subr.bf16.mxu1 %v22663_v38 }
  0x41   : > { %1043 = vmatprep.mubr.bf16.mxu0 %v33105_v4  ;;  %22393 = vmatpush3.bf16.msra.mxu0 %v946_v42 }
  0x42   : > { %22394 = vmatprep.subr.bf16.mxu0 %v22665_v40 }
  0x43   : > { %963 = vmatpush1.bf16.msra.mxu1 %v22661_v41 }
  0x44   : > { %19138 = vmatprep.subr.msk.bf16.mxu1 %vm628_vm0, %v22666_v43 }
  0x45   : > { %22395 = vmatpush3.bf16.msra.mxu0 %v22665_v40 }
  0x46   : > { %19133 = vmatmul.mubr.msk.bf16.vlgmr.msra.gmra.mxu1 %vm621_vm1, %v25793_v10  ;;  %19173 = vmatprep.subr.msk.bf16.mxu0 %vm628_vm0, %v22669_v45 }
  0x47   : > { %990 = vmatprep.mubr.bf16.mxu1 %v33105_v4  ;;  %1067 = vmatpush1.bf16.msra.mxu1 %v940_v47 }
  0x48   : > { %19137 = vmatmul.mubr.msk.bf16.gmra.mxu0 %vm621_vm1, %v25787_v8  ;;  %1068 = vmatprep.subr.bf16.mxu1 %v22674_v46 }
  0x49   : > { %22396 = vmatprep.mubr.msk.bf16.mxu0 %vm621_vm1, %v25793_v10 }
  0x4b   : > { %1069 = vmatpush1.bf16.msra.mxu1 %v22672_v48 }
  0x4c   : > { %19176 = vmatprep.subr.msk.bf16.mxu1 %vm628_vm0, %v22678_v49 }
  0x4e   : > { %19134 = vmatmul.mubr.msk.bf16.gmra.mxu1 %vm621_vm1, %v25787_v8 }
  0x4f   : > { %1086 = vmatprep.mubr.bf16.mxu1 %v33105_v4 }
  0x50   : > { %22397 = vmatmul.mubr.msk.bf16.vlgmr.msra.gmra.mxu0 %vm621_vm1, %v25787_v8 }
  0x51   : > { %1282 = vmatpush1.bf16.msra.mxu0 %v1249_v52  ;;  %1301 = vmatprep.mubr.bf16.mxu0 %v33105_v4 }
  0x52   : > { %1283 = vmatprep.subr.bf16.mxu0 %v22677_v51  ;;  %v1507_v51 = vlaneseq }
  0x54   : > { %v26050_v56 = vshrl.u32 %v1507_v51, 7 }
  0x55   : > { %1284 = vmatpush1.bf16.msra.mxu0 %v22675_v54 }
  0x56   : > { %19139 = vmatmul.mubr.msk.bf16.vlgmr.msra.gmra.mxu1 %vm621_vm1, %v25793_v10  ;;  %19179 = vmatprep.subr.msk.bf16.mxu0 %vm628_vm0, %v22681_v55 }
  0x57   : > { %1096 = vmatprep.mubr.bf16.mxu1 %v33105_v4  ;;  %1335 = vmatpush1.bf16.msra.mxu1 %v1255_v60 }
  0x58   : > { %19174 = vmatmul.mubr.msk.bf16.vlgmr.msra.gmra.mxu0 %vm621_vm1, %v1176_v62  ;;  %1336 = vmatprep.subr.bf16.mxu1 %v22686_v59  ;;  %v1505_v59 = vld [vmem:[%s33086_s2] sm:$0xff] }
  0x59   : > { %1311 = vmatprep.mubr.bf16.mxu0 %v33105_v4  ;;  %1388 = vmatpush1.bf16.msra.mxu0 %v1261_v0  ;;  %v26066_v0 = vsub.s32 2, %v26050_v56 }
  0x5a   : > { %1389 = vmatprep.subr.bf16.mxu0 %v22689_v61 }
  0x5b   : > { %1337 = vmatpush1.bf16.msra.mxu1 %v22684_v63  ;;  %v26063_v63 = vsub.s32 1, %v26050_v56  ;;  %33139 = vst [vmem:[#allocation22_spill] sm:$0xff] %v26066_v0 }
  0x5c   : > { %22586 = vmatprep.subr.msk.bf16.mxu1 %vm628_vm0, %v22690_v1 }
  0x5d   : > { %1390 = vmatpush1.bf16.msra.mxu0 %v22687_v2  ;;  %33138 = vst [vmem:[#allocation21_spill] sm:$0xff] %v26063_v63 }
  0x5e   : > { %19140 = vmatmul.mubr.msk.bf16.gmra.mxu1 %vm621_vm1, %v25787_v8 }
  0x5f   : > { %1354 = vmatprep.mubr.bf16.mxu1 %v33105_v4 }
  0x60   : > { %19175 = vmatmul.mubr.msk.bf16.gmra.mxu0 %vm621_vm1, %v1175_v58 }
  0x61   : > { %1407 = vmatprep.mubr.bf16.mxu0 %v33105_v4 }
  0x66   : > { %19177 = vmatmul.mubr.msk.bf16.vlgmr.msra.gmra.mxu1 %vm621_vm1, %v1176_v62 }
  0x67   : > { %1364 = vmatprep.mubr.bf16.mxu1 %v33105_v4  ;;  %22401 = vmatpush3.bf16.msra.mxu1 %v1267_v5  ;;  %v26074_v5 = vsub.s32 3, %v26050_v56 }
  0x68   : > { %19180 = vmatmul.mubr.msk.bf16.vlgmr.msra.gmra.mxu0 %vm621_vm1, %v1176_v62  ;;  %22402 = vmatprep.subr.bf16.mxu1 %v22691_v3 }
  0x69   : > { %1417 = vmatprep.mubr.bf16.mxu0 %v33105_v4  ;;  %33141 = vst [vmem:[#allocation24_spill] sm:$0xff] %v26074_v5 }
  0x6b   : > { %22403 = vmatpush3.bf16.msra.mxu1 %v22691_v3  ;;  %v26071_v3 = vsub.s32 4, %v26050_v56 }
  0x6d   : > { %33140 = vst [vmem:[#allocation23_spill] sm:$0xff] %v26071_v3  ;;  %v26090_v51 = vrot.slane %v1505_v59, %v26071_v3 }
  0x6e   : > { %19178 = vmatmul.mubr.msk.bf16.gmra.mxu1 %vm621_vm1, %v1175_v58 }
  0x6f   : > { %22404 = vmatprep.mubr.msk.bf16.mxu1 %vm621_vm1, %v1176_v62  ;;  %v26060_v62 = vsub.s32 0, %v26050_v56 }
  0x70   : > { %19181 = vmatmul.mubr.msk.bf16.gmra.mxu0 %vm621_vm1, %v1175_v58 }
  0x71   : > { %1720 = vmatprep.mubr.bf16.mxu0 %v33105_v4  ;;  %33137 = vst [vmem:[#allocation20_spill] sm:$0xff] %v26060_v62 }
  0x76   : > { %22405 = vmatmul.mubr.msk.bf16.vlgmr.msra.gmra.mxu1 %vm621_vm1, %v1175_v58 }
  0x77   : > { %1677 = vmatprep.mubr.bf16.mxu1 %v33105_v4  ;;  %v1533_v4 = vsub.s32 6, %v26050_v56 }
  0xe6   : > { %v25978_v6 = vpop.f32.mrf.mxu1 }
  0xe8   : > { %v25980_v7 = vpop.f32.mrf.mxu0  ;;  %v25982_v8 = vpop.f32.mrf.mxu1 }
  0xea   : > { %v25984_v9 = vpop.f32.mrf.mxu0  ;;  %v25986_v10 = vpop.f32.mrf.mxu1 }
  0xec   : > { %v25988_v11 = vpop.f32.mrf.mxu0  ;;  %v25990_v12 = vpop.f32.mrf.mxu1 }
  0xee   : > { %v25992_v13 = vpop.f32.mrf.mxu0  ;;  %v25994_v14 = vpop.f32.mrf.mxu1 }
  0xf0   : > { %v25996_v15 = vpop.f32.mrf.mxu0  ;;  %v25998_v16 = vpop.f32.mrf.mxu1 }
  0xf2   : > { %v26000_v17 = vpop.f32.mrf.mxu0  ;;  %v26002_v18 = vpop.f32.mrf.mxu1 }
  0xf4   : > { %v26004_v19 = vpop.f32.mrf.mxu0  ;;  %v26006_v20 = vpop.f32.mrf.mxu1 }
  0xf6   : > { %v26008_v21 = vpop.f32.mrf.mxu0  ;;  %v26010_v22 = vpop.f32.mrf.mxu1 }
  0xf8   : > { %v26012_v23 = vpop.f32.mrf.mxu0  ;;  %v26014_v24 = vpop.f32.mrf.mxu1 }
  0xf9   : > { %33127 = vst [vmem:[#allocation10_spill] sm:$0xff] %v26012_v23  ;;  %v26093_v23 = vrot.slane %v1505_v59, %v26074_v5 }
  0xfa   : > { %v26016_v25 = vpop.f32.mrf.mxu0  ;;  %v26018_v26 = vpop.f32.mrf.mxu1 }
  0xfb   : > { %33128 = vst [vmem:[#allocation11_spill] sm:$0xff] %v26016_v25  ;;  %33144 = vst [vmem:[#allocation27_spill] sm:$0xff] %v26093_v23 }
  0xfc   : > { %v26020_v27 = vpop.f32.mrf.mxu0  ;;  %v26022_v28 = vpop.f32.mrf.mxu1 }
  0xfd   : > { %33129 = vst [vmem:[#allocation12_spill] sm:$0xff] %v26020_v27  ;;  %v26084_v27 = vrot.slane %v1505_v59, %v26066_v0 }
  0xfe   : > { %v26024_v29 = vpop.f32.mrf.mxu0  ;;  %v26026_v30 = vpop.f32.mrf.mxu1 }
  0xff   : > { %33130 = vst [vmem:[#allocation13_spill] sm:$0xff] %v26024_v29  ;;  %v1514_v29 = vrot.slane %v1505_v59, %v26063_v63 }
 0x100   : > { %v1035_v31 = vpop.f32.mrf.mxu0  ;;  %v26028_v32 = vpop.f32.mrf.mxu1 }
 0x101   : > { %33131 = vst [vmem:[#allocation14_spill] sm:$0xff] %v26028_v32 }
 0x102   : > { %v1037_v33 = vpop.f32.mrf.mxu0  ;;  %v26030_v34 = vpop.f32.mrf.mxu1 }
 0x103   : > { %33132 = vst [vmem:[#allocation15_spill] sm:$0xff] %v26030_v34 }
 0x104   : > { %v1039_v35 = vpop.f32.mrf.mxu0  ;;  %v26032_v36 = vpop.f32.mrf.mxu1 }
 0x105   : > { %33133 = vst [vmem:[#allocation16_spill] sm:$0xff] %v26032_v36  ;;  %v1510_v36 = vrot.slane %v1505_v59, %v26060_v62 }
 0x106   : > { %v1041_v37 = vpop.f32.mrf.mxu0  ;;  %v982_v38 = vpop.f32.mrf.mxu1 }
 0x108   : > { %v26034_v39 = vpop.f32.mrf.mxu0  ;;  %v984_v40 = vpop.f32.mrf.mxu1 }
 0x109   : > { %v985_v3 = vadd.f32 %v984_v40, %v25984_v9  ;;  %v1046_v9 = vadd.f32 %v26034_v39, %v26010_v22 }
 0x10a   : > { %v26036_v41 = vpop.f32.mrf.mxu0  ;;  %v986_v42 = vpop.f32.mrf.mxu1 }
 0x10c   : > { %v26038_v43 = vpop.f32.mrf.mxu0  ;;  %v988_v44 = vpop.f32.mrf.mxu1 }
 0x10d   : > { %v989_v63 = vadd.f32 %v988_v44, %v25992_v13 }
 0x10e   : > { %v26040_v45 = vpop.f32.mrf.mxu0  ;;  %v992_v46 = vpop.f32.mrf.mxu1 }
 0x110   : > { %v26042_v47 = vpop.f32.mrf.mxu0  ;;  %v994_v48 = vpop.f32.mrf.mxu1 }
 0x111   : > { %v995_v0 = vadd.f32 %v994_v48, %v25982_v8 }
 0x112   : > { %v26044_v49 = vpop.f32.mrf.mxu0  ;;  %v996_v50 = vpop.f32.mrf.mxu1 }
 0x113   : > { %33134 = vst [vmem:[#allocation17_spill] sm:$0xff] %v26044_v49  ;;  %v997_v13 = vadd.f32 %v996_v50, %v25986_v10  ;;  %v26121_v10 = vadd.f32 %v26036_v41, %v26014_v24 }
 0x114   : > { %v26046_v52 = vpop.f32.mrf.mxu0  ;;  %v998_v53 = vpop.f32.mrf.mxu1 }
 0x115   : > { %33135 = vst [vmem:[#allocation18_spill] sm:$0xff] %v26046_v52  ;;  %v987_v52 = vadd.f32 %v986_v42, %v25988_v11  ;;  %v1036_v11 = vadd.f32 %v1035_v31, %v25994_v14  ;;  %v983_v42 = vadd.f32 %v982_v38, %v25980_v7 }
 0x116   : > { %v26048_v54 = vpop.f32.mrf.mxu0  ;;  %v1088_v55 = vpop.f32.mrf.mxu1 }
 0x117   : > { %33136 = vst [vmem:[#allocation19_spill] sm:$0xff] %v26048_v54  ;;  %v993_v54 = vadd.f32 %v992_v46, %v25978_v6  ;;  %v33145_v6 = vsub.s32 5, %v26050_v56 }
 0x118   : > { %v1303_v57 = vpop.f32.mrf.mxu0  ;;  %v26052_v58 = vpop.f32.mrf.mxu1 }
 0x119   : > { %v26097_v46 = vrot.slane %v1505_v59, %v33145_v6  ;;  %v26109_v6 = vadd.f32 %v1037_v33, %v25998_v16  ;;  %v1477_v14 = vadd.f32 %v1303_v57, %v983_v42  ;;  %v999_v16 = vadd.f32 %v998_v53, %v25990_v12  ;;  %v33146_v42 = vld [vmem:[#allocation10_spill] sm:$0xff] }
 0x11a   : > { %v1305_v60 = vpop.f32.mrf.mxu0  ;;  %v26057_v61 = vpop.f32.mrf.mxu1  ;;  %v26130_v12 = vadd.f32 %v26040_v45, %v26022_v28 }
 0x11b   : > { %v1478_v31 = vadd.f32 %v1305_v60, %v985_v3  ;;  %v1093_v28 = vadd.f32 %v26057_v61, %v26004_v19 }
 0x11c   : > { %v1307_v1 = vpop.f32.mrf.mxu0  ;;  %v26068_v2 = vpop.f32.mrf.mxu1 }
 0x11d   : > { %v1543_v24 = vadd.f32 %v1514_v29, %v1478_v31  ;;  %v1095_v61 = vadd.f32 %v26068_v2, %v26008_v21 }
 0x11e   : > { %v1309_v49 = vpop.f32.mrf.mxu0  ;;  %v26078_v32 = vpop.f32.mrf.mxu1 }
 0x11f   : > { %33142 = vst [vmem:[#allocation25_spill] sm:$0xff] %v26078_v32  ;;  %v26101_v32 = vrot.slane %v1505_v59, %v1533_v4  ;;  %v1485_v44 = vadd.f32 %v1309_v49, %v989_v63  ;;  %v1040_v4 = vadd.f32 %v1039_v35, %v26002_v18  ;;  %v26125_v18 = vadd.f32 %v26038_v43, %v26018_v26 }
 0x120   : > { %v1313_v34 = vpop.f32.mrf.mxu0  ;;  %v26087_v25 = vpop.f32.mrf.mxu1 }
 0x121   : > { %33143 = vst [vmem:[#allocation26_spill] sm:$0xff] %v26087_v25  ;;  %v1491_v62 = vadd.f32 %v1313_v34, %v993_v54  ;;  %v1484_v25 = vadd.f32 %v1307_v1, %v987_v52  ;;  %v1042_v34 = vadd.f32 %v1041_v37, %v26006_v20  ;;  %v1089_v20 = vadd.f32 %v1088_v55, %v25996_v15 }
 0x122   : > { %v1315_v5 = vpop.f32.mrf.mxu0  ;;  %v26106_v23 = vpop.f32.mrf.mxu1  ;;  %v1550_v49 = vadd.f32 %v1514_v29, %v1485_v44  ;;  %v1542_v52 = vadd.f32 %v1510_v36, %v1477_v14  ;;  %v1091_v55 = vadd.f32 %v26052_v58, %v26000_v17 }
 0x123   : > { %v1492_v8 = vadd.f32 %v1315_v5, %v995_v0  ;;  %v1556_v33 = vadd.f32 %v1510_v36, %v1491_v62  ;;  %v1549_v35 = vadd.f32 %v1510_v36, %v1484_v25  ;;  %v26134_v25 = vadd.f32 %v26042_v47, %v26026_v30 }
 0x124   : > { %v1317_v7 = vpop.f32.mrf.mxu0  ;;  %v26114_v38 = vpop.f32.mrf.mxu1  ;;  %v1578_v60 = vmax.f32 %v1550_v49, 0.0  ;;  %v1570_v1 = vmax.f32 %v1542_v52, 0.0  ;;  %v33150_v52 = vld [vmem:[#allocation27_spill] sm:$0xff] }
 0x125   : > { %v1498_v40 = vadd.f32 %v1317_v7, %v997_v13  ;;  %v1557_v50 = vadd.f32 %v1514_v29, %v1492_v8  ;;  %v1584_v26 = vmax.f32 %v1556_v33, 0.0  ;;  %v1577_v45 = vmax.f32 %v1549_v35, 0.0  ;;  %v33148_v8 = vld [vmem:[#allocation11_spill] sm:$0xff] }
 0x126   : > { %v1319_v37 = vpop.f32.mrf.mxu0  ;;  %v1356_v48 = vpop.f32.mrf.mxu1  ;;  %v33147_v13 = vld [vmem:[#allocation25_spill] sm:$0xff] }
 0x127   : > { %v1563_v22 = vadd.f32 %v1510_v36, %v1498_v40  ;;  %v1499_v39 = vadd.f32 %v1319_v37, %v999_v16  ;;  %v1479_v41 = vadd.f32 %v1356_v48, %v1036_v11  ;;  %v1585_v62 = vmax.f32 %v1557_v50, 0.0 }
 0x128   : > { %v1409_v53 = vpop.f32.mrf.mxu0  ;;  %v1358_v54 = vpop.f32.mrf.mxu1  ;;  %v1099_v44 = vadd.f32 %v33147_v13, %v33146_v42  ;;  %v33149_v14 = vld [vmem:[#allocation26_spill] sm:$0xff]  ;;  %v26151_v33 = vpack.c.bf16 %v1577_v45, %v1570_v1 }
 0x129   : > { %v1591_v43 = vmax.f32 %v1563_v22, 0.0  ;;  %v1564_v57 = vadd.f32 %v1514_v29, %v1499_v39  ;;  %v1481_v15 = vadd.f32 %v1409_v53, %v1089_v20  ;;  %v1571_v29 = vmax.f32 %v1543_v24, 0.0 }
 0x12a   : > { %v1411_v36 = vpop.f32.mrf.mxu0  ;;  %v1360_v59 = vpop.f32.mrf.mxu1  ;;  %v1544_v3 = vadd.f32 %v26084_v27, %v1479_v41  ;;  %v1101_v31 = vadd.f32 %v33149_v14, %v33148_v8  ;;  %v1480_v20 = vadd.f32 %v1358_v54, %v26109_v6  ;;  %v26170_v41 = vld [vmem:[%s33087_s3] sm:$0x7f]  }
 0x12b   : > { %v1605_v63 = vpack.c.bf16 %v1591_v43, %v1584_v26  ;;  %v1592_v0 = vmax.f32 %v1564_v57, 0.0  ;;  %v1486_v5 = vadd.f32 %v1360_v59, %v1040_v4  ;;  %v1546_v17 = vadd.f32 %v26090_v51, %v1481_v15  ;;  %v33151_v57 = vld [vmem:[#allocation15_spill] sm:$0xff]  ;;  %v33152_v15 = vld [vmem:[#allocation18_spill] sm:$0xff] }
 0x12c   : > { %v1413_v30 = vpop.f32.mrf.mxu0  ;;  %v1362_v47 = vpop.f32.mrf.mxu1  ;;  %v26159_v21 = vpack.c.bf16 %v1578_v60, %v1571_v29  ;;  %v1572_v2 = vmax.f32 %v1544_v3, 0.0  ;;  %v1482_v22 = vadd.f32 %v1411_v36, %v1091_v55  ;;  %v1153_v55 = vadd.f32 %v33152_v15, %v33151_v57  ;;  %v33154_v60 = vld [vmem:[#allocation13_spill] sm:$0xff] }
 0x12d   : > { %v26141_v11 = vpack.c.bf16 %v1592_v0, %v1585_v62  ;;  %v1488_v19 = vadd.f32 %v1413_v30, %v1093_v28  ;;  %v1487_v58 = vadd.f32 %v1362_v47, %v1042_v34  ;;  %v1551_v4 = vadd.f32 %v26084_v27, %v1486_v5  ;;  %v33153_v28 = vld [vmem:[#allocation12_spill] sm:$0xff] }
 0x12e   : > { %v1415_v7 = vpop.f32.mrf.mxu0  ;;  %v1366_v16 = vpop.f32.mrf.mxu1  ;;  %v26157_v34 = vsel %vm1623_vm3, %v1605_v63, 0  ;;  %v1574_v50 = vmax.f32 %v1546_v17, 0.0  ;;  %v1103_v45 = vadd.f32 %v26106_v23, %v33153_v28  ;;  %v1105_v62 = vadd.f32 %v26114_v38, %v33154_v60 }
 0x12f   : > { %v1553_v40 = vadd.f32 %v26090_v51, %v1488_v19  ;;  %19185 = vmatprep.subr.msk.bf16.mxu1 %vm1623_vm3, %v26141_v11  ;;  %v1579_v35 = vmax.f32 %v1551_v4, 0.0  ;;  %v1493_v37 = vadd.f32 %v1366_v16, %v1046_v9  ;;  %v26164_v24 = vadd.f32 %v33150_v52, %v1487_v58 }
 0x130   : > { %v1419_v48 = vpop.f32.mrf.mxu0  ;;  %1658 = vmatpush1.bf16.msra.mxu1 %v26157_v34  ;;  %v1368_v49 = vpop.f32.mrf.mxu1  ;;  %v1489_v9 = vadd.f32 %v1415_v7, %v1095_v61  ;;  %v1545_v3 = vadd.f32 %v33150_v52, %v1480_v20  ;;  %v1547_v47 = vadd.f32 %v26097_v46, %v1482_v22  ;;  %v33155_v7 = vmov 0   ;;  %v33157_v20 = vld [vmem:[#allocation19_spill] sm:$0xff] }
 0x131   : > { %v1581_v39 = vmax.f32 %v1553_v40, 0.0  ;;  %1659 = vmatprep.subr.bf16.mxu1 %v26159_v21  ;;  %v26172_v6 = vpack.c.bf16 %v1579_v35, %v1572_v2  ;;  %v1495_v53 = vadd.f32 %v1419_v48, %v1099_v44  ;;  %v1494_v54 = vadd.f32 %v1368_v49, %v26121_v10 }
 0x132   : > { %v1421_v26 = vpop.f32.mrf.mxu0  ;;  %v1370_v43 = vpop.f32.mrf.mxu1  ;;  %v1558_v63 = vadd.f32 %v26084_v27, %v1493_v37  ;;  %v1580_v38 = vmax.f32 %v26164_v24, 0.0  ;;  %v1554_v17 = vadd.f32 %v26097_v46, %v1489_v9  ;;  %v1573_v37 = vmax.f32 %v1545_v3, 0.0  ;;  %v33159_v9 = vld [vmem:[#allocation17_spill] sm:$0xff] }
 0x133   : > { %v26179_v36 = vpack.c.bf16 %v1581_v39, %v1574_v50  ;;  %v1496_v59 = vadd.f32 %v1421_v26, %v1101_v31  ;;  %v1560_v0 = vadd.f32 %v26090_v51, %v1495_v53  ;;  %v1500_v10 = vadd.f32 %v1370_v43, %v26125_v18 }
 0x134   : > { %v1423_v1 = vpop.f32.mrf.mxu0  ;;  %1660 = vmatpush1.bf16.msra.mxu1 %v26151_v33  ;;  %v1372_v29 = vpop.f32.mrf.mxu1  ;;  %v1559_v23 = vadd.f32 %v33150_v52, %v1494_v54  ;;  %v1582_v48 = vmax.f32 %v1554_v17, 0.0  ;;  %v1575_v54 = vmax.f32 %v1547_v47, 0.0  ;;  %v25627_v3 = vmov 0.0   ;;  %v22700_v47 = vld [vmem:[%s33088_s4 + $0x2e0] ss:$16 sps:$4 sm:$0xff]  }
 0x135   : > { %v1502_v5 = vadd.f32 %v1423_v1, %v1103_v45  ;;  %v1501_v30 = vadd.f32 %v1372_v29, %v26130_v12  ;;  %v1565_v19 = vadd.f32 %v26084_v27, %v1500_v10  ;;  %v1561_v61 = vadd.f32 %v26097_v46, %v1496_v59  ;;  %v22703_v17 = vld [vmem:[%s33088_s4 + $0xa0] ss:$16 sps:$4 sm:$0xff]  }
 0x136   : > { %v1425_v18 = vpop.f32.mrf.mxu0  ;;  %v22406_v58 = vpop.f32.mrf.mxu1  ;;  %v1586_v12 = vmax.f32 %v1558_v63, 0.0  ;;  %v1588_v8 = vmax.f32 %v1560_v0, 0.0  ;;  %v1587_v27 = vmax.f32 %v1559_v23, 0.0  ;;  %v1601_v45 = vpack.c.bf16 %v1580_v38, %v1573_v37  ;;  %v22708_v38 = vld [vmem:[%s33088_s4 + $0x2c4] ss:$16 sps:$4 sm:$0xff]  }
 0x137   : > { %v1567_v42 = vadd.f32 %v26090_v51, %v1502_v5  ;;  %v1566_v13 = vadd.f32 %v33150_v52, %v1501_v30  ;;  %v1503_v44 = vadd.f32 %v1425_v18, %v1105_v62  ;;  %19186 = vmatmul.mubr.msk.bf16.vlgmr.msra.gmra.mxu1 %vm1619_vm4, %v26170_v41  ;;  %v1593_v14 = vmax.f32 %v1565_v19, 0.0  ;;  %v33156_v51 = vld [vmem:[#allocation16_spill] sm:$0xff] }
 0x138   : > { %v1497_v31 = vadd.f32 %v22406_v58, %v26134_v25  ;;  %v1462_v4 = vpop.f32.mrf.mxu1  ;;  %1763 = vmatprep.mubr.bf16.mxu1 %v33155_v7  ;;  %v1145_v35 = vadd.f32 %v33157_v20, %v33156_v51  ;;  %v1589_v22 = vmax.f32 %v1561_v61, 0.0  ;;  %v33158_v25 = vld [vmem:[#allocation14_spill] sm:$0xff]  ;;  %v1603_v63 = vpack.c.bf16 %v1582_v48, %v1575_v54 }
 0x139   : > { %v1595_v16 = vmax.f32 %v1567_v42, 0.0  ;;  %v1594_v40 = vmax.f32 %v1566_v13, 0.0  ;;  %v1568_v2 = vadd.f32 %v26097_v46, %v1503_v44  ;;  %v1607_v49 = vpack.c.bf16 %v1593_v14, %v1586_v12  ;;  %v22711_v19 = vld [vmem:[%s33088_s4 + $0x84] ss:$16 sps:$4 sm:$0xff]   ;;  %v22706_v18 = vld [vmem:[%s33088_s4 + $0x2c0] ss:$16 sps:$4 sm:$0xff]  }
 0x13a   : > { %v22407_v50 = vpop.f32.mrf.mxu1  ;;  %v1142_v53 = vadd.f32 %v33159_v9, %v33158_v25  ;;  %v1562_v26 = vadd.f32 %v26101_v32, %v1497_v31  ;;  %v22714_v58 = vld [vmem:[%s33088_s4 + $0x2a4] ss:$16 sps:$4 sm:$0xff]   ;;  %v22709_v61 = vld [vmem:[%s33088_s4 + $0x80] ss:$16 sps:$4 sm:$0xff]  }
 0x13b   : > { %v1609_v39 = vpack.c.bf16 %v1595_v16, %v1588_v8  ;;  %v1608_v52 = vpack.c.bf16 %v1594_v40, %v1587_v27  ;;  %v1596_v24 = vmax.f32 %v1568_v2, 0.0  ;;  %v1504_v43 = vadd.f32 %v22407_v50, %v1153_v55  ;;  %v22717_v42 = vld [vmem:[%s33088_s4 + $0x64] ss:$16 sps:$4 sm:$0xff]   ;;  %v22712_v13 = vld [vmem:[%s33088_s4 + $0x2a0] ss:$16 sps:$4 sm:$0xff]  }
 0x13c   : > { %v1465_v57 = vpop.f32.mrf.mxu1  ;;  %v1631_v28 = vsel %vm1623_vm3, %v1607_v49, 0  ;;  %v1483_v59 = vadd.f32 %v1462_v4, %v1142_v53  ;;  %v1590_v0 = vmax.f32 %v1562_v26, 0.0  ;;  %v22720_v44 = vld [vmem:[%s33088_s4 + $0x284] ss:$16 sps:$4 sm:$0xff]   ;;  %v22715_v12 = vld [vmem:[%s33088_s4 + $0x60] ss:$16 sps:$4 sm:$0xff]  }
 0x13d   : > { %v1610_v46 = vpack.c.bf16 %v1596_v24, %v1589_v22  ;;  %v1490_v15 = vadd.f32 %v1465_v57, %v1145_v35  ;;  %19187 = vmatprep.subr.msk.bf16.mxu0 %vm1623_vm3, %v1608_v52  ;;  %v1569_v60 = vadd.f32 %v26101_v32, %v1504_v43  ;;  %v1637_v62 = vsel %vm1623_vm3, %v1609_v39, 0  ;;  %v22723_v8 = vld [vmem:[%s33088_s4 + $0x44] ss:$16 sps:$4 sm:$0xff]   ;;  %v22718_v14 = vld [vmem:[%s33088_s4 + $0x280] ss:$16 sps:$4 sm:$0xff]  }
 0x13e   : > { %1701 = vmatpush1.bf16.msra.mxu0 %v1631_v28  ;;  %v1548_v1 = vadd.f32 %v26101_v32, %v1483_v59  ;;  %v22726_v31 = vld [vmem:[%s33088_s4 + $0x264] ss:$16 sps:$4 sm:$0xff]   ;;  %v22721_v4 = vld [vmem:[%s33088_s4 + $0x40] ss:$16 sps:$4 sm:$0xff]  }
 0x13f   : > { %19189 = vmatprep.subr.msk.bf16.mxu1 %vm1623_vm3, %v1610_v46  ;;  %1702 = vmatprep.subr.bf16.mxu0 %v1601_v45  ;;  %v1597_v55 = vmax.f32 %v1569_v60, 0.0  ;;  %v1555_v10 = vadd.f32 %v26101_v32, %v1490_v15  ;;  %v22729_v27 = vld [vmem:[%s33088_s4 + $0x24] ss:$16 sps:$4 sm:$0xff]   ;;  %v22724_v16 = vld [vmem:[%s33088_s4 + $0x260] ss:$16 sps:$4 sm:$0xff]  }
 0x140   : > { %1744 = vmatpush1.bf16.msra.mxu1 %v1637_v62  ;;  %v1576_v30 = vmax.f32 %v1548_v1, 0.0  ;;  %v22732_v40 = vld [vmem:[%s33088_s4 + $0x244] ss:$16 sps:$4 sm:$0xff]   ;;  %v22727_v2 = vld [vmem:[%s33088_s4 + $0x20] ss:$16 sps:$4 sm:$0xff]  }
 0x141   : > { %1745 = vmatprep.subr.bf16.mxu1 %v1603_v63  ;;  %v1611_v29 = vpack.c.bf16 %v1597_v55, %v1590_v0  ;;  %v1583_v23 = vmax.f32 %v1555_v10, 0.0  ;;  %v22735_v51 = vld [vmem:[%s33088_s4 + $0x4] ss:$16 sps:$4 sm:$0xff]   ;;  %v22730_v20 = vld [vmem:[%s33088_s4 + $0x240] ss:$16 sps:$4 sm:$0xff]  }
 0x142   : > { %1703 = vmatpush1.bf16.msra.mxu0 %v26172_v6  ;;  %v22738_v35 = vld [vmem:[%s33088_s4 + $0x224] ss:$16 sps:$4 sm:$0xff]   ;;  %v22733_v37 = vld [vmem:[%s33088_s4] ss:$16 sps:$4 sm:$0xff]  }
 0x143   : > { %22408 = vmatprep.subr.bf16.mxu0 %v25627_v3  ;;  %v1643_v5 = vsel %vm1623_vm3, %v1611_v29, 0  ;;  %v1604_v32 = vpack.c.bf16 %v1583_v23, %v1576_v30  ;;  %v22741_v48 = vld [vmem:[%s33088_s4 + $0x1e4] ss:$16 sps:$4 sm:$0xff]   ;;  %v22736_v49 = vld [vmem:[%s33088_s4 + $0x220] ss:$16 sps:$4 sm:$0xff]  }
 0x144   : > { %1746 = vmatpush1.bf16.msra.mxu1 %v26179_v36  ;;  %v22744_v50 = vld [vmem:[%s33088_s4 + $0x204] ss:$16 sps:$4 sm:$0xff]   ;;  %v22739_v22 = vld [vmem:[%s33088_s4 + $0x1e0] ss:$16 sps:$4 sm:$0xff]  }
 0x145   : > { %19195 = vmatprep.subr.msk.bf16.mxu1 %vm1623_vm3, %v26141_v11  ;;  %19188 = vmatmul.mubr.msk.bf16.vlgmr.msra.gmra.mxu0 %vm1619_vm4, %v26170_v41  ;;  %v22693_v11 = vld [vmem:[%s33087_s3 + $0x8] sm:$0x7f]   ;;  %v22747_v39 = vld [vmem:[%s33088_s4 + $0x1c4] ss:$16 sps:$4 sm:$0xff]   ;;  %v22745_v24 = vld [vmem:[%s33088_s4 + $0x1c0] ss:$16 sps:$4 sm:$0xff]  }
 0x146   : > { %22409 = vmatpush3.bf16.msra.mxu0 %v1643_v5  ;;  %22412 = vmatprep.mubr.msk.bf16.mxu0 %vm25628_vm5, %v25627_v3  ;;  %v22748_v25 = vld [vmem:[%s33088_s4 + $0x3e0] ss:$16 sps:$4 sm:$0xff]   ;;  %v22750_v9 = vld [vmem:[%s33088_s4 + $0x3e4] ss:$16 sps:$4 sm:$0xff]  }
 0x147   : > { %19190 = vmatmul.mubr.msk.bf16.vlgmr.msra.gmra.mxu1 %vm1619_vm4, %v26170_v41  ;;  %22410 = vmatprep.subr.bf16.mxu0 %v25627_v3  ;;  %v22751_v53 = vld [vmem:[%s33088_s4 + $0x1a0] ss:$16 sps:$4 sm:$0xff]   ;;  %v22753_v54 = vld [vmem:[%s33088_s4 + $0x1a4] ss:$16 sps:$4 sm:$0xff]  }
 0x148   : > { %1839 = vmatpush1.bf16.msra.mxu1 %v26157_v34  ;;  %1858 = vmatprep.mubr.bf16.mxu1 %v33155_v7  ;;  %v22696_v34 = vld [vmem:[%s33088_s4 + $0xe4] ss:$16 sps:$4 sm:$0xff]   ;;  %v22754_v26 = vld [vmem:[%s33088_s4 + $0x3c0] ss:$16 sps:$4 sm:$0xff]  }
 0x149   : > { %1840 = vmatprep.subr.bf16.mxu1 %v26159_v21  ;;  %v22699_v21 = vld [vmem:[%s33088_s4 + $0xc4] ss:$16 sps:$4 sm:$0xff]   ;;  %v22757_v57 = vld [vmem:[%s33088_s4 + $0x180] ss:$16 sps:$4 sm:$0xff]  }
 0x14a   : > { %22411 = vmatpush3.bf16.msra.mxu0 %v1604_v32  ;;  %v22756_v43 = vld [vmem:[%s33088_s4 + $0x3c4] ss:$16 sps:$4 sm:$0xff]   ;;  %v22772_v10 = vld [vmem:[%s33088_s4 + $0x360] ss:$16 sps:$4 sm:$0xff]  }
 0x14b   : > { %19197 = vmatprep.subr.msk.bf16.mxu0 %vm1623_vm3, %v1608_v52  ;;  %v22742_v52 = vld [vmem:[%s33088_s4 + $0x200] ss:$16 sps:$4 sm:$0xff]   ;;  %v22762_v15 = vld [vmem:[%s33088_s4 + $0x3a4] ss:$16 sps:$4 sm:$0xff]  }
 0x14c   : > { %1841 = vmatpush1.bf16.msra.mxu1 %v26151_v33  ;;  %v22694_v33 = vld [vmem:[%s33088_s4 + $0xe0] ss:$16 sps:$4 sm:$0xff]   ;;  %v22765_v59 = vld [vmem:[%s33088_s4 + $0x164] ss:$16 sps:$4 sm:$0xff]  }
 0x14d   : > { %19199 = vmatprep.subr.msk.bf16.mxu1 %vm1623_vm3, %v1610_v46  ;;  %22413 = vmatmul.mubr.msk.bf16.vlgmr.msra.gmra.mxu0 %vm1619_vm4, %v26170_v41  ;;  %v22702_v41 = vld [vmem:[%s33088_s4 + $0x2e4] ss:$16 sps:$4 sm:$0xff]   ;;  %v22775_v29 = vld [vmem:[%s33088_s4 + $0x120] ss:$16 sps:$4 sm:$0xff]  }
 0x14e   : > { %1882 = vmatpush1.bf16.msra.mxu0 %v1631_v28  ;;  %1901 = vmatprep.mubr.bf16.mxu0 %v33155_v7  ;;  %v22759_v46 = vld [vmem:[%s33088_s4 + $0x184] ss:$16 sps:$4 sm:$0xff]   ;;  %v22760_v28 = vld [vmem:[%s33088_s4 + $0x3a0] ss:$16 sps:$4 sm:$0xff]  }
 0x14f   : > { %19196 = vmatmul.mubr.msk.bf16.vlgmr.msra.gmra.mxu1 %vm1619_vm4, %v22693_v11  ;;  %1883 = vmatprep.subr.bf16.mxu0 %v1601_v45  ;;  %v22763_v45 = vld [vmem:[%s33088_s4 + $0x160] ss:$16 sps:$4 sm:$0xff]   ;;  %v22768_v60 = vld [vmem:[%s33088_s4 + $0x384] ss:$16 sps:$4 sm:$0xff]  }
 0x150   : > { %1925 = vmatpush1.bf16.msra.mxu1 %v1637_v62  ;;  %1944 = vmatprep.mubr.bf16.mxu1 %v33155_v7  ;;  %v22766_v62 = vld [vmem:[%s33088_s4 + $0x380] ss:$16 sps:$4 sm:$0xff]   ;;  %v22771_v0 = vld [vmem:[%s33088_s4 + $0x144] ss:$16 sps:$4 sm:$0xff]  }
 0x151   : > { %1926 = vmatprep.subr.bf16.mxu1 %v1603_v63  ;;  %v22769_v63 = vld [vmem:[%s33088_s4 + $0x140] ss:$16 sps:$4 sm:$0xff]   ;;  %v22774_v55 = vld [vmem:[%s33088_s4 + $0x364] ss:$16 sps:$4 sm:$0xff]  }
 0x152   : > { %1884 = vmatpush1.bf16.msra.mxu0 %v26172_v6  ;;  %v22697_v6 = vld [vmem:[%s33088_s4 + $0xc0] ss:$16 sps:$4 sm:$0xff]   ;;  %v22777_v1 = vld [vmem:[%s33088_s4 + $0x124] ss:$16 sps:$4 sm:$0xff]  }
 0x153   : > { %22416 = vmatprep.subr.bf16.mxu0 %v25627_v3  ;;  %v22780_v23 = vld [vmem:[%s33088_s4 + $0x344] ss:$16 sps:$4 sm:$0xff]  }
 0x154   : > { %1927 = vmatpush1.bf16.msra.mxu1 %v26179_v36  ;;  %v22705_v36 = vld [vmem:[%s33088_s4 + $0xa4] ss:$16 sps:$4 sm:$0xff]  }
 0x155   : > { %19198 = vmatmul.mubr.msk.bf16.vlgmr.msra.gmra.mxu0 %vm1619_vm4, %v22693_v11  ;;  %3361 = vmatprep.subr.bf16.mxu1 %v22696_v34  ;;  %v22783_v30 = vld [vmem:[%s33088_s4 + $0x104] ss:$16 sps:$4 sm:$0xff]   ;;  %v22784_v34 = vld [vmem:[%s33088_s4 + $0x320] ss:$16 sps:$4 sm:$0xff]  }
 0x156   : > { %22417 = vmatpush3.bf16.msra.mxu0 %v1643_v5  ;;  %22420 = vmatprep.mubr.msk.bf16.mxu0 %vm25628_vm5, %v25627_v3  ;;  %v22778_v5 = vld [vmem:[%s33088_s4 + $0x340] ss:$16 sps:$4 sm:$0xff]  }
 0x157   : > { %19200 = vmatmul.mubr.msk.bf16.vlgmr.msra.gmra.mxu1 %vm1619_vm4, %v22693_v11  ;;  %22418 = vmatprep.subr.bf16.mxu0 %v25627_v3 }
 0x158   : > { %3362 = vmatpush1.bf16.msra.mxu1 %v22694_v33  ;;  %v22789_v33 = vld [vmem:[%s33088_s4 + $0x4e4] ss:$16 sps:$4 sm:$0xff]  }
 0x159   : > { %3363 = vmatprep.subr.bf16.mxu1 %v22699_v21  ;;  %v22792_v21 = vld [vmem:[%s33088_s4 + $0x304] ss:$16 sps:$4 sm:$0xff]  }
 0x15a   : > { %22419 = vmatpush3.bf16.msra.mxu0 %v1604_v32  ;;  %v22781_v32 = vld [vmem:[%s33088_s4 + $0x100] ss:$16 sps:$4 sm:$0xff]  }
 0x15b   : > { %3404 = vmatprep.subr.bf16.mxu0 %v22702_v41  ;;  %v22790_v41 = vld [vmem:[%s33088_s4 + $0x300] ss:$16 sps:$4 sm:$0xff]  }
 0x15c   : > { %3364 = vmatpush1.bf16.msra.mxu1 %v22697_v6  ;;  %v22798_v6 = vld [vmem:[%s33088_s4 + $0x6e4] ss:$16 sps:$4 sm:$0xff]  }
 0x15d   : > { %22421 = vmatmul.mubr.msk.bf16.vlgmr.msra.gmra.mxu0 %vm1619_vm4, %v22693_v11  ;;  %3365 = vmatprep.subr.bf16.mxu1 %v22705_v36  ;;  %v22786_v11 = vld [vmem:[%s33088_s4 + $0x324] ss:$16 sps:$4 sm:$0xff]  }
 0x15e   : > { %3405 = vmatpush1.bf16.msra.mxu0 %v22700_v47 }
 0x15f   : > { %3406 = vmatprep.subr.bf16.mxu0 %v22708_v38 }
 0x160   : > { %3366 = vmatpush1.bf16.msra.mxu1 %v22703_v17 }
 0x161   : > { %3367 = vmatprep.subr.bf16.mxu1 %v22711_v19 }
 0x162   : > { %3407 = vmatpush1.bf16.msra.mxu0 %v22706_v18 }
 0x163   : > { %3408 = vmatprep.subr.bf16.mxu0 %v22714_v58 }
 0x164   : > { %3368 = vmatpush1.bf16.msra.mxu1 %v22709_v61 }
 0x165   : > { %3369 = vmatprep.subr.bf16.mxu1 %v22717_v42 }
 0x166   : > { %3409 = vmatpush1.bf16.msra.mxu0 %v22712_v13 }
 0x167   : > { %3410 = vmatprep.subr.bf16.mxu0 %v22720_v44 }
 0x168   : > { %3370 = vmatpush1.bf16.msra.mxu1 %v22715_v12 }
 0x169   : > { %3371 = vmatprep.subr.bf16.mxu1 %v22723_v8 }
 0x16a   : > { %3411 = vmatpush1.bf16.msra.mxu0 %v22718_v14 }
 0x16b   : > { %3412 = vmatprep.subr.bf16.mxu0 %v22726_v31 }
 0x16c   : > { %3372 = vmatpush1.bf16.msra.mxu1 %v22721_v4 }
 0x16d   : > { %3373 = vmatprep.subr.bf16.mxu1 %v22729_v27 }
 0x16e   : > { %3413 = vmatpush1.bf16.msra.mxu0 %v22724_v16 }
 0x16f   : > { %3414 = vmatprep.subr.bf16.mxu0 %v22732_v40 }
 0x170   : > { %3374 = vmatpush1.bf16.msra.mxu1 %v22727_v2 }
 0x171   : > { %3375 = vmatprep.subr.bf16.mxu1 %v22735_v51 }
 0x172   : > { %3415 = vmatpush1.bf16.msra.mxu0 %v22730_v20 }
 0x173   : > { %3416 = vmatprep.subr.bf16.mxu0 %v22738_v35 }
 0x174   : > { %3376 = vmatpush1.bf16.msra.mxu1 %v22733_v37 }
 0x175   : > { %3377 = vmatprep.subr.bf16.mxu1 %v22741_v48 }
 0x176   : > { %3417 = vmatpush1.bf16.msra.mxu0 %v22736_v49 }
 0x177   : > { %3418 = vmatprep.subr.bf16.mxu0 %v22744_v50 }
 0x178   : > { %3378 = vmatpush2.bf16.msra.mxu1 %v22739_v22 }
 0x179   : > { %3379 = vmatprep.subr.bf16.mxu1 %v22747_v39  ;;  %v22787_v39 = vld [vmem:[%s33088_s4 + $0x4e0] ss:$16 sps:$4 sm:$0xff]  }
 0x17a   : > { %3419 = vmatpush1.bf16.msra.mxu0 %v22742_v52 }
 0x17b   : > { %3420 = vmatprep.subr.bf16.mxu0 %v22750_v9  ;;  %v22795_v9 = vld [vmem:[%s33088_s4 + $0x4c4] ss:$16 sps:$4 sm:$0xff]  }
 0x17c   : > { %3380 = vmatpush2.bf16.msra.mxu1 %v22745_v24 }
 0x17d   : > { %3381 = vmatprep.subr.bf16.mxu1 %v22753_v54 }
 0x17e   : > { %3421 = vmatpush2.bf16.msra.mxu0 %v22748_v25 }
 0x17f   : > { %3422 = vmatprep.subr.bf16.mxu0 %v22756_v43 }
 0x180   : > { %3382 = vmatpush2.bf16.msra.mxu1 %v22751_v53 }
 0x181   : > { %3383 = vmatprep.subr.bf16.mxu1 %v22759_v46 }
 0x182   : > { %3423 = vmatpush2.bf16.msra.mxu0 %v22754_v26 }
 0x183   : > { %3424 = vmatprep.subr.bf16.mxu0 %v22762_v15 }
 0x184   : > { %3384 = vmatpush2.bf16.msra.mxu1 %v22757_v57 }
 0x185   : > { %3385 = vmatprep.subr.bf16.mxu1 %v22765_v59 }
 0x186   : > { %3425 = vmatpush2.bf16.msra.mxu0 %v22760_v28  ;;  %v22793_v28 = vld [vmem:[%s33088_s4 + $0x4c0] ss:$16 sps:$4 sm:$0xff]  }
 0x187   : > { %3426 = vmatprep.subr.bf16.mxu0 %v22768_v60 }
 0x188   : > { %3386 = vmatpush2.bf16.msra.mxu1 %v22763_v45  ;;  %v22796_v45 = vld [vmem:[%s33088_s4 + $0x6e0] ss:$16 sps:$4 sm:$0xff]  }
 0x189   : > { %3387 = vmatprep.subr.bf16.mxu1 %v22771_v0 }
 0x18a   : > { %3427 = vmatpush2.bf16.msra.mxu0 %v22766_v62 }
 0x18b   : > { %3428 = vmatprep.subr.bf16.mxu0 %v22774_v55 }
 0x18c   : > { %3388 = vmatpush2.bf16.msra.mxu1 %v22769_v63  ;;  %v22801_v63 = vld [vmem:[%s33088_s4 + $0x4a4] ss:$16 sps:$4 sm:$0xff]  }
 0x18d   : > { %3389 = vmatprep.subr.bf16.mxu1 %v22777_v1 }
 0x18e   : > { %3429 = vmatpush2.bf16.msra.mxu0 %v22772_v10 }
 0x18f   : > { %3430 = vmatprep.subr.bf16.mxu0 %v22780_v23 }
 0x190   : > { %3390 = vmatpush2.bf16.msra.mxu1 %v22775_v29  ;;  %v22804_v29 = vld [vmem:[%s33088_s4 + $0x6c4] ss:$16 sps:$4 sm:$0xff]  }
 0x191   : > { %3391 = vmatprep.subr.bf16.mxu1 %v22783_v30 }
 0x192   : > { %3431 = vmatpush2.bf16.msra.mxu0 %v22778_v5 }
 0x193   : > { %3432 = vmatprep.subr.bf16.mxu0 %v22786_v11  ;;  %v22802_v11 = vld [vmem:[%s33088_s4 + $0x6c0] ss:$16 sps:$4 sm:$0xff]  }
 0x194   : > { %3392 = vmatpush2.bf16.msra.mxu1 %v22781_v32  ;;  %v22799_v32 = vld [vmem:[%s33088_s4 + $0x4a0] ss:$16 sps:$4 sm:$0xff]  }
 0x195   : > { %3447 = vmatprep.subr.bf16.mxu1 %v22789_v33  ;;  %v22807_v33 = vld [vmem:[%s33088_s4 + $0x484] ss:$16 sps:$4 sm:$0xff]  }
 0x196   : > { %3433 = vmatpush2.bf16.msra.mxu0 %v22784_v34 }
 0x197   : > { %3434 = vmatprep.subr.bf16.mxu0 %v22792_v21  ;;  %v22810_v21 = vld [vmem:[%s33088_s4 + $0x6a4] ss:$16 sps:$4 sm:$0xff]  }
 0x19a   : > { %3435 = vmatpush2.bf16.msra.mxu0 %v22790_v41 }
 0x19b   : > { %3490 = vmatprep.subr.bf16.mxu0 %v22798_v6  ;;  %v22805_v6 = vld [vmem:[%s33088_s4 + $0x480] ss:$16 sps:$4 sm:$0xff]  }
 0x1f7   : > { %v1679_v36 = vpop.f32.mrf.mxu1 }
 0x1f9   : > { %v1681_v47 = vpop.f32.mrf.mxu1 }
 0x1fb   : > { %v1683_v38 = vpop.f32.mrf.mxu1 }
 0x1fd   : > { %v1685_v17 = vpop.f32.mrf.mxu1 }
 0x205   : > { %v1722_v19 = vpop.f32.mrf.mxu0 }
 0x207   : > { %v1765_v18 = vpop.f32.mrf.mxu1  ;;  %v1724_v58 = vpop.f32.mrf.mxu0 }
 0x209   : > { %v1767_v61 = vpop.f32.mrf.mxu1  ;;  %v1726_v42 = vpop.f32.mrf.mxu0 }
 0x20b   : > { %v1769_v13 = vpop.f32.mrf.mxu1  ;;  %v1728_v44 = vpop.f32.mrf.mxu0 }
 0x20d   : > { %v1771_v12 = vpop.f32.mrf.mxu1  ;;  %v26448_v8 = vpop.f32.mrf.mxu0 }
 0x20f   : > { %v1860_v14 = vpop.f32.mrf.mxu1  ;;  %v22414_v31 = vpop.f32.mrf.mxu0 }
 0x210   : > { %v1996_v48 = vmax.f32 %v1679_v36, %v1860_v14  ;;  %v22808_v36 = vld [vmem:[%s33088_s4 + $0x6a0] ss:$16 sps:$4 sm:$0xff]   ;;  %v22831_v31 = vld [vmem:[%s33088_s4 + $0x404] ss:$16 sps:$4 sm:$0xff]  }
 0x211   : > { %v1862_v4 = vpop.f32.mrf.mxu1  ;;  %v26450_v27 = vpop.f32.mrf.mxu0  ;;  %v22826_v14 = vld [vmem:[%s33088_s4 + $0x640] ss:$16 sps:$4 sm:$0xff]  }
 0x212   : > { %v1997_v35 = vmax.f32 %v1681_v47, %v1862_v4  ;;  %v22813_v47 = vld [vmem:[%s33088_s4 + $0x464] ss:$16 sps:$4 sm:$0xff]  }
 0x213   : > { %v1864_v16 = vpop.f32.mrf.mxu1  ;;  %v22415_v40 = vpop.f32.mrf.mxu0  ;;  %v22834_v4 = vld [vmem:[%s33088_s4 + $0x624] ss:$16 sps:$4 sm:$0xff]  }
 0x214   : > { %v2003_v2 = vmax.f32 %v1683_v38, %v1864_v16  ;;  %v22816_v38 = vld [vmem:[%s33088_s4 + $0x684] ss:$16 sps:$4 sm:$0xff]   ;;  %v22829_v16 = vld [vmem:[%s33088_s4 + $0x400] ss:$16 sps:$4 sm:$0xff]  }
 0x215   : > { %v1866_v51 = vpop.f32.mrf.mxu1  ;;  %v1903_v20 = vpop.f32.mrf.mxu0  ;;  %v22832_v40 = vld [vmem:[%s33088_s4 + $0x620] ss:$16 sps:$4 sm:$0xff]  }
 0x216   : > { %v2004_v37 = vmax.f32 %v1685_v17, %v1866_v51  ;;  %v26457_v52 = vpack.c.bf16 %v2003_v2, %v1996_v48  ;;  %v1998_v59 = vmax.f32 %v1722_v19, %v1903_v20  ;;  %v22811_v17 = vld [vmem:[%s33088_s4 + $0x460] ss:$16 sps:$4 sm:$0xff]   ;;  %v22837_v2 = vld [vmem:[%s33088_s4 + $0x5e4] ss:$16 sps:$4 sm:$0xff]   ;;  %v22846_v48 = vld [vmem:[%s33088_s4 + $0xec] ss:$16 sps:$4 sm:$0xff]  }
 0x217   : > { %v1946_v49 = vpop.f32.mrf.mxu1  ;;  %v1905_v50 = vpop.f32.mrf.mxu0  ;;  %v22814_v19 = vld [vmem:[%s33088_s4 + $0x680] ss:$16 sps:$4 sm:$0xff]   ;;  %v22840_v51 = vld [vmem:[%s33088_s4 + $0x604] ss:$16 sps:$4 sm:$0xff]  }
 0x218   : > { %v26452_v22 = vpack.c.bf16 %v2004_v37, %v1997_v35  ;;  %v2000_v43 = vmax.f32 %v1765_v18, %v1946_v49  ;;  %v1999_v57 = vmax.f32 %v1724_v58, %v1905_v50  ;;  %v22819_v18 = vld [vmem:[%s33088_s4 + $0x444] ss:$16 sps:$4 sm:$0xff]   ;;  %v22835_v20 = vld [vmem:[%s33088_s4 + $0x5e0] ss:$16 sps:$4 sm:$0xff]  }
 0x219   : > { %v1948_v24 = vpop.f32.mrf.mxu1  ;;  %v1907_v25 = vpop.f32.mrf.mxu0  ;;  %v22822_v58 = vld [vmem:[%s33088_s4 + $0x664] ss:$16 sps:$4 sm:$0xff]   ;;  %v22838_v35 = vld [vmem:[%s33088_s4 + $0x600] ss:$16 sps:$4 sm:$0xff]  }
 0x21a   : > { %3393 = vmatprep.mubr.bf16.mxu1 %v26452_v22  ;;  %v2005_v53 = vmax.f32 %v1726_v42, %v1907_v25  ;;  %v2001_v0 = vmax.f32 %v1767_v61, %v1948_v24  ;;  %v22817_v61 = vld [vmem:[%s33088_s4 + $0x440] ss:$16 sps:$4 sm:$0xff]   ;;  %v22843_v37 = vld [vmem:[%s33088_s4 + $0x5c4] ss:$16 sps:$4 sm:$0xff]  }
 0x21b   : > { %v1950_v54 = vpop.f32.mrf.mxu1  ;;  %3394 = vmatmul.mubr.bf16.vlgmr.msra.gmra.mxu1 %v26457_v52  ;;  %v1909_v26 = vpop.f32.mrf.mxu0  ;;  %v22820_v42 = vld [vmem:[%s33088_s4 + $0x660] ss:$16 sps:$4 sm:$0xff]   ;;  %v22849_v25 = vld [vmem:[%s33088_s4 + $0x5a4] ss:$16 sps:$4 sm:$0xff]  }
 0x21c   : > { %v2007_v46 = vmax.f32 %v1769_v13, %v1950_v54  ;;  %3448 = vmatpush1.bf16.msra.mxu1 %v22787_v39  ;;  %v2006_v15 = vmax.f32 %v1728_v44, %v1909_v26  ;;  %v26482_v23 = vpack.c.bf16 %v2005_v53, %v1998_v59  ;;  %v22825_v13 = vld [vmem:[%s33088_s4 + $0x424] ss:$16 sps:$4 sm:$0xff]   ;;  %v22841_v50 = vld [vmem:[%s33088_s4 + $0x5c0] ss:$16 sps:$4 sm:$0xff]   ;;  %v22844_v39 = vld [vmem:[%s33088_s4 + $0xe8] ss:$16 sps:$4 sm:$0xff]  }
 0x21d   : > { %v1952_v60 = vpop.f32.mrf.mxu1  ;;  %v26470_v62 = vpop.f32.mrf.mxu0  ;;  %3449 = vmatprep.subr.bf16.mxu1 %v22795_v9  ;;  %v22828_v44 = vld [vmem:[%s33088_s4 + $0x644] ss:$16 sps:$4 sm:$0xff]   ;;  %v22847_v53 = vld [vmem:[%s33088_s4 + $0x5a0] ss:$16 sps:$4 sm:$0xff]   ;;  %v22858_v26 = vld [vmem:[%s33088_s4 + $0xac] ss:$16 sps:$4 sm:$0xff]  }
 0x21e   : > { %v26475_v55 = vpack.c.bf16 %v2007_v46, %v2000_v43  ;;  %v26477_v10 = vpack.c.bf16 %v2006_v15, %v1999_v57  ;;  %v2008_v1 = vmax.f32 %v1771_v12, %v1952_v60  ;;  %v22823_v12 = vld [vmem:[%s33088_s4 + $0x420] ss:$16 sps:$4 sm:$0xff]   ;;  %v2002_v24 = vmax.f32 %v26448_v8, %v26470_v62  ;;  %v22850_v8 = vld [vmem:[%s33088_s4 + $0xc8] ss:$16 sps:$4 sm:$0xff]   ;;  %v22855_v54 = vld [vmem:[%s33088_s4 + $0x584] ss:$16 sps:$4 sm:$0xff]  }
 0x21f   : > { %v22422_v5 = vpop.f32.mrf.mxu0  ;;  %v22853_v43 = vld [vmem:[%s33088_s4 + $0x580] ss:$16 sps:$4 sm:$0xff]   ;;  %v22856_v57 = vld [vmem:[%s33088_s4 + $0xa8] ss:$16 sps:$4 sm:$0xff]   ;;  %v22861_v46 = vld [vmem:[%s33088_s4 + $0x564] ss:$16 sps:$4 sm:$0xff]  }
 0x220   : > { %v26484_v30 = vpack.c.bf16 %v2008_v1, %v2001_v0  ;;  %3450 = vmatpush1.bf16.msra.mxu1 %v22793_v28  ;;  %3436 = vmatprep.mubr.bf16.mxu0 %v26477_v10  ;;  %v22864_v15 = vld [vmem:[%s33088_s4 + $0x8c] ss:$16 sps:$4 sm:$0xff]   ;;  %v22859_v28 = vld [vmem:[%s33088_s4 + $0x560] ss:$16 sps:$4 sm:$0xff]   ;;  %v22867_v59 = vld [vmem:[%s33088_s4 + $0x544] ss:$16 sps:$4 sm:$0xff]  }
 0x221   : > { %v26493_v34 = vpop.f32.mrf.mxu0  ;;  %3437 = vmatmul.mubr.bf16.vlgmr.msra.gmra.mxu0 %v26482_v23  ;;  %3451 = vmatprep.subr.bf16.mxu1 %v22801_v63  ;;  %v22870_v60 = vld [vmem:[%s33088_s4 + $0x6c] ss:$16 sps:$4 sm:$0xff]   ;;  %v22865_v62 = vld [vmem:[%s33088_s4 + $0x540] ss:$16 sps:$4 sm:$0xff]   ;;  %v22868_v63 = vld [vmem:[%s33088_s4 + $0x68] ss:$16 sps:$4 sm:$0xff]  }
 0x222   : > { %3479 = vmatprep.mubr.bf16.mxu1 %v26484_v30  ;;  %3491 = vmatpush1.bf16.msra.mxu0 %v22796_v45  ;;  %v2009_v49 = vmax.f32 %v26450_v27, %v26493_v34  ;;  %v22852_v27 = vld [vmem:[%s33088_s4 + $0xcc] ss:$16 sps:$4 sm:$0xff]   ;;  %v22862_v45 = vld [vmem:[%s33088_s4 + $0x88] ss:$16 sps:$4 sm:$0xff]   ;;  %v22873_v0 = vld [vmem:[%s33088_s4 + $0x524] ss:$16 sps:$4 sm:$0xff]  }
 0x223   : > { %3492 = vmatprep.subr.bf16.mxu0 %v22804_v29  ;;  %v22423_v41 = vpop.f32.mrf.mxu0  ;;  %3522 = vmatprep.mubr.bf16.mxu0 %v33155_v7  ;;  %v22876_v1 = vld [vmem:[%s33088_s4 + $0x4c] ss:$16 sps:$4 sm:$0xff]   ;;  %v22871_v29 = vld [vmem:[%s33088_s4 + $0x520] ss:$16 sps:$4 sm:$0xff]   ;;  %v22874_v5 = vld [vmem:[%s33088_s4 + $0x48] ss:$16 sps:$4 sm:$0xff]  }
 0x224   : > { %3452 = vmatpush1.bf16.msra.mxu1 %v22799_v32  ;;  %v26592_v9 = vpack.c.bf16 %v2009_v49, %v2002_v24  ;;  %v22879_v32 = vld [vmem:[%s33088_s4 + $0x504] ss:$16 sps:$4 sm:$0xff]   ;;  %v22877_v34 = vld [vmem:[%s33088_s4 + $0x500] ss:$16 sps:$4 sm:$0xff]   ;;  %v22888_v41 = vld [vmem:[%s33088_s4 + $0xc] ss:$16 sps:$4 sm:$0xff]  }
 0x225   : > { %3453 = vmatprep.subr.bf16.mxu1 %v22807_v33  ;;  %v22880_v33 = vld [vmem:[%s33088_s4 + $0x28] ss:$16 sps:$4 sm:$0xff]   ;;  %v22930_v24 = vld [vmem:[%s33088_s4 + $0x12c] ss:$16 sps:$4 sm:$0xff]  }
 0x226   : > { %3493 = vmatpush1.bf16.msra.mxu0 %v22802_v11  ;;  %v22882_v11 = vld [vmem:[%s33088_s4 + $0x2c] ss:$16 sps:$4 sm:$0xff]   ;;  %v22919_v49 = vld [vmem:[%s33088_s4 + $0x228] ss:$16 sps:$4 sm:$0xff]  }
 0x227   : > { %3494 = vmatprep.subr.bf16.mxu0 %v22810_v21  ;;  %v22885_v21 = vld [vmem:[%s33088_s4 + $0x2ec] ss:$16 sps:$4 sm:$0xff]  }
 0x228   : > { %3454 = vmatpush1.bf16.msra.mxu1 %v22805_v6  ;;  %v22883_v6 = vld [vmem:[%s33088_s4 + $0x2e8] ss:$16 sps:$4 sm:$0xff]  }
 0x229   : > { %3455 = vmatprep.subr.bf16.mxu1 %v22813_v47  ;;  %v22891_v47 = vld [vmem:[%s33088_s4 + $0x2cc] ss:$16 sps:$4 sm:$0xff]  }
 0x22a   : > { %3495 = vmatpush1.bf16.msra.mxu0 %v22808_v36  ;;  %v22886_v36 = vld [vmem:[%s33088_s4 + $0x8] ss:$16 sps:$4 sm:$0xff]  }
 0x22b   : > { %3496 = vmatprep.subr.bf16.mxu0 %v22816_v38  ;;  %v22894_v38 = vld [vmem:[%s33088_s4 + $0x1ec] ss:$16 sps:$4 sm:$0xff]  }
 0x22c   : > { %3456 = vmatpush1.bf16.msra.mxu1 %v22811_v17  ;;  %v22889_v17 = vld [vmem:[%s33088_s4 + $0x2c8] ss:$16 sps:$4 sm:$0xff]  }
 0x22d   : > { %3457 = vmatprep.subr.bf16.mxu1 %v22819_v18  ;;  %v22897_v18 = vld [vmem:[%s33088_s4 + $0x2ac] ss:$16 sps:$4 sm:$0xff]  }
 0x22e   : > { %3497 = vmatpush1.bf16.msra.mxu0 %v22814_v19  ;;  %v22892_v19 = vld [vmem:[%s33088_s4 + $0x1e8] ss:$16 sps:$4 sm:$0xff]  }
 0x22f   : > { %3498 = vmatprep.subr.bf16.mxu0 %v22822_v58  ;;  %v22900_v58 = vld [vmem:[%s33088_s4 + $0x1cc] ss:$16 sps:$4 sm:$0xff]  }
 0x230   : > { %3458 = vmatpush1.bf16.msra.mxu1 %v22817_v61  ;;  %v22895_v61 = vld [vmem:[%s33088_s4 + $0x2a8] ss:$16 sps:$4 sm:$0xff]  }
 0x231   : > { %3459 = vmatprep.subr.bf16.mxu1 %v22825_v13  ;;  %v22903_v13 = vld [vmem:[%s33088_s4 + $0x28c] ss:$16 sps:$4 sm:$0xff]  }
 0x232   : > { %3499 = vmatpush1.bf16.msra.mxu0 %v22820_v42  ;;  %v22898_v42 = vld [vmem:[%s33088_s4 + $0x1c8] ss:$16 sps:$4 sm:$0xff]  }
 0x233   : > { %3500 = vmatprep.subr.bf16.mxu0 %v22828_v44  ;;  %v22906_v44 = vld [vmem:[%s33088_s4 + $0x1ac] ss:$16 sps:$4 sm:$0xff]  }
 0x234   : > { %3460 = vmatpush1.bf16.msra.mxu1 %v22823_v12  ;;  %v22901_v12 = vld [vmem:[%s33088_s4 + $0x288] ss:$16 sps:$4 sm:$0xff]  }
 0x235   : > { %3461 = vmatprep.subr.bf16.mxu1 %v22831_v31  ;;  %v22909_v31 = vld [vmem:[%s33088_s4 + $0x26c] ss:$16 sps:$4 sm:$0xff]  }
 0x236   : > { %3501 = vmatpush1.bf16.msra.mxu0 %v22826_v14  ;;  %v22904_v14 = vld [vmem:[%s33088_s4 + $0x1a8] ss:$16 sps:$4 sm:$0xff]  }
 0x237   : > { %3502 = vmatprep.subr.bf16.mxu0 %v22834_v4  ;;  %v22912_v4 = vld [vmem:[%s33088_s4 + $0x18c] ss:$16 sps:$4 sm:$0xff]  }
 0x238   : > { %3462 = vmatpush1.bf16.msra.mxu1 %v22829_v16  ;;  %v22907_v16 = vld [vmem:[%s33088_s4 + $0x268] ss:$16 sps:$4 sm:$0xff]  }
 0x239   : > { %3463 = vmatprep.subr.bf16.mxu1 %v22837_v2  ;;  %v22915_v2 = vld [vmem:[%s33088_s4 + $0x24c] ss:$16 sps:$4 sm:$0xff]  }
 0x23a   : > { %3503 = vmatpush1.bf16.msra.mxu0 %v22832_v40  ;;  %v22910_v40 = vld [vmem:[%s33088_s4 + $0x188] ss:$16 sps:$4 sm:$0xff]  }
 0x23b   : > { %3504 = vmatprep.subr.bf16.mxu0 %v22840_v51  ;;  %v22918_v51 = vld [vmem:[%s33088_s4 + $0x16c] ss:$16 sps:$4 sm:$0xff]  }
 0x23c   : > { %3464 = vmatpush2.bf16.msra.mxu1 %v22835_v20  ;;  %v22913_v20 = vld [vmem:[%s33088_s4 + $0x248] ss:$16 sps:$4 sm:$0xff]  }
 0x23d   : > { %3465 = vmatprep.subr.bf16.mxu1 %v22843_v37  ;;  %v22921_v37 = vld [vmem:[%s33088_s4 + $0x22c] ss:$16 sps:$4 sm:$0xff]  }
 0x23e   : > { %3505 = vmatpush1.bf16.msra.mxu0 %v22838_v35  ;;  %v22916_v35 = vld [vmem:[%s33088_s4 + $0x168] ss:$16 sps:$4 sm:$0xff]  }
 0x23f   : > { %3533 = vmatprep.subr.bf16.mxu0 %v22846_v48  ;;  %v22924_v48 = vld [vmem:[%s33088_s4 + $0x14c] ss:$16 sps:$4 sm:$0xff]  }
 0x240   : > { %3466 = vmatpush2.bf16.msra.mxu1 %v22841_v50  ;;  %v22922_v50 = vld [vmem:[%s33088_s4 + $0x148] ss:$16 sps:$4 sm:$0xff]  }
 0x241   : > { %3523 = vmatmul.mubr.bf16.vlgmr.msra.gmra.mxu0 %v26592_v9  ;;  %3467 = vmatprep.subr.bf16.mxu1 %v22849_v25  ;;  %v22925_v25 = vld [vmem:[%s33088_s4 + $0x208] ss:$16 sps:$4 sm:$0xff]  }
 0x242   : > { %3534 = vmatpush1.bf16.msra.mxu0 %v22844_v39  ;;  %3565 = vmatprep.mubr.bf16.mxu0 %v26452_v22  ;;  %v22927_v39 = vld [vmem:[%s33088_s4 + $0x20c] ss:$16 sps:$4 sm:$0xff]  }
 0x243   : > { %3535 = vmatprep.subr.bf16.mxu0 %v22852_v27  ;;  %v22928_v27 = vld [vmem:[%s33088_s4 + $0x128] ss:$16 sps:$4 sm:$0xff]  }
 0x244   : > { %3468 = vmatpush2.bf16.msra.mxu1 %v22847_v53  ;;  %v22933_v53 = vld [vmem:[%s33088_s4 + $0x3ec] ss:$16 sps:$4 sm:$0xff]  }
 0x245   : > { %3469 = vmatprep.subr.bf16.mxu1 %v22855_v54  ;;  %v22931_v54 = vld [vmem:[%s33088_s4 + $0x3e8] ss:$16 sps:$4 sm:$0xff]  }
 0x246   : > { %3536 = vmatpush1.bf16.msra.mxu0 %v22850_v8  ;;  %v22936_v8 = vld [vmem:[%s33088_s4 + $0x10c] ss:$16 sps:$4 sm:$0xff]  }
 0x247   : > { %3537 = vmatprep.subr.bf16.mxu0 %v22858_v26  ;;  %v22934_v26 = vld [vmem:[%s33088_s4 + $0x108] ss:$16 sps:$4 sm:$0xff]  }
 0x248   : > { %3470 = vmatpush2.bf16.msra.mxu1 %v22853_v43  ;;  %v22939_v43 = vld [vmem:[%s33088_s4 + $0x3cc] ss:$16 sps:$4 sm:$0xff]  }
 0x249   : > { %3471 = vmatprep.subr.bf16.mxu1 %v22861_v46  ;;  %v22937_v46 = vld [vmem:[%s33088_s4 + $0x3c8] ss:$16 sps:$4 sm:$0xff]  }
 0x24a   : > { %3538 = vmatpush1.bf16.msra.mxu0 %v22856_v57  ;;  %v22942_v57 = vld [vmem:[%s33088_s4 + $0x4ec] ss:$16 sps:$4 sm:$0xff]  }
 0x24b   : > { %3539 = vmatprep.subr.bf16.mxu0 %v22864_v15  ;;  %v22940_v15 = vld [vmem:[%s33088_s4 + $0x4e8] ss:$16 sps:$4 sm:$0xff]  }
 0x24c   : > { %3472 = vmatpush2.bf16.msra.mxu1 %v22859_v28  ;;  %v22945_v28 = vld [vmem:[%s33088_s4 + $0x3ac] ss:$16 sps:$4 sm:$0xff]  }
 0x24d   : > { %3473 = vmatprep.subr.bf16.mxu1 %v22867_v59  ;;  %v22943_v59 = vld [vmem:[%s33088_s4 + $0x3a8] ss:$16 sps:$4 sm:$0xff]  }
 0x24e   : > { %3540 = vmatpush1.bf16.msra.mxu0 %v22862_v45  ;;  %v22948_v45 = vld [vmem:[%s33088_s4 + $0x4cc] ss:$16 sps:$4 sm:$0xff]  }
 0x24f   : > { %3541 = vmatprep.subr.bf16.mxu0 %v22870_v60  ;;  %v22946_v60 = vld [vmem:[%s33088_s4 + $0x4c8] ss:$16 sps:$4 sm:$0xff]  }
 0x250   : > { %3474 = vmatpush2.bf16.msra.mxu1 %v22865_v62  ;;  %v22951_v62 = vld [vmem:[%s33088_s4 + $0x38c] ss:$16 sps:$4 sm:$0xff]  }
 0x251   : > { %3475 = vmatprep.subr.bf16.mxu1 %v22873_v0  ;;  %v22949_v0 = vld [vmem:[%s33088_s4 + $0x388] ss:$16 sps:$4 sm:$0xff]  }
 0x252   : > { %3542 = vmatpush1.bf16.msra.mxu0 %v22868_v63  ;;  %v22954_v63 = vld [vmem:[%s33088_s4 + $0x4ac] ss:$16 sps:$4 sm:$0xff]  }
 0x253   : > { %3543 = vmatprep.subr.bf16.mxu0 %v22876_v1  ;;  %v22952_v1 = vld [vmem:[%s33088_s4 + $0x4a8] ss:$16 sps:$4 sm:$0xff]  }
 0x254   : > { %3476 = vmatpush2.bf16.msra.mxu1 %v22871_v29  ;;  %v22957_v29 = vld [vmem:[%s33088_s4 + $0x36c] ss:$16 sps:$4 sm:$0xff]  }
 0x255   : > { %3477 = vmatprep.subr.bf16.mxu1 %v22879_v32  ;;  %v22955_v32 = vld [vmem:[%s33088_s4 + $0x368] ss:$16 sps:$4 sm:$0xff]  }
 0x256   : > { %3544 = vmatpush1.bf16.msra.mxu0 %v22874_v5  ;;  %v22960_v5 = vld [vmem:[%s33088_s4 + $0x48c] ss:$16 sps:$4 sm:$0xff]  }
 0x257   : > { %3545 = vmatprep.subr.bf16.mxu0 %v22882_v11  ;;  %v22958_v11 = vld [vmem:[%s33088_s4 + $0x488] ss:$16 sps:$4 sm:$0xff]  }
 0x258   : > { %3478 = vmatpush2.bf16.msra.mxu1 %v22877_v34  ;;  %v22963_v34 = vld [vmem:[%s33088_s4 + $0x34c] ss:$16 sps:$4 sm:$0xff]  }
 0x259   : > { %3576 = vmatprep.subr.bf16.mxu1 %v22885_v21  ;;  %v22961_v21 = vld [vmem:[%s33088_s4 + $0x348] ss:$16 sps:$4 sm:$0xff]  }
 0x25a   : > { %3546 = vmatpush1.bf16.msra.mxu0 %v22880_v33  ;;  %v22966_v33 = vld [vmem:[%s33088_s4 + $0x46c] ss:$16 sps:$4 sm:$0xff]  }
 0x25b   : > { %3480 = vmatmul.mubr.bf16.vlgmr.msra.gmra.mxu1 %v26475_v55  ;;  %3547 = vmatprep.subr.bf16.mxu0 %v22888_v41  ;;  %v22964_v41 = vld [vmem:[%s33088_s4 + $0x468] ss:$16 sps:$4 sm:$0xff]  }
 0x25c   : > { %3577 = vmatpush1.bf16.msra.mxu1 %v22883_v6  ;;  %3608 = vmatprep.mubr.bf16.mxu1 %v26477_v10  ;;  %v22969_v6 = vld [vmem:[%s33088_s4 + $0x32c] ss:$16 sps:$4 sm:$0xff]  }
 0x25d   : > { %3578 = vmatprep.subr.bf16.mxu1 %v22891_v47  ;;  %v22967_v47 = vld [vmem:[%s33088_s4 + $0x328] ss:$16 sps:$4 sm:$0xff]  }
 0x25e   : > { %3548 = vmatpush1.bf16.msra.mxu0 %v22886_v36  ;;  %v22972_v36 = vld [vmem:[%s33088_s4 + $0x44c] ss:$16 sps:$4 sm:$0xff]  }
 0x25f   : > { %3549 = vmatprep.subr.bf16.mxu0 %v22894_v38  ;;  %v22970_v38 = vld [vmem:[%s33088_s4 + $0x448] ss:$16 sps:$4 sm:$0xff]  }
 0x260   : > { %3579 = vmatpush1.bf16.msra.mxu1 %v22889_v17  ;;  %v22975_v17 = vld [vmem:[%s33088_s4 + $0x30c] ss:$16 sps:$4 sm:$0xff]  }
 0x261   : > { %3580 = vmatprep.subr.bf16.mxu1 %v22897_v18  ;;  %v22973_v18 = vld [vmem:[%s33088_s4 + $0x308] ss:$16 sps:$4 sm:$0xff]  }
 0x262   : > { %3550 = vmatpush2.bf16.msra.mxu0 %v22892_v19  ;;  %v22978_v19 = vld [vmem:[%s33088_s4 + $0x42c] ss:$16 sps:$4 sm:$0xff]  }
 0x263   : > { %3551 = vmatprep.subr.bf16.mxu0 %v22900_v58  ;;  %v22976_v58 = vld [vmem:[%s33088_s4 + $0x428] ss:$16 sps:$4 sm:$0xff]  }
 0x264   : > { %3581 = vmatpush1.bf16.msra.mxu1 %v22895_v61  ;;  %v22981_v61 = vld [vmem:[%s33088_s4 + $0x6ec] ss:$16 sps:$4 sm:$0xff]  }
 0x265   : > { %3582 = vmatprep.subr.bf16.mxu1 %v22903_v13  ;;  %v22979_v13 = vld [vmem:[%s33088_s4 + $0x6e8] ss:$16 sps:$4 sm:$0xff]  }
 0x266   : > { %3552 = vmatpush2.bf16.msra.mxu0 %v22898_v42  ;;  %v22984_v42 = vld [vmem:[%s33088_s4 + $0x40c] ss:$16 sps:$4 sm:$0xff]  }
 0x267   : > { %3553 = vmatprep.subr.bf16.mxu0 %v22906_v44  ;;  %v22982_v44 = vld [vmem:[%s33088_s4 + $0x408] ss:$16 sps:$4 sm:$0xff]  }
 0x268   : > { %3583 = vmatpush1.bf16.msra.mxu1 %v22901_v12  ;;  %v22987_v12 = vld [vmem:[%s33088_s4 + $0x6cc] ss:$16 sps:$4 sm:$0xff]  }
 0x269   : > { %3584 = vmatprep.subr.bf16.mxu1 %v22909_v31  ;;  %v22985_v31 = vld [vmem:[%s33088_s4 + $0x6c8] ss:$16 sps:$4 sm:$0xff]  }
 0x26a   : > { %3554 = vmatpush2.bf16.msra.mxu0 %v22904_v14  ;;  %v22990_v14 = vld [vmem:[%s33088_s4 + $0x5ec] ss:$16 sps:$4 sm:$0xff]  }
 0x26b   : > { %3555 = vmatprep.subr.bf16.mxu0 %v22912_v4  ;;  %v22988_v4 = vld [vmem:[%s33088_s4 + $0x5e8] ss:$16 sps:$4 sm:$0xff]  }
 0x26c   : > { %3585 = vmatpush1.bf16.msra.mxu1 %v22907_v16  ;;  %v22993_v16 = vld [vmem:[%s33088_s4 + $0x6ac] ss:$16 sps:$4 sm:$0xff]  }
 0x26d   : > { %3586 = vmatprep.subr.bf16.mxu1 %v22915_v2  ;;  %v22991_v2 = vld [vmem:[%s33088_s4 + $0x6a8] ss:$16 sps:$4 sm:$0xff]  }
 0x26e   : > { %3556 = vmatpush2.bf16.msra.mxu0 %v22910_v40  ;;  %v22996_v40 = vld [vmem:[%s33088_s4 + $0x5cc] ss:$16 sps:$4 sm:$0xff]  }
 0x26f   : > { %3557 = vmatprep.subr.bf16.mxu0 %v22918_v51  ;;  %v22994_v51 = vld [vmem:[%s33088_s4 + $0x5c8] ss:$16 sps:$4 sm:$0xff]  }
 0x270   : > { %3587 = vmatpush1.bf16.msra.mxu1 %v22913_v20  ;;  %v22999_v20 = vld [vmem:[%s33088_s4 + $0x68c] ss:$16 sps:$4 sm:$0xff]  }
 0x271   : > { %3588 = vmatprep.subr.bf16.mxu1 %v22921_v37  ;;  %v22997_v37 = vld [vmem:[%s33088_s4 + $0x688] ss:$16 sps:$4 sm:$0xff]  }
 0x272   : > { %3558 = vmatpush2.bf16.msra.mxu0 %v22916_v35  ;;  %v23002_v35 = vld [vmem:[%s33088_s4 + $0x5ac] ss:$16 sps:$4 sm:$0xff]  }
 0x273   : > { %3559 = vmatprep.subr.bf16.mxu0 %v22924_v48  ;;  %v23000_v48 = vld [vmem:[%s33088_s4 + $0x5a8] ss:$16 sps:$4 sm:$0xff]  }
 0x274   : > { %3589 = vmatpush1.bf16.msra.mxu1 %v22919_v49  ;;  %v23005_v49 = vld [vmem:[%s33088_s4 + $0x66c] ss:$16 sps:$4 sm:$0xff]  }
 0x275   : > { %3590 = vmatprep.subr.bf16.mxu1 %v22927_v39  ;;  %v23003_v39 = vld [vmem:[%s33088_s4 + $0x668] ss:$16 sps:$4 sm:$0xff]  }
 0x276   : > { %3560 = vmatpush2.bf16.msra.mxu0 %v22922_v50  ;;  %v23008_v50 = vld [vmem:[%s33088_s4 + $0x58c] ss:$16 sps:$4 sm:$0xff]  }
 0x277   : > { %3561 = vmatprep.subr.bf16.mxu0 %v22930_v24  ;;  %v23006_v24 = vld [vmem:[%s33088_s4 + $0x588] ss:$16 sps:$4 sm:$0xff]  }
 0x278   : > { %3591 = vmatpush1.bf16.msra.mxu1 %v22925_v25  ;;  %v23011_v25 = vld [vmem:[%s33088_s4 + $0x64c] ss:$16 sps:$4 sm:$0xff]  }
 0x279   : > { %3592 = vmatprep.subr.bf16.mxu1 %v22933_v53  ;;  %v23009_v53 = vld [vmem:[%s33088_s4 + $0x648] ss:$16 sps:$4 sm:$0xff]  }
 0x27a   : > { %3562 = vmatpush2.bf16.msra.mxu0 %v22928_v27  ;;  %v23014_v27 = vld [vmem:[%s33088_s4 + $0x56c] ss:$16 sps:$4 sm:$0xff]  }
 0x27b   : > { %3563 = vmatprep.subr.bf16.mxu0 %v22936_v8  ;;  %v23012_v8 = vld [vmem:[%s33088_s4 + $0x568] ss:$16 sps:$4 sm:$0xff]  }
 0x27c   : > { %3593 = vmatpush2.bf16.msra.mxu1 %v22931_v54  ;;  %v23017_v54 = vld [vmem:[%s33088_s4 + $0x62c] ss:$16 sps:$4 sm:$0xff]  }
 0x27d   : > { %3594 = vmatprep.subr.bf16.mxu1 %v22939_v43  ;;  %v23015_v43 = vld [vmem:[%s33088_s4 + $0x628] ss:$16 sps:$4 sm:$0xff]  }
 0x27e   : > { %3564 = vmatpush2.bf16.msra.mxu0 %v22934_v26  ;;  %v23020_v26 = vld [vmem:[%s33088_s4 + $0x54c] ss:$16 sps:$4 sm:$0xff]  }
 0x27f   : > { %3619 = vmatprep.subr.bf16.mxu0 %v22942_v57  ;;  %v23018_v57 = vld [vmem:[%s33088_s4 + $0x548] ss:$16 sps:$4 sm:$0xff]  }
 0x280   : > { %3595 = vmatpush2.bf16.msra.mxu1 %v22937_v46  ;;  %v23023_v46 = vld [vmem:[%s33088_s4 + $0x60c] ss:$16 sps:$4 sm:$0xff]  }
 0x281   : > { %3566 = vmatmul.mubr.bf16.vlgmr.msra.gmra.mxu0 %v26457_v52  ;;  %3596 = vmatprep.subr.bf16.mxu1 %v22945_v28  ;;  %v23021_v28 = vld [vmem:[%s33088_s4 + $0x608] ss:$16 sps:$4 sm:$0xff]  }
 0x282   : > { %3620 = vmatpush1.bf16.msra.mxu0 %v22940_v15  ;;  %3651 = vmatprep.mubr.bf16.mxu0 %v26484_v30  ;;  %v23026_v15 = vld [vmem:[%s33088_s4 + $0x52c] ss:$16 sps:$4 sm:$0xff]  }
 0x283   : > { %3621 = vmatprep.subr.bf16.mxu0 %v22948_v45  ;;  %v23024_v45 = vld [vmem:[%s33088_s4 + $0x528] ss:$16 sps:$4 sm:$0xff]  }
 0x284   : > { %3597 = vmatpush2.bf16.msra.mxu1 %v22943_v59  ;;  %v23029_v59 = vld [vmem:[%s33088_s4 + $0x7e4] ss:$16 sps:$4 sm:$0xff]  }
 0x285   : > { %3598 = vmatprep.subr.bf16.mxu1 %v22951_v62  ;;  %v23027_v62 = vld [vmem:[%s33088_s4 + $0x7e0] ss:$16 sps:$4 sm:$0xff]  }
 0x286   : > { %3622 = vmatpush1.bf16.msra.mxu0 %v22946_v60  ;;  %v23032_v60 = vld [vmem:[%s33088_s4 + $0x50c] ss:$16 sps:$4 sm:$0xff]  }
 0x287   : > { %3623 = vmatprep.subr.bf16.mxu0 %v22954_v63  ;;  %v23030_v63 = vld [vmem:[%s33088_s4 + $0x508] ss:$16 sps:$4 sm:$0xff]  }
 0x288   : > { %3599 = vmatpush2.bf16.msra.mxu1 %v22949_v0  ;;  %v23035_v0 = vld [vmem:[%s33088_s4 + $0x7c4] ss:$16 sps:$4 sm:$0xff]  }
 0x289   : > { %3600 = vmatprep.subr.bf16.mxu1 %v22957_v29  ;;  %v23033_v29 = vld [vmem:[%s33088_s4 + $0x7c0] ss:$16 sps:$4 sm:$0xff]  }
 0x28a   : > { %3624 = vmatpush1.bf16.msra.mxu0 %v22952_v1  ;;  %v23038_v1 = vld [vmem:[%s33088_s4 + $0x9e4] ss:$16 sps:$4 sm:$0xff]  }
 0x28b   : > { %3625 = vmatprep.subr.bf16.mxu0 %v22960_v5  ;;  %v23036_v5 = vld [vmem:[%s33088_s4 + $0x9e0] ss:$16 sps:$4 sm:$0xff]  }
 0x28c   : > { %3601 = vmatpush2.bf16.msra.mxu1 %v22955_v32  ;;  %v23041_v32 = vld [vmem:[%s33088_s4 + $0x7a4] ss:$16 sps:$4 sm:$0xff]  }
 0x28d   : > { %3602 = vmatprep.subr.bf16.mxu1 %v22963_v34  ;;  %v23039_v34 = vld [vmem:[%s33088_s4 + $0x7a0] ss:$16 sps:$4 sm:$0xff]  }
 0x28e   : > { %3626 = vmatpush1.bf16.msra.mxu0 %v22958_v11  ;;  %v23044_v11 = vld [vmem:[%s33088_s4 + $0x9c4] ss:$16 sps:$4 sm:$0xff]  }
 0x28f   : > { %3627 = vmatprep.subr.bf16.mxu0 %v22966_v33  ;;  %v23042_v33 = vld [vmem:[%s33088_s4 + $0x9c0] ss:$16 sps:$4 sm:$0xff]  }
 0x290   : > { %3603 = vmatpush2.bf16.msra.mxu1 %v22961_v21  ;;  %v23047_v21 = vld [vmem:[%s33088_s4 + $0x784] ss:$16 sps:$4 sm:$0xff]  }
 0x291   : > { %3604 = vmatprep.subr.bf16.mxu1 %v22969_v6  ;;  %v23045_v6 = vld [vmem:[%s33088_s4 + $0x780] ss:$16 sps:$4 sm:$0xff]  }
 0x292   : > { %3628 = vmatpush1.bf16.msra.mxu0 %v22964_v41  ;;  %v23050_v41 = vld [vmem:[%s33088_s4 + $0x9a4] ss:$16 sps:$4 sm:$0xff]  }
 0x293   : > { %3629 = vmatprep.subr.bf16.mxu0 %v22972_v36  ;;  %v23048_v36 = vld [vmem:[%s33088_s4 + $0x9a0] ss:$16 sps:$4 sm:$0xff]  }
 0x294   : > { %3605 = vmatpush2.bf16.msra.mxu1 %v22967_v47  ;;  %v23053_v47 = vld [vmem:[%s33088_s4 + $0x764] ss:$16 sps:$4 sm:$0xff]  }
 0x295   : > { %3606 = vmatprep.subr.bf16.mxu1 %v22975_v17  ;;  %v23051_v17 = vld [vmem:[%s33088_s4 + $0x760] ss:$16 sps:$4 sm:$0xff]  }
 0x296   : > { %3630 = vmatpush1.bf16.msra.mxu0 %v22970_v38  ;;  %v23056_v38 = vld [vmem:[%s33088_s4 + $0x984] ss:$16 sps:$4 sm:$0xff]  }
 0x297   : > { %3631 = vmatprep.subr.bf16.mxu0 %v22978_v19  ;;  %v23054_v19 = vld [vmem:[%s33088_s4 + $0x980] ss:$16 sps:$4 sm:$0xff]  }
 0x298   : > { %3607 = vmatpush2.bf16.msra.mxu1 %v22973_v18  ;;  %v23059_v18 = vld [vmem:[%s33088_s4 + $0x744] ss:$16 sps:$4 sm:$0xff]  }
 0x299   : > { %3662 = vmatprep.subr.bf16.mxu1 %v22981_v61  ;;  %v23057_v61 = vld [vmem:[%s33088_s4 + $0x740] ss:$16 sps:$4 sm:$0xff]  }
 0x29a   : > { %3632 = vmatpush1.bf16.msra.mxu0 %v22976_v58  ;;  %v23062_v58 = vld [vmem:[%s33088_s4 + $0x964] ss:$16 sps:$4 sm:$0xff]  }
 0x29b   : > { %3609 = vmatmul.mubr.bf16.vlgmr.msra.gmra.mxu1 %v26482_v23  ;;  %3633 = vmatprep.subr.bf16.mxu0 %v22984_v42  ;;  %v23060_v42 = vld [vmem:[%s33088_s4 + $0x960] ss:$16 sps:$4 sm:$0xff]  }
 0x29c   : > { %3663 = vmatpush1.bf16.msra.mxu1 %v22979_v13  ;;  %3694 = vmatprep.mubr.bf16.mxu1 %v33155_v7  ;;  %v23065_v13 = vld [vmem:[%s33088_s4 + $0x724] ss:$16 sps:$4 sm:$0xff]  }
 0x29d   : > { %3664 = vmatprep.subr.bf16.mxu1 %v22987_v12  ;;  %v23063_v12 = vld [vmem:[%s33088_s4 + $0x720] ss:$16 sps:$4 sm:$0xff]  }
 0x29e   : > { %3634 = vmatpush1.bf16.msra.mxu0 %v22982_v44  ;;  %v23068_v44 = vld [vmem:[%s33088_s4 + $0x944] ss:$16 sps:$4 sm:$0xff]  }
 0x29f   : > { %3635 = vmatprep.subr.bf16.mxu0 %v22990_v14  ;;  %v23066_v14 = vld [vmem:[%s33088_s4 + $0x940] ss:$16 sps:$4 sm:$0xff]  }
 0x2a0   : > { %3665 = vmatpush1.bf16.msra.mxu1 %v22985_v31  ;;  %v23071_v31 = vld [vmem:[%s33088_s4 + $0x704] ss:$16 sps:$4 sm:$0xff]  }
 0x2a1   : > { %3666 = vmatprep.subr.bf16.mxu1 %v22993_v16  ;;  %v23069_v16 = vld [vmem:[%s33088_s4 + $0x700] ss:$16 sps:$4 sm:$0xff]  }
 0x2a2   : > { %3636 = vmatpush2.bf16.msra.mxu0 %v22988_v4  ;;  %v23074_v4 = vld [vmem:[%s33088_s4 + $0x924] ss:$16 sps:$4 sm:$0xff]  }
 0x2a3   : > { %3637 = vmatprep.subr.bf16.mxu0 %v22996_v40  ;;  %v23072_v40 = vld [vmem:[%s33088_s4 + $0x920] ss:$16 sps:$4 sm:$0xff]  }
 0x2a4   : > { %3667 = vmatpush1.bf16.msra.mxu1 %v22991_v2  ;;  %v23077_v2 = vld [vmem:[%s33088_s4 + $0x8e4] ss:$16 sps:$4 sm:$0xff]  }
 0x2a5   : > { %3668 = vmatprep.subr.bf16.mxu1 %v22999_v20  ;;  %v23075_v20 = vld [vmem:[%s33088_s4 + $0x8e0] ss:$16 sps:$4 sm:$0xff]  }
 0x2a6   : > { %3638 = vmatpush2.bf16.msra.mxu0 %v22994_v51  ;;  %v23080_v51 = vld [vmem:[%s33088_s4 + $0x904] ss:$16 sps:$4 sm:$0xff]  }
 0x2a7   : > { %3639 = vmatprep.subr.bf16.mxu0 %v23002_v35  ;;  %v23078_v35 = vld [vmem:[%s33088_s4 + $0x900] ss:$16 sps:$4 sm:$0xff]  }
 0x2a8   : > { %3669 = vmatpush1.bf16.msra.mxu1 %v22997_v37  ;;  %v23083_v37 = vld [vmem:[%s33088_s4 + $0x8c4] ss:$16 sps:$4 sm:$0xff]  }
 0x2a9   : > { %3670 = vmatprep.subr.bf16.mxu1 %v23005_v49  ;;  %v23081_v49 = vld [vmem:[%s33088_s4 + $0x8c0] ss:$16 sps:$4 sm:$0xff]  }
 0x2aa   : > { %3640 = vmatpush2.bf16.msra.mxu0 %v23000_v48  ;;  %v23086_v48 = vld [vmem:[%s33088_s4 + $0xae4] ss:$16 sps:$4 sm:$0xff]  }
 0x2ab   : > { %3641 = vmatprep.subr.bf16.mxu0 %v23008_v50  ;;  %v23084_v50 = vld [vmem:[%s33088_s4 + $0xae0] ss:$16 sps:$4 sm:$0xff]  }
 0x2ac   : > { %3671 = vmatpush1.bf16.msra.mxu1 %v23003_v39  ;;  %v23089_v39 = vld [vmem:[%s33088_s4 + $0x8a4] ss:$16 sps:$4 sm:$0xff]  }
 0x2ad   : > { %3672 = vmatprep.subr.bf16.mxu1 %v23011_v25  ;;  %v23087_v25 = vld [vmem:[%s33088_s4 + $0x8a0] ss:$16 sps:$4 sm:$0xff]  }
 0x2ae   : > { %3642 = vmatpush2.bf16.msra.mxu0 %v23006_v24  ;;  %v23092_v24 = vld [vmem:[%s33088_s4 + $0xac4] ss:$16 sps:$4 sm:$0xff]  }
 0x2af   : > { %3643 = vmatprep.subr.bf16.mxu0 %v23014_v27  ;;  %v23090_v27 = vld [vmem:[%s33088_s4 + $0xac0] ss:$16 sps:$4 sm:$0xff]  }
 0x2b0   : > { %3673 = vmatpush1.bf16.msra.mxu1 %v23009_v53  ;;  %v23095_v53 = vld [vmem:[%s33088_s4 + $0x884] ss:$16 sps:$4 sm:$0xff]  }
 0x2b1   : > { %3674 = vmatprep.subr.bf16.mxu1 %v23017_v54  ;;  %v23093_v54 = vld [vmem:[%s33088_s4 + $0x880] ss:$16 sps:$4 sm:$0xff]  }
 0x2b2   : > { %3644 = vmatpush2.bf16.msra.mxu0 %v23012_v8  ;;  %v23098_v8 = vld [vmem:[%s33088_s4 + $0xaa4] ss:$16 sps:$4 sm:$0xff]  }
 0x2b3   : > { %3645 = vmatprep.subr.bf16.mxu0 %v23020_v26  ;;  %v23096_v26 = vld [vmem:[%s33088_s4 + $0xaa0] ss:$16 sps:$4 sm:$0xff]  }
 0x2b4   : > { %3675 = vmatpush1.bf16.msra.mxu1 %v23015_v43  ;;  %v23101_v43 = vld [vmem:[%s33088_s4 + $0x864] ss:$16 sps:$4 sm:$0xff]  }
 0x2b5   : > { %3676 = vmatprep.subr.bf16.mxu1 %v23023_v46  ;;  %v23099_v46 = vld [vmem:[%s33088_s4 + $0x860] ss:$16 sps:$4 sm:$0xff]  }
 0x2b6   : > { %3646 = vmatpush2.bf16.msra.mxu0 %v23018_v57  ;;  %v23104_v57 = vld [vmem:[%s33088_s4 + $0xa84] ss:$16 sps:$4 sm:$0xff]  }
 0x2b7   : > { %3647 = vmatprep.subr.bf16.mxu0 %v23026_v15  ;;  %v23102_v15 = vld [vmem:[%s33088_s4 + $0xa80] ss:$16 sps:$4 sm:$0xff]  }
 0x2b8   : > { %3677 = vmatpush1.bf16.msra.mxu1 %v23021_v28  ;;  %v23107_v28 = vld [vmem:[%s33088_s4 + $0x844] ss:$16 sps:$4 sm:$0xff]  }
 0x2b9   : > { %5050 = vmatprep.subr.bf16.mxu1 %v23029_v59  ;;  %v23105_v59 = vld [vmem:[%s33088_s4 + $0x840] ss:$16 sps:$4 sm:$0xff]  }
 0x2ba   : > { %3648 = vmatpush2.bf16.msra.mxu0 %v23024_v45  ;;  %v23110_v45 = vld [vmem:[%s33088_s4 + $0xa64] ss:$16 sps:$4 sm:$0xff]  }
 0x2bb   : > { %3695 = vmatmul.mubr.bf16.vlgmr.msra.gmra.mxu1 %v26592_v9  ;;  %3649 = vmatprep.subr.bf16.mxu0 %v23032_v60  ;;  %v23108_v60 = vld [vmem:[%s33088_s4 + $0xa60] ss:$16 sps:$4 sm:$0xff]  }
 0x2bc   : > { %5051 = vmatpush1.bf16.msra.mxu1 %v23027_v62  ;;  %5082 = vmatprep.mubr.bf16.mxu1 %v26452_v22  ;;  %v23113_v62 = vld [vmem:[%s33088_s4 + $0x824] ss:$16 sps:$4 sm:$0xff]  }
 0x2bd   : > { %5052 = vmatprep.subr.bf16.mxu1 %v23035_v0  ;;  %v23111_v0 = vld [vmem:[%s33088_s4 + $0x820] ss:$16 sps:$4 sm:$0xff]  }
 0x2be   : > { %3650 = vmatpush2.bf16.msra.mxu0 %v23030_v63  ;;  %v23116_v63 = vld [vmem:[%s33088_s4 + $0xa44] ss:$16 sps:$4 sm:$0xff]  }
 0x2bf   : > { %5093 = vmatprep.subr.bf16.mxu0 %v23038_v1  ;;  %v23114_v1 = vld [vmem:[%s33088_s4 + $0xa40] ss:$16 sps:$4 sm:$0xff]  }
 0x2c0   : > { %5053 = vmatpush1.bf16.msra.mxu1 %v23033_v29  ;;  %v23119_v29 = vld [vmem:[%s33088_s4 + $0x804] ss:$16 sps:$4 sm:$0xff]  }
 0x2c1   : > { %3652 = vmatmul.mubr.bf16.vlgmr.msra.gmra.mxu0 %v26475_v55  ;;  %5054 = vmatprep.subr.bf16.mxu1 %v23041_v32  ;;  %v23117_v32 = vld [vmem:[%s33088_s4 + $0x800] ss:$16 sps:$4 sm:$0xff]  }
 0x2c2   : > { %5094 = vmatpush1.bf16.msra.mxu0 %v23036_v5  ;;  %5125 = vmatprep.mubr.bf16.mxu0 %v26477_v10  ;;  %v23122_v5 = vld [vmem:[%s33088_s4 + $0xa24] ss:$16 sps:$4 sm:$0xff]  }
 0x2c3   : > { %5095 = vmatprep.subr.bf16.mxu0 %v23044_v11  ;;  %v23120_v11 = vld [vmem:[%s33088_s4 + $0xa20] ss:$16 sps:$4 sm:$0xff]  }
 0x2c4   : > { %5055 = vmatpush1.bf16.msra.mxu1 %v23039_v34  ;;  %v23125_v34 = vld [vmem:[%s33088_s4 + $0xbe4] ss:$16 sps:$4 sm:$0xff]  }
 0x2c5   : > { %5056 = vmatprep.subr.bf16.mxu1 %v23047_v21  ;;  %v23123_v21 = vld [vmem:[%s33088_s4 + $0xbe0] ss:$16 sps:$4 sm:$0xff]  }
 0x2c6   : > { %5096 = vmatpush1.bf16.msra.mxu0 %v23042_v33  ;;  %v23128_v33 = vld [vmem:[%s33088_s4 + $0xa04] ss:$16 sps:$4 sm:$0xff]  }
 0x2c7   : > { %5097 = vmatprep.subr.bf16.mxu0 %v23050_v41  ;;  %v23126_v41 = vld [vmem:[%s33088_s4 + $0xa00] ss:$16 sps:$4 sm:$0xff]  }
 0x2c8   : > { %5057 = vmatpush1.bf16.msra.mxu1 %v23045_v6  ;;  %v23131_v6 = vld [vmem:[%s33088_s4 + $0xbc4] ss:$16 sps:$4 sm:$0xff]  }
 0x2c9   : > { %5058 = vmatprep.subr.bf16.mxu1 %v23053_v47  ;;  %v23129_v47 = vld [vmem:[%s33088_s4 + $0xbc0] ss:$16 sps:$4 sm:$0xff]  }
 0x2ca   : > { %5098 = vmatpush1.bf16.msra.mxu0 %v23048_v36  ;;  %v23134_v36 = vld [vmem:[%s33088_s4 + $0xde4] ss:$16 sps:$4 sm:$0xff]  }
 0x2cb   : > { %5099 = vmatprep.subr.bf16.mxu0 %v23056_v38  ;;  %v23132_v38 = vld [vmem:[%s33088_s4 + $0xde0] ss:$16 sps:$4 sm:$0xff]  }
 0x2cc   : > { %5059 = vmatpush1.bf16.msra.mxu1 %v23051_v17  ;;  %v23137_v17 = vld [vmem:[%s33088_s4 + $0xba4] ss:$16 sps:$4 sm:$0xff]  }
 0x2cd   : > { %5060 = vmatprep.subr.bf16.mxu1 %v23059_v18  ;;  %v23135_v18 = vld [vmem:[%s33088_s4 + $0xba0] ss:$16 sps:$4 sm:$0xff]  }
 0x2ce   : > { %5100 = vmatpush1.bf16.msra.mxu0 %v23054_v19  ;;  %v23140_v19 = vld [vmem:[%s33088_s4 + $0xdc4] ss:$16 sps:$4 sm:$0xff]  }
 0x2cf   : > { %5101 = vmatprep.subr.bf16.mxu0 %v23062_v58  ;;  %v23138_v58 = vld [vmem:[%s33088_s4 + $0xdc0] ss:$16 sps:$4 sm:$0xff]  }
 0x2d0   : > { %5061 = vmatpush1.bf16.msra.mxu1 %v23057_v61  ;;  %v23143_v61 = vld [vmem:[%s33088_s4 + $0xb84] ss:$16 sps:$4 sm:$0xff]  }
 0x2d1   : > { %5062 = vmatprep.subr.bf16.mxu1 %v23065_v13  ;;  %v23141_v13 = vld [vmem:[%s33088_s4 + $0xb80] ss:$16 sps:$4 sm:$0xff]  }
 0x2d2   : > { %5102 = vmatpush1.bf16.msra.mxu0 %v23060_v42  ;;  %v23146_v42 = vld [vmem:[%s33088_s4 + $0xda4] ss:$16 sps:$4 sm:$0xff]  }
 0x2d3   : > { %5103 = vmatprep.subr.bf16.mxu0 %v23068_v44  ;;  %v23144_v44 = vld [vmem:[%s33088_s4 + $0xda0] ss:$16 sps:$4 sm:$0xff]  }
 0x2d4   : > { %5063 = vmatpush1.bf16.msra.mxu1 %v23063_v12  ;;  %v23149_v12 = vld [vmem:[%s33088_s4 + $0xb64] ss:$16 sps:$4 sm:$0xff]  }
 0x2d5   : > { %5064 = vmatprep.subr.bf16.mxu1 %v23071_v31  ;;  %v23147_v31 = vld [vmem:[%s33088_s4 + $0xb60] ss:$16 sps:$4 sm:$0xff]  }
 0x2d6   : > { %5104 = vmatpush1.bf16.msra.mxu0 %v23066_v14  ;;  %v23152_v14 = vld [vmem:[%s33088_s4 + $0xd84] ss:$16 sps:$4 sm:$0xff]  }
 0x2d7   : > { %5105 = vmatprep.subr.bf16.mxu0 %v23074_v4  ;;  %v23150_v4 = vld [vmem:[%s33088_s4 + $0xd80] ss:$16 sps:$4 sm:$0xff]  }
 0x2d8   : > { %5065 = vmatpush1.bf16.msra.mxu1 %v23069_v16  ;;  %v23155_v16 = vld [vmem:[%s33088_s4 + $0xb44] ss:$16 sps:$4 sm:$0xff]  }
 0x2d9   : > { %5066 = vmatprep.subr.bf16.mxu1 %v23077_v2  ;;  %v23153_v2 = vld [vmem:[%s33088_s4 + $0xb40] ss:$16 sps:$4 sm:$0xff]  }
 0x2da   : > { %5106 = vmatpush1.bf16.msra.mxu0 %v23072_v40  ;;  %v23158_v40 = vld [vmem:[%s33088_s4 + $0xd64] ss:$16 sps:$4 sm:$0xff]  }
 0x2db   : > { %5107 = vmatprep.subr.bf16.mxu0 %v23080_v51  ;;  %v23156_v51 = vld [vmem:[%s33088_s4 + $0xd60] ss:$16 sps:$4 sm:$0xff]  }
 0x2dc   : > { %5067 = vmatpush2.bf16.msra.mxu1 %v23075_v20  ;;  %v23161_v20 = vld [vmem:[%s33088_s4 + $0xb24] ss:$16 sps:$4 sm:$0xff]  }
 0x2dd   : > { %5068 = vmatprep.subr.bf16.mxu1 %v23083_v37  ;;  %v23159_v37 = vld [vmem:[%s33088_s4 + $0xb20] ss:$16 sps:$4 sm:$0xff]  }
 0x2de   : > { %5108 = vmatpush1.bf16.msra.mxu0 %v23078_v35  ;;  %v23164_v35 = vld [vmem:[%s33088_s4 + $0xd44] ss:$16 sps:$4 sm:$0xff]  }
 0x2df   : > { %5109 = vmatprep.subr.bf16.mxu0 %v23086_v48  ;;  %v23162_v48 = vld [vmem:[%s33088_s4 + $0xd40] ss:$16 sps:$4 sm:$0xff]  }
 0x2e0   : > { %5069 = vmatpush2.bf16.msra.mxu1 %v23081_v49  ;;  %v23167_v49 = vld [vmem:[%s33088_s4 + $0xb04] ss:$16 sps:$4 sm:$0xff]  }
 0x2e1   : > { %5070 = vmatprep.subr.bf16.mxu1 %v23089_v39  ;;  %v23165_v39 = vld [vmem:[%s33088_s4 + $0xb00] ss:$16 sps:$4 sm:$0xff]  }
 0x2e2   : > { %5110 = vmatpush2.bf16.msra.mxu0 %v23084_v50  ;;  %v23170_v50 = vld [vmem:[%s33088_s4 + $0xd24] ss:$16 sps:$4 sm:$0xff]  }
 0x2e3   : > { %5111 = vmatprep.subr.bf16.mxu0 %v23092_v24  ;;  %v23168_v24 = vld [vmem:[%s33088_s4 + $0xd20] ss:$16 sps:$4 sm:$0xff]  }
 0x2e4   : > { %5071 = vmatpush2.bf16.msra.mxu1 %v23087_v25  ;;  %v23173_v25 = vld [vmem:[%s33088_s4 + $0xce4] ss:$16 sps:$4 sm:$0xff]  }
 0x2e5   : > { %5072 = vmatprep.subr.bf16.mxu1 %v23095_v53  ;;  %v23176_v53 = vld [vmem:[%s33088_s4 + $0xd04] ss:$16 sps:$4 sm:$0xff]  }
 0x2e6   : > { %5112 = vmatpush2.bf16.msra.mxu0 %v23090_v27  ;;  %v23171_v27 = vld [vmem:[%s33088_s4 + $0xce0] ss:$16 sps:$4 sm:$0xff]  }
 0x2e7   : > { %5113 = vmatprep.subr.bf16.mxu0 %v23098_v8  ;;  %v23174_v8 = vld [vmem:[%s33088_s4 + $0xd00] ss:$16 sps:$4 sm:$0xff]  }
 0x2e8   : > { %5073 = vmatpush2.bf16.msra.mxu1 %v23093_v54  ;;  %v23179_v54 = vld [vmem:[%s33088_s4 + $0xcc4] ss:$16 sps:$4 sm:$0xff]  }
 0x2e9   : > { %5074 = vmatprep.subr.bf16.mxu1 %v23101_v43  ;;  %v23182_v43 = vld [vmem:[%s33088_s4 + $0x7ec] ss:$16 sps:$4 sm:$0xff]  }
 0x2ea   : > { %5114 = vmatpush2.bf16.msra.mxu0 %v23096_v26  ;;  %v23177_v26 = vld [vmem:[%s33088_s4 + $0xcc0] ss:$16 sps:$4 sm:$0xff]  }
 0x2eb   : > { %5115 = vmatprep.subr.bf16.mxu0 %v23104_v57  ;;  %v23185_v57 = vld [vmem:[%s33088_s4 + $0xca4] ss:$16 sps:$4 sm:$0xff]  }
 0x2ec   : > { %5075 = vmatpush2.bf16.msra.mxu1 %v23099_v46  ;;  %v23180_v46 = vld [vmem:[%s33088_s4 + $0x7e8] ss:$16 sps:$4 sm:$0xff]  }
 0x2ed   : > { %5076 = vmatprep.subr.bf16.mxu1 %v23107_v28  ;;  %v23183_v28 = vld [vmem:[%s33088_s4 + $0xca0] ss:$16 sps:$4 sm:$0xff]  }
 0x2ee   : > { %5116 = vmatpush2.bf16.msra.mxu0 %v23102_v15  ;;  %v23188_v15 = vld [vmem:[%s33088_s4 + $0x7cc] ss:$16 sps:$4 sm:$0xff]  }
 0x2ef   : > { %5117 = vmatprep.subr.bf16.mxu0 %v23110_v45  ;;  %v23191_v45 = vld [vmem:[%s33088_s4 + $0xc84] ss:$16 sps:$4 sm:$0xff]  }
 0x2f0   : > { %5077 = vmatpush2.bf16.msra.mxu1 %v23105_v59  ;;  %v23186_v59 = vld [vmem:[%s33088_s4 + $0x7c8] ss:$16 sps:$4 sm:$0xff]  }
 0x2f1   : > { %5078 = vmatprep.subr.bf16.mxu1 %v23113_v62  ;;  %v23189_v62 = vld [vmem:[%s33088_s4 + $0xc80] ss:$16 sps:$4 sm:$0xff]  }
 0x2f2   : > { %5118 = vmatpush2.bf16.msra.mxu0 %v23108_v60  ;;  %v23194_v60 = vld [vmem:[%s33088_s4 + $0x7ac] ss:$16 sps:$4 sm:$0xff]  }
 0x2f3   : > { %5119 = vmatprep.subr.bf16.mxu0 %v23116_v63  ;;  %v23197_v63 = vld [vmem:[%s33088_s4 + $0xc64] ss:$16 sps:$4 sm:$0xff]  }
 0x2f4   : > { %5079 = vmatpush2.bf16.msra.mxu1 %v23111_v0  ;;  %v23192_v0 = vld [vmem:[%s33088_s4 + $0x7a8] ss:$16 sps:$4 sm:$0xff]  }
 0x2f5   : > { %5080 = vmatprep.subr.bf16.mxu1 %v23119_v29  ;;  %v23203_v29 = vld [vmem:[%s33088_s4 + $0xc44] ss:$16 sps:$4 sm:$0xff]  }
 0x2f6   : > { %5120 = vmatpush2.bf16.msra.mxu0 %v23114_v1  ;;  %v23200_v1 = vld [vmem:[%s33088_s4 + $0x78c] ss:$16 sps:$4 sm:$0xff]  }
 0x2f7   : > { %5121 = vmatprep.subr.bf16.mxu0 %v23122_v5  ;;  %v23198_v5 = vld [vmem:[%s33088_s4 + $0x788] ss:$16 sps:$4 sm:$0xff]  }
 0x2f8   : > { %5081 = vmatpush2.bf16.msra.mxu1 %v23117_v32  ;;  %v23206_v32 = vld [vmem:[%s33088_s4 + $0x76c] ss:$16 sps:$4 sm:$0xff]  }
 0x2f9   : > { %5136 = vmatprep.subr.bf16.mxu1 %v23125_v34  ;;  %v23209_v34 = vld [vmem:[%s33088_s4 + $0xc24] ss:$16 sps:$4 sm:$0xff]  }
 0x2fa   : > { %5122 = vmatpush2.bf16.msra.mxu0 %v23120_v11  ;;  %v23201_v11 = vld [vmem:[%s33088_s4 + $0xc40] ss:$16 sps:$4 sm:$0xff]  }
 0x2fb   : > { %5083 = vmatmul.mubr.bf16.vlgmr.msra.gmra.mxu1 %v26457_v52  ;;  %5123 = vmatprep.subr.bf16.mxu0 %v23128_v33  ;;  %v23204_v33 = vld [vmem:[%s33088_s4 + $0x768] ss:$16 sps:$4 sm:$0xff]  }
 0x2fc   : > { %5137 = vmatpush1.bf16.msra.mxu1 %v23123_v21  ;;  %5168 = vmatprep.mubr.bf16.mxu1 %v26484_v30  ;;  %v23212_v21 = vld [vmem:[%s33088_s4 + $0x74c] ss:$16 sps:$4 sm:$0xff]  }
 0x2fd   : > { %5138 = vmatprep.subr.bf16.mxu1 %v23131_v6  ;;  %v23215_v6 = vld [vmem:[%s33088_s4 + $0xc04] ss:$16 sps:$4 sm:$0xff]  }
 0x2fe   : > { %5124 = vmatpush2.bf16.msra.mxu0 %v23126_v41  ;;  %v23207_v41 = vld [vmem:[%s33088_s4 + $0xc20] ss:$16 sps:$4 sm:$0xff]  }
 0x2ff   : > { %5179 = vmatprep.subr.bf16.mxu0 %v23134_v36  ;;  %v23210_v36 = vld [vmem:[%s33088_s4 + $0x748] ss:$16 sps:$4 sm:$0xff]  }
 0x300   : > { %5139 = vmatpush1.bf16.msra.mxu1 %v23129_v47  ;;  %v23218_v47 = vld [vmem:[%s33088_s4 + $0x72c] ss:$16 sps:$4 sm:$0xff]  }
 0x301   : > { %5126 = vmatmul.mubr.bf16.vlgmr.msra.gmra.mxu0 %v26482_v23  ;;  %5140 = vmatprep.subr.bf16.mxu1 %v23137_v17  ;;  %v23221_v17 = vld [vmem:[%s33088_s4 + $0x9ec] ss:$16 sps:$4 sm:$0xff]  }
 0x302   : > { %5180 = vmatpush1.bf16.msra.mxu0 %v23132_v38  ;;  %5211 = vmatprep.mubr.bf16.mxu0 %v33155_v7  ;;  %v23213_v38 = vld [vmem:[%s33088_s4 + $0xc00] ss:$16 sps:$4 sm:$0xff]  }
 0x303   : > { %5181 = vmatprep.subr.bf16.mxu0 %v23140_v19  ;;  %v23216_v19 = vld [vmem:[%s33088_s4 + $0x728] ss:$16 sps:$4 sm:$0xff]  }
 0x304   : > { %5141 = vmatpush1.bf16.msra.mxu1 %v23135_v18  ;;  %v23224_v18 = vld [vmem:[%s33088_s4 + $0x70c] ss:$16 sps:$4 sm:$0xff]  }
 0x305   : > { %5142 = vmatprep.subr.bf16.mxu1 %v23143_v61  ;;  %v23227_v61 = vld [vmem:[%s33088_s4 + $0x9cc] ss:$16 sps:$4 sm:$0xff]  }
 0x306   : > { %5182 = vmatpush1.bf16.msra.mxu0 %v23138_v58  ;;  %v23219_v58 = vld [vmem:[%s33088_s4 + $0x9e8] ss:$16 sps:$4 sm:$0xff]  }
 0x307   : > { %5183 = vmatprep.subr.bf16.mxu0 %v23146_v42  ;;  %v23222_v42 = vld [vmem:[%s33088_s4 + $0x708] ss:$16 sps:$4 sm:$0xff]  }
 0x308   : > { %5143 = vmatpush1.bf16.msra.mxu1 %v23141_v13  ;;  %v23230_v13 = vld [vmem:[%s33088_s4 + $0x8ec] ss:$16 sps:$4 sm:$0xff]  }
 0x309   : > { %5144 = vmatprep.subr.bf16.mxu1 %v23149_v12  ;;  %v27371_v12 = vpop.f32.mrf.mxu0 }
 0x30a   : > { %5184 = vmatpush1.bf16.msra.mxu0 %v23144_v44  ;;  %v23225_v44 = vld [vmem:[%s33088_s4 + $0x9c8] ss:$16 sps:$4 sm:$0xff]  }
 0x30b   : > { %5185 = vmatprep.subr.bf16.mxu0 %v23152_v14  ;;  %v23233_v14 = vld [vmem:[%s33088_s4 + $0x9ac] ss:$16 sps:$4 sm:$0xff]  }
 0x30c   : > { %5145 = vmatpush1.bf16.msra.mxu1 %v23147_v31  ;;  %v23228_v31 = vld [vmem:[%s33088_s4 + $0x8e8] ss:$16 sps:$4 sm:$0xff]  }
 0x30d   : > { %5146 = vmatprep.subr.bf16.mxu1 %v23155_v16  ;;  %v23231_v16 = vld [vmem:[%s33088_s4 + $0x9a8] ss:$16 sps:$4 sm:$0xff]  }
 0x30e   : > { %5186 = vmatpush1.bf16.msra.mxu0 %v23150_v4  ;;  %v23236_v4 = vld [vmem:[%s33088_s4 + $0x8cc] ss:$16 sps:$4 sm:$0xff]  }
 0x30f   : > { %5187 = vmatprep.subr.bf16.mxu0 %v23158_v40  ;;  %v27387_v40 = vpop.f32.mrf.mxu1 }
 0x310   : > { %5147 = vmatpush1.bf16.msra.mxu1 %v23153_v2  ;;  %v27389_v2 = vpop.f32.mrf.mxu0 }
 0x311   : > { %5148 = vmatprep.subr.bf16.mxu1 %v23161_v20  ;;  %v23242_v20 = vld [vmem:[%s33088_s4 + $0x8ac] ss:$16 sps:$4 sm:$0xff]  }
 0x312   : > { %5188 = vmatpush1.bf16.msra.mxu0 %v23156_v51  ;;  %v23234_v51 = vld [vmem:[%s33088_s4 + $0x8c8] ss:$16 sps:$4 sm:$0xff]  }
 0x313   : > { %5189 = vmatprep.subr.bf16.mxu0 %v23164_v35  ;;  %v23237_v35 = vld [vmem:[%s33088_s4 + $0x988] ss:$16 sps:$4 sm:$0xff]  }
 0x314   : > { %5149 = vmatpush1.bf16.msra.mxu1 %v23159_v37  ;;  %v27403_v37 = vpop.f32.mrf.mxu1 }
 0x315   : > { %5150 = vmatprep.subr.bf16.mxu1 %v23167_v49  ;;  %v23245_v49 = vld [vmem:[%s33088_s4 + $0x96c] ss:$16 sps:$4 sm:$0xff]  }
 0x316   : > { %5190 = vmatpush1.bf16.msra.mxu0 %v23162_v48  ;;  %v27405_v48 = vpop.f32.mrf.mxu0 }
 0x317   : > { %5191 = vmatprep.subr.bf16.mxu0 %v23170_v50  ;;  %v23240_v50 = vld [vmem:[%s33088_s4 + $0x8a8] ss:$16 sps:$4 sm:$0xff]  }
 0x318   : > { %5151 = vmatpush1.bf16.msra.mxu1 %v23165_v39  ;;  %v23248_v39 = vld [vmem:[%s33088_s4 + $0x88c] ss:$16 sps:$4 sm:$0xff]  }
 0x319   : > { %5152 = vmatprep.subr.bf16.mxu1 %v23173_v25  ;;  %v27418_v25 = vpop.f32.mrf.mxu0 }
 0x31a   : > { %5192 = vmatpush1.bf16.msra.mxu0 %v23168_v24  ;;  %v27416_v24 = vpop.f32.mrf.mxu1 }
 0x31b   : > { %5193 = vmatprep.subr.bf16.mxu0 %v23176_v53  ;;  %v27423_v53 = vpop.f32.mrf.mxu0 }
 0x31c   : > { %5153 = vmatpush2.bf16.msra.mxu1 %v23171_v27  ;;  %v23243_v27 = vld [vmem:[%s33088_s4 + $0x968] ss:$16 sps:$4 sm:$0xff]  }
 0x31d   : > { %5154 = vmatprep.subr.bf16.mxu1 %v23179_v54  ;;  %v23246_v54 = vld [vmem:[%s33088_s4 + $0x888] ss:$16 sps:$4 sm:$0xff]  }
 0x31e   : > { %5194 = vmatpush1.bf16.msra.mxu0 %v23174_v8  ;;  %v23251_v8 = vld [vmem:[%s33088_s4 + $0x94c] ss:$16 sps:$4 sm:$0xff]  }
 0x31f   : > { %5222 = vmatprep.subr.bf16.mxu0 %v23182_v43  ;;  %v23254_v43 = vld [vmem:[%s33088_s4 + $0x86c] ss:$16 sps:$4 sm:$0xff]  }
 0x320   : > { %5155 = vmatpush2.bf16.msra.mxu1 %v23177_v26  ;;  %v23249_v26 = vld [vmem:[%s33088_s4 + $0x948] ss:$16 sps:$4 sm:$0xff]  }
 0x321   : > { %5212 = vmatmul.mubr.bf16.vlgmr.msra.gmra.mxu0 %v26592_v9  ;;  %5156 = vmatprep.subr.bf16.mxu1 %v23185_v57  ;;  %v27437_v57 = vpop.f32.mrf.mxu1 }
 0x322   : > { %5223 = vmatpush1.bf16.msra.mxu0 %v23180_v46  ;;  %5254 = vmatprep.mubr.bf16.mxu0 %v26452_v22  ;;  %v23195_v22 = vld [vmem:[%s33088_s4 + $0xc60] ss:$16 sps:$4 sm:$0xff]   ;;  %v23257_v46 = vld [vmem:[%s33088_s4 + $0x92c] ss:$16 sps:$4 sm:$0xff]  }
 0x323   : > { %5224 = vmatprep.subr.bf16.mxu0 %v23188_v15  ;;  %v23252_v15 = vld [vmem:[%s33088_s4 + $0x868] ss:$16 sps:$4 sm:$0xff]  }
 0x324   : > { %5157 = vmatpush2.bf16.msra.mxu1 %v23183_v28  ;;  %v27445_v28 = vpop.f32.mrf.mxu0 }
 0x325   : > { %5158 = vmatprep.subr.bf16.mxu1 %v23191_v45  ;;  %v27447_v45 = vpop.f32.mrf.mxu1 }
 0x326   : > { %5225 = vmatpush1.bf16.msra.mxu0 %v23186_v59  ;;  %v23260_v59 = vld [vmem:[%s33088_s4 + $0x84c] ss:$16 sps:$4 sm:$0xff]  }
 0x327   : > { %5226 = vmatprep.subr.bf16.mxu0 %v23194_v60  ;;  %v23255_v60 = vld [vmem:[%s33088_s4 + $0x928] ss:$16 sps:$4 sm:$0xff]  }
 0x328   : > { %5159 = vmatpush2.bf16.msra.mxu1 %v23189_v62  ;;  %v23263_v62 = vld [vmem:[%s33088_s4 + $0x90c] ss:$16 sps:$4 sm:$0xff]  }
 0x329   : > { %5160 = vmatprep.subr.bf16.mxu1 %v23197_v63  ;;  %v23258_v63 = vld [vmem:[%s33088_s4 + $0x848] ss:$16 sps:$4 sm:$0xff]  }
 0x32a   : > { %5227 = vmatpush1.bf16.msra.mxu0 %v23192_v0  ;;  %v27461_v0 = vpop.f32.mrf.mxu0 }
 0x32b   : > { %5228 = vmatprep.subr.bf16.mxu0 %v23200_v1  ;;  %v27463_v1 = vpop.f32.mrf.mxu1 }
 0x32c   : > { %5161 = vmatpush2.bf16.msra.mxu1 %v23195_v22  ;;  %v23266_v22 = vld [vmem:[%s33088_s4 + $0x82c] ss:$16 sps:$4 sm:$0xff]  }
 0x32d   : > { %5162 = vmatprep.subr.bf16.mxu1 %v23203_v29  ;;  %v23261_v29 = vld [vmem:[%s33088_s4 + $0x908] ss:$16 sps:$4 sm:$0xff]  }
 0x32e   : > { %5229 = vmatpush1.bf16.msra.mxu0 %v23198_v5  ;;  %v23269_v5 = vld [vmem:[%s33088_s4 + $0xaec] ss:$16 sps:$4 sm:$0xff]  }
 0x32f   : > { %5230 = vmatprep.subr.bf16.mxu0 %v23206_v32  ;;  %v23264_v32 = vld [vmem:[%s33088_s4 + $0x828] ss:$16 sps:$4 sm:$0xff]  }
 0x330   : > { %5163 = vmatpush2.bf16.msra.mxu1 %v23201_v11  ;;  %v27477_v11 = vpop.f32.mrf.mxu0 }
 0x331   : > { %5164 = vmatprep.subr.bf16.mxu1 %v23209_v34  ;;  %v27479_v34 = vpop.f32.mrf.mxu1 }
 0x332   : > { %5231 = vmatpush1.bf16.msra.mxu0 %v23204_v33  ;;  %v23272_v33 = vld [vmem:[%s33088_s4 + $0x80c] ss:$16 sps:$4 sm:$0xff]  }
 0x333   : > { %5232 = vmatprep.subr.bf16.mxu0 %v23212_v21  ;;  %v23267_v21 = vld [vmem:[%s33088_s4 + $0xae8] ss:$16 sps:$4 sm:$0xff]  }
 0x334   : > { %5165 = vmatpush2.bf16.msra.mxu1 %v23207_v41 }
 0x335   : > { %5166 = vmatprep.subr.bf16.mxu1 %v23215_v6  ;;  %v23275_v6 = vld [vmem:[%s33088_s4 + $0xacc] ss:$16 sps:$4 sm:$0xff]  }
 0x336   : > { %5233 = vmatpush1.bf16.msra.mxu0 %v23210_v36  ;;  %v23270_v36 = vld [vmem:[%s33088_s4 + $0x808] ss:$16 sps:$4 sm:$0xff]  }
 0x337   : > { %5234 = vmatprep.subr.bf16.mxu0 %v23218_v47  ;;  %v27493_v47 = vpop.f32.mrf.mxu1 }
 0x338   : > { %5167 = vmatpush2.bf16.msra.mxu1 %v23213_v38  ;;  %v23278_v38 = vld [vmem:[%s33088_s4 + $0xbec] ss:$16 sps:$4 sm:$0xff]  }
 0x339   : > { %5265 = vmatprep.subr.bf16.mxu1 %v23221_v17  ;;  %v23273_v17 = vld [vmem:[%s33088_s4 + $0xac8] ss:$16 sps:$4 sm:$0xff]  }
 0x33a   : > { %5235 = vmatpush1.bf16.msra.mxu0 %v23216_v19 }
 0x33b   : > { %5169 = vmatmul.mubr.bf16.vlgmr.msra.gmra.mxu1 %v26475_v55  ;;  %5236 = vmatprep.subr.bf16.mxu0 %v23224_v18 }
 0x33c   : > { %5266 = vmatpush1.bf16.msra.mxu1 %v23219_v58  ;;  %5297 = vmatprep.mubr.bf16.mxu1 %v26477_v10  ;;  %v23239_v10 = vld [vmem:[%s33088_s4 + $0x98c] ss:$16 sps:$4 sm:$0xff]  }
 0x33d   : > { %5267 = vmatprep.subr.bf16.mxu1 %v23227_v61  ;;  %v23281_v58 = vld [vmem:[%s33088_s4 + $0xaac] ss:$16 sps:$4 sm:$0xff]  }
 0x33e   : > { %5237 = vmatpush1.bf16.msra.mxu0 %v23222_v42  ;;  %v23276_v42 = vld [vmem:[%s33088_s4 + $0xbe8] ss:$16 sps:$4 sm:$0xff]  }
 0x33f   : > { %5238 = vmatprep.subr.bf16.mxu0 %v23230_v13 }
 0x340   : > { %5268 = vmatpush1.bf16.msra.mxu1 %v23225_v44  ;;  %v23284_v44 = vld [vmem:[%s33088_s4 + $0xbcc] ss:$16 sps:$4 sm:$0xff]  }
 0x341   : > { %5269 = vmatprep.subr.bf16.mxu1 %v23233_v14  ;;  %v3567_v41 = vpop.f32.mrf.mxu0 }
 0x342   : > { %5239 = vmatpush2.bf16.msra.mxu0 %v23228_v31  ;;  %v23279_v31 = vld [vmem:[%s33088_s4 + $0xaa8] ss:$16 sps:$4 sm:$0xff]  }
 0x343   : > { %5240 = vmatprep.subr.bf16.mxu0 %v23236_v4  ;;  %v3569_v19 = vpop.f32.mrf.mxu0 }
 0x344   : > { %5270 = vmatpush1.bf16.msra.mxu1 %v23231_v16 }
 0x345   : > { %5271 = vmatprep.subr.bf16.mxu1 %v23239_v10  ;;  %v3571_v4 = vpop.f32.mrf.mxu0  ;;  %v23287_v10 = vld [vmem:[%s33088_s4 + $0xa8c] ss:$16 sps:$4 sm:$0xff]  }
 0x346   : > { %5241 = vmatpush2.bf16.msra.mxu0 %v23234_v51 }
 0x347   : > { %5242 = vmatprep.subr.bf16.mxu0 %v23242_v20  ;;  %v23282_v20 = vld [vmem:[%s33088_s4 + $0xbc8] ss:$16 sps:$4 sm:$0xff]  }
 0x348   : > { %5272 = vmatpush1.bf16.msra.mxu1 %v23237_v35  ;;  %v23285_v35 = vld [vmem:[%s33088_s4 + $0xa88] ss:$16 sps:$4 sm:$0xff]  }
 0x349   : > { %5273 = vmatprep.subr.bf16.mxu1 %v23245_v49  ;;  %v23290_v49 = vld [vmem:[%s33088_s4 + $0xbac] ss:$16 sps:$4 sm:$0xff]  }
 0x34a   : > { %5243 = vmatpush2.bf16.msra.mxu0 %v23240_v50  ;;  %v23293_v50 = vld [vmem:[%s33088_s4 + $0xa6c] ss:$16 sps:$4 sm:$0xff]  }
 0x34b   : > { %5244 = vmatprep.subr.bf16.mxu0 %v23248_v39  ;;  %v23291_v39 = vld [vmem:[%s33088_s4 + $0xa68] ss:$16 sps:$4 sm:$0xff]  }
 0x34c   : > { %5274 = vmatpush1.bf16.msra.mxu1 %v23243_v27  ;;  %v23294_v27 = vld [vmem:[%s33088_s4 + $0xb88] ss:$16 sps:$4 sm:$0xff]  }
 0x34d   : > { %5275 = vmatprep.subr.bf16.mxu1 %v23251_v8  ;;  %v23299_v8 = vld [vmem:[%s33088_s4 + $0xa4c] ss:$16 sps:$4 sm:$0xff]  }
 0x34e   : > { %5245 = vmatpush2.bf16.msra.mxu0 %v23246_v54  ;;  %v23297_v54 = vld [vmem:[%s33088_s4 + $0xa48] ss:$16 sps:$4 sm:$0xff]  }
 0x34f   : > { %5246 = vmatprep.subr.bf16.mxu0 %v23254_v43  ;;  %v23305_v43 = vld [vmem:[%s33088_s4 + $0xa2c] ss:$16 sps:$4 sm:$0xff]  }
 0x350   : > { %5276 = vmatpush1.bf16.msra.mxu1 %v23249_v26  ;;  %v23302_v26 = vld [vmem:[%s33088_s4 + $0xb6c] ss:$16 sps:$4 sm:$0xff]  }
 0x351   : > { %5277 = vmatprep.subr.bf16.mxu1 %v23257_v46  ;;  %v23300_v46 = vld [vmem:[%s33088_s4 + $0xb68] ss:$16 sps:$4 sm:$0xff]  }
 0x352   : > { %5247 = vmatpush2.bf16.msra.mxu0 %v23252_v15  ;;  %v23308_v15 = vld [vmem:[%s33088_s4 + $0xb4c] ss:$16 sps:$4 sm:$0xff]  }
 0x353   : > { %5248 = vmatprep.subr.bf16.mxu0 %v23260_v59  ;;  %v23303_v59 = vld [vmem:[%s33088_s4 + $0xa28] ss:$16 sps:$4 sm:$0xff]  }
 0x354   : > { %5278 = vmatpush1.bf16.msra.mxu1 %v23255_v60  ;;  %v23311_v60 = vld [vmem:[%s33088_s4 + $0xa0c] ss:$16 sps:$4 sm:$0xff]  }
 0x355   : > { %5279 = vmatprep.subr.bf16.mxu1 %v23263_v62  ;;  %v23306_v62 = vld [vmem:[%s33088_s4 + $0xb48] ss:$16 sps:$4 sm:$0xff]  }
 0x356   : > { %5249 = vmatpush2.bf16.msra.mxu0 %v23258_v63  ;;  %v23314_v63 = vld [vmem:[%s33088_s4 + $0xb2c] ss:$16 sps:$4 sm:$0xff]  }
 0x357   : > { %5250 = vmatprep.subr.bf16.mxu0 %v23266_v22  ;;  %v23309_v22 = vld [vmem:[%s33088_s4 + $0xa08] ss:$16 sps:$4 sm:$0xff]  }
 0x358   : > { %5280 = vmatpush1.bf16.msra.mxu1 %v23261_v29  ;;  %v23317_v29 = vld [vmem:[%s33088_s4 + $0xdec] ss:$16 sps:$4 sm:$0xff]  }
 0x359   : > { %5281 = vmatprep.subr.bf16.mxu1 %v23269_v5  ;;  %v23312_v5 = vld [vmem:[%s33088_s4 + $0xb28] ss:$16 sps:$4 sm:$0xff]  }
 0x35a   : > { %5251 = vmatpush2.bf16.msra.mxu0 %v23264_v32  ;;  %v23320_v32 = vld [vmem:[%s33088_s4 + $0xb0c] ss:$16 sps:$4 sm:$0xff]  }
 0x35b   : > { %v3610_v18 = vpop.f32.mrf.mxu1  ;;  %5252 = vmatprep.subr.bf16.mxu0 %v23272_v33  ;;  %v23315_v33 = vld [vmem:[%s33088_s4 + $0xde8] ss:$16 sps:$4 sm:$0xff]  }
 0x35c   : > { %v27504_v61 = vadd.f32 %v3610_v18, %v3567_v41  ;;  %5282 = vmatpush2.bf16.msra.mxu1 %v23267_v21  ;;  %v23323_v21 = vld [vmem:[%s33088_s4 + $0xdcc] ss:$16 sps:$4 sm:$0xff]   ;;  %v23318_v41 = vld [vmem:[%s33088_s4 + $0xb08] ss:$16 sps:$4 sm:$0xff]   ;;  %v27618_v18 = vpop.f32.mrf.mxu0 }
 0x35d   : > { %v3612_v13 = vpop.f32.mrf.mxu1  ;;  %5283 = vmatprep.subr.bf16.mxu1 %v23275_v6  ;;  %v23321_v6 = vld [vmem:[%s33088_s4 + $0xdc8] ss:$16 sps:$4 sm:$0xff]  }
 0x35e   : > { %v27512_v14 = vadd.f32 %v3612_v13, %v3569_v19  ;;  %5253 = vmatpush2.bf16.msra.mxu0 %v23270_v36  ;;  %v23326_v36 = vld [vmem:[%s33088_s4 + $0xcec] ss:$16 sps:$4 sm:$0xff]   ;;  %v23330_v13 = vld [vmem:[%s33088_s4 + $0xcc8] ss:$16 sps:$4 sm:$0xff]  }
 0x35f   : > { %v3614_v16 = vpop.f32.mrf.mxu1  ;;  %5308 = vmatprep.subr.bf16.mxu0 %v23278_v38  ;;  %v23324_v38 = vld [vmem:[%s33088_s4 + $0xce8] ss:$16 sps:$4 sm:$0xff]  }
 0x360   : > { %v27520_v51 = vadd.f32 %v3614_v16, %v3571_v4  ;;  %5284 = vmatpush2.bf16.msra.mxu1 %v23273_v17  ;;  %v23329_v17 = vld [vmem:[%s33088_s4 + $0xdac] ss:$16 sps:$4 sm:$0xff]   ;;  %v23333_v16 = vld [vmem:[%s33088_s4 + $0xd88] ss:$16 sps:$4 sm:$0xff]  }
 0x361   : > { %5255 = vmatmul.mubr.bf16.vlgmr.msra.gmra.mxu0 %v26457_v52  ;;  %5285 = vmatprep.subr.bf16.mxu1 %v23281_v58  ;;  %v23288_v52 = vld [vmem:[%s33088_s4 + $0xba8] ss:$16 sps:$4 sm:$0xff]   ;;  %v27613_v19 = vpop.f32.mrf.mxu1 }
 0x362   : > { %5309 = vmatpush1.bf16.msra.mxu0 %v23276_v42  ;;  %5340 = vmatprep.mubr.bf16.mxu0 %v26484_v30  ;;  %v23296_v30 = vld [vmem:[%s33088_s4 + $0xb8c] ss:$16 sps:$4 sm:$0xff]  }
 0x363   : > { %5310 = vmatprep.subr.bf16.mxu0 %v23284_v44  ;;  %v23332_v42 = vld [vmem:[%s33088_s4 + $0xccc] ss:$16 sps:$4 sm:$0xff]  }
 0x364   : > { %5286 = vmatpush2.bf16.msra.mxu1 %v23279_v31  ;;  %v23335_v44 = vld [vmem:[%s33088_s4 + $0xd8c] ss:$16 sps:$4 sm:$0xff]  }
 0x365   : > { %5287 = vmatprep.subr.bf16.mxu1 %v23287_v10 }
 0x366   : > { %5311 = vmatpush1.bf16.msra.mxu0 %v23282_v20 }
 0x367   : > { %5312 = vmatprep.subr.bf16.mxu0 %v23290_v49 }
 0x368   : > { %5288 = vmatpush2.bf16.msra.mxu1 %v23285_v35  ;;  %v23338_v35 = vld [vmem:[%s33088_s4 + $0xcac] ss:$16 sps:$4 sm:$0xff]  }
 0x369   : > { %5289 = vmatprep.subr.bf16.mxu1 %v23293_v50 }
 0x36a   : > { %5313 = vmatpush1.bf16.msra.mxu0 %v23288_v52  ;;  %v23341_v52 = vld [vmem:[%s33088_s4 + $0xd6c] ss:$16 sps:$4 sm:$0xff]  }
 0x36b   : > { %5314 = vmatprep.subr.bf16.mxu0 %v23296_v30 }
 0x36c   : > { %5290 = vmatpush2.bf16.msra.mxu1 %v23291_v39 }
 0x36d   : > { %5291 = vmatprep.subr.bf16.mxu1 %v23299_v8 }
 0x36e   : > { %5315 = vmatpush1.bf16.msra.mxu0 %v23294_v27 }
 0x36f   : > { %5316 = vmatprep.subr.bf16.mxu0 %v23302_v26  ;;  %v23339_v26 = vld [vmem:[%s33088_s4 + $0xd68] ss:$16 sps:$4 sm:$0xff]  }
 0x370   : > { %5292 = vmatpush2.bf16.msra.mxu1 %v23297_v54 }
 0x371   : > { %5293 = vmatprep.subr.bf16.mxu1 %v23305_v43  ;;  %v23342_v43 = vld [vmem:[%s33088_s4 + $0xc88] ss:$16 sps:$4 sm:$0xff]  }
 0x372   : > { %5317 = vmatpush1.bf16.msra.mxu0 %v23300_v46  ;;  %v23350_v46 = vld [vmem:[%s33088_s4 + $0xc6c] ss:$16 sps:$4 sm:$0xff]  }
 0x373   : > { %5318 = vmatprep.subr.bf16.mxu0 %v23308_v15  ;;  %v23345_v15 = vld [vmem:[%s33088_s4 + $0xd48] ss:$16 sps:$4 sm:$0xff]  }
 0x374   : > { %5294 = vmatpush2.bf16.msra.mxu1 %v23303_v59  ;;  %v23353_v59 = vld [vmem:[%s33088_s4 + $0xd2c] ss:$16 sps:$4 sm:$0xff]  }
 0x375   : > { %5295 = vmatprep.subr.bf16.mxu1 %v23311_v60  ;;  %v23348_v60 = vld [vmem:[%s33088_s4 + $0xc68] ss:$16 sps:$4 sm:$0xff]  }
 0x376   : > { %5319 = vmatpush1.bf16.msra.mxu0 %v23306_v62  ;;  %v23356_v62 = vld [vmem:[%s33088_s4 + $0xc4c] ss:$16 sps:$4 sm:$0xff]  }
 0x377   : > { %5320 = vmatprep.subr.bf16.mxu0 %v23314_v63  ;;  %v23351_v63 = vld [vmem:[%s33088_s4 + $0xd28] ss:$16 sps:$4 sm:$0xff]  }
 0x378   : > { %5296 = vmatpush2.bf16.msra.mxu1 %v23309_v22  ;;  %v23359_v22 = vld [vmem:[%s33088_s4 + $0xd0c] ss:$16 sps:$4 sm:$0xff]  }
 0x379   : > { %5351 = vmatprep.subr.bf16.mxu1 %v23317_v29  ;;  %v23354_v29 = vld [vmem:[%s33088_s4 + $0xc48] ss:$16 sps:$4 sm:$0xff]  }
 0x37a   : > { %5321 = vmatpush1.bf16.msra.mxu0 %v23312_v5  ;;  %v23362_v5 = vld [vmem:[%s33088_s4 + $0xc2c] ss:$16 sps:$4 sm:$0xff]  }
 0x37b   : > { %5298 = vmatmul.mubr.bf16.vlgmr.msra.gmra.mxu1 %v26482_v23  ;;  %5322 = vmatprep.subr.bf16.mxu0 %v23320_v32  ;;  %v23327_v23 = vld [vmem:[%s33088_s4 + $0xda8] ss:$16 sps:$4 sm:$0xff]   ;;  %v3696_v58 = vpop.f32.mrf.mxu1 }
 0x37c   : > { %5352 = vmatpush1.bf16.msra.mxu1 %v23315_v33  ;;  %5383 = vmatprep.mubr.bf16.mxu1 %v33155_v7  ;;  %v23357_v32 = vld [vmem:[%s33088_s4 + $0xd08] ss:$16 sps:$4 sm:$0xff]   ;;  %v23368_v33 = vld [vmem:[%s33089_s5 + $0x694] ss:$24 sps:$4 sm:$0xff]  }
 0x37d   : > { %5353 = vmatprep.subr.bf16.mxu1 %v23323_v21  ;;  %v3698_v10 = vpop.f32.mrf.mxu1  ;;  %v23360_v21 = vld [vmem:[%s33088_s4 + $0xc28] ss:$16 sps:$4 sm:$0xff]  }
 0x37e   : > { %5323 = vmatpush1.bf16.msra.mxu0 %v23318_v41  ;;  %v23365_v41 = vld [vmem:[%s33088_s4 + $0xc0c] ss:$16 sps:$4 sm:$0xff]  }
 0x37f   : > { %5324 = vmatprep.subr.bf16.mxu0 %v23326_v36  ;;  %v3700_v8 = vpop.f32.mrf.mxu1  ;;  %v23371_v36 = vld [vmem:[%s33089_s5 + $0x664] ss:$24 sps:$4 sm:$0xff]  }
 0x380   : > { %5354 = vmatpush1.bf16.msra.mxu1 %v23321_v6  ;;  %v23366_v6 = vld [vmem:[%s33089_s5 + $0x690] ss:$24 sps:$4 sm:$0xff]  }
 0x381   : > { %v3653_v31 = vpop.f32.mrf.mxu0  ;;  %5355 = vmatprep.subr.bf16.mxu1 %v23329_v17  ;;  %v23369_v17 = vld [vmem:[%s33089_s5 + $0x660] ss:$24 sps:$4 sm:$0xff]  }
 0x382   : > { %v3654_v4 = vadd.f32 %v3653_v31, %v27504_v61  ;;  %5325 = vmatpush2.bf16.msra.mxu0 %v23324_v38  ;;  %v23336_v61 = vld [vmem:[%s33088_s4 + $0xca8] ss:$16 sps:$4 sm:$0xff]   ;;  %v23383_v31 = vld [vmem:[%s33089_s5 + $0x5a4] ss:$24 sps:$4 sm:$0xff]  }
 0x383   : > { %v3655_v20 = vpop.f32.mrf.mxu0  ;;  %5326 = vmatprep.subr.bf16.mxu0 %v23332_v42  ;;  %v23363_v38 = vld [vmem:[%s33088_s4 + $0xc08] ss:$16 sps:$4 sm:$0xff]   ;;  %v23377_v42 = vld [vmem:[%s33089_s5 + $0x604] ss:$24 sps:$4 sm:$0xff]  }
 0x384   : > { %v27636_v49 = vadd.f32 %v3696_v58, %v3654_v4  ;;  %v3656_v50 = vadd.f32 %v3655_v20, %v27512_v14  ;;  %5356 = vmatpush1.bf16.msra.mxu1 %v23327_v23  ;;  %v23344_v14 = vld [vmem:[%s33088_s4 + $0xc8c] ss:$16 sps:$4 sm:$0xff]   ;;  %v23372_v58 = vld [vmem:[%s33089_s5 + $0x630] ss:$24 sps:$4 sm:$0xff]   ;;  %v23387_v20 = vld [vmem:[%s33089_s5 + $0x540] ss:$24 sps:$4 sm:$0xff]  }
 0x385   : > { %v3657_v30 = vpop.f32.mrf.mxu0  ;;  %5357 = vmatprep.subr.bf16.mxu1 %v23335_v44  ;;  %v23374_v23 = vld [vmem:[%s33089_s5 + $0x634] ss:$24 sps:$4 sm:$0xff]   ;;  %v23378_v44 = vld [vmem:[%s33089_s5 + $0x5d0] ss:$24 sps:$4 sm:$0xff]  }
 0x386   : > { %v27645_v39 = vadd.f32 %v3698_v10, %v3656_v50  ;;  %v3658_v27 = vadd.f32 %v3657_v30, %v27520_v51  ;;  %5327 = vmatpush2.bf16.msra.mxu0 %v23330_v13  ;;  %v23347_v51 = vld [vmem:[%s33088_s4 + $0xd4c] ss:$16 sps:$4 sm:$0xff]   ;;  %v23390_v50 = vld [vmem:[%s33089_s5 + $0x810] ss:$24 sps:$4 sm:$0xff]  }
 0x387   : > { %5328 = vmatprep.subr.bf16.mxu0 %v23338_v35  ;;  %v23380_v13 = vld [vmem:[%s33089_s5 + $0x5d4] ss:$24 sps:$4 sm:$0xff]   ;;  %v23389_v10 = vld [vmem:[%s33089_s5 + $0x544] ss:$24 sps:$4 sm:$0xff]  }
 0x388   : > { %v27651_v54 = vadd.f32 %v3700_v8, %v3658_v27  ;;  %5358 = vmatpush1.bf16.msra.mxu1 %v23333_v16  ;;  %v23386_v4 = vld [vmem:[%s33089_s5 + $0x574] ss:$24 sps:$4 sm:$0xff]   ;;  %v23384_v16 = vld [vmem:[%s33089_s5 + $0x570] ss:$24 sps:$4 sm:$0xff]   ;;  %v23401_v8 = vld [vmem:[%s33089_s5 + $0x784] ss:$24 sps:$4 sm:$0xff]  }
 0x389   : > { %5359 = vmatprep.subr.bf16.mxu1 %v23341_v52  ;;  %v23392_v35 = vld [vmem:[%s33089_s5 + $0x814] ss:$24 sps:$4 sm:$0xff]   ;;  %v23393_v52 = vld [vmem:[%s33089_s5 + $0x7e0] ss:$24 sps:$4 sm:$0xff]   ;;  %v23396_v27 = vld [vmem:[%s33089_s5 + $0x7b0] ss:$24 sps:$4 sm:$0xff]  }
 0x38a   : > { %5329 = vmatpush2.bf16.msra.mxu0 %v23336_v61  ;;  %v23395_v61 = vld [vmem:[%s33089_s5 + $0x7e4] ss:$24 sps:$4 sm:$0xff]   ;;  %v23398_v30 = vld [vmem:[%s33089_s5 + $0x7b4] ss:$24 sps:$4 sm:$0xff]  }
 0x38b   : > { %5330 = vmatprep.subr.bf16.mxu0 %v23344_v14  ;;  %v23414_v14 = vld [vmem:[%s33089_s5 + $0x990] ss:$24 sps:$4 sm:$0xff]  }
 0x38c   : > { %5360 = vmatpush1.bf16.msra.mxu1 %v23339_v26  ;;  %v23416_v26 = vld [vmem:[%s33089_s5 + $0x994] ss:$24 sps:$4 sm:$0xff]  }
 0x38d   : > { %5361 = vmatprep.subr.bf16.mxu1 %v23347_v51  ;;  %v23399_v51 = vld [vmem:[%s33089_s5 + $0x780] ss:$24 sps:$4 sm:$0xff]  }
 0x38e   : > { %5331 = vmatpush2.bf16.msra.mxu0 %v23342_v43  ;;  %v23422_v43 = vld [vmem:[%s33089_s5 + $0x964] ss:$24 sps:$4 sm:$0xff]  }
 0x38f   : > { %5332 = vmatprep.subr.bf16.mxu0 %v23350_v46  ;;  %v23404_v46 = vld [vmem:[%s33089_s5 + $0x754] ss:$24 sps:$4 sm:$0xff]  }
 0x390   : > { %5362 = vmatpush1.bf16.msra.mxu1 %v23345_v15  ;;  %v23420_v15 = vld [vmem:[%s33089_s5 + $0x960] ss:$24 sps:$4 sm:$0xff]  }
 0x391   : > { %5363 = vmatprep.subr.bf16.mxu1 %v23353_v59  ;;  %v23428_v59 = vld [vmem:[%s33089_s5 + $0x934] ss:$24 sps:$4 sm:$0xff]  }
 0x392   : > { %5333 = vmatpush2.bf16.msra.mxu0 %v23348_v60  ;;  %v23402_v60 = vld [vmem:[%s33089_s5 + $0x750] ss:$24 sps:$4 sm:$0xff]  }
 0x393   : > { %5334 = vmatprep.subr.bf16.mxu0 %v23356_v62  ;;  %v23407_v62 = vld [vmem:[%s33089_s5 + $0x724] ss:$24 sps:$4 sm:$0xff]  }
 0x394   : > { %5364 = vmatpush1.bf16.msra.mxu1 %v23351_v63  ;;  %v23426_v63 = vld [vmem:[%s33089_s5 + $0x930] ss:$24 sps:$4 sm:$0xff]  }
 0x395   : > { %5365 = vmatprep.subr.bf16.mxu1 %v23359_v22  ;;  %v23434_v22 = vld [vmem:[%s33089_s5 + $0x904] ss:$24 sps:$4 sm:$0xff]  }
 0x396   : > { %5335 = vmatpush2.bf16.msra.mxu0 %v23354_v29  ;;  %v23405_v29 = vld [vmem:[%s33089_s5 + $0x720] ss:$24 sps:$4 sm:$0xff]  }
 0x397   : > { %5336 = vmatprep.subr.bf16.mxu0 %v23362_v5  ;;  %v23410_v5 = vld [vmem:[%s33089_s5 + $0x6f4] ss:$24 sps:$4 sm:$0xff]  }
 0x398   : > { %5366 = vmatpush1.bf16.msra.mxu1 %v23357_v32  ;;  %v23432_v32 = vld [vmem:[%s33089_s5 + $0x900] ss:$24 sps:$4 sm:$0xff]  }
 0x399   : > { %6618 = vmatprep.subr.bf16.mxu1 %v23368_v33  ;;  %v23440_v33 = vld [vmem:[%s33089_s5 + $0x8d4] ss:$24 sps:$4 sm:$0xff]  }
 0x39a   : > { %5337 = vmatpush2.bf16.msra.mxu0 %v23360_v21  ;;  %v23408_v21 = vld [vmem:[%s33089_s5 + $0x6f0] ss:$24 sps:$4 sm:$0xff]  }
 0x39b   : > { %5384 = vmatmul.mubr.bf16.vlgmr.msra.gmra.mxu1 %v26592_v9  ;;  %5338 = vmatprep.subr.bf16.mxu0 %v23365_v41  ;;  %v23375_v9 = vld [vmem:[%s33089_s5 + $0x600] ss:$24 sps:$4 sm:$0xff]   ;;  %v23413_v41 = vld [vmem:[%s33089_s5 + $0x6c4] ss:$24 sps:$4 sm:$0xff]  }
 0x39c   : > { %6619 = vmatpush1.bf16.msra.mxu1 %v23366_v6  ;;  %v23438_v6 = vld [vmem:[%s33089_s5 + $0x8d0] ss:$24 sps:$4 sm:$0xff]  }
 0x39d   : > { %6620 = vmatprep.subr.bf16.mxu1 %v23371_v36  ;;  %v23411_v36 = vld [vmem:[%s33089_s5 + $0x6c0] ss:$24 sps:$4 sm:$0xff]  }
 0x39e   : > { %5339 = vmatpush2.bf16.msra.mxu0 %v23363_v38  ;;  %v23419_v38 = vld [vmem:[%s33089_s5 + $0x99c] ss:$24 sps:$4 sm:$0xff]  }
 0x39f   : > { %6661 = vmatprep.subr.bf16.mxu0 %v23416_v26 }
 0x3a0   : > { %6621 = vmatpush1.bf16.msra.mxu1 %v23369_v17  ;;  %v23446_v17 = vld [vmem:[%s33089_s5 + $0x8a4] ss:$24 sps:$4 sm:$0xff]  }
 0x3a1   : > { %5341 = vmatmul.mubr.bf16.vlgmr.msra.gmra.mxu0 %v26475_v55  ;;  %6622 = vmatprep.subr.bf16.mxu1 %v23374_v23  ;;  %v23381_v55 = vld [vmem:[%s33089_s5 + $0x5a0] ss:$24 sps:$4 sm:$0xff]  }
 0x3a2   : > { %6662 = vmatpush1.bf16.msra.mxu0 %v23414_v14  ;;  %v23444_v23 = vld [vmem:[%s33089_s5 + $0x8a0] ss:$24 sps:$4 sm:$0xff]  }
 0x3a3   : > { %6663 = vmatprep.subr.bf16.mxu0 %v23422_v43 }
 0x3a4   : > { %6623 = vmatpush1.bf16.msra.mxu1 %v23372_v58  ;;  %v23452_v58 = vld [vmem:[%s33089_s5 + $0x874] ss:$24 sps:$4 sm:$0xff]  }
 0x3a5   : > { %6624 = vmatprep.subr.bf16.mxu1 %v23377_v42  ;;  %v23450_v42 = vld [vmem:[%s33089_s5 + $0x870] ss:$24 sps:$4 sm:$0xff]  }
 0x3a6   : > { %6664 = vmatpush1.bf16.msra.mxu0 %v23420_v15 }
 0x3a7   : > { %6665 = vmatprep.subr.bf16.mxu0 %v23428_v59 }
 0x3a8   : > { %6625 = vmatpush1.bf16.msra.mxu1 %v23375_v9  ;;  %v23458_v9 = vld [vmem:[%s33089_s5 + $0x844] ss:$24 sps:$4 sm:$0xff]  }
 0x3a9   : > { %6626 = vmatprep.subr.bf16.mxu1 %v23380_v13  ;;  %v23456_v13 = vld [vmem:[%s33089_s5 + $0x840] ss:$24 sps:$4 sm:$0xff]  }
 0x3aa   : > { %6666 = vmatpush1.bf16.msra.mxu0 %v23426_v63 }
 0x3ab   : > { %6667 = vmatprep.subr.bf16.mxu0 %v23434_v22  ;;  %v3443_v22 = vadd.f32 %v27405_v48, %v27416_v24 }
 0x3ac   : > { %6627 = vmatpush1.bf16.msra.mxu1 %v23378_v44  ;;  %v23464_v44 = vld [vmem:[%s33089_s5 + $0xa54] ss:$24 sps:$4 sm:$0xff]  }
 0x3ad   : > { %6628 = vmatprep.subr.bf16.mxu1 %v23383_v31  ;;  %v23462_v31 = vld [vmem:[%s33089_s5 + $0xa50] ss:$24 sps:$4 sm:$0xff]  }
 0x3ae   : > { %6668 = vmatpush1.bf16.msra.mxu0 %v23432_v32  ;;  %v3441_v32 = vadd.f32 %v27389_v2, %v27403_v37 }
 0x3af   : > { %6669 = vmatprep.subr.bf16.mxu0 %v23440_v33 }
 0x3b0   : > { %6629 = vmatpush1.bf16.msra.mxu1 %v23381_v55  ;;  %v27856_v55 = vpop.f32.mrf.mxu0 }
 0x3b1   : > { %6630 = vmatprep.subr.bf16.mxu1 %v23386_v4 }
 0x3b2   : > { %6670 = vmatpush1.bf16.msra.mxu0 %v23438_v6  ;;  %v3486_v6 = vadd.f32 %v27479_v34, %v3443_v22  ;;  %v23461_v22 = vld [vmem:[%s33089_s5 + $0x84c] ss:$24 sps:$4 sm:$0xff]  }
 0x3b3   : > { %6671 = vmatprep.subr.bf16.mxu0 %v23446_v17 }
 0x3b4   : > { %6631 = vmatpush1.bf16.msra.mxu1 %v23384_v16  ;;  %v23470_v16 = vld [vmem:[%s33089_s5 + $0xa24] ss:$24 sps:$4 sm:$0xff]  }
 0x3b5   : > { %6632 = vmatprep.subr.bf16.mxu1 %v23389_v10  ;;  %v23468_v10 = vld [vmem:[%s33089_s5 + $0xa20] ss:$24 sps:$4 sm:$0xff]  }
 0x3b6   : > { %6672 = vmatpush1.bf16.msra.mxu0 %v23444_v23 }
 0x3b7   : > { %6673 = vmatprep.subr.bf16.mxu0 %v23452_v58 }
 0x3b8   : > { %6633 = vmatpush1.bf16.msra.mxu1 %v23387_v20  ;;  %v27864_v20 = vpop.f32.mrf.mxu1 }
 0x3b9   : > { %6634 = vmatprep.subr.bf16.mxu1 %v23392_v35 }
 0x3ba   : > { %6674 = vmatpush1.bf16.msra.mxu0 %v23450_v42 }
 0x3bb   : > { %6675 = vmatprep.subr.bf16.mxu0 %v23458_v9  ;;  %v5084_v35 = vpop.f32.mrf.mxu1 }
 0x3bc   : > { %6635 = vmatpush2.bf16.msra.mxu1 %v23390_v50 }
 0x3bd   : > { %6636 = vmatprep.subr.bf16.mxu1 %v23395_v61  ;;  %v23476_v61 = vld [vmem:[%s33089_s5 + $0x9f4] ss:$24 sps:$4 sm:$0xff]  }
 0x3be   : > { %6676 = vmatpush1.bf16.msra.mxu0 %v23456_v13 }
 0x3bf   : > { %6685 = vmatprep.subr.bf16.mxu0 %v23464_v44 }
 0x3c0   : > { %6637 = vmatpush2.bf16.msra.mxu1 %v23393_v52  ;;  %v23474_v52 = vld [vmem:[%s33089_s5 + $0x9f0] ss:$24 sps:$4 sm:$0xff]  }
 0x3c1   : > { %6638 = vmatprep.subr.bf16.mxu1 %v23398_v30  ;;  %v5127_v4 = vpop.f32.mrf.mxu0  ;;  %v23482_v30 = vld [vmem:[%s33089_s5 + $0x9c4] ss:$24 sps:$4 sm:$0xff]  }
 0x3c2   : > { %6686 = vmatpush2.bf16.msra.mxu0 %v23462_v31  ;;  %v5128_v59 = vadd.f32 %v5127_v4, %v5084_v35 }
 0x3c3   : > { %6687 = vmatprep.subr.bf16.mxu0 %v23470_v16  ;;  %v5129_v50 = vpop.f32.mrf.mxu0 }
 0x3c4   : > { %6639 = vmatpush2.bf16.msra.mxu1 %v23396_v27  ;;  %v23480_v27 = vld [vmem:[%s33089_s5 + $0x9c0] ss:$24 sps:$4 sm:$0xff]  }
 0x3c5   : > { %6640 = vmatprep.subr.bf16.mxu1 %v23401_v8  ;;  %v5086_v8 = vpop.f32.mrf.mxu1  ;;  %v5131_v14 = vpop.f32.mrf.mxu0 }
 0x3c6   : > { %6688 = vmatpush2.bf16.msra.mxu0 %v23468_v10 }
 0x3c7   : > { %6689 = vmatprep.subr.bf16.mxu0 %v23476_v61  ;;  %v5088_v26 = vpop.f32.mrf.mxu1  ;;  %v5133_v43 = vpop.f32.mrf.mxu0 }
 0x3c8   : > { %6641 = vmatpush2.bf16.msra.mxu1 %v23399_v51  ;;  %v23488_v51 = vld [vmem:[%s33089_s5 + $0x69c] ss:$24 sps:$4 sm:$0xff]  }
 0x3c9   : > { %6642 = vmatprep.subr.bf16.mxu1 %v23404_v46  ;;  %v5090_v15 = vpop.f32.mrf.mxu1 }
 0x3ca   : > { %6690 = vmatpush2.bf16.msra.mxu0 %v23474_v52  ;;  %v5134_v24 = vadd.f32 %v5133_v43, %v5090_v15  ;;  %v23417_v52 = vld [vmem:[%s33089_s5 + $0x998] ss:$24 sps:$4 sm:$0xff]   ;;  %v23437_v43 = vld [vmem:[%s33089_s5 + $0x90c] ss:$24 sps:$4 sm:$0xff]  }
 0x3cb   : > { %6691 = vmatprep.subr.bf16.mxu0 %v23482_v30  ;;  %v23441_v15 = vld [vmem:[%s33089_s5 + $0x8d8] ss:$24 sps:$4 sm:$0xff]  }
 0x3cc   : > { %6643 = vmatpush2.bf16.msra.mxu1 %v23402_v60  ;;  %v3439_v60 = vadd.f32 %v27371_v12, %v27387_v40  ;;  %v3484_v40 = vadd.f32 %v27463_v1, %v3441_v32  ;;  %v23465_v32 = vld [vmem:[%s33089_s5 + $0xa58] ss:$24 sps:$4 sm:$0xff]  }
 0x3cd   : > { %6644 = vmatprep.subr.bf16.mxu1 %v23407_v62 }
 0x3ce   : > { %6692 = vmatpush2.bf16.msra.mxu0 %v23480_v27  ;;  %v3482_v33 = vadd.f32 %v27447_v45, %v3439_v60  ;;  %v3529_v45 = vadd.f32 %v27461_v0, %v3486_v6  ;;  %v3527_v34 = vadd.f32 %v27445_v28, %v3484_v40  ;;  %v23425_v27 = vld [vmem:[%s33089_s5 + $0x96c] ss:$24 sps:$4 sm:$0xff]   ;;  %v23447_v60 = vld [vmem:[%s33089_s5 + $0x8a8] ss:$24 sps:$4 sm:$0xff]   ;;  %v23477_v6 = vld [vmem:[%s33089_s5 + $0x9f8] ss:$24 sps:$4 sm:$0xff]  }
 0x3cf   : > { %6704 = vmatprep.subr.bf16.mxu0 %v23488_v51  ;;  %v23435_v51 = vld [vmem:[%s33089_s5 + $0x908] ss:$24 sps:$4 sm:$0xff]   ;;  %v23491_v40 = vld [vmem:[%s33089_s5 + $0x6a4] ss:$24 sps:$4 sm:$0xff]  }
 0x3d0   : > { %6645 = vmatpush2.bf16.msra.mxu1 %v23405_v29  ;;  %v5130_v29 = vadd.f32 %v5129_v50, %v5086_v8  ;;  %v3525_v2 = vadd.f32 %v27423_v53, %v3482_v33  ;;  %v23423_v8 = vld [vmem:[%s33089_s5 + $0x968] ss:$24 sps:$4 sm:$0xff]   ;;  %v23473_v33 = vld [vmem:[%s33089_s5 + $0xa2c] ss:$24 sps:$4 sm:$0xff]  }
 0x3d1   : > { %6646 = vmatprep.subr.bf16.mxu1 %v23410_v5 }
 0x3d4   : > { %6647 = vmatpush2.bf16.msra.mxu1 %v23408_v21 }
 0x3d5   : > { %6648 = vmatprep.subr.bf16.mxu1 %v23413_v41  ;;  %v3445_v41 = vadd.f32 %v27418_v25, %v27437_v57 }
 0x3d7   : > { %v3488_v48 = vadd.f32 %v27493_v47, %v3445_v41  ;;  %v23479_v41 = vld [vmem:[%s33089_s5 + $0x9fc] ss:$24 sps:$4 sm:$0xff]  }
 0x3d8   : > { %6649 = vmatpush2.bf16.msra.mxu1 %v23411_v36  ;;  %v5132_v36 = vadd.f32 %v5131_v14, %v5088_v26  ;;  %v23431_v14 = vld [vmem:[%s33089_s5 + $0x93c] ss:$24 sps:$4 sm:$0xff]   ;;  %v23429_v26 = vld [vmem:[%s33089_s5 + $0x938] ss:$24 sps:$4 sm:$0xff]  }
 0x3d9   : > { %6747 = vmatprep.subr.bf16.mxu1 %v23419_v38  ;;  %v3531_v1 = vadd.f32 %v27477_v11, %v3488_v48 }
 0x3e1   : > { %v5213_v46 = vpop.f32.mrf.mxu0 }
 0x3e3   : > { %v5215_v62 = vpop.f32.mrf.mxu0 }
 0x3e5   : > { %v5217_v38 = vpop.f32.mrf.mxu0 }
 0x3e7   : > { %v5219_v9 = vpop.f32.mrf.mxu0 }
 0x3fb   : > { %v5170_v63 = vpop.f32.mrf.mxu1 }
 0x3fc   : > { %v5171_v5 = vadd.f32 %v5170_v63, %v5128_v59  ;;  %v23449_v59 = vld [vmem:[%s33089_s5 + $0x8ac] ss:$24 sps:$4 sm:$0xff]   ;;  %v23453_v63 = vld [vmem:[%s33089_s5 + $0x878] ss:$24 sps:$4 sm:$0xff]  }
 0x3fd   : > { %v5172_v21 = vpop.f32.mrf.mxu1 }
 0x3fe   : > { %v5173_v12 = vadd.f32 %v5172_v21, %v5130_v29  ;;  %v5214_v23 = vadd.f32 %v5213_v46, %v5171_v5  ;;  %v23443_v46 = vld [vmem:[%s33089_s5 + $0x8dc] ss:$24 sps:$4 sm:$0xff]   ;;  %v23459_v29 = vld [vmem:[%s33089_s5 + $0x848] ss:$24 sps:$4 sm:$0xff]  }
 0x3ff   : > { %v5174_v17 = vpop.f32.mrf.mxu1  ;;  %v23467_v5 = vld [vmem:[%s33089_s5 + $0xa5c] ss:$24 sps:$4 sm:$0xff]   ;;  %v23471_v21 = vld [vmem:[%s33089_s5 + $0xa28] ss:$24 sps:$4 sm:$0xff]  }
 0x400   : > { %v5175_v58 = vadd.f32 %v5174_v17, %v5132_v36  ;;  %v5216_v42 = vadd.f32 %v5215_v62, %v5173_v12  ;;  %v5394_v13 = vmax.f32 %v3525_v2, %v5214_v23  ;;  %v23455_v62 = vld [vmem:[%s33089_s5 + $0x87c] ss:$24 sps:$4 sm:$0xff]   ;;  %v23485_v36 = vld [vmem:[%s33089_s5 + $0x9cc] ss:$24 sps:$4 sm:$0xff]   ;;  %v23483_v12 = vld [vmem:[%s33089_s5 + $0x9c8] ss:$24 sps:$4 sm:$0xff]  }
 0x401   : > { %v5176_v37 = vpop.f32.mrf.mxu1 }
 0x402   : > { %v5218_v25 = vadd.f32 %v5217_v38, %v5175_v58  ;;  %v5177_v57 = vadd.f32 %v5176_v37, %v5134_v24  ;;  %v5395_v47 = vmax.f32 %v3527_v34, %v5216_v42 }
 0x404   : > { %v5398_v44 = vmax.f32 %v3529_v45, %v5218_v25  ;;  %v5220_v31 = vadd.f32 %v5219_v9, %v5177_v57 }
 0x406   : > { %v27897_v4 = vpack.c.bf16 %v5398_v44, %v5394_v13  ;;  %v5399_v16 = vmax.f32 %v3531_v1, %v5220_v31  ;;  %v3617_v13 = vadd.f32 %v27613_v19, %v27618_v18 }
 0x408   : > { %v27899_v10 = vpack.c.bf16 %v5399_v16, %v5395_v47  ;;  %v5746_v53 = vshll.u32 %v27897_v4, 16  ;;  %v5744_v61 = vshrl.u32 %v27897_v4, 16 }
 0x40a   : > { %v5753_v0 = vshll.u32 %v27899_v10, 16  ;;  %v5748_v35 = vrot.slane %v5746_v53, 1  ;;  %v5751_v50 = vshrl.u32 %v27899_v10, 16  ;;  %v3660_v53 = vadd.f32 %v27856_v55, %v3617_v13  ;;  %v23528_v13 = vld [vmem:[%s33089_s5 + $0x548] ss:$24 sps:$4 sm:$0xff]  }
 0x40c   : > { %v5755_v28 = vrot.slane %v5753_v0, 1  ;;  %v27910_v30 = vor.u32 %v5748_v35, %v5744_v61 }
 0x40e   : > { %v27905_v11 = vor.u32 %v5755_v28, %v5751_v50 }
 0x410   : > { %6650 = vmatprep.mubr.bf16.mxu1 %v27905_v11 }
 0x411   : > { %6651 = vmatmul.mubr.bf16.vlgmr.msra.gmra.mxu1 %v27910_v30 }
 0x412   : > { %6748 = vmatpush1.bf16.msra.mxu1 %v23417_v52 }
 0x413   : > { %6749 = vmatprep.subr.bf16.mxu1 %v23425_v27 }
 0x416   : > { %6750 = vmatpush1.bf16.msra.mxu1 %v23423_v8 }
 0x417   : > { %6751 = vmatprep.subr.bf16.mxu1 %v23431_v14  ;;  %v3703_v14 = vadd.f32 %v27864_v20, %v3660_v53  ;;  %v23537_v53 = vld [vmem:[%s33089_s5 + $0x820] ss:$24 sps:$4 sm:$0xff]  }
 0x41a   : > { %6752 = vmatpush1.bf16.msra.mxu1 %v23429_v26 }
 0x41b   : > { %6753 = vmatprep.subr.bf16.mxu1 %v23437_v43 }
 0x41e   : > { %6754 = vmatpush1.bf16.msra.mxu1 %v23435_v51 }
 0x41f   : > { %6755 = vmatprep.subr.bf16.mxu1 %v23443_v46 }
 0x421   : > { %v5256_v17 = vpop.f32.mrf.mxu0 }
 0x422   : > { %6756 = vmatpush1.bf16.msra.mxu1 %v23441_v15 }
 0x423   : > { %6757 = vmatprep.subr.bf16.mxu1 %v23449_v59  ;;  %v5258_v24 = vpop.f32.mrf.mxu0 }
 0x425   : > { %v5260_v58 = vpop.f32.mrf.mxu0 }
 0x426   : > { %6758 = vmatpush1.bf16.msra.mxu1 %v23447_v60 }
 0x427   : > { %6759 = vmatprep.subr.bf16.mxu1 %v23455_v62  ;;  %v5262_v45 = vpop.f32.mrf.mxu0 }
 0x42a   : > { %6760 = vmatpush1.bf16.msra.mxu1 %v23453_v63  ;;  %v23489_v63 = vld [vmem:[%s33089_s5 + $0x6a0] ss:$24 sps:$4 sm:$0xff]  }
 0x42b   : > { %6761 = vmatprep.subr.bf16.mxu1 %v23461_v22 }
 0x42e   : > { %6762 = vmatpush1.bf16.msra.mxu1 %v23459_v29  ;;  %v23494_v29 = vld [vmem:[%s33089_s5 + $0x66c] ss:$24 sps:$4 sm:$0xff]  }
 0x42f   : > { %6771 = vmatprep.subr.bf16.mxu1 %v23467_v5  ;;  %v23497_v5 = vld [vmem:[%s33089_s5 + $0x674] ss:$24 sps:$4 sm:$0xff]  }
 0x432   : > { %6772 = vmatpush2.bf16.msra.mxu1 %v23465_v32  ;;  %v23492_v32 = vld [vmem:[%s33089_s5 + $0x668] ss:$24 sps:$4 sm:$0xff]  }
 0x433   : > { %6773 = vmatprep.subr.bf16.mxu1 %v23473_v33  ;;  %v23495_v33 = vld [vmem:[%s33089_s5 + $0x670] ss:$24 sps:$4 sm:$0xff]  }
 0x436   : > { %6774 = vmatpush2.bf16.msra.mxu1 %v23471_v21  ;;  %v23500_v21 = vld [vmem:[%s33089_s5 + $0x63c] ss:$24 sps:$4 sm:$0xff]  }
 0x437   : > { %6775 = vmatprep.subr.bf16.mxu1 %v23479_v41  ;;  %v23503_v41 = vld [vmem:[%s33089_s5 + $0x644] ss:$24 sps:$4 sm:$0xff]  }
 0x43a   : > { %6776 = vmatpush2.bf16.msra.mxu1 %v23477_v6  ;;  %v23498_v6 = vld [vmem:[%s33089_s5 + $0x638] ss:$24 sps:$4 sm:$0xff]  }
 0x43b   : > { %6777 = vmatprep.subr.bf16.mxu1 %v23485_v36  ;;  %v5299_v38 = vpop.f32.mrf.mxu1  ;;  %v23506_v36 = vld [vmem:[%s33089_s5 + $0x60c] ss:$24 sps:$4 sm:$0xff]  }
 0x43c   : > { %v5300_v42 = vadd.f32 %v5299_v38, %v5256_v17  ;;  %v23507_v38 = vld [vmem:[%s33089_s5 + $0x610] ss:$24 sps:$4 sm:$0xff]   ;;  %v23512_v17 = vld [vmem:[%s33089_s5 + $0x5dc] ss:$24 sps:$4 sm:$0xff]  }
 0x43d   : > { %v5301_v48 = vpop.f32.mrf.mxu1 }
 0x43e   : > { %6778 = vmatpush2.bf16.msra.mxu1 %v23483_v12  ;;  %v5302_v34 = vadd.f32 %v5301_v48, %v5258_v24  ;;  %v23509_v12 = vld [vmem:[%s33089_s5 + $0x614] ss:$24 sps:$4 sm:$0xff]   ;;  %v23515_v48 = vld [vmem:[%s33089_s5 + $0x5e4] ss:$24 sps:$4 sm:$0xff]   ;;  %v23510_v24 = vld [vmem:[%s33089_s5 + $0x5d8] ss:$24 sps:$4 sm:$0xff]  }
 0x43f   : > { %6790 = vmatprep.subr.bf16.mxu1 %v23491_v40  ;;  %v5303_v23 = vpop.f32.mrf.mxu1  ;;  %v23504_v40 = vld [vmem:[%s33089_s5 + $0x608] ss:$24 sps:$4 sm:$0xff]  }
 0x440   : > { %v5304_v44 = vadd.f32 %v5303_v23, %v5260_v58  ;;  %v23513_v23 = vld [vmem:[%s33089_s5 + $0x5e0] ss:$24 sps:$4 sm:$0xff]   ;;  %v23518_v58 = vld [vmem:[%s33089_s5 + $0x5ac] ss:$24 sps:$4 sm:$0xff]  }
 0x441   : > { %v5305_v2 = vpop.f32.mrf.mxu1 }
 0x442   : > { %v5306_v0 = vadd.f32 %v5305_v2, %v5262_v45  ;;  %v23521_v2 = vld [vmem:[%s33089_s5 + $0x5b4] ss:$24 sps:$4 sm:$0xff]   ;;  %v23519_v45 = vld [vmem:[%s33089_s5 + $0x5b0] ss:$24 sps:$4 sm:$0xff]  }
 0x45b   : > { %v5385_v37 = vpop.f32.mrf.mxu1 }
 0x45d   : > { %v5387_v25 = vpop.f32.mrf.mxu1 }
 0x45f   : > { %v5389_v47 = vpop.f32.mrf.mxu1 }
 0x461   : > { %v5342_v57 = vpop.f32.mrf.mxu0  ;;  %v5391_v8 = vpop.f32.mrf.mxu1 }
 0x462   : > { %v5343_v9 = vadd.f32 %v5342_v57, %v5300_v42  ;;  %v23524_v42 = vld [vmem:[%s33089_s5 + $0x57c] ss:$24 sps:$4 sm:$0xff]   ;;  %v23522_v57 = vld [vmem:[%s33089_s5 + $0x578] ss:$24 sps:$4 sm:$0xff]  }
 0x463   : > { %v5344_v1 = vpop.f32.mrf.mxu0 }
 0x464   : > { %v5345_v31 = vadd.f32 %v5344_v1, %v5302_v34  ;;  %v5386_v35 = vadd.f32 %v5385_v37, %v5343_v9  ;;  %v23516_v37 = vld [vmem:[%s33089_s5 + $0x5a8] ss:$24 sps:$4 sm:$0xff]   ;;  %v23530_v9 = vld [vmem:[%s33089_s5 + $0x54c] ss:$24 sps:$4 sm:$0xff]  }
 0x465   : > { %v5346_v16 = vpop.f32.mrf.mxu0  ;;  %v23525_v34 = vld [vmem:[%s33089_s5 + $0x580] ss:$24 sps:$4 sm:$0xff]   ;;  %v23533_v1 = vld [vmem:[%s33089_s5 + $0x554] ss:$24 sps:$4 sm:$0xff]  }
 0x466   : > { %v5347_v50 = vadd.f32 %v5346_v16, %v5304_v44  ;;  %v5388_v61 = vadd.f32 %v5387_v25, %v5345_v31  ;;  %v5396_v26 = vmax.f32 %v27636_v49, %v5386_v35  ;;  %v23527_v25 = vld [vmem:[%s33089_s5 + $0x584] ss:$24 sps:$4 sm:$0xff]   ;;  %v23531_v44 = vld [vmem:[%s33089_s5 + $0x550] ss:$24 sps:$4 sm:$0xff]   ;;  %v23545_v35 = vld [vmem:[%s33089_s5 + $0x7f4] ss:$24 sps:$4 sm:$0xff]  }
 0x467   : > { %v5348_v28 = vpop.f32.mrf.mxu0  ;;  %v23536_v31 = vld [vmem:[%s33089_s5 + $0x81c] ss:$24 sps:$4 sm:$0xff]   ;;  %v23534_v16 = vld [vmem:[%s33089_s5 + $0x818] ss:$24 sps:$4 sm:$0xff]  }
 0x468   : > { %v5390_v52 = vadd.f32 %v5389_v47, %v5347_v50  ;;  %v5349_v27 = vadd.f32 %v5348_v28, %v5306_v0  ;;  %v5397_v43 = vmax.f32 %v27645_v39, %v5388_v61  ;;  %v23486_v39 = vld [vmem:[%s33089_s5 + $0x698] ss:$24 sps:$4 sm:$0xff]   ;;  %v23539_v47 = vld [vmem:[%s33089_s5 + $0x824] ss:$24 sps:$4 sm:$0xff]   ;;  %v23540_v50 = vld [vmem:[%s33089_s5 + $0x7e8] ss:$24 sps:$4 sm:$0xff]  }
 0x469   : > { %v23542_v0 = vld [vmem:[%s33089_s5 + $0x7ec] ss:$24 sps:$4 sm:$0xff]   ;;  %v23543_v28 = vld [vmem:[%s33089_s5 + $0x7f0] ss:$24 sps:$4 sm:$0xff]   ;;  %v23548_v61 = vld [vmem:[%s33089_s5 + $0x7bc] ss:$24 sps:$4 sm:$0xff]  }
 0x46a   : > { %v5400_v19 = vmax.f32 %v27651_v54, %v5390_v52  ;;  %v5392_v18 = vadd.f32 %v5391_v8, %v5349_v27  ;;  %v23551_v52 = vld [vmem:[%s33089_s5 + $0x7c4] ss:$24 sps:$4 sm:$0xff]   ;;  %v23546_v27 = vld [vmem:[%s33089_s5 + $0x7b8] ss:$24 sps:$4 sm:$0xff]  }
 0x46b   : > { %v23549_v8 = vld [vmem:[%s33089_s5 + $0x7c0] ss:$24 sps:$4 sm:$0xff]  }
 0x46c   : > { %v27990_v51 = vpack.c.bf16 %v5400_v19, %v5396_v26  ;;  %v5401_v55 = vmax.f32 %v3703_v14, %v5392_v18  ;;  %v23554_v14 = vld [vmem:[%s33089_s5 + $0x78c] ss:$24 sps:$4 sm:$0xff]   ;;  %v23552_v19 = vld [vmem:[%s33089_s5 + $0x788] ss:$24 sps:$4 sm:$0xff]  }
 0x46d   : > { %v23557_v26 = vld [vmem:[%s33089_s5 + $0x794] ss:$24 sps:$4 sm:$0xff]   ;;  %v23555_v18 = vld [vmem:[%s33089_s5 + $0x790] ss:$24 sps:$4 sm:$0xff]  }
 0x46e   : > { %v27992_v46 = vpack.c.bf16 %v5401_v55, %v5397_v43  ;;  %v5760_v15 = vshll.u32 %v27990_v51, 16  ;;  %v5758_v49 = vshrl.u32 %v27990_v51, 16  ;;  %v23560_v43 = vld [vmem:[%s33089_s5 + $0x75c] ss:$24 sps:$4 sm:$0xff]  }
 0x46f   : > { %v23563_v55 = vld [vmem:[%s33089_s5 + $0x764] ss:$24 sps:$4 sm:$0xff]  }
 0x470   : > { %v5767_v59 = vshll.u32 %v27992_v46, 16  ;;  %v5762_v60 = vrot.slane %v5760_v15, 1  ;;  %v5765_v62 = vshrl.u32 %v27992_v46, 16  ;;  %v23558_v15 = vld [vmem:[%s33089_s5 + $0x758] ss:$24 sps:$4 sm:$0xff]  }
 0x472   : > { %v5769_v20 = vrot.slane %v5767_v59, 1  ;;  %v28006_v22 = vor.u32 %v5762_v60, %v5758_v49  ;;  %v23561_v59 = vld [vmem:[%s33089_s5 + $0x760] ss:$24 sps:$4 sm:$0xff]   ;;  %v23566_v60 = vld [vmem:[%s33089_s5 + $0x72c] ss:$24 sps:$4 sm:$0xff]  }
 0x473   : > { %v23567_v49 = vld [vmem:[%s33089_s5 + $0x730] ss:$24 sps:$4 sm:$0xff]  }
 0x474   : > { %v27998_v54 = vor.u32 %v5769_v20, %v5765_v62  ;;  %v23569_v62 = vld [vmem:[%s33089_s5 + $0x734] ss:$24 sps:$4 sm:$0xff]   ;;  %v23564_v20 = vld [vmem:[%s33089_s5 + $0x728] ss:$24 sps:$4 sm:$0xff]  }
 0x476   : > { %20210 = vmatprep.mubr.msk.bf16.mxu0 %vm6614_vm6, %v27998_v54  ;;  %20211 = vmatprep.mubr.msk.bf16.mxu1 %vm6614_vm6, %v27998_v54 }
 0x477   : > { %6694 = vmatmul.mubr.bf16.vlgmr.msra.gmra.mxu0 %v28006_v22  ;;  %6780 = vmatmul.mubr.bf16.vlgmr.msra.gmra.mxu1 %v28006_v22 }
 0x478   : > { %6705 = vmatpush1.bf16.msra.mxu0 %v23486_v39  ;;  %6791 = vmatpush1.bf16.msra.mxu1 %v23489_v63  ;;  %v23572_v39 = vld [vmem:[%s33089_s5 + $0x6fc] ss:$24 sps:$4 sm:$0xff]  }
 0x479   : > { %6736 = vmatprep.mubr.bf16.mxu0 %v27905_v11  ;;  %6822 = vmatprep.mubr.bf16.mxu1 %v27905_v11  ;;  %v23501_v11 = vld [vmem:[%s33089_s5 + $0x640] ss:$24 sps:$4 sm:$0xff]   ;;  %v23575_v63 = vld [vmem:[%s33089_s5 + $0x704] ss:$24 sps:$4 sm:$0xff]  }
 0x47a   : > { %6706 = vmatprep.subr.bf16.mxu0 %v23494_v29  ;;  %6792 = vmatprep.subr.bf16.mxu1 %v23497_v5  ;;  %v23570_v29 = vld [vmem:[%s33089_s5 + $0x6f8] ss:$24 sps:$4 sm:$0xff]  }
 0x47b   : > { %v23573_v5 = vld [vmem:[%s33089_s5 + $0x700] ss:$24 sps:$4 sm:$0xff]  }
 0x47c   : > { %6707 = vmatpush1.bf16.msra.mxu0 %v23492_v32  ;;  %6793 = vmatpush1.bf16.msra.mxu1 %v23495_v33  ;;  %v23578_v32 = vld [vmem:[%s33089_s5 + $0x6cc] ss:$24 sps:$4 sm:$0xff]  }
 0x47d   : > { %6708 = vmatprep.subr.bf16.mxu0 %v23500_v21  ;;  %6794 = vmatprep.subr.bf16.mxu1 %v23503_v41  ;;  %v23581_v33 = vld [vmem:[%s33089_s5 + $0x6d4] ss:$24 sps:$4 sm:$0xff]   ;;  %v23576_v21 = vld [vmem:[%s33089_s5 + $0x6c8] ss:$24 sps:$4 sm:$0xff]  }
 0x47e   : > { %v23579_v41 = vld [vmem:[%s33089_s5 + $0x6d0] ss:$24 sps:$4 sm:$0xff]  }
 0x480   : > { %6709 = vmatpush1.bf16.msra.mxu0 %v23498_v6  ;;  %6795 = vmatpush1.bf16.msra.mxu1 %v23501_v11  ;;  %v23584_v6 = vld [vmem:[%s33089_s5 + $0x9a4] ss:$24 sps:$4 sm:$0xff]   ;;  %v23587_v11 = vld [vmem:[%s33089_s5 + $0x454] ss:$24 sps:$4 sm:$0xff]  }
 0x481   : > { %6710 = vmatprep.subr.bf16.mxu0 %v23506_v36  ;;  %6796 = vmatprep.subr.bf16.mxu1 %v23509_v12  ;;  %v23582_v36 = vld [vmem:[%s33089_s5 + $0x9a0] ss:$24 sps:$4 sm:$0xff]   ;;  %v23585_v12 = vld [vmem:[%s33089_s5 + $0x450] ss:$24 sps:$4 sm:$0xff]  }
 0x484   : > { %6711 = vmatpush1.bf16.msra.mxu0 %v23504_v40  ;;  %6797 = vmatpush1.bf16.msra.mxu1 %v23507_v38  ;;  %v23590_v40 = vld [vmem:[%s33089_s5 + $0x974] ss:$24 sps:$4 sm:$0xff]   ;;  %v23593_v38 = vld [vmem:[%s33089_s5 + $0x424] ss:$24 sps:$4 sm:$0xff]  }
 0x485   : > { %6712 = vmatprep.subr.bf16.mxu0 %v23512_v17  ;;  %6798 = vmatprep.subr.bf16.mxu1 %v23515_v48  ;;  %v23588_v17 = vld [vmem:[%s33089_s5 + $0x970] ss:$24 sps:$4 sm:$0xff]   ;;  %v23591_v48 = vld [vmem:[%s33089_s5 + $0x420] ss:$24 sps:$4 sm:$0xff]  }
 0x488   : > { %6713 = vmatpush1.bf16.msra.mxu0 %v23510_v24  ;;  %6799 = vmatpush1.bf16.msra.mxu1 %v23513_v23  ;;  %v23594_v24 = vld [vmem:[%s33089_s5 + $0x940] ss:$24 sps:$4 sm:$0xff]   ;;  %v23597_v23 = vld [vmem:[%s33089_s5 + $0x3f0] ss:$24 sps:$4 sm:$0xff]  }
 0x489   : > { %6714 = vmatprep.subr.bf16.mxu0 %v23518_v58  ;;  %6800 = vmatprep.subr.bf16.mxu1 %v23521_v2  ;;  %v23602_v58 = vld [vmem:[%s33089_s5 + $0x914] ss:$24 sps:$4 sm:$0xff]   ;;  %v23605_v2 = vld [vmem:[%s33089_s5 + $0x3c4] ss:$24 sps:$4 sm:$0xff]  }
 0x48c   : > { %6715 = vmatpush1.bf16.msra.mxu0 %v23516_v37  ;;  %6801 = vmatpush1.bf16.msra.mxu1 %v23519_v45  ;;  %v23600_v37 = vld [vmem:[%s33089_s5 + $0x910] ss:$24 sps:$4 sm:$0xff]   ;;  %v23603_v45 = vld [vmem:[%s33089_s5 + $0x3c0] ss:$24 sps:$4 sm:$0xff]  }
 0x48d   : > { %6716 = vmatprep.subr.bf16.mxu0 %v23524_v42  ;;  %6802 = vmatprep.subr.bf16.mxu1 %v23527_v25  ;;  %v23608_v42 = vld [vmem:[%s33089_s5 + $0x8e4] ss:$24 sps:$4 sm:$0xff]   ;;  %v23611_v25 = vld [vmem:[%s33089_s5 + $0x394] ss:$24 sps:$4 sm:$0xff]  }
 0x490   : > { %6717 = vmatpush1.bf16.msra.mxu0 %v23522_v57  ;;  %6803 = vmatpush1.bf16.msra.mxu1 %v23525_v34  ;;  %v23606_v57 = vld [vmem:[%s33089_s5 + $0x8e0] ss:$24 sps:$4 sm:$0xff]   ;;  %v23609_v34 = vld [vmem:[%s33089_s5 + $0x390] ss:$24 sps:$4 sm:$0xff]  }
 0x491   : > { %6718 = vmatprep.subr.bf16.mxu0 %v23530_v9  ;;  %6804 = vmatprep.subr.bf16.mxu1 %v23533_v1  ;;  %v23614_v9 = vld [vmem:[%s33089_s5 + $0x8b4] ss:$24 sps:$4 sm:$0xff]   ;;  %v23617_v1 = vld [vmem:[%s33089_s5 + $0x364] ss:$24 sps:$4 sm:$0xff]  }
 0x494   : > { %6719 = vmatpush1.bf16.msra.mxu0 %v23528_v13  ;;  %6805 = vmatpush1.bf16.msra.mxu1 %v23531_v44  ;;  %v23612_v13 = vld [vmem:[%s33089_s5 + $0x8b0] ss:$24 sps:$4 sm:$0xff]   ;;  %v23615_v44 = vld [vmem:[%s33089_s5 + $0x360] ss:$24 sps:$4 sm:$0xff]  }
 0x495   : > { %6720 = vmatprep.subr.bf16.mxu0 %v23536_v31  ;;  %6806 = vmatprep.subr.bf16.mxu1 %v23539_v47  ;;  %v23620_v31 = vld [vmem:[%s33089_s5 + $0x884] ss:$24 sps:$4 sm:$0xff]   ;;  %v23623_v47 = vld [vmem:[%s33089_s5 + $0x334] ss:$24 sps:$4 sm:$0xff]  }
 0x498   : > { %6721 = vmatpush2.bf16.msra.mxu0 %v23534_v16  ;;  %6807 = vmatpush2.bf16.msra.mxu1 %v23537_v53  ;;  %v23618_v16 = vld [vmem:[%s33089_s5 + $0x880] ss:$24 sps:$4 sm:$0xff]   ;;  %v23621_v53 = vld [vmem:[%s33089_s5 + $0x330] ss:$24 sps:$4 sm:$0xff]  }
 0x499   : > { %6722 = vmatprep.subr.bf16.mxu0 %v23542_v0  ;;  %6808 = vmatprep.subr.bf16.mxu1 %v23545_v35  ;;  %v23626_v0 = vld [vmem:[%s33089_s5 + $0x854] ss:$24 sps:$4 sm:$0xff]   ;;  %v23629_v35 = vld [vmem:[%s33089_s5 + $0x304] ss:$24 sps:$4 sm:$0xff]  }
 0x49c   : > { %6723 = vmatpush2.bf16.msra.mxu0 %v23540_v50  ;;  %6809 = vmatpush2.bf16.msra.mxu1 %v23543_v28  ;;  %v23624_v50 = vld [vmem:[%s33089_s5 + $0x850] ss:$24 sps:$4 sm:$0xff]   ;;  %v23627_v28 = vld [vmem:[%s33089_s5 + $0x300] ss:$24 sps:$4 sm:$0xff]  }
 0x49d   : > { %6724 = vmatprep.subr.bf16.mxu0 %v23548_v61  ;;  %6810 = vmatprep.subr.bf16.mxu1 %v23551_v52  ;;  %v23632_v61 = vld [vmem:[%s33089_s5 + $0xa64] ss:$24 sps:$4 sm:$0xff]   ;;  %v23635_v52 = vld [vmem:[%s33089_s5 + $0x514] ss:$24 sps:$4 sm:$0xff]  }
 0x4a0   : > { %6725 = vmatpush2.bf16.msra.mxu0 %v23546_v27  ;;  %6811 = vmatpush2.bf16.msra.mxu1 %v23549_v8  ;;  %v23630_v27 = vld [vmem:[%s33089_s5 + $0xa60] ss:$24 sps:$4 sm:$0xff]   ;;  %v23633_v8 = vld [vmem:[%s33089_s5 + $0x510] ss:$24 sps:$4 sm:$0xff]  }
 0x4a1   : > { %6726 = vmatprep.subr.bf16.mxu0 %v23554_v14  ;;  %6812 = vmatprep.subr.bf16.mxu1 %v23557_v26  ;;  %v23638_v14 = vld [vmem:[%s33089_s5 + $0xa34] ss:$24 sps:$4 sm:$0xff]   ;;  %v23641_v26 = vld [vmem:[%s33089_s5 + $0x4e4] ss:$24 sps:$4 sm:$0xff]  }
 0x4a4   : > { %6727 = vmatpush2.bf16.msra.mxu0 %v23552_v19  ;;  %6813 = vmatpush2.bf16.msra.mxu1 %v23555_v18  ;;  %v23636_v19 = vld [vmem:[%s33089_s5 + $0xa30] ss:$24 sps:$4 sm:$0xff]   ;;  %v23639_v18 = vld [vmem:[%s33089_s5 + $0x4e0] ss:$24 sps:$4 sm:$0xff]  }
 0x4a5   : > { %6728 = vmatprep.subr.bf16.mxu0 %v23560_v43  ;;  %6814 = vmatprep.subr.bf16.mxu1 %v23563_v55  ;;  %v23644_v43 = vld [vmem:[%s33089_s5 + $0xa04] ss:$24 sps:$4 sm:$0xff]   ;;  %v23647_v55 = vld [vmem:[%s33089_s5 + $0x4b4] ss:$24 sps:$4 sm:$0xff]  }
 0x4a8   : > { %6729 = vmatpush2.bf16.msra.mxu0 %v23558_v15  ;;  %6815 = vmatpush2.bf16.msra.mxu1 %v23561_v59  ;;  %v23642_v15 = vld [vmem:[%s33089_s5 + $0xa00] ss:$24 sps:$4 sm:$0xff]   ;;  %v23645_v59 = vld [vmem:[%s33089_s5 + $0x4b0] ss:$24 sps:$4 sm:$0xff]  }
 0x4a9   : > { %6730 = vmatprep.subr.bf16.mxu0 %v23566_v60  ;;  %6816 = vmatprep.subr.bf16.mxu1 %v23569_v62  ;;  %v23650_v60 = vld [vmem:[%s33089_s5 + $0x9d4] ss:$24 sps:$4 sm:$0xff]   ;;  %v23653_v62 = vld [vmem:[%s33089_s5 + $0x484] ss:$24 sps:$4 sm:$0xff]  }
 0x4ac   : > { %6731 = vmatpush2.bf16.msra.mxu0 %v23564_v20  ;;  %6817 = vmatpush2.bf16.msra.mxu1 %v23567_v49  ;;  %v23648_v20 = vld [vmem:[%s33089_s5 + $0x9d0] ss:$24 sps:$4 sm:$0xff]   ;;  %v23651_v49 = vld [vmem:[%s33089_s5 + $0x480] ss:$24 sps:$4 sm:$0xff]  }
 0x4ad   : > { %6732 = vmatprep.subr.bf16.mxu0 %v23572_v39  ;;  %6818 = vmatprep.subr.bf16.mxu1 %v23575_v63  ;;  %v23656_v39 = vld [vmem:[%s33089_s5 + $0x154] ss:$24 sps:$4 sm:$0xff]  }
 0x4ae   : > { %v23659_v63 = vld [vmem:[%s33089_s5 + $0x15c] ss:$24 sps:$4 sm:$0xff]  }
 0x4b0   : > { %6733 = vmatpush2.bf16.msra.mxu0 %v23570_v29  ;;  %6819 = vmatpush2.bf16.msra.mxu1 %v23573_v5  ;;  %v23654_v29 = vld [vmem:[%s33089_s5 + $0x150] ss:$24 sps:$4 sm:$0xff]  }
 0x4b1   : > { %6734 = vmatprep.subr.bf16.mxu0 %v23578_v32  ;;  %6820 = vmatprep.subr.bf16.mxu1 %v23581_v33  ;;  %v23657_v5 = vld [vmem:[%s33089_s5 + $0x158] ss:$24 sps:$4 sm:$0xff]   ;;  %v23662_v32 = vld [vmem:[%s33089_s5 + $0x124] ss:$24 sps:$4 sm:$0xff]  }
 0x4b2   : > { %v23665_v33 = vld [vmem:[%s33089_s5 + $0x12c] ss:$24 sps:$4 sm:$0xff]  }
 0x4b4   : > { %6735 = vmatpush2.bf16.msra.mxu0 %v23576_v21  ;;  %6821 = vmatpush2.bf16.msra.mxu1 %v23579_v41  ;;  %v23660_v21 = vld [vmem:[%s33089_s5 + $0x120] ss:$24 sps:$4 sm:$0xff]  }
 0x4b5   : > { %6833 = vmatprep.subr.bf16.mxu0 %v23584_v6  ;;  %7761 = vmatprep.subr.bf16.mxu1 %v23587_v11  ;;  %v23663_v41 = vld [vmem:[%s33089_s5 + $0x128] ss:$24 sps:$4 sm:$0xff]   ;;  %v23671_v6 = vld [vmem:[%s33089_s5 + $0xfc] ss:$24 sps:$4 sm:$0xff]  }
 0x4b6   : > { %v23666_v11 = vld [vmem:[%s33089_s5 + $0xf0] ss:$24 sps:$4 sm:$0xff]  }
 0x4b7   : > { %6737 = vmatmul.mubr.bf16.vlgmr.msra.gmra.mxu0 %v27910_v30  ;;  %6823 = vmatmul.mubr.bf16.vlgmr.msra.gmra.mxu1 %v27910_v30  ;;  %v23596_v30 = vld [vmem:[%s33089_s5 + $0x944] ss:$24 sps:$4 sm:$0xff]  }
 0x4b8   : > { %6834 = vmatpush1.bf16.msra.mxu0 %v23582_v36  ;;  %20212 = vmatprep.mubr.msk.bf16.mxu0 %vm6614_vm6, %v27998_v54  ;;  %v23599_v54 = vld [vmem:[%s33089_s5 + $0x3f4] ss:$24 sps:$4 sm:$0xff]   ;;  %v23669_v36 = vld [vmem:[%s33089_s5 + $0xf8] ss:$24 sps:$4 sm:$0xff]  }
 0x4b9   : > { %7762 = vmatpush1.bf16.msra.mxu1 %v23585_v12  ;;  %20381 = vmatprep.mubr.msk.bf16.mxu1 %vm6614_vm6, %v27992_v46  ;;  %v23674_v12 = vld [vmem:[%s33089_s5 + $0xc4] ss:$24 sps:$4 sm:$0xff]  }
 0x4ba   : > { %6835 = vmatprep.subr.bf16.mxu0 %v23590_v40  ;;  %7763 = vmatprep.subr.bf16.mxu1 %v23593_v38  ;;  %v23677_v40 = vld [vmem:[%s33089_s5 + $0xcc] ss:$24 sps:$4 sm:$0xff]   ;;  %v23672_v38 = vld [vmem:[%s33089_s5 + $0xc0] ss:$24 sps:$4 sm:$0xff]  }
 0x4bc   : > { %6836 = vmatpush1.bf16.msra.mxu0 %v23588_v17  ;;  %v23675_v17 = vld [vmem:[%s33089_s5 + $0xc8] ss:$24 sps:$4 sm:$0xff]  }
 0x4bd   : > { %7764 = vmatpush1.bf16.msra.mxu1 %v23591_v48  ;;  %6837 = vmatprep.subr.bf16.mxu0 %v23596_v30  ;;  %v23680_v48 = vld [vmem:[%s33089_s5 + $0x94] ss:$24 sps:$4 sm:$0xff]  }
 0x4be   : > { %7765 = vmatprep.subr.bf16.mxu1 %v23599_v54  ;;  %v23683_v30 = vld [vmem:[%s33089_s5 + $0x9c] ss:$24 sps:$4 sm:$0xff]   ;;  %v23678_v54 = vld [vmem:[%s33089_s5 + $0x90] ss:$24 sps:$4 sm:$0xff]  }
 0x4c0   : > { %6838 = vmatpush1.bf16.msra.mxu0 %v23594_v24  ;;  %v23681_v24 = vld [vmem:[%s33089_s5 + $0x98] ss:$24 sps:$4 sm:$0xff]  }
 0x4c1   : > { %7766 = vmatpush1.bf16.msra.mxu1 %v23597_v23  ;;  %6839 = vmatprep.subr.bf16.mxu0 %v23602_v58  ;;  %v23686_v23 = vld [vmem:[%s33089_s5 + $0x64] ss:$24 sps:$4 sm:$0xff]  }
 0x4c2   : > { %7767 = vmatprep.subr.bf16.mxu1 %v23605_v2  ;;  %v23689_v58 = vld [vmem:[%s33089_s5 + $0x6c] ss:$24 sps:$4 sm:$0xff]   ;;  %v23684_v2 = vld [vmem:[%s33089_s5 + $0x60] ss:$24 sps:$4 sm:$0xff]  }
 0x4c4   : > { %6840 = vmatpush1.bf16.msra.mxu0 %v23600_v37  ;;  %v23687_v37 = vld [vmem:[%s33089_s5 + $0x68] ss:$24 sps:$4 sm:$0xff]  }
 0x4c5   : > { %7768 = vmatpush1.bf16.msra.mxu1 %v23603_v45  ;;  %6841 = vmatprep.subr.bf16.mxu0 %v23608_v42  ;;  %v23692_v45 = vld [vmem:[%s33089_s5 + $0x34] ss:$24 sps:$4 sm:$0xff]  }
 0x4c6   : > { %7769 = vmatprep.subr.bf16.mxu1 %v23611_v25  ;;  %v23695_v42 = vld [vmem:[%s33089_s5 + $0x3c] ss:$24 sps:$4 sm:$0xff]   ;;  %v23690_v25 = vld [vmem:[%s33089_s5 + $0x30] ss:$24 sps:$4 sm:$0xff]  }
 0x4c8   : > { %6842 = vmatpush1.bf16.msra.mxu0 %v23606_v57  ;;  %v23693_v57 = vld [vmem:[%s33089_s5 + $0x38] ss:$24 sps:$4 sm:$0xff]  }
 0x4c9   : > { %7770 = vmatpush1.bf16.msra.mxu1 %v23609_v34  ;;  %6843 = vmatprep.subr.bf16.mxu0 %v23614_v9  ;;  %v23698_v34 = vld [vmem:[%s33089_s5 + $0x4] ss:$24 sps:$4 sm:$0xff]  }
 0x4ca   : > { %7771 = vmatprep.subr.bf16.mxu1 %v23617_v1  ;;  %v23701_v9 = vld [vmem:[%s33089_s5 + $0xc] ss:$24 sps:$4 sm:$0xff]   ;;  %v23696_v1 = vld [vmem:[%s33089_s5] ss:$24 sps:$4 sm:$0xff]  }
 0x4cc   : > { %6844 = vmatpush1.bf16.msra.mxu0 %v23612_v13  ;;  %v23699_v13 = vld [vmem:[%s33089_s5 + $0x8] ss:$24 sps:$4 sm:$0xff]  }
 0x4cd   : > { %7772 = vmatpush1.bf16.msra.mxu1 %v23615_v44  ;;  %6845 = vmatprep.subr.bf16.mxu0 %v23620_v31  ;;  %v23704_v44 = vld [vmem:[%s33089_s5 + $0x2d4] ss:$24 sps:$4 sm:$0xff]  }
 0x4ce   : > { %7773 = vmatprep.subr.bf16.mxu1 %v23623_v47  ;;  %v23707_v31 = vld [vmem:[%s33089_s5 + $0x2dc] ss:$24 sps:$4 sm:$0xff]   ;;  %v23702_v47 = vld [vmem:[%s33089_s5 + $0x2d0] ss:$24 sps:$4 sm:$0xff]  }
 0x4d0   : > { %6846 = vmatpush1.bf16.msra.mxu0 %v23618_v16  ;;  %v23705_v16 = vld [vmem:[%s33089_s5 + $0x2d8] ss:$24 sps:$4 sm:$0xff]  }
 0x4d1   : > { %7774 = vmatpush1.bf16.msra.mxu1 %v23621_v53  ;;  %6847 = vmatprep.subr.bf16.mxu0 %v23626_v0  ;;  %v23710_v53 = vld [vmem:[%s33089_s5 + $0x2a4] ss:$24 sps:$4 sm:$0xff]  }
 0x4d2   : > { %7775 = vmatprep.subr.bf16.mxu1 %v23629_v35  ;;  %v23713_v0 = vld [vmem:[%s33089_s5 + $0x2ac] ss:$24 sps:$4 sm:$0xff]   ;;  %v23708_v35 = vld [vmem:[%s33089_s5 + $0x2a0] ss:$24 sps:$4 sm:$0xff]  }
 0x4d4   : > { %6848 = vmatpush1.bf16.msra.mxu0 %v23624_v50  ;;  %v23711_v50 = vld [vmem:[%s33089_s5 + $0x2a8] ss:$24 sps:$4 sm:$0xff]  }
 0x4d5   : > { %7776 = vmatpush1.bf16.msra.mxu1 %v23627_v28  ;;  %6857 = vmatprep.subr.bf16.mxu0 %v23632_v61  ;;  %v23716_v28 = vld [vmem:[%s33089_s5 + $0x274] ss:$24 sps:$4 sm:$0xff]  }
 0x4d6   : > { %7785 = vmatprep.subr.bf16.mxu1 %v23635_v52  ;;  %v23719_v61 = vld [vmem:[%s33089_s5 + $0x27c] ss:$24 sps:$4 sm:$0xff]   ;;  %v23714_v52 = vld [vmem:[%s33089_s5 + $0x270] ss:$24 sps:$4 sm:$0xff]  }
 0x4d8   : > { %6858 = vmatpush2.bf16.msra.mxu0 %v23630_v27  ;;  %v23717_v27 = vld [vmem:[%s33089_s5 + $0x278] ss:$24 sps:$4 sm:$0xff]  }
 0x4d9   : > { %7786 = vmatpush2.bf16.msra.mxu1 %v23633_v8  ;;  %6859 = vmatprep.subr.bf16.mxu0 %v23638_v14  ;;  %v23722_v8 = vld [vmem:[%s33089_s5 + $0x244] ss:$24 sps:$4 sm:$0xff]  }
 0x4da   : > { %7787 = vmatprep.subr.bf16.mxu1 %v23641_v26  ;;  %v23725_v14 = vld [vmem:[%s33089_s5 + $0x24c] ss:$24 sps:$4 sm:$0xff]   ;;  %v23720_v26 = vld [vmem:[%s33089_s5 + $0x240] ss:$24 sps:$4 sm:$0xff]  }
 0x4dc   : > { %6860 = vmatpush2.bf16.msra.mxu0 %v23636_v19  ;;  %v23723_v19 = vld [vmem:[%s33089_s5 + $0x248] ss:$24 sps:$4 sm:$0xff]  }
 0x4dd   : > { %7788 = vmatpush2.bf16.msra.mxu1 %v23639_v18  ;;  %6861 = vmatprep.subr.bf16.mxu0 %v23644_v43  ;;  %v23728_v18 = vld [vmem:[%s33089_s5 + $0x214] ss:$24 sps:$4 sm:$0xff]  }
 0x4de   : > { %7789 = vmatprep.subr.bf16.mxu1 %v23647_v55  ;;  %v23731_v43 = vld [vmem:[%s33089_s5 + $0x21c] ss:$24 sps:$4 sm:$0xff]   ;;  %v23726_v55 = vld [vmem:[%s33089_s5 + $0x210] ss:$24 sps:$4 sm:$0xff]  }
 0x4e0   : > { %6862 = vmatpush2.bf16.msra.mxu0 %v23642_v15  ;;  %v23729_v15 = vld [vmem:[%s33089_s5 + $0x218] ss:$24 sps:$4 sm:$0xff]  }
 0x4e1   : > { %7790 = vmatpush2.bf16.msra.mxu1 %v23645_v59  ;;  %6863 = vmatprep.subr.bf16.mxu0 %v23650_v60  ;;  %v23734_v59 = vld [vmem:[%s33089_s5 + $0x1e4] ss:$24 sps:$4 sm:$0xff]  }
 0x4e2   : > { %7791 = vmatprep.subr.bf16.mxu1 %v23653_v62  ;;  %v23737_v60 = vld [vmem:[%s33089_s5 + $0x1ec] ss:$24 sps:$4 sm:$0xff]   ;;  %v23732_v62 = vld [vmem:[%s33089_s5 + $0x1e0] ss:$24 sps:$4 sm:$0xff]  }
 0x4e4   : > { %6864 = vmatpush2.bf16.msra.mxu0 %v23648_v20  ;;  %v23735_v20 = vld [vmem:[%s33089_s5 + $0x1e8] ss:$24 sps:$4 sm:$0xff]  }
 0x4e5   : > { %7792 = vmatpush2.bf16.msra.mxu1 %v23651_v49  ;;  %7718 = vmatprep.subr.bf16.mxu0 %v23656_v39  ;;  %v23740_v49 = vld [vmem:[%s33089_s5 + $0x1b4] ss:$24 sps:$4 sm:$0xff]  }
 0x4e6   : > { %7804 = vmatprep.subr.bf16.mxu1 %v23659_v63  ;;  %v23743_v39 = vld [vmem:[%s33089_s5 + $0x1bc] ss:$24 sps:$4 sm:$0xff]   ;;  %v23738_v63 = vld [vmem:[%s33089_s5 + $0x1b0] ss:$24 sps:$4 sm:$0xff]  }
 0x4e7   : > { %6866 = vmatmul.mubr.bf16.vlgmr.msra.gmra.mxu0 %v28006_v22  ;;  %v23668_v22 = vld [vmem:[%s33089_s5 + $0xf4] ss:$24 sps:$4 sm:$0xff]  }
 0x4e8   : > { %7794 = vmatmul.mubr.bf16.vlgmr.msra.gmra.mxu1 %v27990_v51  ;;  %7719 = vmatpush1.bf16.msra.mxu0 %v23654_v29  ;;  %v23741_v29 = vld [vmem:[%s33089_s5 + $0x1b8] ss:$24 sps:$4 sm:$0xff]  }
 0x4e9   : > { %7750 = vmatprep.mubr.bf16.mxu0 %v27899_v10  ;;  %7805 = vmatpush1.bf16.msra.mxu1 %v23657_v5  ;;  %v23746_v5 = vld [vmem:[%s33089_s5 + $0x184] ss:$24 sps:$4 sm:$0xff]  }
 0x4ea   : > { %7836 = vmatprep.mubr.bf16.mxu1 %v27899_v10  ;;  %7720 = vmatprep.subr.bf16.mxu0 %v23662_v32  ;;  %v23749_v32 = vld [vmem:[%s33089_s5 + $0x18c] ss:$24 sps:$4 sm:$0xff]  }
 0x4eb   : > { %7806 = vmatprep.subr.bf16.mxu1 %v23665_v33  ;;  %v23744_v33 = vld [vmem:[%s33089_s5 + $0x180] ss:$24 sps:$4 sm:$0xff]  }
 0x4ec   : > { %7721 = vmatpush1.bf16.msra.mxu0 %v23660_v21  ;;  %v23747_v21 = vld [vmem:[%s33089_s5 + $0x188] ss:$24 sps:$4 sm:$0xff]  }
 0x4ed   : > { %7807 = vmatpush1.bf16.msra.mxu1 %v23663_v41  ;;  %7722 = vmatprep.subr.bf16.mxu0 %v23668_v22  ;;  %v23752_v41 = vld [vmem:[%s33089_s5 + $0x45c] ss:$24 sps:$4 sm:$0xff]  }
 0x4ee   : > { %7808 = vmatprep.subr.bf16.mxu1 %v23671_v6  ;;  %v23755_v22 = vld [vmem:[%s33089_s5 + $0x464] ss:$24 sps:$4 sm:$0xff]   ;;  %v23750_v6 = vld [vmem:[%s33089_s5 + $0x458] ss:$24 sps:$4 sm:$0xff]  }
 0x4f0   : > { %7723 = vmatpush1.bf16.msra.mxu0 %v23666_v11  ;;  %v23753_v11 = vld [vmem:[%s33089_s5 + $0x460] ss:$24 sps:$4 sm:$0xff]  }
 0x4f1   : > { %7809 = vmatpush1.bf16.msra.mxu1 %v23669_v36  ;;  %7724 = vmatprep.subr.bf16.mxu0 %v23674_v12  ;;  %v23758_v36 = vld [vmem:[%s33089_s5 + $0x42c] ss:$24 sps:$4 sm:$0xff]  }
 0x4f2   : > { %7810 = vmatprep.subr.bf16.mxu1 %v23677_v40  ;;  %v23761_v12 = vld [vmem:[%s33089_s5 + $0x434] ss:$24 sps:$4 sm:$0xff]   ;;  %v23756_v40 = vld [vmem:[%s33089_s5 + $0x428] ss:$24 sps:$4 sm:$0xff]  }
 0x4f4   : > { %7725 = vmatpush1.bf16.msra.mxu0 %v23672_v38  ;;  %v23759_v38 = vld [vmem:[%s33089_s5 + $0x430] ss:$24 sps:$4 sm:$0xff]  }
 0x4f5   : > { %7811 = vmatpush1.bf16.msra.mxu1 %v23675_v17  ;;  %7726 = vmatprep.subr.bf16.mxu0 %v23680_v48  ;;  %v23764_v17 = vld [vmem:[%s33089_s5 + $0x3fc] ss:$24 sps:$4 sm:$0xff]  }
 0x4f6   : > { %7812 = vmatprep.subr.bf16.mxu1 %v23683_v30  ;;  %v23767_v48 = vld [vmem:[%s33089_s5 + $0x404] ss:$24 sps:$4 sm:$0xff]   ;;  %v23762_v30 = vld [vmem:[%s33089_s5 + $0x3f8] ss:$24 sps:$4 sm:$0xff]  }
 0x4f8   : > { %7727 = vmatpush1.bf16.msra.mxu0 %v23678_v54  ;;  %v23765_v54 = vld [vmem:[%s33089_s5 + $0x400] ss:$24 sps:$4 sm:$0xff]  }
 0x4f9   : > { %7813 = vmatpush1.bf16.msra.mxu1 %v23681_v24  ;;  %7728 = vmatprep.subr.bf16.mxu0 %v23686_v23  ;;  %v23770_v24 = vld [vmem:[%s33089_s5 + $0x3cc] ss:$24 sps:$4 sm:$0xff]  }
 0x4fa   : > { %7814 = vmatprep.subr.bf16.mxu1 %v23689_v58  ;;  %v23773_v23 = vld [vmem:[%s33089_s5 + $0x3d4] ss:$24 sps:$4 sm:$0xff]   ;;  %v23768_v58 = vld [vmem:[%s33089_s5 + $0x3c8] ss:$24 sps:$4 sm:$0xff]  }
 0x4fc   : > { %7729 = vmatpush1.bf16.msra.mxu0 %v23684_v2  ;;  %v23771_v2 = vld [vmem:[%s33089_s5 + $0x3d0] ss:$24 sps:$4 sm:$0xff]  }
 0x4fd   : > { %7815 = vmatpush1.bf16.msra.mxu1 %v23687_v37  ;;  %7730 = vmatprep.subr.bf16.mxu0 %v23692_v45  ;;  %v23776_v37 = vld [vmem:[%s33089_s5 + $0x39c] ss:$24 sps:$4 sm:$0xff]  }
 0x4fe   : > { %7816 = vmatprep.subr.bf16.mxu1 %v23695_v42  ;;  %v23779_v45 = vld [vmem:[%s33089_s5 + $0x3a4] ss:$24 sps:$4 sm:$0xff]   ;;  %v23774_v42 = vld [vmem:[%s33089_s5 + $0x398] ss:$24 sps:$4 sm:$0xff]  }
 0x500   : > { %7731 = vmatpush1.bf16.msra.mxu0 %v23690_v25  ;;  %v23777_v25 = vld [vmem:[%s33089_s5 + $0x3a0] ss:$24 sps:$4 sm:$0xff]  }
 0x501   : > { %7817 = vmatpush1.bf16.msra.mxu1 %v23693_v57  ;;  %7732 = vmatprep.subr.bf16.mxu0 %v23698_v34  ;;  %v23782_v57 = vld [vmem:[%s33089_s5 + $0x36c] ss:$24 sps:$4 sm:$0xff]  }
 0x502   : > { %7818 = vmatprep.subr.bf16.mxu1 %v23701_v9  ;;  %v23785_v34 = vld [vmem:[%s33089_s5 + $0x374] ss:$24 sps:$4 sm:$0xff]   ;;  %v23780_v9 = vld [vmem:[%s33089_s5 + $0x368] ss:$24 sps:$4 sm:$0xff]  }
 0x504   : > { %7733 = vmatpush1.bf16.msra.mxu0 %v23696_v1  ;;  %v23783_v1 = vld [vmem:[%s33089_s5 + $0x370] ss:$24 sps:$4 sm:$0xff]  }
 0x505   : > { %7819 = vmatpush1.bf16.msra.mxu1 %v23699_v13  ;;  %7734 = vmatprep.subr.bf16.mxu0 %v23704_v44  ;;  %v23788_v13 = vld [vmem:[%s33089_s5 + $0x33c] ss:$24 sps:$4 sm:$0xff]  }
 0x506   : > { %7820 = vmatprep.subr.bf16.mxu1 %v23707_v31  ;;  %v23791_v44 = vld [vmem:[%s33089_s5 + $0x344] ss:$24 sps:$4 sm:$0xff]   ;;  %v23786_v31 = vld [vmem:[%s33089_s5 + $0x338] ss:$24 sps:$4 sm:$0xff]  }
 0x508   : > { %7735 = vmatpush2.bf16.msra.mxu0 %v23702_v47  ;;  %v23789_v47 = vld [vmem:[%s33089_s5 + $0x340] ss:$24 sps:$4 sm:$0xff]  }
 0x509   : > { %7821 = vmatpush2.bf16.msra.mxu1 %v23705_v16  ;;  %7736 = vmatprep.subr.bf16.mxu0 %v23710_v53  ;;  %v23794_v16 = vld [vmem:[%s33089_s5 + $0x30c] ss:$24 sps:$4 sm:$0xff]  }
 0x50a   : > { %7822 = vmatprep.subr.bf16.mxu1 %v23713_v0  ;;  %v23797_v53 = vld [vmem:[%s33089_s5 + $0x314] ss:$24 sps:$4 sm:$0xff]   ;;  %v23792_v0 = vld [vmem:[%s33089_s5 + $0x308] ss:$24 sps:$4 sm:$0xff]  }
 0x50c   : > { %7737 = vmatpush2.bf16.msra.mxu0 %v23708_v35  ;;  %v23795_v35 = vld [vmem:[%s33089_s5 + $0x310] ss:$24 sps:$4 sm:$0xff]  }
 0x50d   : > { %7823 = vmatpush2.bf16.msra.mxu1 %v23711_v50  ;;  %7738 = vmatprep.subr.bf16.mxu0 %v23716_v28  ;;  %v23800_v50 = vld [vmem:[%s33089_s5 + $0x51c] ss:$24 sps:$4 sm:$0xff]  }
 0x50e   : > { %7824 = vmatprep.subr.bf16.mxu1 %v23719_v61  ;;  %v23803_v28 = vld [vmem:[%s33089_s5 + $0x524] ss:$24 sps:$4 sm:$0xff]   ;;  %v23798_v61 = vld [vmem:[%s33089_s5 + $0x518] ss:$24 sps:$4 sm:$0xff]  }
 0x510   : > { %7739 = vmatpush2.bf16.msra.mxu0 %v23714_v52  ;;  %v23801_v52 = vld [vmem:[%s33089_s5 + $0x520] ss:$24 sps:$4 sm:$0xff]  }
 0x511   : > { %7825 = vmatpush2.bf16.msra.mxu1 %v23717_v27  ;;  %7740 = vmatprep.subr.bf16.mxu0 %v23722_v8  ;;  %v23806_v27 = vld [vmem:[%s33089_s5 + $0x4ec] ss:$24 sps:$4 sm:$0xff]  }
 0x512   : > { %7826 = vmatprep.subr.bf16.mxu1 %v23725_v14  ;;  %v23809_v8 = vld [vmem:[%s33089_s5 + $0x4f4] ss:$24 sps:$4 sm:$0xff]   ;;  %v23804_v14 = vld [vmem:[%s33089_s5 + $0x4e8] ss:$24 sps:$4 sm:$0xff]  }
 0x514   : > { %7741 = vmatpush2.bf16.msra.mxu0 %v23720_v26  ;;  %v23807_v26 = vld [vmem:[%s33089_s5 + $0x4f0] ss:$24 sps:$4 sm:$0xff]  }
 0x515   : > { %7827 = vmatpush2.bf16.msra.mxu1 %v23723_v19  ;;  %7742 = vmatprep.subr.bf16.mxu0 %v23728_v18  ;;  %v23812_v19 = vld [vmem:[%s33089_s5 + $0x4bc] ss:$24 sps:$4 sm:$0xff]  }
 0x516   : > { %7828 = vmatprep.subr.bf16.mxu1 %v23731_v43  ;;  %v23815_v18 = vld [vmem:[%s33089_s5 + $0x4c4] ss:$24 sps:$4 sm:$0xff]   ;;  %v23810_v43 = vld [vmem:[%s33089_s5 + $0x4b8] ss:$24 sps:$4 sm:$0xff]  }
 0x518   : > { %7743 = vmatpush2.bf16.msra.mxu0 %v23726_v55  ;;  %v23813_v55 = vld [vmem:[%s33089_s5 + $0x4c0] ss:$24 sps:$4 sm:$0xff]  }
 0x519   : > { %7829 = vmatpush2.bf16.msra.mxu1 %v23729_v15  ;;  %7744 = vmatprep.subr.bf16.mxu0 %v23734_v59  ;;  %v23818_v15 = vld [vmem:[%s33089_s5 + $0x48c] ss:$24 sps:$4 sm:$0xff]  }
 0x51a   : > { %7830 = vmatprep.subr.bf16.mxu1 %v23737_v60  ;;  %v23821_v59 = vld [vmem:[%s33089_s5 + $0x494] ss:$24 sps:$4 sm:$0xff]   ;;  %v23816_v60 = vld [vmem:[%s33089_s5 + $0x488] ss:$24 sps:$4 sm:$0xff]  }
 0x51c   : > { %7745 = vmatpush2.bf16.msra.mxu0 %v23732_v62  ;;  %v23819_v62 = vld [vmem:[%s33089_s5 + $0x490] ss:$24 sps:$4 sm:$0xff]  }
 0x51d   : > { %7831 = vmatpush2.bf16.msra.mxu1 %v23735_v20  ;;  %7746 = vmatprep.subr.bf16.mxu0 %v23740_v49  ;;  %v23824_v20 = vld [vmem:[%s33089_s5 + $0x164] ss:$24 sps:$4 sm:$0xff]   ;;  %v23827_v49 = vld [vmem:[%s33089_s5 + $0xbd4] ss:$24 sps:$4 sm:$0xff]  }
 0x51e   : > { %7832 = vmatprep.subr.bf16.mxu1 %v23743_v39  ;;  %v23822_v39 = vld [vmem:[%s33089_s5 + $0x160] ss:$24 sps:$4 sm:$0xff]  }
 0x520   : > { %7747 = vmatpush2.bf16.msra.mxu0 %v23738_v63  ;;  %v23825_v63 = vld [vmem:[%s33089_s5 + $0xbd0] ss:$24 sps:$4 sm:$0xff]  }
 0x521   : > { %7833 = vmatpush2.bf16.msra.mxu1 %v23741_v29  ;;  %7748 = vmatprep.subr.bf16.mxu0 %v23746_v5  ;;  %v23830_v29 = vld [vmem:[%s33089_s5 + $0x134] ss:$24 sps:$4 sm:$0xff]   ;;  %v23833_v5 = vld [vmem:[%s33089_s5 + $0xba4] ss:$24 sps:$4 sm:$0xff]  }
 0x522   : > { %7834 = vmatprep.subr.bf16.mxu1 %v23749_v32  ;;  %v28713_v32 = vrot.slane %v27899_v10, 1 }
 0x524   : > { %7749 = vmatpush2.bf16.msra.mxu0 %v23744_v33  ;;  %v23828_v33 = vld [vmem:[%s33089_s5 + $0x130] ss:$24 sps:$4 sm:$0xff]  }
 0x525   : > { %7835 = vmatpush2.bf16.msra.mxu1 %v23747_v21  ;;  %7847 = vmatprep.subr.bf16.mxu0 %v23752_v41  ;;  %v23831_v21 = vld [vmem:[%s33089_s5 + $0xba0] ss:$24 sps:$4 sm:$0xff]   ;;  %v23836_v41 = vld [vmem:[%s33089_s5 + $0x104] ss:$24 sps:$4 sm:$0xff]  }
 0x526   : > { %7933 = vmatprep.subr.bf16.mxu1 %v23755_v22  ;;  %v23839_v22 = vld [vmem:[%s33089_s5 + $0xb74] ss:$24 sps:$4 sm:$0xff]  }
 0x527   : > { %7751 = vmatmul.mubr.bf16.vlgmr.msra.gmra.mxu0 %v27897_v4 }
 0x528   : > { %7837 = vmatmul.mubr.bf16.vlgmr.msra.gmra.mxu1 %v27897_v4  ;;  %7848 = vmatpush1.bf16.msra.mxu0 %v23750_v6  ;;  %v23837_v6 = vld [vmem:[%s33089_s5 + $0xb70] ss:$24 sps:$4 sm:$0xff]  }
 0x529   : > { %20382 = vmatprep.mubr.msk.bf16.mxu0 %vm6614_vm6, %v27992_v46  ;;  %7934 = vmatpush1.bf16.msra.mxu1 %v23753_v11  ;;  %v23842_v11 = vld [vmem:[%s33089_s5 + $0xd4] ss:$24 sps:$4 sm:$0xff]  }
 0x52a   : > { %20383 = vmatprep.mubr.msk.bf16.mxu1 %vm6614_vm6, %v27992_v46  ;;  %7849 = vmatprep.subr.bf16.mxu0 %v23758_v36  ;;  %v23845_v36 = vld [vmem:[%s33089_s5 + $0xb44] ss:$24 sps:$4 sm:$0xff]  }
 0x52b   : > { %7935 = vmatprep.subr.bf16.mxu1 %v23761_v12  ;;  %v23840_v12 = vld [vmem:[%s33089_s5 + $0xd0] ss:$24 sps:$4 sm:$0xff]  }
 0x52c   : > { %7850 = vmatpush1.bf16.msra.mxu0 %v23756_v40  ;;  %v23843_v40 = vld [vmem:[%s33089_s5 + $0xb40] ss:$24 sps:$4 sm:$0xff]  }
 0x52d   : > { %7936 = vmatpush1.bf16.msra.mxu1 %v23759_v38  ;;  %7851 = vmatprep.subr.bf16.mxu0 %v23764_v17  ;;  %v23848_v38 = vld [vmem:[%s33089_s5 + $0xa4] ss:$24 sps:$4 sm:$0xff]   ;;  %v23851_v17 = vld [vmem:[%s33089_s5 + $0xb14] ss:$24 sps:$4 sm:$0xff]  }
 0x52e   : > { %7937 = vmatprep.subr.bf16.mxu1 %v23767_v48  ;;  %v23846_v48 = vld [vmem:[%s33089_s5 + $0xa0] ss:$24 sps:$4 sm:$0xff]  }
 0x530   : > { %7852 = vmatpush1.bf16.msra.mxu0 %v23762_v30  ;;  %v28756_v30 = vpop.f32.mrf.mxu1 }
 0x531   : > { %7938 = vmatpush1.bf16.msra.mxu1 %v23765_v54  ;;  %7853 = vmatprep.subr.bf16.mxu0 %v23770_v24  ;;  %v23849_v54 = vld [vmem:[%s33089_s5 + $0xb10] ss:$24 sps:$4 sm:$0xff]   ;;  %v23854_v24 = vld [vmem:[%s33089_s5 + $0x74] ss:$24 sps:$4 sm:$0xff]  }
 0x532   : > { %7939 = vmatprep.subr.bf16.mxu1 %v23773_v23  ;;  %v23857_v23 = vld [vmem:[%s33089_s5 + $0xae4] ss:$24 sps:$4 sm:$0xff]  }
 0x534   : > { %7854 = vmatpush1.bf16.msra.mxu0 %v23768_v58  ;;  %v23852_v58 = vld [vmem:[%s33089_s5 + $0x70] ss:$24 sps:$4 sm:$0xff]  }
 0x535   : > { %7940 = vmatpush1.bf16.msra.mxu1 %v23771_v2  ;;  %7855 = vmatprep.subr.bf16.mxu0 %v23776_v37  ;;  %v28770_v2 = vpop.f32.mrf.mxu1 }
 0x536   : > { %7941 = vmatprep.subr.bf16.mxu1 %v23779_v45  ;;  %v23855_v45 = vld [vmem:[%s33089_s5 + $0xae0] ss:$24 sps:$4 sm:$0xff]  }
 0x537   : > { %v28772_v37 = vpop.f32.mrf.mxu0 }
 0x538   : > { %7856 = vmatpush1.bf16.msra.mxu0 %v23774_v42  ;;  %v23860_v42 = vld [vmem:[%s33089_s5 + $0x44] ss:$24 sps:$4 sm:$0xff]  }
 0x539   : > { %7942 = vmatpush1.bf16.msra.mxu1 %v23777_v25  ;;  %7857 = vmatprep.subr.bf16.mxu0 %v23782_v57  ;;  %v23863_v25 = vld [vmem:[%s33089_s5 + $0xab4] ss:$24 sps:$4 sm:$0xff]   ;;  %v23858_v57 = vld [vmem:[%s33089_s5 + $0x40] ss:$24 sps:$4 sm:$0xff]  }
 0x53a   : > { %7943 = vmatprep.subr.bf16.mxu1 %v23785_v34  ;;  %v28786_v34 = vpop.f32.mrf.mxu1 }
 0x53c   : > { %7858 = vmatpush1.bf16.msra.mxu0 %v23780_v9  ;;  %v28788_v9 = vpop.f32.mrf.mxu0 }
 0x53d   : > { %7944 = vmatpush1.bf16.msra.mxu1 %v23783_v1  ;;  %7859 = vmatprep.subr.bf16.mxu0 %v23788_v13  ;;  %v23861_v1 = vld [vmem:[%s33089_s5 + $0xab0] ss:$24 sps:$4 sm:$0xff]   ;;  %v23866_v13 = vld [vmem:[%s33089_s5 + $0x14] ss:$24 sps:$4 sm:$0xff]  }
 0x53e   : > { %7945 = vmatprep.subr.bf16.mxu1 %v23791_v44  ;;  %v23869_v44 = vld [vmem:[%s33089_s5 + $0xa84] ss:$24 sps:$4 sm:$0xff]  }
 0x540   : > { %7860 = vmatpush1.bf16.msra.mxu0 %v23786_v31  ;;  %v23864_v31 = vld [vmem:[%s33089_s5 + $0x10] ss:$24 sps:$4 sm:$0xff]  }
 0x541   : > { %7946 = vmatpush1.bf16.msra.mxu1 %v23789_v47  ;;  %7861 = vmatprep.subr.bf16.mxu0 %v23794_v16  ;;  %v28802_v47 = vpop.f32.mrf.mxu1  ;;  %v28804_v16 = vpop.f32.mrf.mxu0 }
 0x542   : > { %7947 = vmatprep.subr.bf16.mxu1 %v23797_v53  ;;  %v23867_v53 = vld [vmem:[%s33089_s5 + $0xa80] ss:$24 sps:$4 sm:$0xff]  }
 0x544   : > { %7862 = vmatpush1.bf16.msra.mxu0 %v23792_v0  ;;  %v23872_v0 = vld [vmem:[%s33089_s5 + $0x2e4] ss:$24 sps:$4 sm:$0xff]  }
 0x545   : > { %7948 = vmatpush1.bf16.msra.mxu1 %v23795_v35  ;;  %7871 = vmatprep.subr.bf16.mxu0 %v23800_v50  ;;  %v23875_v35 = vld [vmem:[%s33089_s5 + $0xd54] ss:$24 sps:$4 sm:$0xff]   ;;  %v6781_v50 = vpop.f32.mrf.mxu1 }
 0x546   : > { %7957 = vmatprep.subr.bf16.mxu1 %v23803_v28  ;;  %v23870_v28 = vld [vmem:[%s33089_s5 + $0x2e0] ss:$24 sps:$4 sm:$0xff]  }
 0x548   : > { %7872 = vmatpush2.bf16.msra.mxu0 %v23798_v61  ;;  %v28818_v61 = vpop.f32.mrf.mxu0 }
 0x549   : > { %7958 = vmatpush2.bf16.msra.mxu1 %v23801_v52  ;;  %7873 = vmatprep.subr.bf16.mxu0 %v23806_v27  ;;  %v23873_v52 = vld [vmem:[%s33089_s5 + $0xd50] ss:$24 sps:$4 sm:$0xff]   ;;  %v23878_v27 = vld [vmem:[%s33089_s5 + $0x2b4] ss:$24 sps:$4 sm:$0xff]  }
 0x54a   : > { %7959 = vmatprep.subr.bf16.mxu1 %v23809_v8  ;;  %v23881_v8 = vld [vmem:[%s33089_s5 + $0xd24] ss:$24 sps:$4 sm:$0xff]  }
 0x54c   : > { %7874 = vmatpush2.bf16.msra.mxu0 %v23804_v14  ;;  %v6783_v14 = vpop.f32.mrf.mxu1 }
 0x54d   : > { %7960 = vmatpush2.bf16.msra.mxu1 %v23807_v26  ;;  %7875 = vmatprep.subr.bf16.mxu0 %v23812_v19 }
 0x54e   : > { %7961 = vmatprep.subr.bf16.mxu1 %v23815_v18  ;;  %v23876_v18 = vld [vmem:[%s33089_s5 + $0x2b0] ss:$24 sps:$4 sm:$0xff]  }
 0x550   : > { %7876 = vmatpush2.bf16.msra.mxu0 %v23810_v43 }
 0x551   : > { %7962 = vmatpush2.bf16.msra.mxu1 %v23813_v55  ;;  %7877 = vmatprep.subr.bf16.mxu0 %v23818_v15  ;;  %v23879_v55 = vld [vmem:[%s33089_s5 + $0xd20] ss:$24 sps:$4 sm:$0xff]   ;;  %v23884_v15 = vld [vmem:[%s33089_s5 + $0x284] ss:$24 sps:$4 sm:$0xff]  }
 0x552   : > { %7963 = vmatprep.subr.bf16.mxu1 %v23821_v59 }
 0x554   : > { %7878 = vmatpush2.bf16.msra.mxu0 %v23816_v60  ;;  %v23887_v60 = vld [vmem:[%s33089_s5 + $0xcf4] ss:$24 sps:$4 sm:$0xff]  }
 0x555   : > { %7964 = vmatpush2.bf16.msra.mxu1 %v23819_v62  ;;  %7890 = vmatprep.subr.bf16.mxu0 %v23824_v20  ;;  %v6785_v62 = vpop.f32.mrf.mxu1 }
 0x556   : > { %8999 = vmatprep.subr.bf16.mxu1 %v23827_v49 }
 0x557   : > { %7880 = vmatmul.mubr.bf16.vlgmr.msra.gmra.mxu0 %v27990_v51 }
 0x558   : > { %7966 = vmatmul.mubr.bf16.vlgmr.msra.gmra.mxu1 %v27990_v51  ;;  %7891 = vmatpush1.bf16.msra.mxu0 %v23822_v39  ;;  %v23882_v39 = vld [vmem:[%s33089_s5 + $0x280] ss:$24 sps:$4 sm:$0xff]  }
 0x559   : > { %7922 = vmatprep.mubr.bf16.mxu0 %v27899_v10  ;;  %9000 = vmatpush1.bf16.msra.mxu1 %v23825_v63  ;;  %v23834_v10 = vld [vmem:[%s33089_s5 + $0x100] ss:$24 sps:$4 sm:$0xff]   ;;  %v23885_v63 = vld [vmem:[%s33089_s5 + $0xcf0] ss:$24 sps:$4 sm:$0xff]  }
 0x55a   : > { %9031 = vmatprep.mubr.bf16.mxu1 %v28713_v32  ;;  %7892 = vmatprep.subr.bf16.mxu0 %v23830_v29  ;;  %v23890_v29 = vld [vmem:[%s33089_s5 + $0x254] ss:$24 sps:$4 sm:$0xff]  }
 0x55b   : > { %9001 = vmatprep.subr.bf16.mxu1 %v23833_v5  ;;  %v23893_v5 = vld [vmem:[%s33089_s5 + $0xcc4] ss:$24 sps:$4 sm:$0xff]  }
 0x55c   : > { %7893 = vmatpush1.bf16.msra.mxu0 %v23828_v33  ;;  %v23888_v33 = vld [vmem:[%s33089_s5 + $0x250] ss:$24 sps:$4 sm:$0xff]  }
 0x55d   : > { %9002 = vmatpush1.bf16.msra.mxu1 %v23831_v21  ;;  %7894 = vmatprep.subr.bf16.mxu0 %v23836_v41  ;;  %v23891_v21 = vld [vmem:[%s33089_s5 + $0xcc0] ss:$24 sps:$4 sm:$0xff]   ;;  %v23896_v41 = vld [vmem:[%s33089_s5 + $0x224] ss:$24 sps:$4 sm:$0xff]  }
 0x55e   : > { %9003 = vmatprep.subr.bf16.mxu1 %v23839_v22  ;;  %v23899_v22 = vld [vmem:[%s33089_s5 + $0xc94] ss:$24 sps:$4 sm:$0xff]  }
 0x560   : > { %7895 = vmatpush1.bf16.msra.mxu0 %v23834_v10  ;;  %v23894_v10 = vld [vmem:[%s33089_s5 + $0x220] ss:$24 sps:$4 sm:$0xff]  }
 0x561   : > { %9004 = vmatpush1.bf16.msra.mxu1 %v23837_v6  ;;  %7896 = vmatprep.subr.bf16.mxu0 %v23842_v11  ;;  %v23897_v6 = vld [vmem:[%s33089_s5 + $0xc90] ss:$24 sps:$4 sm:$0xff]   ;;  %v23902_v11 = vld [vmem:[%s33089_s5 + $0x1f4] ss:$24 sps:$4 sm:$0xff]  }
 0x562   : > { %9005 = vmatprep.subr.bf16.mxu1 %v23845_v36  ;;  %v23905_v36 = vld [vmem:[%s33089_s5 + $0xc64] ss:$24 sps:$4 sm:$0xff]  }
 0x564   : > { %7897 = vmatpush1.bf16.msra.mxu0 %v23840_v12  ;;  %v23900_v12 = vld [vmem:[%s33089_s5 + $0x1f0] ss:$24 sps:$4 sm:$0xff]  }
 0x565   : > { %9006 = vmatpush1.bf16.msra.mxu1 %v23843_v40  ;;  %7898 = vmatprep.subr.bf16.mxu0 %v23848_v38  ;;  %v23903_v40 = vld [vmem:[%s33089_s5 + $0xc60] ss:$24 sps:$4 sm:$0xff]   ;;  %v23908_v38 = vld [vmem:[%s33089_s5 + $0x1c4] ss:$24 sps:$4 sm:$0xff]  }
 0x566   : > { %9007 = vmatprep.subr.bf16.mxu1 %v23851_v17  ;;  %v23911_v17 = vld [vmem:[%s33089_s5 + $0xc34] ss:$24 sps:$4 sm:$0xff]  }
 0x568   : > { %7899 = vmatpush1.bf16.msra.mxu0 %v23846_v48  ;;  %v23906_v48 = vld [vmem:[%s33089_s5 + $0x1c0] ss:$24 sps:$4 sm:$0xff]  }
 0x569   : > { %9008 = vmatpush1.bf16.msra.mxu1 %v23849_v54  ;;  %7900 = vmatprep.subr.bf16.mxu0 %v23854_v24  ;;  %v23909_v54 = vld [vmem:[%s33089_s5 + $0xc30] ss:$24 sps:$4 sm:$0xff]   ;;  %v23914_v24 = vld [vmem:[%s33089_s5 + $0x194] ss:$24 sps:$4 sm:$0xff]  }
 0x56a   : > { %9009 = vmatprep.subr.bf16.mxu1 %v23857_v23  ;;  %v23917_v23 = vld [vmem:[%s33089_s5 + $0xc04] ss:$24 sps:$4 sm:$0xff]  }
 0x56c   : > { %7901 = vmatpush1.bf16.msra.mxu0 %v23852_v58  ;;  %v23912_v58 = vld [vmem:[%s33089_s5 + $0x190] ss:$24 sps:$4 sm:$0xff]  }
 0x56d   : > { %9010 = vmatpush1.bf16.msra.mxu1 %v23855_v45  ;;  %7902 = vmatprep.subr.bf16.mxu0 %v23860_v42  ;;  %v23915_v45 = vld [vmem:[%s33089_s5 + $0xc00] ss:$24 sps:$4 sm:$0xff]   ;;  %v23920_v42 = vld [vmem:[%s33089_s5 + $0xed4] ss:$24 sps:$4 sm:$0xff]  }
 0x56e   : > { %9011 = vmatprep.subr.bf16.mxu1 %v23863_v25  ;;  %v23923_v25 = vld [vmem:[%s33089_s5 + $0xedc] ss:$24 sps:$4 sm:$0xff]  }
 0x570   : > { %7903 = vmatpush1.bf16.msra.mxu0 %v23858_v57  ;;  %v23918_v57 = vld [vmem:[%s33089_s5 + $0xed0] ss:$24 sps:$4 sm:$0xff]  }
 0x571   : > { %9012 = vmatpush1.bf16.msra.mxu1 %v23861_v1  ;;  %7904 = vmatprep.subr.bf16.mxu0 %v23866_v13  ;;  %v23921_v1 = vld [vmem:[%s33089_s5 + $0xed8] ss:$24 sps:$4 sm:$0xff]   ;;  %v28926_v13 = vrot.slane %v27897_v4, 1 }
 0x572   : > { %9013 = vmatprep.subr.bf16.mxu1 %v23869_v44  ;;  %v23926_v44 = vld [vmem:[%s33089_s5 + $0xea4] ss:$24 sps:$4 sm:$0xff]  }
 0x574   : > { %7905 = vmatpush1.bf16.msra.mxu0 %v23864_v31  ;;  %v28933_v31 = vrot.slane %v27992_v46, 1  ;;  %v23932_v46 = vld [vmem:[%s33089_s5 + $0xe74] ss:$24 sps:$4 sm:$0xff]  }
 0x575   : > { %9014 = vmatpush1.bf16.msra.mxu1 %v23867_v53  ;;  %7906 = vmatprep.subr.bf16.mxu0 %v23872_v0  ;;  %v23929_v53 = vld [vmem:[%s33089_s5 + $0xeac] ss:$24 sps:$4 sm:$0xff]   ;;  %v23924_v0 = vld [vmem:[%s33089_s5 + $0xea0] ss:$24 sps:$4 sm:$0xff]  }
 0x576   : > { %9015 = vmatprep.subr.bf16.mxu1 %v23875_v35  ;;  %v23935_v35 = vld [vmem:[%s33089_s5 + $0xe7c] ss:$24 sps:$4 sm:$0xff]  }
 0x577   : > { %v6738_v26 = vpop.f32.mrf.mxu0 }
 0x578   : > { %v28829_v19 = vadd.f32 %v6781_v50, %v6738_v26  ;;  %7907 = vmatpush2.bf16.msra.mxu0 %v23870_v28  ;;  %v23930_v50 = vld [vmem:[%s33089_s5 + $0xe70] ss:$24 sps:$4 sm:$0xff]  }
 0x579   : > { %9016 = vmatpush2.bf16.msra.mxu1 %v23873_v52  ;;  %v6740_v43 = vpop.f32.mrf.mxu0  ;;  %7908 = vmatprep.subr.bf16.mxu0 %v23878_v27  ;;  %v23933_v28 = vld [vmem:[%s33089_s5 + $0xe78] ss:$24 sps:$4 sm:$0xff]   ;;  %v23938_v52 = vld [vmem:[%s33089_s5 + $0xe44] ss:$24 sps:$4 sm:$0xff]   ;;  %v23939_v26 = vld [vmem:[%s33089_s5 + $0xe48] ss:$24 sps:$4 sm:$0xff]  }
 0x57a   : > { %v28840_v59 = vadd.f32 %v6783_v14, %v6740_v43  ;;  %9017 = vmatprep.subr.bf16.mxu1 %v23881_v8  ;;  %v23941_v27 = vld [vmem:[%s33089_s5 + $0xe4c] ss:$24 sps:$4 sm:$0xff]   ;;  %v23936_v8 = vld [vmem:[%s33089_s5 + $0xe40] ss:$24 sps:$4 sm:$0xff]   ;;  %v28970_v14 = vpop.f32.mrf.mxu1  ;;  %v23947_v43 = vld [vmem:[%s33089_s5 + $0xe1c] ss:$24 sps:$4 sm:$0xff]  }
 0x57b   : > { %v6742_v20 = vpop.f32.mrf.mxu0 }
 0x57c   : > { %v28845_v49 = vadd.f32 %v6785_v62, %v6742_v20  ;;  %7909 = vmatpush2.bf16.msra.mxu0 %v23876_v18  ;;  %v23944_v18 = vld [vmem:[%s33089_s5 + $0xe14] ss:$24 sps:$4 sm:$0xff]   ;;  %v23945_v62 = vld [vmem:[%s33089_s5 + $0xe18] ss:$24 sps:$4 sm:$0xff]   ;;  %v23950_v20 = vld [vmem:[%s33089_s5 + $0xde4] ss:$24 sps:$4 sm:$0xff]  }
 0x57d   : > { %9018 = vmatpush2.bf16.msra.mxu1 %v23879_v55  ;;  %7910 = vmatprep.subr.bf16.mxu0 %v23884_v15  ;;  %v6824_v55 = vpop.f32.mrf.mxu1  ;;  %v23942_v15 = vld [vmem:[%s33089_s5 + $0xe10] ss:$24 sps:$4 sm:$0xff]  }
 0x57e   : > { %9019 = vmatprep.subr.bf16.mxu1 %v23887_v60  ;;  %v28984_v60 = vpop.f32.mrf.mxu0 }
 0x580   : > { %7911 = vmatpush2.bf16.msra.mxu0 %v23882_v39  ;;  %v23953_v39 = vld [vmem:[%s33089_s5 + $0xdec] ss:$24 sps:$4 sm:$0xff]  }
 0x581   : > { %9020 = vmatpush2.bf16.msra.mxu1 %v23885_v63  ;;  %7912 = vmatprep.subr.bf16.mxu0 %v23890_v29  ;;  %v6826_v63 = vpop.f32.mrf.mxu1 }
 0x582   : > { %9021 = vmatprep.subr.bf16.mxu1 %v23893_v5 }
 0x584   : > { %7913 = vmatpush2.bf16.msra.mxu0 %v23888_v33  ;;  %v23948_v33 = vld [vmem:[%s33089_s5 + $0xde0] ss:$24 sps:$4 sm:$0xff]  }
 0x585   : > { %9022 = vmatpush2.bf16.msra.mxu1 %v23891_v21  ;;  %7914 = vmatprep.subr.bf16.mxu0 %v23896_v41  ;;  %v23951_v41 = vld [vmem:[%s33089_s5 + $0xde8] ss:$24 sps:$4 sm:$0xff]  }
 0x586   : > { %9023 = vmatprep.subr.bf16.mxu1 %v23899_v22  ;;  %v23956_v22 = vld [vmem:[%s33089_s5 + $0xdb4] ss:$24 sps:$4 sm:$0xff]  }
 0x588   : > { %7915 = vmatpush2.bf16.msra.mxu0 %v23894_v10 }
 0x589   : > { %9024 = vmatpush2.bf16.msra.mxu1 %v23897_v6  ;;  %7916 = vmatprep.subr.bf16.mxu0 %v23902_v11  ;;  %v23959_v6 = vld [vmem:[%s33089_s5 + $0xdbc] ss:$24 sps:$4 sm:$0xff]   ;;  %v6828_v11 = vpop.f32.mrf.mxu1 }
 0x58a   : > { %9025 = vmatprep.subr.bf16.mxu1 %v23905_v36 }
 0x58c   : > { %7917 = vmatpush2.bf16.msra.mxu0 %v23900_v12 }
 0x58d   : > { %9026 = vmatpush2.bf16.msra.mxu1 %v23903_v40  ;;  %7918 = vmatprep.subr.bf16.mxu0 %v23908_v38  ;;  %v23954_v40 = vld [vmem:[%s33089_s5 + $0xdb0] ss:$24 sps:$4 sm:$0xff]  }
 0x58e   : > { %9027 = vmatprep.subr.bf16.mxu1 %v23911_v17  ;;  %v23957_v38 = vld [vmem:[%s33089_s5 + $0xdb8] ss:$24 sps:$4 sm:$0xff]   ;;  %v23962_v17 = vld [vmem:[%s33089_s5 + $0xd84] ss:$24 sps:$4 sm:$0xff]  }
 0x590   : > { %7919 = vmatpush2.bf16.msra.mxu0 %v23906_v48  ;;  %v23965_v48 = vld [vmem:[%s33089_s5 + $0xd8c] ss:$24 sps:$4 sm:$0xff]  }
 0x591   : > { %9028 = vmatpush2.bf16.msra.mxu1 %v23909_v54  ;;  %7920 = vmatprep.subr.bf16.mxu0 %v23914_v24  ;;  %v23960_v54 = vld [vmem:[%s33089_s5 + $0xd80] ss:$24 sps:$4 sm:$0xff]  }
 0x592   : > { %9029 = vmatprep.subr.bf16.mxu1 %v23917_v23  ;;  %v23963_v24 = vld [vmem:[%s33089_s5 + $0xd88] ss:$24 sps:$4 sm:$0xff]   ;;  %v23968_v23 = vld [vmem:[%s33089_s5 + $0xf94] ss:$24 sps:$4 sm:$0xff]  }
 0x594   : > { %7921 = vmatpush2.bf16.msra.mxu0 %v23912_v58  ;;  %v23971_v58 = vld [vmem:[%s33089_s5 + $0xf9c] ss:$24 sps:$4 sm:$0xff]  }
 0x595   : > { %9030 = vmatpush2.bf16.msra.mxu1 %v23915_v45  ;;  %9042 = vmatprep.subr.bf16.mxu0 %v23920_v42  ;;  %v23966_v45 = vld [vmem:[%s33089_s5 + $0xf90] ss:$24 sps:$4 sm:$0xff]  }
 0x596   : > { %9128 = vmatprep.subr.bf16.mxu1 %v23923_v25  ;;  %v23969_v42 = vld [vmem:[%s33089_s5 + $0xf98] ss:$24 sps:$4 sm:$0xff]   ;;  %v23974_v25 = vld [vmem:[%s33089_s5 + $0xf64] ss:$24 sps:$4 sm:$0xff]  }
 0x597   : > { %7923 = vmatmul.mubr.bf16.vlgmr.msra.gmra.mxu0 %v27897_v4  ;;  %v23927_v4 = vld [vmem:[%s33089_s5 + $0xea8] ss:$24 sps:$4 sm:$0xff]  }
 0x598   : > { %9032 = vmatmul.mubr.bf16.vlgmr.msra.gmra.mxu1 %v28926_v13  ;;  %9043 = vmatpush1.bf16.msra.mxu0 %v23918_v57  ;;  %v23977_v57 = vld [vmem:[%s33089_s5 + $0xf6c] ss:$24 sps:$4 sm:$0xff]  }
 0x599   : > { %20720 = vmatprep.mubr.msk.bf16.mxu0 %vm6614_vm6, %v28933_v31  ;;  %9129 = vmatpush1.bf16.msra.mxu1 %v23921_v1  ;;  %v23972_v1 = vld [vmem:[%s33089_s5 + $0xf60] ss:$24 sps:$4 sm:$0xff]  }
 0x59a   : > { %20721 = vmatprep.mubr.msk.bf16.mxu1 %vm6614_vm6, %v28933_v31  ;;  %9044 = vmatprep.subr.bf16.mxu0 %v23926_v44  ;;  %v23975_v44 = vld [vmem:[%s33089_s5 + $0xf68] ss:$24 sps:$4 sm:$0xff]  }
 0x59b   : > { %9130 = vmatprep.subr.bf16.mxu1 %v23929_v53  ;;  %v23980_v53 = vld [vmem:[%s33089_s5 + $0xf34] ss:$24 sps:$4 sm:$0xff]  }
 0x59c   : > { %9045 = vmatpush1.bf16.msra.mxu0 %v23924_v0  ;;  %v23983_v0 = vld [vmem:[%s33089_s5 + $0xf3c] ss:$24 sps:$4 sm:$0xff]  }
 0x59d   : > { %9131 = vmatpush1.bf16.msra.mxu1 %v23927_v4  ;;  %9046 = vmatprep.subr.bf16.mxu0 %v23932_v46  ;;  %v23978_v4 = vld [vmem:[%s33089_s5 + $0xf30] ss:$24 sps:$4 sm:$0xff]  }
 0x59e   : > { %9132 = vmatprep.subr.bf16.mxu1 %v23935_v35  ;;  %v23981_v46 = vld [vmem:[%s33089_s5 + $0xf38] ss:$24 sps:$4 sm:$0xff]   ;;  %v23986_v35 = vld [vmem:[%s33089_s5 + $0xf04] ss:$24 sps:$4 sm:$0xff]  }
 0x5a0   : > { %9047 = vmatpush1.bf16.msra.mxu0 %v23930_v50  ;;  %v23989_v50 = vld [vmem:[%s33089_s5 + $0xf0c] ss:$24 sps:$4 sm:$0xff]  }
 0x5a1   : > { %9133 = vmatpush1.bf16.msra.mxu1 %v23933_v28  ;;  %9048 = vmatprep.subr.bf16.mxu0 %v23938_v52  ;;  %v23984_v28 = vld [vmem:[%s33089_s5 + $0xf00] ss:$24 sps:$4 sm:$0xff]  }
 0x5a2   : > { %9134 = vmatprep.subr.bf16.mxu1 %v23941_v27  ;;  %v23987_v52 = vld [vmem:[%s33089_s5 + $0xf08] ss:$24 sps:$4 sm:$0xff]   ;;  %v23992_v27 = vld [vmem:[%s33089_s5 + $0xbdc] ss:$24 sps:$4 sm:$0xff]  }
 0x5a4   : > { %9049 = vmatpush1.bf16.msra.mxu0 %v23936_v8  ;;  %v23995_v8 = vld [vmem:[%s33089_s5 + $0xbe4] ss:$24 sps:$4 sm:$0xff]  }
 0x5a5   : > { %9135 = vmatpush1.bf16.msra.mxu1 %v23939_v26  ;;  %9050 = vmatprep.subr.bf16.mxu0 %v23944_v18  ;;  %v23990_v26 = vld [vmem:[%s33089_s5 + $0xbd8] ss:$24 sps:$4 sm:$0xff]   ;;  %v29089_v18 = vrot.slane %v27990_v51, 1  ;;  %v23996_v51 = vld [vmem:[%s33089_s5 + $0xba8] ss:$24 sps:$4 sm:$0xff]  }
 0x5a6   : > { %9136 = vmatprep.subr.bf16.mxu1 %v23947_v43  ;;  %v23993_v43 = vld [vmem:[%s33089_s5 + $0xbe0] ss:$24 sps:$4 sm:$0xff]  }
 0x5a7   : > { %v6867_v29 = vpop.f32.mrf.mxu0 }
 0x5a8   : > { %v28995_v5 = vadd.f32 %v6867_v29, %v6824_v55  ;;  %9051 = vmatpush1.bf16.msra.mxu0 %v23942_v15  ;;  %v23998_v55 = vld [vmem:[%s33089_s5 + $0xbac] ss:$24 sps:$4 sm:$0xff]   ;;  %v24005_v29 = vld [vmem:[%s33089_s5 + $0xb80] ss:$24 sps:$4 sm:$0xff]  }
 0x5a9   : > { %9137 = vmatpush1.bf16.msra.mxu1 %v23945_v62  ;;  %v6869_v21 = vpop.f32.mrf.mxu0  ;;  %9052 = vmatprep.subr.bf16.mxu0 %v23950_v20  ;;  %v24001_v15 = vld [vmem:[%s33089_s5 + $0xbb4] ss:$24 sps:$4 sm:$0xff]   ;;  %v23999_v62 = vld [vmem:[%s33089_s5 + $0xbb0] ss:$24 sps:$4 sm:$0xff]  }
 0x5aa   : > { %v29006_v10 = vadd.f32 %v6869_v21, %v6826_v63  ;;  %9138 = vmatprep.subr.bf16.mxu1 %v23953_v39  ;;  %v24004_v20 = vld [vmem:[%s33089_s5 + $0xb7c] ss:$24 sps:$4 sm:$0xff]   ;;  %v24002_v63 = vld [vmem:[%s33089_s5 + $0xb78] ss:$24 sps:$4 sm:$0xff]   ;;  %v24008_v21 = vld [vmem:[%s33089_s5 + $0xb48] ss:$24 sps:$4 sm:$0xff]  }
 0x5ab   : > { %v6871_v36 = vpop.f32.mrf.mxu0  ;;  %v24007_v39 = vld [vmem:[%s33089_s5 + $0xb84] ss:$24 sps:$4 sm:$0xff]  }
 0x5ac   : > { %v29011_v12 = vadd.f32 %v6871_v36, %v6828_v11  ;;  %9053 = vmatpush1.bf16.msra.mxu0 %v23948_v33  ;;  %v24013_v33 = vld [vmem:[%s33089_s5 + $0xb54] ss:$24 sps:$4 sm:$0xff]   ;;  %v24014_v11 = vld [vmem:[%s33089_s5 + $0xb18] ss:$24 sps:$4 sm:$0xff]  }
 0x5ad   : > { %9139 = vmatpush1.bf16.msra.mxu1 %v23951_v41  ;;  %9054 = vmatprep.subr.bf16.mxu0 %v23956_v22  ;;  %v24011_v41 = vld [vmem:[%s33089_s5 + $0xb50] ss:$24 sps:$4 sm:$0xff]   ;;  %v24016_v22 = vld [vmem:[%s33089_s5 + $0xb1c] ss:$24 sps:$4 sm:$0xff]   ;;  %v24017_v36 = vld [vmem:[%s33089_s5 + $0xb20] ss:$24 sps:$4 sm:$0xff]  }
 0x5ae   : > { %9140 = vmatprep.subr.bf16.mxu1 %v23959_v6  ;;  %v24019_v6 = vld [vmem:[%s33089_s5 + $0xb24] ss:$24 sps:$4 sm:$0xff]  }
 0x5b0   : > { %9055 = vmatpush1.bf16.msra.mxu0 %v23954_v40  ;;  %v24022_v40 = vld [vmem:[%s33089_s5 + $0xaec] ss:$24 sps:$4 sm:$0xff]  }
 0x5b1   : > { %9141 = vmatpush1.bf16.msra.mxu1 %v23957_v38  ;;  %9056 = vmatprep.subr.bf16.mxu0 %v23962_v17  ;;  %v24025_v38 = vld [vmem:[%s33089_s5 + $0xaf4] ss:$24 sps:$4 sm:$0xff]   ;;  %v29152_v17 = vpop.f32.mrf.mxu1 }
 0x5b2   : > { %9142 = vmatprep.subr.bf16.mxu1 %v23965_v48  ;;  %v24020_v48 = vld [vmem:[%s33089_s5 + $0xae8] ss:$24 sps:$4 sm:$0xff]  }
 0x5b4   : > { %9057 = vmatpush1.bf16.msra.mxu0 %v23960_v54  ;;  %v24023_v54 = vld [vmem:[%s33089_s5 + $0xaf0] ss:$24 sps:$4 sm:$0xff]  }
 0x5b5   : > { %9143 = vmatpush1.bf16.msra.mxu1 %v23963_v24  ;;  %9066 = vmatprep.subr.bf16.mxu0 %v23968_v23  ;;  %v24028_v24 = vld [vmem:[%s33089_s5 + $0xabc] ss:$24 sps:$4 sm:$0xff]   ;;  %v29163_v23 = vpop.f32.mrf.mxu1 }
 0x5b6   : > { %9152 = vmatprep.subr.bf16.mxu1 %v23971_v58  ;;  %v24031_v58 = vld [vmem:[%s33089_s5 + $0xac4] ss:$24 sps:$4 sm:$0xff]  }
 0x5b8   : > { %9067 = vmatpush2.bf16.msra.mxu0 %v23966_v45  ;;  %v24026_v45 = vld [vmem:[%s33089_s5 + $0xab8] ss:$24 sps:$4 sm:$0xff]  }
 0x5b9   : > { %9153 = vmatpush2.bf16.msra.mxu1 %v23969_v42  ;;  %9068 = vmatprep.subr.bf16.mxu0 %v23974_v25  ;;  %v24029_v42 = vld [vmem:[%s33089_s5 + $0xac0] ss:$24 sps:$4 sm:$0xff]   ;;  %v24034_v25 = vld [vmem:[%s33089_s5 + $0xa8c] ss:$24 sps:$4 sm:$0xff]  }
 0x5ba   : > { %9154 = vmatprep.subr.bf16.mxu1 %v23977_v57  ;;  %v29177_v57 = vpop.f32.mrf.mxu1 }
 0x5bc   : > { %9069 = vmatpush2.bf16.msra.mxu0 %v23972_v1  ;;  %v24037_v1 = vld [vmem:[%s33089_s5 + $0xa94] ss:$24 sps:$4 sm:$0xff]  }
 0x5bd   : > { %9155 = vmatpush2.bf16.msra.mxu1 %v23975_v44  ;;  %9070 = vmatprep.subr.bf16.mxu0 %v23980_v53  ;;  %v24032_v44 = vld [vmem:[%s33089_s5 + $0xa88] ss:$24 sps:$4 sm:$0xff]  }
 0x5be   : > { %9156 = vmatprep.subr.bf16.mxu1 %v23983_v0  ;;  %v24035_v53 = vld [vmem:[%s33089_s5 + $0xa90] ss:$24 sps:$4 sm:$0xff]   ;;  %v24040_v0 = vld [vmem:[%s33089_s5 + $0xd5c] ss:$24 sps:$4 sm:$0xff]  }
 0x5c0   : > { %9071 = vmatpush2.bf16.msra.mxu0 %v23978_v4  ;;  %v29191_v4 = vpop.f32.mrf.mxu1 }
 0x5c1   : > { %9157 = vmatpush2.bf16.msra.mxu1 %v23981_v46  ;;  %9072 = vmatprep.subr.bf16.mxu0 %v23986_v35  ;;  %v24043_v46 = vld [vmem:[%s33089_s5 + $0xd64] ss:$24 sps:$4 sm:$0xff]   ;;  %v24038_v35 = vld [vmem:[%s33089_s5 + $0xd58] ss:$24 sps:$4 sm:$0xff]  }
 0x5c2   : > { %9158 = vmatprep.subr.bf16.mxu1 %v23989_v50  ;;  %v24041_v50 = vld [vmem:[%s33089_s5 + $0xd60] ss:$24 sps:$4 sm:$0xff]  }
 0x5c4   : > { %9073 = vmatpush2.bf16.msra.mxu0 %v23984_v28  ;;  %v24046_v28 = vld [vmem:[%s33089_s5 + $0xd2c] ss:$24 sps:$4 sm:$0xff]  }
 0x5c5   : > { %9159 = vmatpush2.bf16.msra.mxu1 %v23987_v52  ;;  %9085 = vmatprep.subr.bf16.mxu0 %v23992_v27  ;;  %v29205_v52 = vpop.f32.mrf.mxu1  ;;  %v24049_v27 = vld [vmem:[%s33089_s5 + $0xd34] ss:$24 sps:$4 sm:$0xff]  }
 0x5c6   : > { %9171 = vmatprep.subr.bf16.mxu1 %v23995_v8 }
 0x5c7   : > { %9075 = vmatmul.mubr.bf16.vlgmr.msra.gmra.mxu0 %v29089_v18 }
 0x5c8   : > { %9161 = vmatmul.mubr.bf16.vlgmr.msra.gmra.mxu1 %v29089_v18  ;;  %9086 = vmatpush1.bf16.msra.mxu0 %v23990_v26  ;;  %v24044_v26 = vld [vmem:[%s33089_s5 + $0xd28] ss:$24 sps:$4 sm:$0xff]  }
 0x5c9   : > { %9117 = vmatprep.mubr.bf16.mxu0 %v28713_v32  ;;  %9172 = vmatpush1.bf16.msra.mxu1 %v23993_v43 }
 0x5ca   : > { %9203 = vmatprep.mubr.bf16.mxu1 %v28713_v32  ;;  %9087 = vmatprep.subr.bf16.mxu0 %v23998_v55  ;;  %v24010_v32 = vld [vmem:[%s33089_s5 + $0xb4c] ss:$24 sps:$4 sm:$0xff]   ;;  %v24047_v55 = vld [vmem:[%s33089_s5 + $0xd30] ss:$24 sps:$4 sm:$0xff]  }
 0x5cb   : > { %9173 = vmatprep.subr.bf16.mxu1 %v24001_v15  ;;  %v24052_v15 = vld [vmem:[%s33089_s5 + $0xcfc] ss:$24 sps:$4 sm:$0xff]  }
 0x5cc   : > { %9088 = vmatpush1.bf16.msra.mxu0 %v23996_v51 }
 0x5cd   : > { %9174 = vmatpush1.bf16.msra.mxu1 %v23999_v62  ;;  %9089 = vmatprep.subr.bf16.mxu0 %v24004_v20  ;;  %v24055_v62 = vld [vmem:[%s33089_s5 + $0xd04] ss:$24 sps:$4 sm:$0xff]  }
 0x5ce   : > { %9175 = vmatprep.subr.bf16.mxu1 %v24007_v39  ;;  %v24050_v39 = vld [vmem:[%s33089_s5 + $0xcf8] ss:$24 sps:$4 sm:$0xff]  }
 0x5d0   : > { %9090 = vmatpush1.bf16.msra.mxu0 %v24002_v63 }
 0x5d1   : > { %9176 = vmatpush1.bf16.msra.mxu1 %v24005_v29  ;;  %9091 = vmatprep.subr.bf16.mxu0 %v24010_v32  ;;  %v24053_v29 = vld [vmem:[%s33089_s5 + $0xd00] ss:$24 sps:$4 sm:$0xff]   ;;  %v24061_v32 = vld [vmem:[%s33089_s5 + $0xcd4] ss:$24 sps:$4 sm:$0xff]  }
 0x5d2   : > { %9177 = vmatprep.subr.bf16.mxu1 %v24013_v33  ;;  %v24059_v33 = vld [vmem:[%s33089_s5 + $0xcd0] ss:$24 sps:$4 sm:$0xff]  }
 0x5d4   : > { %9092 = vmatpush1.bf16.msra.mxu0 %v24008_v21  ;;  %v24064_v21 = vld [vmem:[%s33089_s5 + $0xc9c] ss:$24 sps:$4 sm:$0xff]  }
 0x5d5   : > { %9178 = vmatpush1.bf16.msra.mxu1 %v24011_v41  ;;  %9093 = vmatprep.subr.bf16.mxu0 %v24016_v22  ;;  %v24067_v41 = vld [vmem:[%s33089_s5 + $0xca4] ss:$24 sps:$4 sm:$0xff]   ;;  %v24062_v22 = vld [vmem:[%s33089_s5 + $0xc98] ss:$24 sps:$4 sm:$0xff]  }
 0x5d6   : > { %9179 = vmatprep.subr.bf16.mxu1 %v24019_v6  ;;  %v24065_v6 = vld [vmem:[%s33089_s5 + $0xca0] ss:$24 sps:$4 sm:$0xff]  }
 0x5d8   : > { %9094 = vmatpush1.bf16.msra.mxu0 %v24014_v11  ;;  %v24070_v11 = vld [vmem:[%s33089_s5 + $0xc6c] ss:$24 sps:$4 sm:$0xff]  }
 0x5d9   : > { %9180 = vmatpush1.bf16.msra.mxu1 %v24017_v36  ;;  %9095 = vmatprep.subr.bf16.mxu0 %v24022_v40  ;;  %v24073_v36 = vld [vmem:[%s33089_s5 + $0xc74] ss:$24 sps:$4 sm:$0xff]   ;;  %v24068_v40 = vld [vmem:[%s33089_s5 + $0xc68] ss:$24 sps:$4 sm:$0xff]  }
 0x5da   : > { %9181 = vmatprep.subr.bf16.mxu1 %v24025_v38  ;;  %v24071_v38 = vld [vmem:[%s33089_s5 + $0xc70] ss:$24 sps:$4 sm:$0xff]  }
 0x5dc   : > { %9096 = vmatpush1.bf16.msra.mxu0 %v24020_v48  ;;  %v24076_v48 = vld [vmem:[%s33089_s5 + $0xc3c] ss:$24 sps:$4 sm:$0xff]  }
 0x5dd   : > { %9182 = vmatpush1.bf16.msra.mxu1 %v24023_v54  ;;  %9097 = vmatprep.subr.bf16.mxu0 %v24028_v24  ;;  %v24079_v54 = vld [vmem:[%s33089_s5 + $0xc44] ss:$24 sps:$4 sm:$0xff]   ;;  %v24074_v24 = vld [vmem:[%s33089_s5 + $0xc38] ss:$24 sps:$4 sm:$0xff]  }
 0x5de   : > { %9183 = vmatprep.subr.bf16.mxu1 %v24031_v58  ;;  %v24077_v58 = vld [vmem:[%s33089_s5 + $0xc40] ss:$24 sps:$4 sm:$0xff]  }
 0x5e0   : > { %9098 = vmatpush1.bf16.msra.mxu0 %v24026_v45  ;;  %v24082_v45 = vld [vmem:[%s33089_s5 + $0xc0c] ss:$24 sps:$4 sm:$0xff]  }
 0x5e1   : > { %9184 = vmatpush1.bf16.msra.mxu1 %v24029_v42  ;;  %9099 = vmatprep.subr.bf16.mxu0 %v24034_v25  ;;  %v24085_v42 = vld [vmem:[%s33089_s5 + $0xc14] ss:$24 sps:$4 sm:$0xff]   ;;  %v24080_v25 = vld [vmem:[%s33089_s5 + $0xc08] ss:$24 sps:$4 sm:$0xff]  }
 0x5e2   : > { %9185 = vmatprep.subr.bf16.mxu1 %v24037_v1  ;;  %v24083_v1 = vld [vmem:[%s33089_s5 + $0xc10] ss:$24 sps:$4 sm:$0xff]  }
 0x5e4   : > { %9100 = vmatpush1.bf16.msra.mxu0 %v24032_v44  ;;  %v24088_v44 = vld [vmem:[%s33089_s5 + $0xee4] ss:$24 sps:$4 sm:$0xff]  }
 0x5e5   : > { %9186 = vmatpush1.bf16.msra.mxu1 %v24035_v53  ;;  %9101 = vmatprep.subr.bf16.mxu0 %v24040_v0  ;;  %v24086_v53 = vld [vmem:[%s33089_s5 + $0xee0] ss:$24 sps:$4 sm:$0xff]   ;;  %v24091_v0 = vld [vmem:[%s33089_s5 + $0xeb4] ss:$24 sps:$4 sm:$0xff]  }
 0x5e6   : > { %9187 = vmatprep.subr.bf16.mxu1 %v24043_v46  ;;  %v29306_v46 = vpop.f32.mrf.mxu0 }
 0x5e8   : > { %v7838_v8 = vpop.f32.mrf.mxu1  ;;  %9102 = vmatpush2.bf16.msra.mxu0 %v24038_v35  ;;  %v24089_v35 = vld [vmem:[%s33089_s5 + $0xeb0] ss:$24 sps:$4 sm:$0xff]  }
 0x5e9   : > { %v29214_v43 = vadd.f32 %v7838_v8, %v28829_v19  ;;  %9188 = vmatpush2.bf16.msra.mxu1 %v24041_v50  ;;  %9103 = vmatprep.subr.bf16.mxu0 %v24046_v28  ;;  %v29313_v50 = vpop.f32.mrf.mxu0  ;;  %v24094_v28 = vld [vmem:[%s33089_s5 + $0xe84] ss:$24 sps:$4 sm:$0xff]   ;;  %v24097_v8 = vld [vmem:[%s33089_s5 + $0xe54] ss:$24 sps:$4 sm:$0xff]  }
 0x5ea   : > { %v7840_v51 = vpop.f32.mrf.mxu1  ;;  %9189 = vmatprep.subr.bf16.mxu1 %v24049_v27 }
 0x5eb   : > { %v29226_v20 = vadd.f32 %v7840_v51, %v28840_v59  ;;  %v24058_v59 = vld [vmem:[%s33089_s5 + $0xccc] ss:$24 sps:$4 sm:$0xff]   ;;  %v29324_v27 = vpop.f32.mrf.mxu0 }
 0x5ec   : > { %v7842_v19 = vpop.f32.mrf.mxu1  ;;  %9104 = vmatpush2.bf16.msra.mxu0 %v24044_v26 }
 0x5ed   : > { %v29232_v63 = vadd.f32 %v7842_v19, %v28845_v49  ;;  %9190 = vmatpush2.bf16.msra.mxu1 %v24047_v55  ;;  %9105 = vmatprep.subr.bf16.mxu0 %v24052_v15  ;;  %v24056_v49 = vld [vmem:[%s33089_s5 + $0xcc8] ss:$24 sps:$4 sm:$0xff]   ;;  %v29332_v26 = vpop.f32.mrf.mxu0  ;;  %v24100_v55 = vld [vmem:[%s33089_s5 + $0xe24] ss:$24 sps:$4 sm:$0xff]  }
 0x5ee   : > { %9191 = vmatprep.subr.bf16.mxu1 %v24055_v62  ;;  %v24098_v15 = vld [vmem:[%s33089_s5 + $0xe20] ss:$24 sps:$4 sm:$0xff]   ;;  %v24103_v62 = vld [vmem:[%s33089_s5 + $0xdf4] ss:$24 sps:$4 sm:$0xff]  }
 0x5ef   : > { %v29340_v51 = vpop.f32.mrf.mxu0 }
 0x5f0   : > { %9106 = vmatpush2.bf16.msra.mxu0 %v24050_v39 }
 0x5f1   : > { %9192 = vmatpush2.bf16.msra.mxu1 %v24053_v29  ;;  %9107 = vmatprep.subr.bf16.mxu0 %v24058_v59  ;;  %v24101_v29 = vld [vmem:[%s33089_s5 + $0xdf0] ss:$24 sps:$4 sm:$0xff]  }
 0x5f2   : > { %9193 = vmatprep.subr.bf16.mxu1 %v24061_v32  ;;  %v24106_v32 = vld [vmem:[%s33089_s5 + $0xdc4] ss:$24 sps:$4 sm:$0xff]  }
 0x5f4   : > { %9108 = vmatpush2.bf16.msra.mxu0 %v24056_v49 }
 0x5f5   : > { %9194 = vmatpush2.bf16.msra.mxu1 %v24059_v33  ;;  %9109 = vmatprep.subr.bf16.mxu0 %v24064_v21 }
 0x5f6   : > { %9195 = vmatprep.subr.bf16.mxu1 %v24067_v41  ;;  %v24109_v41 = vld [vmem:[%s33089_s5 + $0xd94] ss:$24 sps:$4 sm:$0xff]  }
 0x5f8   : > { %9110 = vmatpush2.bf16.msra.mxu0 %v24062_v22  ;;  %v24110_v22 = vld [vmem:[%s33089_s5 + $0xfa0] ss:$24 sps:$4 sm:$0xff]  }
 0x5f9   : > { %9196 = vmatpush2.bf16.msra.mxu1 %v24065_v6  ;;  %9111 = vmatprep.subr.bf16.mxu0 %v24070_v11  ;;  %v24115_v6 = vld [vmem:[%s33089_s5 + $0xf74] ss:$24 sps:$4 sm:$0xff]   ;;  %v24113_v11 = vld [vmem:[%s33089_s5 + $0xf70] ss:$24 sps:$4 sm:$0xff]  }
 0x5fa   : > { %9197 = vmatprep.subr.bf16.mxu1 %v24073_v36  ;;  %v24118_v36 = vld [vmem:[%s33089_s5 + $0xf44] ss:$24 sps:$4 sm:$0xff]  }
 0x5fc   : > { %9112 = vmatpush2.bf16.msra.mxu0 %v24068_v40  ;;  %v24116_v40 = vld [vmem:[%s33089_s5 + $0xf40] ss:$24 sps:$4 sm:$0xff]  }
 0x5fd   : > { %9198 = vmatpush2.bf16.msra.mxu1 %v24071_v38  ;;  %9113 = vmatprep.subr.bf16.mxu0 %v24076_v48  ;;  %v24121_v38 = vld [vmem:[%s33089_s5 + $0xf14] ss:$24 sps:$4 sm:$0xff]   ;;  %v24119_v48 = vld [vmem:[%s33089_s5 + $0xf10] ss:$24 sps:$4 sm:$0xff]  }
 0x5fe   : > { %9199 = vmatprep.subr.bf16.mxu1 %v24079_v54  ;;  %v29395_v54 = vpop.f32.mrf.mxu1 }
 0x600   : > { %9114 = vmatpush2.bf16.msra.mxu0 %v24074_v24 }
 0x601   : > { %9200 = vmatpush2.bf16.msra.mxu1 %v24077_v58  ;;  %9115 = vmatprep.subr.bf16.mxu0 %v24082_v45 }
 0x602   : > { %9201 = vmatprep.subr.bf16.mxu1 %v24085_v42 }
 0x604   : > { %9116 = vmatpush2.bf16.msra.mxu0 %v24080_v25 }
 0x605   : > { %9202 = vmatpush2.bf16.msra.mxu1 %v24083_v1  ;;  %9214 = vmatprep.subr.bf16.mxu0 %v24088_v44 }
 0x607   : > { %9118 = vmatmul.mubr.bf16.vlgmr.msra.gmra.mxu0 %v28926_v13 }
 0x608   : > { %9204 = vmatmul.mubr.bf16.vlgmr.msra.gmra.mxu1 %v28926_v13  ;;  %9215 = vmatpush1.bf16.msra.mxu0 %v24086_v53  ;;  %v24092_v13 = vld [vmem:[%s33089_s5 + $0xe80] ss:$24 sps:$4 sm:$0xff]  }
 0x609   : > { %20722 = vmatprep.mubr.msk.bf16.mxu0 %vm6614_vm6, %v28933_v31  ;;  %9216 = vmatprep.subr.bf16.mxu0 %v24091_v0  ;;  %v24095_v31 = vld [vmem:[%s33089_s5 + $0xe50] ss:$24 sps:$4 sm:$0xff]  }
 0x60a   : > { %9468 = vmatprep.mubr.bf16.mxu1 %v33155_v7 }
 0x60c   : > { %9217 = vmatpush1.bf16.msra.mxu0 %v24089_v35 }
 0x60d   : > { %9218 = vmatprep.subr.bf16.mxu0 %v24094_v28 }
 0x610   : > { %9219 = vmatpush1.bf16.msra.mxu0 %v24092_v13 }
 0x611   : > { %9220 = vmatprep.subr.bf16.mxu0 %v24097_v8 }
 0x614   : > { %9221 = vmatpush1.bf16.msra.mxu0 %v24095_v31 }
 0x615   : > { %9222 = vmatprep.subr.bf16.mxu0 %v24100_v55  ;;  %v6698_v55 = vadd.f32 %v28788_v9, %v28770_v2 }
 0x617   : > { %v7881_v19 = vpop.f32.mrf.mxu0 }
 0x618   : > { %v29346_v39 = vadd.f32 %v7881_v19, %v29214_v43  ;;  %9223 = vmatpush1.bf16.msra.mxu0 %v24098_v15  ;;  %v24104_v43 = vld [vmem:[%s33089_s5 + $0xdc0] ss:$24 sps:$4 sm:$0xff]   ;;  %v7967_v24 = vpop.f32.mrf.mxu1 }
 0x619   : > { %v7883_v59 = vpop.f32.mrf.mxu0  ;;  %9224 = vmatprep.subr.bf16.mxu0 %v24103_v62 }
 0x61a   : > { %v29355_v49 = vadd.f32 %v7883_v59, %v29226_v20  ;;  %v24107_v20 = vld [vmem:[%s33089_s5 + $0xd90] ss:$24 sps:$4 sm:$0xff]   ;;  %v7969_v25 = vpop.f32.mrf.mxu1  ;;  %v29423_v59 = vld [vmem:[%s33090_s6] sm:$0x3f] }
 0x61b   : > { %v7885_v33 = vpop.f32.mrf.mxu0 }
 0x61c   : > { %v29358_v21 = vadd.f32 %v7885_v33, %v29232_v63  ;;  %9225 = vmatpush1.bf16.msra.mxu0 %v24101_v29  ;;  %v24112_v63 = vld [vmem:[%s33089_s5 + $0xfa4] ss:$24 sps:$4 sm:$0xff]   ;;  %v7971_v28 = vpop.f32.mrf.mxu1  ;;  %v33160_v33 = vld [vmem:[#allocation20_spill] sm:$0xff] }
 0x61d   : > { %9226 = vmatprep.subr.bf16.mxu0 %v24106_v32  ;;  %v29397_v58 = vpop.f32.mrf.mxu0 }
 0x61e   : > { %v29408_v8 = vpop.f32.mrf.mxu1 }
 0x620   : > { %9227 = vmatpush1.bf16.msra.mxu0 %v24104_v43  ;;  %v9274_v43 = vrot.slane %v29423_v59, %v33160_v33 }
 0x621   : > { %9228 = vmatprep.subr.bf16.mxu0 %v24109_v41 }
 0x624   : > { %9229 = vmatpush1.bf16.msra.mxu0 %v24107_v20 }
 0x625   : > { %9238 = vmatprep.subr.bf16.mxu0 %v24112_v63 }
 0x628   : > { %9239 = vmatpush2.bf16.msra.mxu0 %v24110_v22 }
 0x629   : > { %9240 = vmatprep.subr.bf16.mxu0 %v24115_v6 }
 0x62c   : > { %9241 = vmatpush2.bf16.msra.mxu0 %v24113_v11 }
 0x62d   : > { %9242 = vmatprep.subr.bf16.mxu0 %v24118_v36 }
 0x630   : > { %9243 = vmatpush2.bf16.msra.mxu0 %v24116_v40 }
 0x631   : > { %9244 = vmatprep.subr.bf16.mxu0 %v24121_v38 }
 0x634   : > { %9245 = vmatpush2.bf16.msra.mxu0 %v24119_v48 }
 0x637   : > { %9247 = vmatmul.mubr.bf16.vlgmr.msra.gmra.mxu0 %v29089_v18 }
 0x638   : > { %9386 = vmatprep.mubr.bf16.mxu0 %v33155_v7 }
 0x657   : > { %v7924_v45 = vpop.f32.mrf.mxu0 }
 0x658   : > { %v7925_v42 = vadd.f32 %v7924_v45, %v28995_v5  ;;  %v9033_v31 = vpop.f32.mrf.mxu1  ;;  %v6696_v5 = vadd.f32 %v28772_v37, %v28756_v30  ;;  %v6702_v30 = vadd.f32 %v28818_v61, %v28802_v47  ;;  %v33161_v61 = vld [vmem:[#allocation21_spill] sm:$0xff] }
 0x659   : > { %v7926_v1 = vpop.f32.mrf.mxu0 }
 0x65a   : > { %v29400_v44 = vadd.f32 %v7967_v24, %v7925_v42  ;;  %v7927_v53 = vadd.f32 %v7926_v1, %v29006_v10  ;;  %v7753_v15 = vadd.f32 %v29313_v50, %v6696_v5  ;;  %v7755_v10 = vadd.f32 %v29324_v27, %v6698_v55  ;;  %v9035_v62 = vpop.f32.mrf.mxu1 }
 0x65b   : > { %v7928_v0 = vpop.f32.mrf.mxu0 }
 0x65c   : > { %v29403_v35 = vadd.f32 %v7969_v25, %v7927_v53  ;;  %v7929_v18 = vadd.f32 %v7928_v0, %v29011_v12  ;;  %v6700_v12 = vadd.f32 %v28804_v16, %v28786_v34  ;;  %v7796_v2 = vadd.f32 %v29163_v23, %v7753_v15  ;;  %v9037_v27 = vpop.f32.mrf.mxu1 }
 0x65d   : > { %v29416_v19 = vpop.f32.mrf.mxu0  ;;  %v7798_v50 = vadd.f32 %v29177_v57, %v7755_v10  ;;  %v7759_v34 = vadd.f32 %v29340_v51, %v6702_v30  ;;  %v9278_v23 = vrot.slane %v29423_v59, %v33161_v61  ;;  %v6788_v10 = vadd.f32 %v28970_v14, %v28984_v60 }
 0x65e   : > { %v29406_v13 = vadd.f32 %v7971_v28, %v7929_v18  ;;  %v7757_v37 = vadd.f32 %v29332_v26, %v6700_v12  ;;  %v9039_v22 = vpop.f32.mrf.mxu1  ;;  %v33162_v12 = vld [vmem:[#allocation22_spill] sm:$0xff] }
 0x65f   : > { %v7802_v57 = vadd.f32 %v29205_v52, %v7759_v34  ;;  %v29442_v52 = vld [vmem:[%s33091_s7] sm:$0x7] }
 0x660   : > { %v7800_v63 = vadd.f32 %v29191_v4, %v7757_v37  ;;  %v7845_v37 = vadd.f32 %v29395_v54, %v6788_v10 }
 0x687   : > { %v9076_v29 = vpop.f32.mrf.mxu0 }
 0x688   : > { %v9077_v9 = vadd.f32 %v9076_v29, %v9033_v31  ;;  %v9162_v18 = vpop.f32.mrf.mxu1  ;;  %v9282_v29 = vrot.slane %v29423_v59, %v33162_v12 }
 0x689   : > { %v9078_v32 = vpop.f32.mrf.mxu0 }
 0x68a   : > { %v9257_v16 = vadd.f32 %v9077_v9, %v7796_v2  ;;  %v9079_v41 = vadd.f32 %v9078_v32, %v9035_v62  ;;  %v9164_v28 = vpop.f32.mrf.mxu1 }
 0x68b   : > { %v9080_v20 = vpop.f32.mrf.mxu0 }
 0x68c   : > { %v9258_v47 = vadd.f32 %v9079_v41, %v7798_v50  ;;  %v9081_v26 = vadd.f32 %v9080_v20, %v9037_v27  ;;  %v9301_v11 = vadd.f32 %v9274_v43, %v9257_v16  ;;  %v9166_v55 = vpop.f32.mrf.mxu1  ;;  %v33163_v50 = vld [vmem:[#allocation24_spill] sm:$0xff] }
 0x68d   : > { %v9082_v6 = vpop.f32.mrf.mxu0  ;;  %v9286_v27 = vrot.slane %v29423_v59, %v33163_v50 }
 0x68e   : > { %v9263_v36 = vadd.f32 %v9081_v26, %v7800_v63  ;;  %v9083_v51 = vadd.f32 %v9082_v6, %v9039_v22  ;;  %v9302_v40 = vadd.f32 %v9278_v23, %v9258_v47  ;;  %v9313_v24 = vmax.f32 %v9301_v11, 0.0  ;;  %v9168_v34 = vpop.f32.mrf.mxu1 }
 0x690   : > { %v9307_v38 = vadd.f32 %v9274_v43, %v9263_v36  ;;  %v9264_v48 = vadd.f32 %v9083_v51, %v7802_v57  ;;  %v9314_v25 = vmax.f32 %v9302_v40, 0.0  ;;  %v7888_v43 = vadd.f32 %v29397_v58, %v7845_v37 }
 0x691   : > { %v6874_v51 = vadd.f32 %v29306_v46, %v29152_v17 }
 0x692   : > { %v9319_v45 = vmax.f32 %v9307_v38, 0.0  ;;  %v9308_v42 = vadd.f32 %v9278_v23, %v9264_v48 }
 0x694   : > { %v9320_v4 = vmax.f32 %v9308_v42, 0.0  ;;  %v9325_v1 = vpack.c.bf16 %v9319_v45, %v9313_v24  ;;  %v7931_v24 = vadd.f32 %v29416_v19, %v6874_v51  ;;  %v33164_v42 = vld [vmem:[#allocation23_spill] sm:$0xff]  ;;  %v24190_v51 = vld [vmem:[%s33092_s8 + $0x1b4] ss:$12 sps:$4 sm:$0xff]  }
 0x696   : > { %v9326_v53 = vpack.c.bf16 %v9320_v4, %v9314_v25  ;;  %v9337_v0 = vsel %vm1623_vm3, %v9325_v1, 0  ;;  %v9290_v25 = vrot.slane %v29423_v59, %v33164_v42 }
 0x698   : > { %20723 = vmatprep.subr.msk.bf16.mxu0 %vm1623_vm3, %v9326_v53 }
 0x699   : > { %9369 = vmatpush1.bf16.msra.mxu0 %v9337_v0 }
 0x69c   : > { %20724 = vmatmul.mubr.msk.bf16.vlgmr.msra.gmra.mxu0 %vm9332_vm7, %v29442_v52 }
 0x69d   : > { %9427 = vmatprep.mubr.bf16.mxu0 %v33155_v7 }
 0x6c7   : > { %v9119_v31 = vpop.f32.mrf.mxu0 }
 0x6c8   : > { %v9163_v5 = vadd.f32 %v9162_v18, %v9119_v31  ;;  %v9205_v58 = vpop.f32.mrf.mxu1  ;;  %v7974_v31 = vadd.f32 %v29408_v8, %v7931_v24  ;;  %v24124_v8 = vld [vmem:[%s33092_s8 + $0xac] ss:$12 sps:$4 sm:$0xff]   ;;  %v24196_v24 = vld [vmem:[%s33092_s8 + $0x19c] ss:$12 sps:$4 sm:$0xff]  }
 0x6c9   : > { %v9121_v15 = vpop.f32.mrf.mxu0 }
 0x6ca   : > { %v9259_v62 = vadd.f32 %v9163_v5, %v29346_v39  ;;  %v9165_v30 = vadd.f32 %v9164_v28, %v9121_v15  ;;  %v9207_v11 = vpop.f32.mrf.mxu1 }
 0x6cb   : > { %v9123_v2 = vpop.f32.mrf.mxu0 }
 0x6cc   : > { %v9260_v9 = vadd.f32 %v9165_v30, %v29355_v49  ;;  %v9167_v32 = vadd.f32 %v9166_v55, %v9123_v2  ;;  %v9303_v14 = vadd.f32 %v9282_v29, %v9259_v62  ;;  %v9209_v38 = vpop.f32.mrf.mxu1 }
 0x6cd   : > { %v9125_v16 = vpop.f32.mrf.mxu0 }
 0x6ce   : > { %v9265_v60 = vadd.f32 %v9167_v32, %v29358_v21  ;;  %v9169_v39 = vadd.f32 %v9168_v34, %v9125_v16  ;;  %v9304_v41 = vadd.f32 %v9286_v27, %v9260_v9  ;;  %v9315_v47 = vmax.f32 %v9303_v14, 0.0  ;;  %v20729_v21 = vld [vmem:[%s33091_s7 + $0x4] sm:$0x7]  ;;  %v9211_v17 = vpop.f32.mrf.mxu1  ;;  %v24122_v32 = vld [vmem:[%s33092_s8 + $0xa8] ss:$12 sps:$4 sm:$0xff]  }
 0x6cf   : > { %v24127_v34 = vld [vmem:[%s33092_s8 + $0x94] ss:$12 sps:$4 sm:$0xff]   ;;  %v24130_v16 = vld [vmem:[%s33092_s8 + $0x7c] ss:$12 sps:$4 sm:$0xff]   ;;  %v24133_v14 = vld [vmem:[%s33092_s8 + $0x64] ss:$12 sps:$4 sm:$0xff]  }
 0x6d0   : > { %v9309_v20 = vadd.f32 %v9282_v29, %v9265_v60  ;;  %v9266_v63 = vadd.f32 %v9169_v39, %v7888_v43  ;;  %v9316_v26 = vmax.f32 %v9304_v41, 0.0  ;;  %v24128_v43 = vld [vmem:[%s33092_s8 + $0x78] ss:$12 sps:$4 sm:$0xff]   ;;  %v24131_v60 = vld [vmem:[%s33092_s8 + $0x60] ss:$12 sps:$4 sm:$0xff]  }
 0x6d1   : > { %v24136_v39 = vld [vmem:[%s33092_s8 + $0x4c] ss:$12 sps:$4 sm:$0xff]   ;;  %v24167_v41 = vld [vmem:[%s33092_s8 + $0x210] ss:$12 sps:$4 sm:$0xff]  }
 0x6d2   : > { %v9321_v23 = vmax.f32 %v9309_v20, 0.0  ;;  %v9310_v54 = vadd.f32 %v9286_v27, %v9266_v63  ;;  %v24161_v27 = vld [vmem:[%s33092_s8 + $0x228] ss:$12 sps:$4 sm:$0xff]  }
 0x6d3   : > { %v24169_v20 = vld [vmem:[%s33092_s8 + $0x214] ss:$12 sps:$4 sm:$0xff]  }
 0x6d4   : > { %v9322_v49 = vmax.f32 %v9310_v54, 0.0  ;;  %v9327_v22 = vpack.c.bf16 %v9321_v23, %v9315_v47  ;;  %v24134_v63 = vld [vmem:[%s33092_s8 + $0x48] ss:$12 sps:$4 sm:$0xff]   ;;  %v24173_v23 = vld [vmem:[%s33092_s8 + $0x1f8] ss:$12 sps:$4 sm:$0xff]  }
 0x6d5   : > { %v24139_v47 = vld [vmem:[%s33092_s8 + $0x34] ss:$12 sps:$4 sm:$0xff]   ;;  %v24175_v54 = vld [vmem:[%s33092_s8 + $0x1fc] ss:$12 sps:$4 sm:$0xff]  }
 0x6d6   : > { %v9328_v6 = vpack.c.bf16 %v9322_v49, %v9316_v26  ;;  %v9343_v57 = vsel %vm1623_vm3, %v9327_v22, 0  ;;  %v24137_v26 = vld [vmem:[%s33092_s8 + $0x30] ss:$12 sps:$4 sm:$0xff]  }
 0x6d7   : > { %v24142_v49 = vld [vmem:[%s33092_s8 + $0x1c] ss:$12 sps:$4 sm:$0xff]   ;;  %v24181_v22 = vld [vmem:[%s33092_s8 + $0x1e4] ss:$12 sps:$4 sm:$0xff]  }
 0x6d8   : > { %20725 = vmatprep.subr.msk.bf16.mxu0 %vm1623_vm3, %v9328_v6 }
 0x6d9   : > { %9410 = vmatpush1.bf16.msra.mxu0 %v9343_v57 }
 0x6da   : > { %20730 = vmatprep.subr.msk.bf16.mxu0 %vm1623_vm3, %v9326_v53 }
 0x6dc   : > { %20726 = vmatmul.mubr.msk.bf16.vlgmr.msra.gmra.mxu0 %vm9332_vm7, %v29442_v52 }
 0x6dd   : > { %9497 = vmatpush1.bf16.msra.mxu0 %v9337_v0  ;;  %9514 = vmatprep.mubr.bf16.mxu0 %v33155_v7  ;;  %v33165_v0 = vsub.s32 5, %v26050_v56 }
 0x6df   : > { %v9294_v18 = vrot.slane %v29423_v59, %v33165_v0  ;;  %v24163_v59 = vld [vmem:[%s33092_s8 + $0x22c] ss:$12 sps:$4 sm:$0xff]  }
 0x6e0   : > { %v24200_v0 = vld [vmem:[%s33092_s8 + $0x180] ss:$12 sps:$4 sm:$0xff]  }
 0x6e4   : > { %20731 = vmatmul.mubr.msk.bf16.vlgmr.msra.gmra.mxu0 %vm9332_vm7, %v20729_v21 }
 0x6e5   : > { %9596 = vmatprep.mubr.bf16.mxu0 %v33155_v7 }
 0x6f7   : > { %v9248_v36 = vpop.f32.mrf.mxu0 }
 0x6f8   : > { %v9249_v40 = vadd.f32 %v9248_v36, %v9205_v58  ;;  %v24182_v58 = vld [vmem:[%s33092_s8 + $0x1c8] ss:$12 sps:$4 sm:$0xff]   ;;  %v24143_v36 = vld [vmem:[%s33092_s8] ss:$12 sps:$4 sm:$0xff]  }
 0x6f9   : > { %v9250_v48 = vpop.f32.mrf.mxu0 }
 0x6fa   : > { %v9261_v45 = vadd.f32 %v9249_v40, %v29400_v44  ;;  %v9251_v4 = vadd.f32 %v9250_v48, %v9207_v11  ;;  %v24184_v11 = vld [vmem:[%s33092_s8 + $0x1cc] ss:$12 sps:$4 sm:$0xff]   ;;  %v24146_v48 = vld [vmem:[%s33092_s8 + $0x168] ss:$12 sps:$4 sm:$0xff]  }
 0x6fb   : > { %v9252_v1 = vpop.f32.mrf.mxu0  ;;  %v24148_v40 = vld [vmem:[%s33092_s8 + $0x16c] ss:$12 sps:$4 sm:$0xff]  }
 0x6fc   : > { %v9262_v53 = vadd.f32 %v9251_v4, %v29403_v35  ;;  %v9253_v28 = vadd.f32 %v9252_v1, %v9209_v38  ;;  %v9305_v5 = vadd.f32 %v9290_v25, %v9261_v45  ;;  %v24188_v38 = vld [vmem:[%s33092_s8 + $0x1b0] ss:$12 sps:$4 sm:$0xff]   ;;  %v24151_v45 = vld [vmem:[%s33092_s8 + $0x154] ss:$12 sps:$4 sm:$0xff]  }
 0x6fd   : > { %v9254_v46 = vpop.f32.mrf.mxu0  ;;  %v24149_v4 = vld [vmem:[%s33092_s8 + $0x150] ss:$12 sps:$4 sm:$0xff]  }
 0x6fe   : > { %v9267_v19 = vadd.f32 %v9253_v28, %v29406_v13  ;;  %v9255_v44 = vadd.f32 %v9254_v46, %v9211_v17  ;;  %v9306_v55 = vadd.f32 %v9294_v18, %v9262_v53  ;;  %v9317_v62 = vmax.f32 %v9305_v5, 0.0  ;;  %v24202_v1 = vld [vmem:[%s33092_s8 + $0x184] ss:$12 sps:$4 sm:$0xff]   ;;  %v24154_v53 = vld [vmem:[%s33092_s8 + $0x13c] ss:$12 sps:$4 sm:$0xff]  }
 0x6ff   : > { %v24208_v28 = vld [vmem:[%s33092_s8 + $0x2ec] ss:$12 sps:$4 sm:$0xff]   ;;  %v24157_v17 = vld [vmem:[%s33092_s8 + $0x124] ss:$12 sps:$4 sm:$0xff]   ;;  %v24206_v46 = vld [vmem:[%s33092_s8 + $0x2e8] ss:$12 sps:$4 sm:$0xff]  }
 0x700   : > { %v9311_v15 = vadd.f32 %v9290_v25, %v9267_v19  ;;  %v9268_v10 = vadd.f32 %v9255_v44, %v7974_v31  ;;  %v9318_v35 = vmax.f32 %v9306_v55, 0.0  ;;  %v24194_v25 = vld [vmem:[%s33092_s8 + $0x198] ss:$12 sps:$4 sm:$0xff]   ;;  %v24155_v31 = vld [vmem:[%s33092_s8 + $0x120] ss:$12 sps:$4 sm:$0xff]  }
 0x701   : > { %v24214_v5 = vld [vmem:[%s33092_s8 + $0x2d4] ss:$12 sps:$4 sm:$0xff]   ;;  %v24160_v19 = vld [vmem:[%s33092_s8 + $0x10c] ss:$12 sps:$4 sm:$0xff]   ;;  %v24212_v44 = vld [vmem:[%s33092_s8 + $0x2d0] ss:$12 sps:$4 sm:$0xff]  }
 0x702   : > { %v9323_v29 = vmax.f32 %v9311_v15, 0.0  ;;  %v9312_v30 = vadd.f32 %v9294_v18, %v9268_v10  ;;  %v24152_v18 = vld [vmem:[%s33092_s8 + $0x138] ss:$12 sps:$4 sm:$0xff]   ;;  %v24158_v55 = vld [vmem:[%s33092_s8 + $0x108] ss:$12 sps:$4 sm:$0xff]  }
 0x703   : > { %v24220_v15 = vld [vmem:[%s33092_s8 + $0x2bc] ss:$12 sps:$4 sm:$0xff]   ;;  %v24166_v10 = vld [vmem:[%s33092_s8 + $0xf4] ss:$12 sps:$4 sm:$0xff]  }
 0x704   : > { %v9324_v2 = vmax.f32 %v9312_v30, 0.0  ;;  %v9329_v37 = vpack.c.bf16 %v9323_v29, %v9317_v62  ;;  %v24218_v62 = vld [vmem:[%s33092_s8 + $0x2b8] ss:$12 sps:$4 sm:$0xff]   ;;  %v24164_v29 = vld [vmem:[%s33092_s8 + $0xf0] ss:$12 sps:$4 sm:$0xff]  }
 0x705   : > { %v24226_v30 = vld [vmem:[%s33092_s8 + $0x2a4] ss:$12 sps:$4 sm:$0xff]  }
 0x706   : > { %v9330_v9 = vpack.c.bf16 %v9324_v2, %v9318_v35  ;;  %v9349_v13 = vsel %vm1623_vm3, %v9329_v37, 0  ;;  %v24172_v35 = vld [vmem:[%s33092_s8 + $0xdc] ss:$12 sps:$4 sm:$0xff]   ;;  %v24224_v2 = vld [vmem:[%s33092_s8 + $0x2a0] ss:$12 sps:$4 sm:$0xff]  }
 0x707   : > { %v24170_v37 = vld [vmem:[%s33092_s8 + $0xd8] ss:$12 sps:$4 sm:$0xff]  }
 0x708   : > { %20727 = vmatprep.subr.msk.bf16.mxu1 %vm1623_vm3, %v9330_v9  ;;  %20734 = vmatprep.subr.msk.bf16.mxu0 %vm1623_vm3, %v9330_v9  ;;  %v24232_v9 = vld [vmem:[%s33092_s8 + $0x28c] ss:$12 sps:$4 sm:$0xff]  }
 0x709   : > { %9451 = vmatpush1.bf16.msra.mxu1 %v9349_v13  ;;  %9579 = vmatpush1.bf16.msra.mxu0 %v9349_v13  ;;  %v24230_v13 = vld [vmem:[%s33092_s8 + $0x288] ss:$12 sps:$4 sm:$0xff]  }
 0x70a   : > { %20732 = vmatprep.subr.msk.bf16.mxu1 %vm1623_vm3, %v9328_v6  ;;  %10618 = vmatprep.subr.bf16.mxu0 %v24163_v59  ;;  %v24179_v6 = vld [vmem:[%s33092_s8 + $0x1e0] ss:$12 sps:$4 sm:$0xff]   ;;  %v24178_v59 = vld [vmem:[%s33092_s8 + $0xc4] ss:$12 sps:$4 sm:$0xff]  }
 0x70c   : > { %20728 = vmatmul.mubr.msk.bf16.vlgmr.msra.gmra.mxu1 %vm9332_vm7, %v29442_v52  ;;  %20735 = vmatmul.mubr.msk.bf16.vlgmr.msra.gmra.mxu0 %vm9332_vm7, %v20729_v21  ;;  %v24125_v52 = vld [vmem:[%s33092_s8 + $0x90] ss:$12 sps:$4 sm:$0xff]  }
 0x70d   : > { %9538 = vmatpush1.bf16.msra.mxu1 %v9343_v57  ;;  %9555 = vmatprep.mubr.bf16.mxu1 %v33155_v7  ;;  %v24140_v57 = vld [vmem:[%s33092_s8 + $0x18] ss:$12 sps:$4 sm:$0xff]  }
 0x70e   : > { %10577 = vmatprep.subr.bf16.mxu1 %v24124_v8  ;;  %10619 = vmatpush1.bf16.msra.mxu0 %v24161_v27  ;;  %v24176_v8 = vld [vmem:[%s33092_s8 + $0xc0] ss:$12 sps:$4 sm:$0xff]  }
 0x70f   : > { %10620 = vmatprep.subr.bf16.mxu0 %v24169_v20  ;;  %v24187_v27 = vld [vmem:[%s33092_s8 + $0x3ac] ss:$12 sps:$4 sm:$0xff]  }
 0x712   : > { %10621 = vmatpush1.bf16.msra.mxu0 %v24167_v41 }
 0x713   : > { %10622 = vmatprep.subr.bf16.mxu0 %v24175_v54 }
 0x714   : > { %20733 = vmatmul.mubr.msk.bf16.vlgmr.msra.gmra.mxu1 %vm9332_vm7, %v20729_v21  ;;  %v24145_v21 = vld [vmem:[%s33092_s8 + $0x4] ss:$12 sps:$4 sm:$0xff]  }
 0x715   : > { %10578 = vmatpush1.bf16.msra.mxu1 %v24122_v32  ;;  %v24236_v32 = vld [vmem:[%s33092_s8 + $0x270] ss:$12 sps:$4 sm:$0xff]  }
 0x716   : > { %10579 = vmatprep.subr.bf16.mxu1 %v24127_v34  ;;  %10623 = vmatpush1.bf16.msra.mxu0 %v24173_v23  ;;  %v24238_v34 = vld [vmem:[%s33092_s8 + $0x274] ss:$12 sps:$4 sm:$0xff]  }
 0x717   : > { %10624 = vmatprep.subr.bf16.mxu0 %v24181_v22 }
 0x719   : > { %10580 = vmatpush1.bf16.msra.mxu1 %v24125_v52  ;;  %v24242_v52 = vld [vmem:[%s33092_s8 + $0x258] ss:$12 sps:$4 sm:$0xff]  }
 0x71a   : > { %10581 = vmatprep.subr.bf16.mxu1 %v24130_v16  ;;  %10625 = vmatpush1.bf16.msra.mxu0 %v24179_v6  ;;  %v24244_v16 = vld [vmem:[%s33092_s8 + $0x25c] ss:$12 sps:$4 sm:$0xff]  }
 0x71b   : > { %10626 = vmatprep.subr.bf16.mxu0 %v24184_v11 }
 0x71d   : > { %10582 = vmatpush1.bf16.msra.mxu1 %v24128_v43  ;;  %v24250_v43 = vld [vmem:[%s33092_s8 + $0x244] ss:$12 sps:$4 sm:$0xff]  }
 0x71e   : > { %10583 = vmatprep.subr.bf16.mxu1 %v24133_v14  ;;  %10627 = vmatpush1.bf16.msra.mxu0 %v24182_v58  ;;  %v24248_v14 = vld [vmem:[%s33092_s8 + $0x240] ss:$12 sps:$4 sm:$0xff]  }
 0x71f   : > { %10628 = vmatprep.subr.bf16.mxu0 %v24190_v51  ;;  %v24193_v51 = vld [vmem:[%s33092_s8 + $0x394] ss:$12 sps:$4 sm:$0xff]  }
 0x721   : > { %10584 = vmatpush1.bf16.msra.mxu1 %v24131_v60  ;;  %v24257_v60 = vld [vmem:[%s33092_s8 + $0x170] ss:$12 sps:$4 sm:$0xff]  }
 0x722   : > { %10585 = vmatprep.subr.bf16.mxu1 %v24136_v39  ;;  %10629 = vmatpush1.bf16.msra.mxu0 %v24188_v38  ;;  %v24191_v38 = vld [vmem:[%s33092_s8 + $0x390] ss:$12 sps:$4 sm:$0xff]  }
 0x723   : > { %10630 = vmatprep.subr.bf16.mxu0 %v24196_v24  ;;  %v24197_v24 = vld [vmem:[%s33092_s8 + $0x378] ss:$12 sps:$4 sm:$0xff]  }
 0x725   : > { %10586 = vmatpush1.bf16.msra.mxu1 %v24134_v63 }
 0x726   : > { %10587 = vmatprep.subr.bf16.mxu1 %v24139_v47  ;;  %10631 = vmatpush1.bf16.msra.mxu0 %v24194_v25  ;;  %v24203_v25 = vld [vmem:[%s33092_s8 + $0x360] ss:$12 sps:$4 sm:$0xff]  }
 0x727   : > { %10632 = vmatprep.subr.bf16.mxu0 %v24202_v1  ;;  %v24209_v1 = vld [vmem:[%s33092_s8 + $0x348] ss:$12 sps:$4 sm:$0xff]  }
 0x729   : > { %10588 = vmatpush1.bf16.msra.mxu1 %v24137_v26 }
 0x72a   : > { %10589 = vmatprep.subr.bf16.mxu1 %v24142_v49  ;;  %10633 = vmatpush1.bf16.msra.mxu0 %v24200_v0  ;;  %v24215_v0 = vld [vmem:[%s33092_s8 + $0x330] ss:$12 sps:$4 sm:$0xff]  }
 0x72b   : > { %10634 = vmatprep.subr.bf16.mxu0 %v24208_v28  ;;  %v24221_v28 = vld [vmem:[%s33092_s8 + $0x318] ss:$12 sps:$4 sm:$0xff]  }
 0x72d   : > { %10590 = vmatpush1.bf16.msra.mxu1 %v24140_v57 }
 0x72e   : > { %10591 = vmatprep.subr.bf16.mxu1 %v24145_v21  ;;  %10635 = vmatpush2.bf16.msra.mxu0 %v24206_v46  ;;  %v24227_v46 = vld [vmem:[%s33092_s8 + $0x300] ss:$12 sps:$4 sm:$0xff]  }
 0x72f   : > { %10636 = vmatprep.subr.bf16.mxu0 %v24214_v5  ;;  %v24233_v5 = vld [vmem:[%s33092_s8 + $0x468] ss:$12 sps:$4 sm:$0xff]  }
 0x731   : > { %10592 = vmatpush1.bf16.msra.mxu1 %v24143_v36  ;;  %v24185_v36 = vld [vmem:[%s33092_s8 + $0x3a8] ss:$12 sps:$4 sm:$0xff]  }
 0x732   : > { %10593 = vmatprep.subr.bf16.mxu1 %v24148_v40  ;;  %10637 = vmatpush2.bf16.msra.mxu0 %v24212_v44 }
 0x733   : > { %10638 = vmatprep.subr.bf16.mxu0 %v24220_v15  ;;  %v24239_v15 = vld [vmem:[%s33092_s8 + $0x450] ss:$12 sps:$4 sm:$0xff]  }
 0x735   : > { %10594 = vmatpush2.bf16.msra.mxu1 %v24146_v48  ;;  %v24199_v48 = vld [vmem:[%s33092_s8 + $0x37c] ss:$12 sps:$4 sm:$0xff]  }
 0x736   : > { %10595 = vmatprep.subr.bf16.mxu1 %v24151_v45  ;;  %10639 = vmatpush2.bf16.msra.mxu0 %v24218_v62  ;;  %v24205_v45 = vld [vmem:[%s33092_s8 + $0x364] ss:$12 sps:$4 sm:$0xff]   ;;  %v24247_v62 = vld [vmem:[%s33092_s8 + $0x43c] ss:$12 sps:$4 sm:$0xff]  }
 0x737   : > { %10640 = vmatprep.subr.bf16.mxu0 %v24226_v30 }
 0x739   : > { %10596 = vmatpush2.bf16.msra.mxu1 %v24149_v4  ;;  %v24211_v4 = vld [vmem:[%s33092_s8 + $0x34c] ss:$12 sps:$4 sm:$0xff]  }
 0x73a   : > { %10597 = vmatprep.subr.bf16.mxu1 %v24154_v53  ;;  %10641 = vmatpush2.bf16.msra.mxu0 %v24224_v2  ;;  %v24217_v53 = vld [vmem:[%s33092_s8 + $0x334] ss:$12 sps:$4 sm:$0xff]  }
 0x73b   : > { %10642 = vmatprep.subr.bf16.mxu0 %v24232_v9 }
 0x73d   : > { %10598 = vmatpush2.bf16.msra.mxu1 %v24152_v18  ;;  %v24223_v18 = vld [vmem:[%s33092_s8 + $0x31c] ss:$12 sps:$4 sm:$0xff]  }
 0x73e   : > { %10599 = vmatprep.subr.bf16.mxu1 %v24157_v17  ;;  %10643 = vmatpush2.bf16.msra.mxu0 %v24230_v13  ;;  %v24229_v17 = vld [vmem:[%s33092_s8 + $0x304] ss:$12 sps:$4 sm:$0xff]  }
 0x73f   : > { %10644 = vmatprep.subr.bf16.mxu0 %v24238_v34  ;;  %v24253_v13 = vld [vmem:[%s33092_s8 + $0x424] ss:$12 sps:$4 sm:$0xff]  }
 0x741   : > { %10600 = vmatpush2.bf16.msra.mxu1 %v24155_v31  ;;  %v24235_v31 = vld [vmem:[%s33092_s8 + $0x46c] ss:$12 sps:$4 sm:$0xff]  }
 0x742   : > { %10601 = vmatprep.subr.bf16.mxu1 %v24160_v19  ;;  %10645 = vmatpush2.bf16.msra.mxu0 %v24236_v32  ;;  %v24241_v19 = vld [vmem:[%s33092_s8 + $0x454] ss:$12 sps:$4 sm:$0xff]  }
 0x743   : > { %10646 = vmatprep.subr.bf16.mxu0 %v24244_v16  ;;  %v24251_v32 = vld [vmem:[%s33092_s8 + $0x420] ss:$12 sps:$4 sm:$0xff]  }
 0x744   : > { %v24256_v16 = vld [vmem:[%s33092_s8 + $0x40c] ss:$12 sps:$4 sm:$0xff]  }
 0x745   : > { %10602 = vmatpush2.bf16.msra.mxu1 %v24158_v55 }
 0x746   : > { %10603 = vmatprep.subr.bf16.mxu1 %v24166_v10  ;;  %10647 = vmatpush2.bf16.msra.mxu0 %v24242_v52 }
 0x747   : > { %10648 = vmatprep.subr.bf16.mxu0 %v24250_v43 }
 0x749   : > { %10604 = vmatpush2.bf16.msra.mxu1 %v24164_v29 }
 0x74a   : > { %10605 = vmatprep.subr.bf16.mxu1 %v24172_v35  ;;  %10649 = vmatpush2.bf16.msra.mxu0 %v24248_v14 }
 0x74b   : > { %22006 = vmatprep.subr.bf16.mxu0 %v24257_v60 }
 0x74d   : > { %10606 = vmatpush2.bf16.msra.mxu1 %v24170_v37  ;;  %v24245_v37 = vld [vmem:[%s33092_s8 + $0x438] ss:$12 sps:$4 sm:$0xff]  }
 0x74e   : > { %10607 = vmatprep.subr.bf16.mxu1 %v24178_v59 }
 0x751   : > { %10608 = vmatpush2.bf16.msra.mxu1 %v24176_v8 }
 0x752   : > { %10659 = vmatprep.subr.bf16.mxu1 %v24187_v27 }
 0x75c   : > { %v9388_v39 = vpop.f32.mrf.mxu0 }
 0x75e   : > { %v9390_v41 = vpop.f32.mrf.mxu0 }
 0x760   : > { %v9392_v20 = vpop.f32.mrf.mxu0 }
 0x762   : > { %v9393_v63 = vpop.f32.mrf.mxu0 }
 0x79c   : > { %v29688_v47 = vpop.f32.mrf.mxu0 }
 0x79e   : > { %v29690_v23 = vpop.f32.mrf.mxu0 }
 0x7a0   : > { %v9433_v54 = vpop.f32.mrf.mxu0 }
 0x7a1   : > { %v24259_v54 = vld [vmem:[%s33092_s8 + $0x3f0] ss:$12 sps:$4 sm:$0xff]  }
 0x7a2   : > { %v9434_v26 = vpop.f32.mrf.mxu0 }
 0x7a3   : > { %v24263_v26 = vld [vmem:[%s33092_s8 + $0x98] ss:$12 sps:$4 sm:$0xff]  }
 0x7a4   : > { %v9516_v49 = vpop.f32.mrf.mxu0 }
 0x7a5   : > { %v9605_v22 = vmax.f32 %v9388_v39, %v9516_v49  ;;  %v24254_v39 = vld [vmem:[%s33092_s8 + $0x408] ss:$12 sps:$4 sm:$0xff]  }
 0x7a6   : > { %v9518_v6 = vpop.f32.mrf.mxu0  ;;  %v24266_v49 = vld [vmem:[%s33092_s8 + $0x3dc] ss:$12 sps:$4 sm:$0xff]  }
 0x7a7   : > { %v9606_v57 = vmax.f32 %v9390_v41, %v9518_v6  ;;  %v29692_v21 = vpack.c.bf16 %v9605_v22, %v9605_v22  ;;  %v24258_v41 = vld [vmem:[%s33092_s8 + $0xb0] ss:$12 sps:$4 sm:$0xff]   ;;  %v24267_v22 = vld [vmem:[%s33092_s8 + $0x140] ss:$12 sps:$4 sm:$0xff]   ;;  %v24264_v6 = vld [vmem:[%s33092_s8 + $0x3d8] ss:$12 sps:$4 sm:$0xff]  }
 0x7a8   : > { %v9520_v58 = vpop.f32.mrf.mxu0 }
 0x7a9   : > { %v29694_v11 = vpack.c.bf16 %v9606_v57, %v9606_v57  ;;  %v24268_v57 = vld [vmem:[%s33092_s8 + $0x80] ss:$12 sps:$4 sm:$0xff]   ;;  %v24271_v58 = vld [vmem:[%s33092_s8 + $0x3c4] ss:$12 sps:$4 sm:$0xff]  }
 0x7aa   : > { %v9521_v40 = vpop.f32.mrf.mxu0 }
 0x7ab   : > { %10609 = vmatprep.mubr.bf16.mxu1 %v29694_v11  ;;  %v24273_v40 = vld [vmem:[%s33092_s8 + $0x68] ss:$12 sps:$4 sm:$0xff]  }
 0x7ac   : > { %10610 = vmatmul.mubr.bf16.vlgmr.msra.gmra.mxu1 %v29692_v21 }
 0x7ad   : > { %10660 = vmatpush1.bf16.msra.mxu1 %v24185_v36  ;;  %v24272_v36 = vld [vmem:[%s33092_s8 + $0x128] ss:$12 sps:$4 sm:$0xff]  }
 0x7ae   : > { %10661 = vmatprep.subr.bf16.mxu1 %v24193_v51  ;;  %v24269_v51 = vld [vmem:[%s33092_s8 + $0x3c0] ss:$12 sps:$4 sm:$0xff]  }
 0x7b1   : > { %10662 = vmatpush1.bf16.msra.mxu1 %v24191_v38 }
 0x7b2   : > { %10663 = vmatprep.subr.bf16.mxu1 %v24199_v48  ;;  %v24274_v48 = vld [vmem:[%s33092_s8 + $0x110] ss:$12 sps:$4 sm:$0xff]  }
 0x7b5   : > { %10664 = vmatpush1.bf16.msra.mxu1 %v24197_v24  ;;  %v24275_v24 = vld [vmem:[%s33092_s8 + $0x470] ss:$12 sps:$4 sm:$0xff]  }
 0x7b6   : > { %10665 = vmatprep.subr.bf16.mxu1 %v24205_v45  ;;  %v24276_v45 = vld [vmem:[%s33092_s8 + $0x50] ss:$12 sps:$4 sm:$0xff]  }
 0x7b9   : > { %10666 = vmatpush1.bf16.msra.mxu1 %v24203_v25  ;;  %v24277_v25 = vld [vmem:[%s33092_s8 + $0x3b0] ss:$12 sps:$4 sm:$0xff]  }
 0x7ba   : > { %10667 = vmatprep.subr.bf16.mxu1 %v24211_v4 }
 0x7bd   : > { %10668 = vmatpush1.bf16.msra.mxu1 %v24209_v1  ;;  %v24278_v1 = vld [vmem:[%s33092_s8 + $0xf8] ss:$12 sps:$4 sm:$0xff]  }
 0x7be   : > { %10669 = vmatprep.subr.bf16.mxu1 %v24217_v53  ;;  %v24279_v53 = vld [vmem:[%s33092_s8 + $0x458] ss:$12 sps:$4 sm:$0xff]  }
 0x7c1   : > { %10670 = vmatpush1.bf16.msra.mxu1 %v24215_v0  ;;  %v24280_v0 = vld [vmem:[%s33092_s8 + $0x38] ss:$12 sps:$4 sm:$0xff]  }
 0x7c2   : > { %10671 = vmatprep.subr.bf16.mxu1 %v24223_v18  ;;  %v24281_v18 = vld [vmem:[%s33092_s8 + $0x398] ss:$12 sps:$4 sm:$0xff]  }
 0x7c5   : > { %10672 = vmatpush1.bf16.msra.mxu1 %v24221_v28  ;;  %v24282_v28 = vld [vmem:[%s33092_s8 + $0xe0] ss:$12 sps:$4 sm:$0xff]  }
 0x7c6   : > { %10673 = vmatprep.subr.bf16.mxu1 %v24229_v17  ;;  %v24283_v17 = vld [vmem:[%s33092_s8 + $0x440] ss:$12 sps:$4 sm:$0xff]  }
 0x7c9   : > { %10674 = vmatpush1.bf16.msra.mxu1 %v24227_v46  ;;  %v24284_v46 = vld [vmem:[%s33092_s8 + $0x20] ss:$12 sps:$4 sm:$0xff]  }
 0x7ca   : > { %10675 = vmatprep.subr.bf16.mxu1 %v24235_v31  ;;  %v24285_v31 = vld [vmem:[%s33092_s8 + $0x380] ss:$12 sps:$4 sm:$0xff]  }
 0x7cc   : > { %v9470_v44 = vpop.f32.mrf.mxu1  ;;  %v9598_v55 = vpop.f32.mrf.mxu0 }
 0x7cd   : > { %10676 = vmatpush2.bf16.msra.mxu1 %v24233_v5  ;;  %v9609_v38 = vmax.f32 %v9470_v44, %v9598_v55  ;;  %v24286_v5 = vld [vmem:[%s33092_s8 + $0xc8] ss:$12 sps:$4 sm:$0xff]  }
 0x7ce   : > { %v9472_v10 = vpop.f32.mrf.mxu1  ;;  %10677 = vmatprep.subr.bf16.mxu1 %v24241_v19  ;;  %v9600_v29 = vpop.f32.mrf.mxu0  ;;  %v24287_v19 = vld [vmem:[%s33092_s8 + $0x428] ss:$12 sps:$4 sm:$0xff]  }
 0x7cf   : > { %v9610_v30 = vmax.f32 %v9472_v10, %v9600_v29  ;;  %v29836_v4 = vpack.c.bf16 %v9609_v38, %v9609_v38  ;;  %v24288_v44 = vld [vmem:[%s33092_s8 + $0x8] ss:$12 sps:$4 sm:$0xff]   ;;  %v24291_v10 = vld [vmem:[%s33092_s8 + $0x410] ss:$12 sps:$4 sm:$0xff]   ;;  %v24331_v38 = vld [vmem:[%s33092_s8 + $0x64c] ss:$12 sps:$4 sm:$0xff]  }
 0x7d0   : > { %v9474_v35 = vpop.f32.mrf.mxu1  ;;  %v9602_v2 = vpop.f32.mrf.mxu0  ;;  %v24289_v55 = vld [vmem:[%s33092_s8 + $0x368] ss:$12 sps:$4 sm:$0xff]   ;;  %v24293_v29 = vld [vmem:[%s33092_s8 + $0x350] ss:$12 sps:$4 sm:$0xff]  }
 0x7d1   : > { %10678 = vmatpush2.bf16.msra.mxu1 %v24239_v15  ;;  %v29761_v9 = vpack.c.bf16 %v9610_v30, %v9610_v30  ;;  %v24290_v15 = vld [vmem:[%s33092_s8 + $0x2f0] ss:$12 sps:$4 sm:$0xff]   ;;  %v24294_v30 = vld [vmem:[%s33092_s8 + $0x2d8] ss:$12 sps:$4 sm:$0xff]  }
 0x7d2   : > { %v9475_v59 = vpop.f32.mrf.mxu1  ;;  %10679 = vmatprep.subr.bf16.mxu1 %v24247_v62  ;;  %v9603_v8 = vpop.f32.mrf.mxu0  ;;  %v24292_v62 = vld [vmem:[%s33092_s8 + $0x230] ss:$12 sps:$4 sm:$0xff]   ;;  %v24295_v35 = vld [vmem:[%s33092_s8 + $0x3f8] ss:$12 sps:$4 sm:$0xff]  }
 0x7d3   : > { %10691 = vmatprep.mubr.bf16.mxu1 %v29761_v9  ;;  %v24296_v2 = vld [vmem:[%s33092_s8 + $0x218] ss:$12 sps:$4 sm:$0xff]   ;;  %v24298_v59 = vld [vmem:[%s33092_s8 + $0x2c0] ss:$12 sps:$4 sm:$0xff]  }
 0x7d4   : > { %v9557_v27 = vpop.f32.mrf.mxu1  ;;  %v24300_v8 = vld [vmem:[%s33092_s8 + $0x200] ss:$12 sps:$4 sm:$0xff]  }
 0x7d5   : > { %10680 = vmatpush2.bf16.msra.mxu1 %v24245_v37  ;;  %v9607_v34 = vmax.f32 %v29688_v47, %v9557_v27  ;;  %v24261_v47 = vld [vmem:[%s33092_s8 + $0x3f4] ss:$12 sps:$4 sm:$0xff]   ;;  %v24297_v37 = vld [vmem:[%s33092_s8 + $0x338] ss:$12 sps:$4 sm:$0xff]  }
 0x7d6   : > { %v9559_v52 = vpop.f32.mrf.mxu1  ;;  %10681 = vmatprep.subr.bf16.mxu1 %v24253_v13  ;;  %v24299_v13 = vld [vmem:[%s33092_s8 + $0x3e0] ss:$12 sps:$4 sm:$0xff]  }
 0x7d7   : > { %v9608_v43 = vmax.f32 %v29690_v23, %v9559_v52  ;;  %v29783_v20 = vpack.c.bf16 %v9607_v34, %v9607_v34  ;;  %v24262_v23 = vld [vmem:[%s33092_s8 + $0x158] ss:$12 sps:$4 sm:$0xff]   ;;  %v24301_v27 = vld [vmem:[%s33092_s8 + $0x320] ss:$12 sps:$4 sm:$0xff]   ;;  %v24303_v34 = vld [vmem:[%s33092_s8 + $0x3c8] ss:$12 sps:$4 sm:$0xff]  }
 0x7d8   : > { %v9561_v14 = vpop.f32.mrf.mxu1  ;;  %v24304_v52 = vld [vmem:[%s33092_s8 + $0x1e8] ss:$12 sps:$4 sm:$0xff]  }
 0x7d9   : > { %v29775_v60 = vpack.c.bf16 %v9608_v43, %v9608_v43  ;;  %10682 = vmatpush2.bf16.msra.mxu1 %v24251_v32  ;;  %v24302_v32 = vld [vmem:[%s33092_s8 + $0x2a8] ss:$12 sps:$4 sm:$0xff]   ;;  %v24306_v43 = vld [vmem:[%s33092_s8 + $0x290] ss:$12 sps:$4 sm:$0xff]   ;;  %v24309_v14 = vld [vmem:[%s33092_s8 + $0x6ac] ss:$12 sps:$4 sm:$0xff]  }
 0x7da   : > { %10683 = vmatprep.subr.bf16.mxu1 %v24256_v16  ;;  %v9562_v63 = vpop.f32.mrf.mxu1  ;;  %v24305_v16 = vld [vmem:[%s33092_s8 + $0x308] ss:$12 sps:$4 sm:$0xff]  }
 0x7db   : > { %10650 = vmatprep.mubr.bf16.mxu0 %v29775_v60  ;;  %v24311_v63 = vld [vmem:[%s33092_s8 + $0x278] ss:$12 sps:$4 sm:$0xff]  }
 0x7dc   : > { %10651 = vmatmul.mubr.bf16.vlgmr.msra.gmra.mxu0 %v29783_v20 }
 0x7dd   : > { %10684 = vmatpush2.bf16.msra.mxu1 %v24254_v39  ;;  %22007 = vmatpush3.bf16.msra.mxu0 %v24258_v41  ;;  %v24310_v39 = vld [vmem:[%s33092_s8 + $0x1d0] ss:$12 sps:$4 sm:$0xff]   ;;  %v24307_v41 = vld [vmem:[%s33092_s8 + $0x6a8] ss:$12 sps:$4 sm:$0xff]  }
 0x7de   : > { %10732 = vmatprep.mubr.bf16.mxu0 %v29694_v11  ;;  %10685 = vmatprep.subr.bf16.mxu1 %v24261_v47  ;;  %v24314_v47 = vld [vmem:[%s33092_s8 + $0x694] ss:$12 sps:$4 sm:$0xff]  }
 0x7df   : > { %22008 = vmatprep.subr.bf16.mxu0 %v24262_v23  ;;  %v24315_v23 = vld [vmem:[%s33092_s8 + $0x1b8] ss:$12 sps:$4 sm:$0xff]  }
 0x7e1   : > { %10686 = vmatpush2.bf16.msra.mxu1 %v24259_v54  ;;  %22009 = vmatpush3.bf16.msra.mxu0 %v24263_v26  ;;  %v24312_v54 = vld [vmem:[%s33092_s8 + $0x690] ss:$12 sps:$4 sm:$0xff]   ;;  %v24316_v26 = vld [vmem:[%s33092_s8 + $0x260] ss:$12 sps:$4 sm:$0xff]  }
 0x7e2   : > { %10687 = vmatprep.subr.bf16.mxu1 %v24266_v49  ;;  %22010 = vmatprep.subr.bf16.mxu0 %v24267_v22  ;;  %v24319_v49 = vld [vmem:[%s33092_s8 + $0x67c] ss:$12 sps:$4 sm:$0xff]   ;;  %v24320_v22 = vld [vmem:[%s33092_s8 + $0x1a0] ss:$12 sps:$4 sm:$0xff]  }
 0x7e5   : > { %10688 = vmatpush2.bf16.msra.mxu1 %v24264_v6  ;;  %22011 = vmatpush3.bf16.msra.mxu0 %v24268_v57  ;;  %v24317_v6 = vld [vmem:[%s33092_s8 + $0x678] ss:$12 sps:$4 sm:$0xff]   ;;  %v24321_v57 = vld [vmem:[%s33092_s8 + $0x248] ss:$12 sps:$4 sm:$0xff]  }
 0x7e6   : > { %10689 = vmatprep.subr.bf16.mxu1 %v24271_v58  ;;  %22012 = vmatprep.subr.bf16.mxu0 %v24272_v36  ;;  %v24324_v58 = vld [vmem:[%s33092_s8 + $0x664] ss:$12 sps:$4 sm:$0xff]   ;;  %v24325_v36 = vld [vmem:[%s33092_s8 + $0x188] ss:$12 sps:$4 sm:$0xff]  }
 0x7e9   : > { %10690 = vmatpush2.bf16.msra.mxu1 %v24269_v51  ;;  %22013 = vmatpush3.bf16.msra.mxu0 %v24273_v40  ;;  %v24322_v51 = vld [vmem:[%s33092_s8 + $0x660] ss:$12 sps:$4 sm:$0xff]  }
 0x7ea   : > { %22014 = vmatprep.subr.bf16.mxu0 %v24274_v48  ;;  %22050 = vmatprep.subr.bf16.mxu1 %v24275_v24  ;;  %v24328_v40 = vld [vmem:[%s33092_s8 + $0x52c] ss:$12 sps:$4 sm:$0xff]   ;;  %v24326_v48 = vld [vmem:[%s33092_s8 + $0x528] ss:$12 sps:$4 sm:$0xff]  }
 0x7eb   : > { %v24329_v24 = vld [vmem:[%s33092_s8 + $0x648] ss:$12 sps:$4 sm:$0xff]  }
 0x7ec   : > { %10692 = vmatmul.mubr.bf16.vlgmr.msra.gmra.mxu1 %v29836_v4 }
 0x7ed   : > { %22015 = vmatpush3.bf16.msra.mxu0 %v24276_v45  ;;  %22051 = vmatpush3.bf16.msra.mxu1 %v24277_v25  ;;  %v24334_v45 = vld [vmem:[%s33092_s8 + $0x514] ss:$12 sps:$4 sm:$0xff]  }
 0x7ee   : > { %10812 = vmatprep.mubr.bf16.mxu1 %v29761_v9  ;;  %22016 = vmatprep.subr.bf16.mxu0 %v24278_v1  ;;  %v24337_v25 = vld [vmem:[%s33092_s8 + $0x634] ss:$12 sps:$4 sm:$0xff]   ;;  %v24332_v1 = vld [vmem:[%s33092_s8 + $0x510] ss:$12 sps:$4 sm:$0xff]  }
 0x7ef   : > { %22052 = vmatprep.subr.bf16.mxu1 %v24279_v53  ;;  %v24335_v53 = vld [vmem:[%s33092_s8 + $0x630] ss:$12 sps:$4 sm:$0xff]  }
 0x7f1   : > { %22017 = vmatpush3.bf16.msra.mxu0 %v24280_v0  ;;  %22053 = vmatpush3.bf16.msra.mxu1 %v24281_v18  ;;  %v24340_v0 = vld [vmem:[%s33092_s8 + $0x4fc] ss:$12 sps:$4 sm:$0xff]  }
 0x7f2   : > { %22018 = vmatprep.subr.bf16.mxu0 %v24282_v28  ;;  %22054 = vmatprep.subr.bf16.mxu1 %v24283_v17  ;;  %v24343_v18 = vld [vmem:[%s33092_s8 + $0x61c] ss:$12 sps:$4 sm:$0xff]   ;;  %v24338_v28 = vld [vmem:[%s33092_s8 + $0x4f8] ss:$12 sps:$4 sm:$0xff]  }
 0x7f3   : > { %v24341_v17 = vld [vmem:[%s33092_s8 + $0x618] ss:$12 sps:$4 sm:$0xff]  }
 0x7f5   : > { %22019 = vmatpush3.bf16.msra.mxu0 %v24284_v46  ;;  %22055 = vmatpush3.bf16.msra.mxu1 %v24285_v31  ;;  %v24346_v46 = vld [vmem:[%s33092_s8 + $0x4e4] ss:$12 sps:$4 sm:$0xff]  }
 0x7f6   : > { %22020 = vmatprep.subr.bf16.mxu0 %v24286_v5  ;;  %22056 = vmatprep.subr.bf16.mxu1 %v24287_v19  ;;  %v24349_v31 = vld [vmem:[%s33092_s8 + $0x604] ss:$12 sps:$4 sm:$0xff]   ;;  %v24344_v5 = vld [vmem:[%s33092_s8 + $0x4e0] ss:$12 sps:$4 sm:$0xff]  }
 0x7f7   : > { %v24347_v19 = vld [vmem:[%s33092_s8 + $0x600] ss:$12 sps:$4 sm:$0xff]  }
 0x7f9   : > { %22021 = vmatpush3.bf16.msra.mxu0 %v24288_v44  ;;  %22057 = vmatpush3.bf16.msra.mxu1 %v24289_v55  ;;  %v24352_v44 = vld [vmem:[%s33092_s8 + $0x4cc] ss:$12 sps:$4 sm:$0xff]  }
 0x7fa   : > { %22028 = vmatprep.subr.bf16.mxu0 %v24290_v15  ;;  %22058 = vmatprep.subr.bf16.mxu1 %v24291_v10  ;;  %v24355_v55 = vld [vmem:[%s33092_s8 + $0x76c] ss:$12 sps:$4 sm:$0xff]   ;;  %v24350_v15 = vld [vmem:[%s33092_s8 + $0x4c8] ss:$12 sps:$4 sm:$0xff]  }
 0x7fb   : > { %v24353_v10 = vld [vmem:[%s33092_s8 + $0x768] ss:$12 sps:$4 sm:$0xff]  }
 0x7fc   : > { %10733 = vmatmul.mubr.bf16.vlgmr.msra.gmra.mxu0 %v29692_v21 }
 0x7fd   : > { %22029 = vmatpush3.bf16.msra.mxu0 %v24292_v62  ;;  %10772 = vmatprep.mubr.bf16.mxu0 %v29775_v60  ;;  %v24358_v62 = vld [vmem:[%s33092_s8 + $0x4b4] ss:$12 sps:$4 sm:$0xff]  }
 0x7fe   : > { %22059 = vmatpush3.bf16.msra.mxu1 %v24293_v29  ;;  %22030 = vmatprep.subr.bf16.mxu0 %v24294_v30  ;;  %v24361_v29 = vld [vmem:[%s33092_s8 + $0x754] ss:$12 sps:$4 sm:$0xff]   ;;  %v24356_v30 = vld [vmem:[%s33092_s8 + $0x4b0] ss:$12 sps:$4 sm:$0xff]  }
 0x7ff   : > { %22060 = vmatprep.subr.bf16.mxu1 %v24295_v35  ;;  %v24359_v35 = vld [vmem:[%s33092_s8 + $0x750] ss:$12 sps:$4 sm:$0xff]  }
 0x801   : > { %22031 = vmatpush3.bf16.msra.mxu0 %v24296_v2  ;;  %v24364_v2 = vld [vmem:[%s33092_s8 + $0x49c] ss:$12 sps:$4 sm:$0xff]  }
 0x802   : > { %22061 = vmatpush3.bf16.msra.mxu1 %v24297_v37  ;;  %22032 = vmatprep.subr.bf16.mxu0 %v24298_v59  ;;  %v24367_v37 = vld [vmem:[%s33092_s8 + $0x73c] ss:$12 sps:$4 sm:$0xff]   ;;  %v24362_v59 = vld [vmem:[%s33092_s8 + $0x498] ss:$12 sps:$4 sm:$0xff]  }
 0x803   : > { %22062 = vmatprep.subr.bf16.mxu1 %v24299_v13  ;;  %v24365_v13 = vld [vmem:[%s33092_s8 + $0x738] ss:$12 sps:$4 sm:$0xff]  }
 0x805   : > { %22033 = vmatpush3.bf16.msra.mxu0 %v24300_v8  ;;  %v24370_v8 = vld [vmem:[%s33092_s8 + $0x484] ss:$12 sps:$4 sm:$0xff]  }
 0x806   : > { %22063 = vmatpush3.bf16.msra.mxu1 %v24301_v27  ;;  %22034 = vmatprep.subr.bf16.mxu0 %v24302_v32  ;;  %v24373_v27 = vld [vmem:[%s33092_s8 + $0x724] ss:$12 sps:$4 sm:$0xff]   ;;  %v24368_v32 = vld [vmem:[%s33092_s8 + $0x480] ss:$12 sps:$4 sm:$0xff]  }
 0x807   : > { %22064 = vmatprep.subr.bf16.mxu1 %v24303_v34  ;;  %v24371_v34 = vld [vmem:[%s33092_s8 + $0x720] ss:$12 sps:$4 sm:$0xff]  }
 0x809   : > { %22035 = vmatpush3.bf16.msra.mxu0 %v24304_v52  ;;  %v24376_v52 = vld [vmem:[%s33092_s8 + $0x5ec] ss:$12 sps:$4 sm:$0xff]  }
 0x80a   : > { %22065 = vmatpush3.bf16.msra.mxu1 %v24305_v16  ;;  %22036 = vmatprep.subr.bf16.mxu0 %v24306_v43  ;;  %v24379_v16 = vld [vmem:[%s33092_s8 + $0x70c] ss:$12 sps:$4 sm:$0xff]   ;;  %v24374_v43 = vld [vmem:[%s33092_s8 + $0x5e8] ss:$12 sps:$4 sm:$0xff]  }
 0x80b   : > { %11822 = vmatprep.subr.bf16.mxu1 %v24309_v14  ;;  %v24377_v14 = vld [vmem:[%s33092_s8 + $0x708] ss:$12 sps:$4 sm:$0xff]  }
 0x80d   : > { %10813 = vmatmul.mubr.bf16.vlgmr.msra.gmra.mxu1 %v29836_v4  ;;  %22037 = vmatpush3.bf16.msra.mxu0 %v24310_v39  ;;  %v24382_v39 = vld [vmem:[%s33092_s8 + $0x5d4] ss:$12 sps:$4 sm:$0xff]  }
 0x80e   : > { %11823 = vmatpush1.bf16.msra.mxu1 %v24307_v41  ;;  %11854 = vmatprep.mubr.bf16.mxu1 %v29775_v60  ;;  %v24385_v41 = vld [vmem:[%s33092_s8 + $0x6f4] ss:$12 sps:$4 sm:$0xff]  }
 0x80f   : > { %22038 = vmatprep.subr.bf16.mxu0 %v24311_v63  ;;  %11824 = vmatprep.subr.bf16.mxu1 %v24314_v47  ;;  %v24380_v63 = vld [vmem:[%s33092_s8 + $0x5d0] ss:$12 sps:$4 sm:$0xff]  }
 0x810   : > { %v24383_v47 = vld [vmem:[%s33092_s8 + $0x6f0] ss:$12 sps:$4 sm:$0xff]  }
 0x811   : > { %22039 = vmatpush3.bf16.msra.mxu0 %v24315_v23  ;;  %v24388_v23 = vld [vmem:[%s33092_s8 + $0x5bc] ss:$12 sps:$4 sm:$0xff]  }
 0x812   : > { %11825 = vmatpush1.bf16.msra.mxu1 %v24312_v54  ;;  %22040 = vmatprep.subr.bf16.mxu0 %v24316_v26  ;;  %v24391_v54 = vld [vmem:[%s33092_s8 + $0x6dc] ss:$12 sps:$4 sm:$0xff]   ;;  %v24386_v26 = vld [vmem:[%s33092_s8 + $0x5b8] ss:$12 sps:$4 sm:$0xff]  }
 0x813   : > { %11826 = vmatprep.subr.bf16.mxu1 %v24319_v49  ;;  %v24389_v49 = vld [vmem:[%s33092_s8 + $0x6d8] ss:$12 sps:$4 sm:$0xff]  }
 0x815   : > { %22041 = vmatpush3.bf16.msra.mxu0 %v24320_v22  ;;  %v24394_v22 = vld [vmem:[%s33092_s8 + $0x5a4] ss:$12 sps:$4 sm:$0xff]  }
 0x816   : > { %11827 = vmatpush1.bf16.msra.mxu1 %v24317_v6  ;;  %22042 = vmatprep.subr.bf16.mxu0 %v24321_v57  ;;  %v24397_v6 = vld [vmem:[%s33092_s8 + $0x6c4] ss:$12 sps:$4 sm:$0xff]   ;;  %v24392_v57 = vld [vmem:[%s33092_s8 + $0x5a0] ss:$12 sps:$4 sm:$0xff]  }
 0x817   : > { %11828 = vmatprep.subr.bf16.mxu1 %v24324_v58  ;;  %v24395_v58 = vld [vmem:[%s33092_s8 + $0x6c0] ss:$12 sps:$4 sm:$0xff]  }
 0x819   : > { %22043 = vmatpush3.bf16.msra.mxu0 %v24325_v36  ;;  %v24400_v36 = vld [vmem:[%s33092_s8 + $0x58c] ss:$12 sps:$4 sm:$0xff]  }
 0x81a   : > { %11829 = vmatpush1.bf16.msra.mxu1 %v24322_v51  ;;  %11781 = vmatprep.subr.bf16.mxu0 %v24328_v40  ;;  %v24401_v51 = vld [vmem:[%s33092_s8 + $0x5f0] ss:$12 sps:$4 sm:$0xff]   ;;  %v24398_v40 = vld [vmem:[%s33092_s8 + $0x588] ss:$12 sps:$4 sm:$0xff]  }
 0x81b   : > { %11830 = vmatprep.subr.bf16.mxu1 %v24331_v38  ;;  %v24402_v38 = vld [vmem:[%s33092_s8 + $0x530] ss:$12 sps:$4 sm:$0xff]  }
 0x81c   : > { %10773 = vmatmul.mubr.bf16.vlgmr.msra.gmra.mxu0 %v29783_v20 }
 0x81d   : > { %11782 = vmatpush1.bf16.msra.mxu0 %v24326_v48  ;;  %11813 = vmatprep.mubr.bf16.mxu0 %v29694_v11  ;;  %v24405_v48 = vld [vmem:[%s33092_s8 + $0x574] ss:$12 sps:$4 sm:$0xff]  }
 0x81e   : > { %11831 = vmatpush1.bf16.msra.mxu1 %v24329_v24  ;;  %11783 = vmatprep.subr.bf16.mxu0 %v24334_v45  ;;  %v24406_v24 = vld [vmem:[%s33092_s8 + $0x5d8] ss:$12 sps:$4 sm:$0xff]   ;;  %v24403_v45 = vld [vmem:[%s33092_s8 + $0x570] ss:$12 sps:$4 sm:$0xff]  }
 0x81f   : > { %11832 = vmatprep.subr.bf16.mxu1 %v24337_v25  ;;  %v24407_v25 = vld [vmem:[%s33092_s8 + $0x518] ss:$12 sps:$4 sm:$0xff]  }
 0x821   : > { %11784 = vmatpush1.bf16.msra.mxu0 %v24332_v1  ;;  %v24410_v1 = vld [vmem:[%s33092_s8 + $0x55c] ss:$12 sps:$4 sm:$0xff]  }
 0x822   : > { %11833 = vmatpush1.bf16.msra.mxu1 %v24335_v53  ;;  %11785 = vmatprep.subr.bf16.mxu0 %v24340_v0  ;;  %v24411_v53 = vld [vmem:[%s33092_s8 + $0x5c0] ss:$12 sps:$4 sm:$0xff]   ;;  %v24408_v0 = vld [vmem:[%s33092_s8 + $0x558] ss:$12 sps:$4 sm:$0xff]  }
 0x823   : > { %11834 = vmatprep.subr.bf16.mxu1 %v24343_v18  ;;  %v24415_v18 = vld [vmem:[%s33092_s8 + $0x544] ss:$12 sps:$4 sm:$0xff]  }
 0x825   : > { %11786 = vmatpush1.bf16.msra.mxu0 %v24338_v28  ;;  %v24416_v28 = vld [vmem:[%s33092_s8 + $0x5a8] ss:$12 sps:$4 sm:$0xff]  }
 0x826   : > { %11835 = vmatpush1.bf16.msra.mxu1 %v24341_v17  ;;  %11787 = vmatprep.subr.bf16.mxu0 %v24346_v46  ;;  %v24413_v17 = vld [vmem:[%s33092_s8 + $0x540] ss:$12 sps:$4 sm:$0xff]   ;;  %v24417_v46 = vld [vmem:[%s33092_s8 + $0x4e8] ss:$12 sps:$4 sm:$0xff]  }
 0x827   : > { %11836 = vmatprep.subr.bf16.mxu1 %v24349_v31  ;;  %v24420_v31 = vld [vmem:[%s33092_s8 + $0x82c] ss:$12 sps:$4 sm:$0xff]  }
 0x829   : > { %11788 = vmatpush1.bf16.msra.mxu0 %v24344_v5  ;;  %v24421_v5 = vld [vmem:[%s33092_s8 + $0x590] ss:$12 sps:$4 sm:$0xff]  }
 0x82a   : > { %11837 = vmatpush1.bf16.msra.mxu1 %v24347_v19  ;;  %11789 = vmatprep.subr.bf16.mxu0 %v24352_v44  ;;  %v24418_v19 = vld [vmem:[%s33092_s8 + $0x828] ss:$12 sps:$4 sm:$0xff]   ;;  %v24422_v44 = vld [vmem:[%s33092_s8 + $0x4d0] ss:$12 sps:$4 sm:$0xff]  }
 0x82b   : > { %11838 = vmatprep.subr.bf16.mxu1 %v24355_v55  ;;  %v24425_v55 = vld [vmem:[%s33092_s8 + $0x814] ss:$12 sps:$4 sm:$0xff]  }
 0x82d   : > { %11790 = vmatpush1.bf16.msra.mxu0 %v24350_v15  ;;  %v24426_v15 = vld [vmem:[%s33092_s8 + $0x578] ss:$12 sps:$4 sm:$0xff]  }
 0x82e   : > { %11839 = vmatpush2.bf16.msra.mxu1 %v24353_v10  ;;  %11791 = vmatprep.subr.bf16.mxu0 %v24358_v62  ;;  %v24423_v10 = vld [vmem:[%s33092_s8 + $0x810] ss:$12 sps:$4 sm:$0xff]   ;;  %v24427_v62 = vld [vmem:[%s33092_s8 + $0x4b8] ss:$12 sps:$4 sm:$0xff]  }
 0x82f   : > { %11840 = vmatprep.subr.bf16.mxu1 %v24361_v29  ;;  %v24430_v29 = vld [vmem:[%s33092_s8 + $0x7fc] ss:$12 sps:$4 sm:$0xff]  }
 0x831   : > { %11792 = vmatpush1.bf16.msra.mxu0 %v24356_v30  ;;  %v24431_v30 = vld [vmem:[%s33092_s8 + $0x560] ss:$12 sps:$4 sm:$0xff]  }
 0x832   : > { %11841 = vmatpush2.bf16.msra.mxu1 %v24359_v35  ;;  %11793 = vmatprep.subr.bf16.mxu0 %v24364_v2  ;;  %v24428_v35 = vld [vmem:[%s33092_s8 + $0x7f8] ss:$12 sps:$4 sm:$0xff]   ;;  %v24432_v2 = vld [vmem:[%s33092_s8 + $0x4a0] ss:$12 sps:$4 sm:$0xff]  }
 0x833   : > { %11842 = vmatprep.subr.bf16.mxu1 %v24367_v37  ;;  %v24435_v37 = vld [vmem:[%s33092_s8 + $0x7e4] ss:$12 sps:$4 sm:$0xff]  }
 0x835   : > { %11794 = vmatpush1.bf16.msra.mxu0 %v24362_v59  ;;  %v24436_v59 = vld [vmem:[%s33092_s8 + $0x548] ss:$12 sps:$4 sm:$0xff]  }
 0x836   : > { %11843 = vmatpush2.bf16.msra.mxu1 %v24365_v13  ;;  %11795 = vmatprep.subr.bf16.mxu0 %v24370_v8  ;;  %v24433_v13 = vld [vmem:[%s33092_s8 + $0x7e0] ss:$12 sps:$4 sm:$0xff]   ;;  %v24437_v8 = vld [vmem:[%s33092_s8 + $0x488] ss:$12 sps:$4 sm:$0xff]  }
 0x837   : > { %11844 = vmatprep.subr.bf16.mxu1 %v24373_v27  ;;  %v24440_v27 = vld [vmem:[%s33092_s8 + $0x7cc] ss:$12 sps:$4 sm:$0xff]  }
 0x839   : > { %11796 = vmatpush1.bf16.msra.mxu0 %v24368_v32  ;;  %v24441_v32 = vld [vmem:[%s33092_s8 + $0x770] ss:$12 sps:$4 sm:$0xff]  }
 0x83a   : > { %11845 = vmatpush2.bf16.msra.mxu1 %v24371_v34  ;;  %11797 = vmatprep.subr.bf16.mxu0 %v24376_v52  ;;  %v24438_v34 = vld [vmem:[%s33092_s8 + $0x7c8] ss:$12 sps:$4 sm:$0xff]   ;;  %v24442_v52 = vld [vmem:[%s33092_s8 + $0x6b0] ss:$12 sps:$4 sm:$0xff]  }
 0x83b   : > { %11846 = vmatprep.subr.bf16.mxu1 %v24379_v16  ;;  %v24445_v16 = vld [vmem:[%s33092_s8 + $0x7b4] ss:$12 sps:$4 sm:$0xff]  }
 0x83d   : > { %11798 = vmatpush2.bf16.msra.mxu0 %v24374_v43  ;;  %v24446_v43 = vld [vmem:[%s33092_s8 + $0x758] ss:$12 sps:$4 sm:$0xff]  }
 0x83e   : > { %11847 = vmatpush2.bf16.msra.mxu1 %v24377_v14  ;;  %11799 = vmatprep.subr.bf16.mxu0 %v24382_v39  ;;  %v24443_v39 = vld [vmem:[%s33092_s8 + $0x7b0] ss:$12 sps:$4 sm:$0xff]  }
 0x83f   : > { %11848 = vmatprep.subr.bf16.mxu1 %v24385_v41  ;;  %v24447_v41 = vld [vmem:[%s33092_s8 + $0x698] ss:$12 sps:$4 sm:$0xff]  }
 0x841   : > { %11800 = vmatpush2.bf16.msra.mxu0 %v24380_v63  ;;  %v24450_v63 = vld [vmem:[%s33092_s8 + $0x79c] ss:$12 sps:$4 sm:$0xff]  }
 0x842   : > { %11849 = vmatpush2.bf16.msra.mxu1 %v24383_v47  ;;  %11801 = vmatprep.subr.bf16.mxu0 %v24388_v23 }
 0x843   : > { %11850 = vmatprep.subr.bf16.mxu1 %v24391_v54  ;;  %v24452_v54 = vld [vmem:[%s33092_s8 + $0x680] ss:$12 sps:$4 sm:$0xff]  }
 0x845   : > { %11802 = vmatpush2.bf16.msra.mxu0 %v24386_v26  ;;  %v24455_v26 = vld [vmem:[%s33092_s8 + $0x784] ss:$12 sps:$4 sm:$0xff]  }
 0x846   : > { %11851 = vmatpush2.bf16.msra.mxu1 %v24389_v49  ;;  %11803 = vmatprep.subr.bf16.mxu0 %v24394_v22  ;;  %v24456_v22 = vld [vmem:[%s33092_s8 + $0x728] ss:$12 sps:$4 sm:$0xff]  }
 0x847   : > { %11852 = vmatprep.subr.bf16.mxu1 %v24397_v6  ;;  %v24453_v6 = vld [vmem:[%s33092_s8 + $0x780] ss:$12 sps:$4 sm:$0xff]  }
 0x849   : > { %11804 = vmatpush2.bf16.msra.mxu0 %v24392_v57  ;;  %v24457_v57 = vld [vmem:[%s33092_s8 + $0x668] ss:$12 sps:$4 sm:$0xff]  }
 0x84a   : > { %11853 = vmatpush2.bf16.msra.mxu1 %v24395_v58  ;;  %11805 = vmatprep.subr.bf16.mxu0 %v24400_v36  ;;  %v24460_v58 = vld [vmem:[%s33092_s8 + $0x8ec] ss:$12 sps:$4 sm:$0xff]   ;;  %v24461_v36 = vld [vmem:[%s33092_s8 + $0x710] ss:$12 sps:$4 sm:$0xff]  }
 0x84b   : > { %22072 = vmatprep.subr.bf16.mxu1 %v24401_v51  ;;  %v24458_v51 = vld [vmem:[%s33092_s8 + $0x8e8] ss:$12 sps:$4 sm:$0xff]  }
 0x84d   : > { %11855 = vmatmul.mubr.bf16.vlgmr.msra.gmra.mxu1 %v29783_v20  ;;  %11806 = vmatpush2.bf16.msra.mxu0 %v24398_v40  ;;  %v24462_v40 = vld [vmem:[%s33092_s8 + $0x650] ss:$12 sps:$4 sm:$0xff]  }
 0x84e   : > { %22073 = vmatpush3.bf16.msra.mxu1 %v24402_v38  ;;  %11936 = vmatprep.mubr.bf16.mxu1 %v29694_v11  ;;  %v24412_v11 = vld [vmem:[%s33092_s8 + $0x500] ss:$12 sps:$4 sm:$0xff]  }
 0x84f   : > { %11807 = vmatprep.subr.bf16.mxu0 %v24405_v48  ;;  %22074 = vmatprep.subr.bf16.mxu1 %v24406_v24  ;;  %v24465_v38 = vld [vmem:[%s33092_s8 + $0x8d4] ss:$12 sps:$4 sm:$0xff]   ;;  %v24466_v48 = vld [vmem:[%s33092_s8 + $0x6f8] ss:$12 sps:$4 sm:$0xff]   ;;  %v24463_v24 = vld [vmem:[%s33092_s8 + $0x8d0] ss:$12 sps:$4 sm:$0xff]  }
 0x851   : > { %11808 = vmatpush2.bf16.msra.mxu0 %v24403_v45  ;;  %v24467_v45 = vld [vmem:[%s33092_s8 + $0x638] ss:$12 sps:$4 sm:$0xff]  }
 0x852   : > { %22075 = vmatpush3.bf16.msra.mxu1 %v24407_v25  ;;  %11809 = vmatprep.subr.bf16.mxu0 %v24410_v1  ;;  %v24470_v25 = vld [vmem:[%s33092_s8 + $0x8bc] ss:$12 sps:$4 sm:$0xff]   ;;  %v24471_v1 = vld [vmem:[%s33092_s8 + $0x6e0] ss:$12 sps:$4 sm:$0xff]  }
 0x853   : > { %22076 = vmatprep.subr.bf16.mxu1 %v24411_v53  ;;  %v24468_v53 = vld [vmem:[%s33092_s8 + $0x8b8] ss:$12 sps:$4 sm:$0xff]  }
 0x855   : > { %11810 = vmatpush2.bf16.msra.mxu0 %v24408_v0  ;;  %v24472_v0 = vld [vmem:[%s33092_s8 + $0x620] ss:$12 sps:$4 sm:$0xff]  }
 0x856   : > { %22077 = vmatpush3.bf16.msra.mxu1 %v24412_v11  ;;  %11811 = vmatprep.subr.bf16.mxu0 %v24415_v18  ;;  %v24475_v11 = vld [vmem:[%s33092_s8 + $0x8a4] ss:$12 sps:$4 sm:$0xff]   ;;  %v24476_v18 = vld [vmem:[%s33092_s8 + $0x6c8] ss:$12 sps:$4 sm:$0xff]  }
 0x857   : > { %22078 = vmatprep.subr.bf16.mxu1 %v24416_v28  ;;  %v24473_v28 = vld [vmem:[%s33092_s8 + $0x8a0] ss:$12 sps:$4 sm:$0xff]  }
 0x859   : > { %11812 = vmatpush2.bf16.msra.mxu0 %v24413_v17  ;;  %v24477_v17 = vld [vmem:[%s33092_s8 + $0x608] ss:$12 sps:$4 sm:$0xff]  }
 0x85a   : > { %22079 = vmatpush3.bf16.msra.mxu1 %v24417_v46  ;;  %11863 = vmatprep.subr.bf16.mxu0 %v24420_v31  ;;  %v24480_v46 = vld [vmem:[%s33092_s8 + $0x88c] ss:$12 sps:$4 sm:$0xff]   ;;  %v24478_v31 = vld [vmem:[%s33092_s8 + $0x888] ss:$12 sps:$4 sm:$0xff]  }
 0x85b   : > { %22080 = vmatprep.subr.bf16.mxu1 %v24421_v5  ;;  %v24483_v5 = vld [vmem:[%s33092_s8 + $0x874] ss:$12 sps:$4 sm:$0xff]  }
 0x85c   : > { %11814 = vmatmul.mubr.bf16.vlgmr.msra.gmra.mxu0 %v29692_v21 }
 0x85d   : > { %11864 = vmatpush1.bf16.msra.mxu0 %v24418_v19  ;;  %11895 = vmatprep.mubr.bf16.mxu0 %v29761_v9  ;;  %v24481_v19 = vld [vmem:[%s33092_s8 + $0x870] ss:$12 sps:$4 sm:$0xff]  }
 0x85e   : > { %22081 = vmatpush3.bf16.msra.mxu1 %v24422_v44  ;;  %11865 = vmatprep.subr.bf16.mxu0 %v24425_v55  ;;  %v24486_v44 = vld [vmem:[%s33092_s8 + $0x85c] ss:$12 sps:$4 sm:$0xff]   ;;  %v24484_v55 = vld [vmem:[%s33092_s8 + $0x858] ss:$12 sps:$4 sm:$0xff]  }
 0x85f   : > { %22082 = vmatprep.subr.bf16.mxu1 %v24426_v15  ;;  %v24487_v15 = vld [vmem:[%s33092_s8 + $0x840] ss:$12 sps:$4 sm:$0xff]  }
 0x861   : > { %11866 = vmatpush1.bf16.msra.mxu0 %v24423_v10  ;;  %v24490_v10 = vld [vmem:[%s33092_s8 + $0x8f0] ss:$12 sps:$4 sm:$0xff]  }
 0x862   : > { %22083 = vmatpush3.bf16.msra.mxu1 %v24427_v62  ;;  %11867 = vmatprep.subr.bf16.mxu0 %v24430_v29  ;;  %v24491_v62 = vld [vmem:[%s33092_s8 + $0x830] ss:$12 sps:$4 sm:$0xff]   ;;  %v24492_v29 = vld [vmem:[%s33092_s8 + $0x8d8] ss:$12 sps:$4 sm:$0xff]  }
 0x863   : > { %22084 = vmatprep.subr.bf16.mxu1 %v24431_v30 }
 0x865   : > { %11868 = vmatpush1.bf16.msra.mxu0 %v24428_v35 }
 0x866   : > { %22085 = vmatpush3.bf16.msra.mxu1 %v24432_v2  ;;  %11869 = vmatprep.subr.bf16.mxu0 %v24435_v37  ;;  %v24493_v2 = vld [vmem:[%s33092_s8 + $0x818] ss:$12 sps:$4 sm:$0xff]  }
 0x867   : > { %22086 = vmatprep.subr.bf16.mxu1 %v24436_v59  ;;  %v24494_v59 = vld [vmem:[%s33092_s8 + $0x8c0] ss:$12 sps:$4 sm:$0xff]  }
 0x869   : > { %11870 = vmatpush1.bf16.msra.mxu0 %v24433_v13 }
 0x86a   : > { %22087 = vmatpush3.bf16.msra.mxu1 %v24437_v8  ;;  %11871 = vmatprep.subr.bf16.mxu0 %v24440_v27  ;;  %v24495_v27 = vld [vmem:[%s33092_s8 + $0x800] ss:$12 sps:$4 sm:$0xff]  }
 0x86b   : > { %22094 = vmatprep.subr.bf16.mxu1 %v24441_v32 }
 0x86c   : > { %v30240_v14 = vpop.f32.mrf.mxu1 }
 0x86d   : > { %11937 = vmatmul.mubr.bf16.vlgmr.msra.gmra.mxu1 %v29692_v21  ;;  %11872 = vmatpush1.bf16.msra.mxu0 %v24438_v34  ;;  %v24451_v21 = vld [vmem:[%s33092_s8 + $0x740] ss:$12 sps:$4 sm:$0xff]  }
 0x86e   : > { %22095 = vmatpush3.bf16.msra.mxu1 %v24442_v52  ;;  %11976 = vmatprep.mubr.bf16.mxu1 %v29775_v60  ;;  %v30253_v47 = vpop.f32.mrf.mxu1  ;;  %v24448_v60 = vld [vmem:[%s33092_s8 + $0x798] ss:$12 sps:$4 sm:$0xff]   ;;  %v24508_v52 = vld [vmem:[%s33093_s9 + $0x11c] ss:$20 sps:$4 sm:$0xff]  }
 0x86f   : > { %11873 = vmatprep.subr.bf16.mxu0 %v24445_v16  ;;  %22096 = vmatprep.subr.bf16.mxu1 %v24446_v43  ;;  %v24506_v34 = vld [vmem:[%s33093_s9 + $0x118] ss:$20 sps:$4 sm:$0xff]   ;;  %v24511_v16 = vld [vmem:[%s33093_s9 + $0xf4] ss:$20 sps:$4 sm:$0xff]  }
 0x870   : > { %v10615_v23 = vpop.f32.mrf.mxu1  ;;  %v24497_v43 = vld [vmem:[%s33092_s8 + $0x7e8] ss:$12 sps:$4 sm:$0xff]  }
 0x871   : > { %11874 = vmatpush1.bf16.msra.mxu0 %v24443_v39  ;;  %v24498_v39 = vld [vmem:[%s33092_s8 + $0x890] ss:$12 sps:$4 sm:$0xff]   ;;  %v24501_v23 = vld [vmem:[%s33092_s8 + $0x7b8] ss:$12 sps:$4 sm:$0xff]  }
 0x872   : > { %22097 = vmatpush3.bf16.msra.mxu1 %v24447_v41  ;;  %11875 = vmatprep.subr.bf16.mxu0 %v24450_v63  ;;  %v10616_v49 = vpop.f32.mrf.mxu1  ;;  %v24499_v41 = vld [vmem:[%s33092_s8 + $0x7d0] ss:$12 sps:$4 sm:$0xff]   ;;  %v24500_v63 = vld [vmem:[%s33092_s8 + $0x878] ss:$12 sps:$4 sm:$0xff]  }
 0x873   : > { %22098 = vmatprep.subr.bf16.mxu1 %v24451_v21  ;;  %v24512_v49 = vld [vmem:[%s33093_s9 + $0xc8] ss:$20 sps:$4 sm:$0xff]  }
 0x875   : > { %11876 = vmatpush1.bf16.msra.mxu0 %v24448_v60  ;;  %v24514_v60 = vld [vmem:[%s33093_s9 + $0xcc] ss:$20 sps:$4 sm:$0xff]  }
 0x876   : > { %22099 = vmatpush3.bf16.msra.mxu1 %v24452_v54  ;;  %11877 = vmatprep.subr.bf16.mxu0 %v24455_v26  ;;  %v24502_v26 = vld [vmem:[%s33092_s8 + $0x860] ss:$12 sps:$4 sm:$0xff]  }
 0x877   : > { %22100 = vmatprep.subr.bf16.mxu1 %v24456_v22 }
 0x879   : > { %11878 = vmatpush1.bf16.msra.mxu0 %v24453_v6 }
 0x87a   : > { %22101 = vmatpush3.bf16.msra.mxu1 %v24457_v57  ;;  %11879 = vmatprep.subr.bf16.mxu0 %v24460_v58  ;;  %v24503_v57 = vld [vmem:[%s33092_s8 + $0x7a0] ss:$12 sps:$4 sm:$0xff]   ;;  %v24517_v58 = vld [vmem:[%s33093_s9 + $0xa4] ss:$20 sps:$4 sm:$0xff]  }
 0x87b   : > { %22102 = vmatprep.subr.bf16.mxu1 %v24461_v36 }
 0x87d   : > { %11880 = vmatpush2.bf16.msra.mxu0 %v24458_v51  ;;  %v24504_v51 = vld [vmem:[%s33092_s8 + $0x848] ss:$12 sps:$4 sm:$0xff]  }
 0x87e   : > { %22103 = vmatpush3.bf16.msra.mxu1 %v24462_v40  ;;  %11881 = vmatprep.subr.bf16.mxu0 %v24465_v38  ;;  %v24515_v40 = vld [vmem:[%s33093_s9 + $0xa0] ss:$20 sps:$4 sm:$0xff]   ;;  %v24520_v38 = vld [vmem:[%s33093_s9 + $0x7c] ss:$20 sps:$4 sm:$0xff]  }
 0x87f   : > { %22104 = vmatprep.subr.bf16.mxu1 %v24466_v48  ;;  %v24518_v48 = vld [vmem:[%s33093_s9 + $0x78] ss:$20 sps:$4 sm:$0xff]  }
 0x881   : > { %11882 = vmatpush2.bf16.msra.mxu0 %v24463_v24  ;;  %v24505_v24 = vld [vmem:[%s33092_s8 + $0x788] ss:$12 sps:$4 sm:$0xff]  }
 0x882   : > { %22105 = vmatpush3.bf16.msra.mxu1 %v24467_v45  ;;  %11883 = vmatprep.subr.bf16.mxu0 %v24470_v25  ;;  %v24523_v45 = vld [vmem:[%s33093_s9 + $0x54] ss:$20 sps:$4 sm:$0xff]   ;;  %v24521_v25 = vld [vmem:[%s33093_s9 + $0x50] ss:$20 sps:$4 sm:$0xff]  }
 0x883   : > { %22106 = vmatprep.subr.bf16.mxu1 %v24471_v1  ;;  %v24526_v1 = vld [vmem:[%s33093_s9 + $0x2c] ss:$20 sps:$4 sm:$0xff]  }
 0x885   : > { %11884 = vmatpush2.bf16.msra.mxu0 %v24468_v53 }
 0x886   : > { %22107 = vmatpush3.bf16.msra.mxu1 %v24472_v0  ;;  %11885 = vmatprep.subr.bf16.mxu0 %v24475_v11  ;;  %v24524_v0 = vld [vmem:[%s33093_s9 + $0x28] ss:$20 sps:$4 sm:$0xff]   ;;  %v24529_v11 = vld [vmem:[%s33093_s9 + $0x4] ss:$20 sps:$4 sm:$0xff]  }
 0x887   : > { %22108 = vmatprep.subr.bf16.mxu1 %v24476_v18 }
 0x889   : > { %11886 = vmatpush2.bf16.msra.mxu0 %v24473_v28 }
 0x88a   : > { %22109 = vmatpush3.bf16.msra.mxu1 %v24477_v17  ;;  %11887 = vmatprep.subr.bf16.mxu0 %v24480_v46  ;;  %v24532_v46 = vld [vmem:[%s33093_s9 + $0x25c] ss:$20 sps:$4 sm:$0xff]  }
 0x88b   : > { %12799 = vmatprep.subr.bf16.mxu1 %v24508_v52 }
 0x88d   : > { %11977 = vmatmul.mubr.bf16.vlgmr.msra.gmra.mxu1 %v29783_v20  ;;  %11888 = vmatpush2.bf16.msra.mxu0 %v24478_v31  ;;  %v24489_v20 = vld [vmem:[%s33092_s8 + $0x844] ss:$12 sps:$4 sm:$0xff]  }
 0x88e   : > { %11889 = vmatprep.subr.bf16.mxu0 %v24483_v5  ;;  %12800 = vmatpush1.bf16.msra.mxu1 %v24506_v34  ;;  %v24530_v5 = vld [vmem:[%s33093_s9 + $0x258] ss:$20 sps:$4 sm:$0xff]   ;;  %v24548_v34 = vld [vmem:[%s33093_s9 + $0x168] ss:$20 sps:$4 sm:$0xff]  }
 0x88f   : > { %12801 = vmatprep.subr.bf16.mxu1 %v24511_v16 }
 0x891   : > { %11890 = vmatpush2.bf16.msra.mxu0 %v24481_v19  ;;  %v24535_v19 = vld [vmem:[%s33093_s9 + $0x234] ss:$20 sps:$4 sm:$0xff]  }
 0x892   : > { %11891 = vmatprep.subr.bf16.mxu0 %v24486_v44  ;;  %v24533_v44 = vld [vmem:[%s33093_s9 + $0x230] ss:$20 sps:$4 sm:$0xff]  }
 0x895   : > { %11892 = vmatpush2.bf16.msra.mxu0 %v24484_v55 }
 0x896   : > { %11893 = vmatprep.subr.bf16.mxu0 %v24489_v20  ;;  %v24538_v20 = vld [vmem:[%s33093_s9 + $0x20c] ss:$20 sps:$4 sm:$0xff]  }
 0x899   : > { %11894 = vmatpush2.bf16.msra.mxu0 %v24487_v15  ;;  %v24536_v15 = vld [vmem:[%s33093_s9 + $0x208] ss:$20 sps:$4 sm:$0xff]  }
 0x89a   : > { %22116 = vmatprep.subr.bf16.mxu0 %v24490_v10 }
 0x89c   : > { %11896 = vmatmul.mubr.bf16.vlgmr.msra.gmra.mxu0 %v29836_v4  ;;  %v10652_v30 = vpop.f32.mrf.mxu0 }
 0x89d   : > { %v10653_v35 = vadd.f32 %v10652_v30, %v30240_v14  ;;  %22117 = vmatpush3.bf16.msra.mxu0 %v24491_v62  ;;  %12016 = vmatprep.mubr.bf16.mxu0 %v29761_v9  ;;  %v24496_v9 = vld [vmem:[%s33092_s8 + $0x8a8] ss:$12 sps:$4 sm:$0xff]   ;;  %v24509_v14 = vld [vmem:[%s33093_s9 + $0xf0] ss:$20 sps:$4 sm:$0xff]  }
 0x89e   : > { %v10654_v37 = vpop.f32.mrf.mxu0  ;;  %22118 = vmatprep.subr.bf16.mxu0 %v24492_v29  ;;  %12802 = vmatpush1.bf16.msra.mxu1 %v24509_v14  ;;  %v24541_v30 = vld [vmem:[%s33093_s9 + $0x1e4] ss:$20 sps:$4 sm:$0xff]  }
 0x89f   : > { %v10655_v13 = vadd.f32 %v10654_v37, %v30253_v47  ;;  %12803 = vmatprep.subr.bf16.mxu1 %v24514_v60  ;;  %v24544_v37 = vld [vmem:[%s33093_s9 + $0x1bc] ss:$20 sps:$4 sm:$0xff]   ;;  %v24553_v14 = vld [vmem:[%s33093_s9 + $0x144] ss:$20 sps:$4 sm:$0xff]  }
 0x8a0   : > { %v10656_v8 = vpop.f32.mrf.mxu0  ;;  %v24554_v60 = vld [vmem:[%s33093_s9 + $0x398] ss:$20 sps:$4 sm:$0xff]  }
 0x8a1   : > { %22119 = vmatpush3.bf16.msra.mxu0 %v24493_v2  ;;  %v24545_v8 = vld [vmem:[%s33093_s9 + $0x190] ss:$20 sps:$4 sm:$0xff]  }
 0x8a2   : > { %v10657_v32 = vpop.f32.mrf.mxu0  ;;  %22120 = vmatprep.subr.bf16.mxu0 %v24494_v59  ;;  %12804 = vmatpush1.bf16.msra.mxu1 %v24512_v49  ;;  %v24542_v59 = vld [vmem:[%s33093_s9 + $0x1b8] ss:$20 sps:$4 sm:$0xff]  }
 0x8a3   : > { %12805 = vmatprep.subr.bf16.mxu1 %v24517_v58  ;;  %v24550_v32 = vld [vmem:[%s33093_s9 + $0x16c] ss:$20 sps:$4 sm:$0xff]  }
 0x8a4   : > { %v24568_v49 = vld [vmem:[%s33093_s9 + $0x34c] ss:$20 sps:$4 sm:$0xff]  }
 0x8a5   : > { %22121 = vmatpush3.bf16.msra.mxu0 %v24495_v27  ;;  %v24572_v58 = vld [vmem:[%s33093_s9 + $0x320] ss:$20 sps:$4 sm:$0xff]  }
 0x8a6   : > { %22122 = vmatprep.subr.bf16.mxu0 %v24496_v9  ;;  %12806 = vmatpush1.bf16.msra.mxu1 %v24515_v40  ;;  %v24586_v40 = vld [vmem:[%s33093_s9 + $0x2d4] ss:$20 sps:$4 sm:$0xff]  }
 0x8a7   : > { %12807 = vmatprep.subr.bf16.mxu1 %v24520_v38  ;;  %v24584_v38 = vld [vmem:[%s33093_s9 + $0x2d0] ss:$20 sps:$4 sm:$0xff]  }
 0x8a9   : > { %22123 = vmatpush3.bf16.msra.mxu0 %v24497_v43 }
 0x8aa   : > { %22124 = vmatprep.subr.bf16.mxu0 %v24498_v39  ;;  %12808 = vmatpush1.bf16.msra.mxu1 %v24518_v48  ;;  %v24592_v48 = vld [vmem:[%s33093_s9 + $0x2ac] ss:$20 sps:$4 sm:$0xff]  }
 0x8ab   : > { %12809 = vmatprep.subr.bf16.mxu1 %v24523_v45  ;;  %v24598_v45 = vld [vmem:[%s33093_s9 + $0x284] ss:$20 sps:$4 sm:$0xff]  }
 0x8ac   : > { %v10693_v47 = vpop.f32.mrf.mxu1 }
 0x8ad   : > { %v30398_v21 = vadd.f32 %v10693_v47, %v10653_v35  ;;  %22125 = vmatpush3.bf16.msra.mxu0 %v24499_v41  ;;  %v24539_v35 = vld [vmem:[%s33093_s9 + $0x1e0] ss:$20 sps:$4 sm:$0xff]   ;;  %v24556_v47 = vld [vmem:[%s33093_s9 + $0x39c] ss:$20 sps:$4 sm:$0xff]  }
 0x8ae   : > { %v10695_v54 = vpop.f32.mrf.mxu1  ;;  %22126 = vmatprep.subr.bf16.mxu0 %v24500_v63  ;;  %12810 = vmatpush1.bf16.msra.mxu1 %v24521_v25  ;;  %v24551_v41 = vld [vmem:[%s33093_s9 + $0x140] ss:$20 sps:$4 sm:$0xff]  }
 0x8af   : > { %v30412_v22 = vadd.f32 %v10695_v54, %v10655_v13  ;;  %12811 = vmatprep.subr.bf16.mxu1 %v24526_v1  ;;  %v24547_v13 = vld [vmem:[%s33093_s9 + $0x194] ss:$20 sps:$4 sm:$0xff]   ;;  %v24604_v1 = vld [vmem:[%s33093_s9 + $0x124] ss:$20 sps:$4 sm:$0xff]  }
 0x8b0   : > { %v10697_v6 = vpop.f32.mrf.mxu1  ;;  %v24562_v54 = vld [vmem:[%s33093_s9 + $0x374] ss:$20 sps:$4 sm:$0xff]  }
 0x8b1   : > { %22127 = vmatpush3.bf16.msra.mxu0 %v24501_v23  ;;  %v24559_v23 = vld [vmem:[%s33093_s9 + $0x3a4] ss:$20 sps:$4 sm:$0xff]   ;;  %v24566_v6 = vld [vmem:[%s33093_s9 + $0x348] ss:$20 sps:$4 sm:$0xff]   ;;  %v24596_v25 = vld [vmem:[%s33093_s9 + $0x280] ss:$20 sps:$4 sm:$0xff]  }
 0x8b2   : > { %v10698_v36 = vpop.f32.mrf.mxu1  ;;  %22128 = vmatprep.subr.bf16.mxu0 %v24502_v26  ;;  %12812 = vmatpush1.bf16.msra.mxu1 %v24524_v0  ;;  %v24560_v26 = vld [vmem:[%s33093_s9 + $0x370] ss:$20 sps:$4 sm:$0xff]  }
 0x8b3   : > { %12813 = vmatprep.subr.bf16.mxu1 %v24529_v11  ;;  %v24580_v36 = vld [vmem:[%s33093_s9 + $0x2fc] ss:$20 sps:$4 sm:$0xff]  }
 0x8b5   : > { %22129 = vmatpush3.bf16.msra.mxu0 %v24503_v57  ;;  %v24574_v57 = vld [vmem:[%s33093_s9 + $0x324] ss:$20 sps:$4 sm:$0xff]  }
 0x8b6   : > { %22130 = vmatprep.subr.bf16.mxu0 %v24504_v51  ;;  %v24578_v51 = vld [vmem:[%s33093_s9 + $0x2f8] ss:$20 sps:$4 sm:$0xff]  }
 0x8b9   : > { %22131 = vmatpush3.bf16.msra.mxu0 %v24505_v24  ;;  %v24590_v24 = vld [vmem:[%s33093_s9 + $0x2a8] ss:$20 sps:$4 sm:$0xff]  }
 0x8ba   : > { %12840 = vmatprep.subr.bf16.mxu0 %v24556_v47  ;;  %v24581_v47 = vld [vmem:[%s33093_s9 + $0x300] ss:$20 sps:$4 sm:$0xff]  }
 0x8bc   : > { %v22022_v53 = vpop.f32.mrf.mxu0  ;;  %12017 = vmatmul.mubr.bf16.vlgmr.msra.gmra.mxu0 %v29836_v4  ;;  %v24527_v4 = vld [vmem:[%s33093_s9] ss:$20 sps:$4 sm:$0xff]  }
 0x8bd   : > { %12872 = vmatprep.mubr.bf16.mxu0 %v33155_v7  ;;  %12814 = vmatpush1.bf16.msra.mxu1 %v24527_v4 }
 0x8be   : > { %v22023_v18 = vpop.f32.mrf.mxu0  ;;  %12815 = vmatprep.subr.bf16.mxu1 %v24532_v46  ;;  %12841 = vmatpush1.bf16.msra.mxu0 %v24554_v60  ;;  %v24587_v60 = vld [vmem:[%s33093_s9 + $0x2d8] ss:$20 sps:$4 sm:$0xff]  }
 0x8bf   : > { %v22024_v28 = vadd.f32 %v22023_v18, %v22022_v53  ;;  %12842 = vmatprep.subr.bf16.mxu0 %v24562_v54  ;;  %v24595_v54 = vld [vmem:[%s33093_s9 + $0x2b4] ss:$20 sps:$4 sm:$0xff]  }
 0x8c0   : > { %v22025_v17 = vpop.f32.mrf.mxu0 }
 0x8c1   : > { %12816 = vmatpush2.bf16.msra.mxu1 %v24530_v5 }
 0x8c2   : > { %v22026_v31 = vpop.f32.mrf.mxu0  ;;  %12817 = vmatprep.subr.bf16.mxu1 %v24535_v19  ;;  %12843 = vmatpush1.bf16.msra.mxu0 %v24560_v26 }
 0x8c3   : > { %12844 = vmatprep.subr.bf16.mxu0 %v24568_v49  ;;  %v24593_v49 = vld [vmem:[%s33093_s9 + $0x2b0] ss:$20 sps:$4 sm:$0xff]  }
 0x8c5   : > { %12818 = vmatpush2.bf16.msra.mxu1 %v24533_v44 }
 0x8c6   : > { %12819 = vmatprep.subr.bf16.mxu1 %v24538_v20  ;;  %12845 = vmatpush1.bf16.msra.mxu0 %v24566_v6 }
 0x8c7   : > { %12846 = vmatprep.subr.bf16.mxu0 %v24574_v57  ;;  %v24601_v57 = vld [vmem:[%s33093_s9 + $0x28c] ss:$20 sps:$4 sm:$0xff]  }
 0x8c9   : > { %12820 = vmatpush2.bf16.msra.mxu1 %v24536_v15 }
 0x8ca   : > { %12821 = vmatprep.subr.bf16.mxu1 %v24541_v30  ;;  %12847 = vmatpush1.bf16.msra.mxu0 %v24572_v58 }
 0x8cb   : > { %12848 = vmatprep.subr.bf16.mxu0 %v24580_v36 }
 0x8cd   : > { %v22066_v55 = vpop.f32.mrf.mxu1  ;;  %12822 = vmatpush2.bf16.msra.mxu1 %v24539_v35 }
 0x8ce   : > { %12823 = vmatprep.subr.bf16.mxu1 %v24544_v37  ;;  %12849 = vmatpush1.bf16.msra.mxu0 %v24578_v51 }
 0x8cf   : > { %v22067_v10 = vpop.f32.mrf.mxu1  ;;  %12850 = vmatprep.subr.bf16.mxu0 %v24586_v40  ;;  %v24599_v40 = vld [vmem:[%s33093_s9 + $0x288] ss:$20 sps:$4 sm:$0xff]  }
 0x8d0   : > { %v22068_v62 = vadd.f32 %v22067_v10, %v22066_v55 }
 0x8d1   : > { %v22069_v29 = vpop.f32.mrf.mxu1  ;;  %12824 = vmatpush2.bf16.msra.mxu1 %v24542_v59 }
 0x8d2   : > { %12825 = vmatprep.subr.bf16.mxu1 %v24547_v13  ;;  %12851 = vmatpush1.bf16.msra.mxu0 %v24584_v38 }
 0x8d3   : > { %v22070_v2 = vpop.f32.mrf.mxu1  ;;  %12852 = vmatprep.subr.bf16.mxu0 %v24592_v48  ;;  %v24605_v48 = vld [vmem:[%s33093_s9 + $0x268] ss:$20 sps:$4 sm:$0xff]  }
 0x8d5   : > { %12826 = vmatpush2.bf16.msra.mxu1 %v24545_v8 }
 0x8d6   : > { %12827 = vmatprep.subr.bf16.mxu1 %v24550_v32  ;;  %12853 = vmatpush1.bf16.msra.mxu0 %v24590_v24 }
 0x8d7   : > { %12854 = vmatprep.subr.bf16.mxu0 %v24598_v45 }
 0x8d9   : > { %12828 = vmatpush2.bf16.msra.mxu1 %v24548_v34  ;;  %v24557_v34 = vld [vmem:[%s33093_s9 + $0x3a0] ss:$20 sps:$4 sm:$0xff]  }
 0x8da   : > { %12829 = vmatprep.subr.bf16.mxu1 %v24553_v14  ;;  %12855 = vmatpush1.bf16.msra.mxu0 %v24596_v25  ;;  %v24577_v14 = vld [vmem:[%s33093_s9 + $0x32c] ss:$20 sps:$4 sm:$0xff]  }
 0x8db   : > { %12881 = vmatprep.subr.bf16.mxu0 %v24604_v1  ;;  %v24602_v1 = vld [vmem:[%s33093_s9 + $0x120] ss:$20 sps:$4 sm:$0xff]  }
 0x8dc   : > { %v22044_v27 = vpop.f32.mrf.mxu0 }
 0x8dd   : > { %12830 = vmatpush2.bf16.msra.mxu1 %v24551_v41  ;;  %v24583_v41 = vld [vmem:[%s33093_s9 + $0x304] ss:$20 sps:$4 sm:$0xff]  }
 0x8de   : > { %v22045_v9 = vpop.f32.mrf.mxu0  ;;  %12922 = vmatprep.subr.bf16.mxu1 %v24559_v23  ;;  %v24589_v23 = vld [vmem:[%s33093_s9 + $0x2dc] ss:$20 sps:$4 sm:$0xff]  }
 0x8df   : > { %v22046_v52 = vadd.f32 %v22045_v9, %v22044_v27 }
 0x8e0   : > { %v22047_v16 = vpop.f32.mrf.mxu0 }
 0x8e1   : > { %v10775_v43 = vadd.f32 %v22046_v52, %v22024_v28  ;;  %v24565_v16 = vld [vmem:[%s33093_s9 + $0x37c] ss:$20 sps:$4 sm:$0xff]  }
 0x8e2   : > { %v22048_v39 = vpop.f32.mrf.mxu0 }
 0x8e3   : > { %v30503_v63 = vadd.f32 %v22068_v62, %v10775_v43  ;;  %v24569_v43 = vld [vmem:[%s33093_s9 + $0x350] ss:$20 sps:$4 sm:$0xff]   ;;  %v24575_v39 = vld [vmem:[%s33093_s9 + $0x328] ss:$20 sps:$4 sm:$0xff]  }
 0x90d   : > { %v11856_v53 = vpop.f32.mrf.mxu1 }
 0x90f   : > { %v11858_v0 = vpop.f32.mrf.mxu1 }
 0x911   : > { %v11860_v11 = vpop.f32.mrf.mxu1 }
 0x912   : > { %v24609_v11 = vld [vmem:[%s33093_s9 + $0xfc] ss:$20 sps:$4 sm:$0xff]  }
 0x913   : > { %v11861_v18 = vpop.f32.mrf.mxu1 }
 0x914   : > { %v24607_v18 = vld [vmem:[%s33093_s9 + $0xf8] ss:$20 sps:$4 sm:$0xff]  }
 0x91c   : > { %v11815_v28 = vpop.f32.mrf.mxu0 }
 0x91d   : > { %v11857_v17 = vadd.f32 %v11856_v53, %v11815_v28  ;;  %v24606_v53 = vld [vmem:[%s33093_s9 + $0x128] ss:$20 sps:$4 sm:$0xff]   ;;  %v24611_v28 = vld [vmem:[%s33093_s9 + $0x100] ss:$20 sps:$4 sm:$0xff]  }
 0x91e   : > { %v11817_v4 = vpop.f32.mrf.mxu0 }
 0x91f   : > { %v11859_v35 = vadd.f32 %v11858_v0, %v11817_v4  ;;  %v24615_v4 = vld [vmem:[%s33093_s9 + $0x218] ss:$20 sps:$4 sm:$0xff]  }
 0x920   : > { %v11819_v46 = vpop.f32.mrf.mxu0 }
 0x921   : > { %v24612_v46 = vld [vmem:[%s33093_s9 + $0xd0] ss:$20 sps:$4 sm:$0xff]  }
 0x922   : > { %v11820_v31 = vpop.f32.mrf.mxu0 }
 0x923   : > { %v24616_v31 = vld [vmem:[%s33093_s9 + $0xd8] ss:$20 sps:$4 sm:$0xff]  }
 0x92d   : > { %v22088_v5 = vpop.f32.mrf.mxu1 }
 0x92f   : > { %v22089_v19 = vpop.f32.mrf.mxu1 }
 0x930   : > { %v22090_v44 = vadd.f32 %v22089_v19, %v22088_v5  ;;  %v24619_v5 = vld [vmem:[%s33093_s9 + $0xac] ss:$20 sps:$4 sm:$0xff]   ;;  %v24620_v19 = vld [vmem:[%s33093_s9 + $0x1f0] ss:$20 sps:$4 sm:$0xff]  }
 0x931   : > { %v22091_v55 = vpop.f32.mrf.mxu1 }
 0x932   : > { %v24621_v55 = vld [vmem:[%s33093_s9 + $0xb0] ss:$20 sps:$4 sm:$0xff]  }
 0x933   : > { %v22092_v20 = vpop.f32.mrf.mxu1 }
 0x934   : > { %v24624_v20 = vld [vmem:[%s33093_s9 + $0x84] ss:$20 sps:$4 sm:$0xff]  }
 0x94d   : > { %v22110_v15 = vpop.f32.mrf.mxu1 }
 0x94f   : > { %v22111_v10 = vpop.f32.mrf.mxu1 }
 0x950   : > { %v22112_v26 = vadd.f32 %v22111_v10, %v22110_v15  ;;  %v24625_v15 = vld [vmem:[%s33093_s9 + $0x1c8] ss:$20 sps:$4 sm:$0xff]   ;;  %v24622_v10 = vld [vmem:[%s33093_s9 + $0x80] ss:$20 sps:$4 sm:$0xff]  }
 0x951   : > { %v22113_v62 = vpop.f32.mrf.mxu1 }
 0x952   : > { %v11979_v36 = vadd.f32 %v22112_v26, %v22090_v44  ;;  %v24617_v44 = vld [vmem:[%s33093_s9 + $0xa8] ss:$20 sps:$4 sm:$0xff]   ;;  %v24659_v26 = vld [vmem:[%s33093_s9 + $0x48c] ss:$20 sps:$4 sm:$0xff]  }
 0x953   : > { %v22114_v29 = vpop.f32.mrf.mxu1  ;;  %v24626_v62 = vld [vmem:[%s33093_s9 + $0x88] ss:$20 sps:$4 sm:$0xff]  }
 0x954   : > { %v24629_v29 = vld [vmem:[%s33093_s9 + $0x5c] ss:$20 sps:$4 sm:$0xff]  }
 0x95c   : > { %v11897_v30 = vpop.f32.mrf.mxu0 }
 0x95d   : > { %v11898_v2 = vadd.f32 %v11897_v30, %v11857_v17  ;;  %v24614_v17 = vld [vmem:[%s33093_s9 + $0xd4] ss:$20 sps:$4 sm:$0xff]  }
 0x95e   : > { %v11899_v37 = vpop.f32.mrf.mxu0  ;;  %v24630_v30 = vld [vmem:[%s33093_s9 + $0x1a0] ss:$20 sps:$4 sm:$0xff]  }
 0x95f   : > { %v12024_v59 = vmax.f32 %v30398_v21, %v11898_v2  ;;  %v11900_v13 = vadd.f32 %v11899_v37, %v11859_v35  ;;  %v24563_v21 = vld [vmem:[%s33093_s9 + $0x378] ss:$20 sps:$4 sm:$0xff]   ;;  %v24631_v2 = vld [vmem:[%s33093_s9 + $0x60] ss:$20 sps:$4 sm:$0xff]  }
 0x960   : > { %v11901_v8 = vpop.f32.mrf.mxu0  ;;  %v24627_v35 = vld [vmem:[%s33093_s9 + $0x58] ss:$20 sps:$4 sm:$0xff]   ;;  %v24634_v37 = vld [vmem:[%s33093_s9 + $0x34] ss:$20 sps:$4 sm:$0xff]  }
 0x961   : > { %v12025_v27 = vmax.f32 %v30412_v22, %v11900_v13  ;;  %v30566_v52 = vpack.c.bf16 %v12024_v59, %v12024_v59  ;;  %v24571_v22 = vld [vmem:[%s33093_s9 + $0x354] ss:$20 sps:$4 sm:$0xff]   ;;  %v24635_v59 = vld [vmem:[%s33093_s9 + $0x178] ss:$20 sps:$4 sm:$0xff]   ;;  %v24632_v13 = vld [vmem:[%s33093_s9 + $0x30] ss:$20 sps:$4 sm:$0xff]  }
 0x962   : > { %v11902_v32 = vpop.f32.mrf.mxu0  ;;  %v24636_v8 = vld [vmem:[%s33093_s9 + $0x38] ss:$20 sps:$4 sm:$0xff]  }
 0x963   : > { %v30561_v9 = vpack.c.bf16 %v12025_v27, %v12025_v27  ;;  %v24639_v27 = vld [vmem:[%s33093_s9 + $0xc] ss:$20 sps:$4 sm:$0xff]   ;;  %v24640_v32 = vld [vmem:[%s33093_s9 + $0x150] ss:$20 sps:$4 sm:$0xff]  }
 0x965   : > { %12831 = vmatprep.mubr.bf16.mxu1 %v30561_v9 }
 0x966   : > { %12832 = vmatmul.mubr.bf16.vlgmr.msra.gmra.mxu1 %v30566_v52 }
 0x967   : > { %12923 = vmatpush1.bf16.msra.mxu1 %v24557_v34  ;;  %12954 = vmatprep.mubr.bf16.mxu1 %v33155_v7  ;;  %v24637_v34 = vld [vmem:[%s33093_s9 + $0x8] ss:$20 sps:$4 sm:$0xff]  }
 0x968   : > { %12924 = vmatprep.subr.bf16.mxu1 %v24565_v16  ;;  %v24641_v16 = vld [vmem:[%s33093_s9 + $0x10] ss:$20 sps:$4 sm:$0xff]  }
 0x96b   : > { %12925 = vmatpush1.bf16.msra.mxu1 %v24563_v21  ;;  %v24644_v21 = vld [vmem:[%s33093_s9 + $0x264] ss:$20 sps:$4 sm:$0xff]  }
 0x96c   : > { %12926 = vmatprep.subr.bf16.mxu1 %v24571_v22  ;;  %v24647_v22 = vld [vmem:[%s33093_s9 + $0x4dc] ss:$20 sps:$4 sm:$0xff]  }
 0x96f   : > { %12927 = vmatpush1.bf16.msra.mxu1 %v24569_v43  ;;  %v24642_v43 = vld [vmem:[%s33093_s9 + $0x260] ss:$20 sps:$4 sm:$0xff]  }
 0x970   : > { %12928 = vmatprep.subr.bf16.mxu1 %v24577_v14  ;;  %v24645_v14 = vld [vmem:[%s33093_s9 + $0x4d8] ss:$20 sps:$4 sm:$0xff]  }
 0x973   : > { %12929 = vmatpush1.bf16.msra.mxu1 %v24575_v39  ;;  %v24650_v39 = vld [vmem:[%s33093_s9 + $0x23c] ss:$20 sps:$4 sm:$0xff]  }
 0x974   : > { %12930 = vmatprep.subr.bf16.mxu1 %v24583_v41  ;;  %v24653_v41 = vld [vmem:[%s33093_s9 + $0x4b4] ss:$20 sps:$4 sm:$0xff]  }
 0x977   : > { %12931 = vmatpush1.bf16.msra.mxu1 %v24581_v47  ;;  %v30733_v47 = vshrl.u32 %v30561_v9, 16 }
 0x978   : > { %12932 = vmatprep.subr.bf16.mxu1 %v24589_v23  ;;  %v24648_v23 = vld [vmem:[%s33093_s9 + $0x238] ss:$20 sps:$4 sm:$0xff]  }
 0x97b   : > { %12933 = vmatpush1.bf16.msra.mxu1 %v24587_v60  ;;  %v24651_v60 = vld [vmem:[%s33093_s9 + $0x4b0] ss:$20 sps:$4 sm:$0xff]  }
 0x97c   : > { %v22132_v6 = vpop.f32.mrf.mxu0  ;;  %12934 = vmatprep.subr.bf16.mxu1 %v24595_v54  ;;  %v24656_v54 = vld [vmem:[%s33093_s9 + $0x214] ss:$20 sps:$4 sm:$0xff]  }
 0x97e   : > { %v22133_v58 = vpop.f32.mrf.mxu0 }
 0x97f   : > { %v22134_v51 = vadd.f32 %v22133_v58, %v22132_v6  ;;  %12935 = vmatpush1.bf16.msra.mxu1 %v24593_v49  ;;  %v24654_v49 = vld [vmem:[%s33093_s9 + $0x210] ss:$20 sps:$4 sm:$0xff]   ;;  %v24657_v6 = vld [vmem:[%s33093_s9 + $0x488] ss:$20 sps:$4 sm:$0xff]  }
 0x980   : > { %v22135_v38 = vpop.f32.mrf.mxu0  ;;  %12936 = vmatprep.subr.bf16.mxu1 %v24601_v57  ;;  %v24662_v57 = vld [vmem:[%s33093_s9 + $0x1ec] ss:$20 sps:$4 sm:$0xff]   ;;  %v24665_v58 = vld [vmem:[%s33093_s9 + $0x464] ss:$20 sps:$4 sm:$0xff]  }
 0x981   : > { %v12019_v24 = vadd.f32 %v22134_v51, %v11979_v36  ;;  %v24660_v36 = vld [vmem:[%s33093_s9 + $0x1e8] ss:$20 sps:$4 sm:$0xff]   ;;  %v24663_v51 = vld [vmem:[%s33093_s9 + $0x460] ss:$20 sps:$4 sm:$0xff]  }
 0x982   : > { %v22136_v45 = vpop.f32.mrf.mxu0  ;;  %v24671_v38 = vld [vmem:[%s33093_s9 + $0x43c] ss:$20 sps:$4 sm:$0xff]  }
 0x983   : > { %v12026_v25 = vmax.f32 %v30503_v63, %v12019_v24  ;;  %12937 = vmatpush1.bf16.msra.mxu1 %v24599_v40  ;;  %v24610_v63 = vld [vmem:[%s33093_s9 + $0x240] ss:$20 sps:$4 sm:$0xff]   ;;  %v24668_v40 = vld [vmem:[%s33093_s9 + $0x1c4] ss:$20 sps:$4 sm:$0xff]   ;;  %v24674_v45 = vld [vmem:[%s33093_s9 + $0x19c] ss:$20 sps:$4 sm:$0xff]  }
 0x984   : > { %22138 = vmatprep.subr.bf16.mxu1 %v24605_v48  ;;  %v24666_v48 = vld [vmem:[%s33093_s9 + $0x1c0] ss:$20 sps:$4 sm:$0xff]   ;;  %v24669_v24 = vld [vmem:[%s33093_s9 + $0x438] ss:$20 sps:$4 sm:$0xff]  }
 0x985   : > { %v30623_v0 = vpack.c.bf16 %v12026_v25, %v12026_v25  ;;  %v24677_v25 = vld [vmem:[%s33093_s9 + $0x414] ss:$20 sps:$4 sm:$0xff]  }
 0x987   : > { %12873 = vmatmul.mubr.bf16.vlgmr.msra.gmra.mxu0 %v30623_v0  ;;  %12955 = vmatmul.mubr.bf16.vlgmr.msra.gmra.mxu1 %v30623_v0 }
 0x988   : > { %12882 = vmatpush1.bf16.msra.mxu0 %v24602_v1  ;;  %22139 = vmatpush3.bf16.msra.mxu1 %v24606_v53  ;;  %v24672_v1 = vld [vmem:[%s33093_s9 + $0x198] ss:$20 sps:$4 sm:$0xff]   ;;  %v24675_v53 = vld [vmem:[%s33093_s9 + $0x410] ss:$20 sps:$4 sm:$0xff]  }
 0x989   : > { %12913 = vmatprep.mubr.bf16.mxu0 %v30561_v9  ;;  %12995 = vmatprep.mubr.bf16.mxu1 %v30561_v9 }
 0x98a   : > { %12883 = vmatprep.subr.bf16.mxu0 %v24609_v11  ;;  %22140 = vmatprep.subr.bf16.mxu1 %v24610_v63  ;;  %v24680_v11 = vld [vmem:[%s33093_s9 + $0x174] ss:$20 sps:$4 sm:$0xff]   ;;  %v24683_v63 = vld [vmem:[%s33093_s9 + $0x3ec] ss:$20 sps:$4 sm:$0xff]  }
 0x98c   : > { %12884 = vmatpush1.bf16.msra.mxu0 %v24607_v18  ;;  %22141 = vmatpush3.bf16.msra.mxu1 %v24611_v28  ;;  %v24678_v18 = vld [vmem:[%s33093_s9 + $0x170] ss:$20 sps:$4 sm:$0xff]   ;;  %v24681_v28 = vld [vmem:[%s33093_s9 + $0x3e8] ss:$20 sps:$4 sm:$0xff]  }
 0x98d   : > { %12885 = vmatprep.subr.bf16.mxu0 %v24614_v17  ;;  %22142 = vmatprep.subr.bf16.mxu1 %v24615_v4  ;;  %v24686_v17 = vld [vmem:[%s33093_s9 + $0x14c] ss:$20 sps:$4 sm:$0xff]   ;;  %v24689_v4 = vld [vmem:[%s33093_s9 + $0x3c4] ss:$20 sps:$4 sm:$0xff]  }
 0x990   : > { %12886 = vmatpush1.bf16.msra.mxu0 %v24612_v46  ;;  %22143 = vmatpush3.bf16.msra.mxu1 %v24616_v31  ;;  %v24684_v46 = vld [vmem:[%s33093_s9 + $0x148] ss:$20 sps:$4 sm:$0xff]   ;;  %v24687_v31 = vld [vmem:[%s33093_s9 + $0x3c0] ss:$20 sps:$4 sm:$0xff]  }
 0x991   : > { %12887 = vmatprep.subr.bf16.mxu0 %v24619_v5  ;;  %22144 = vmatprep.subr.bf16.mxu1 %v24620_v19  ;;  %v24692_v5 = vld [vmem:[%s33093_s9 + $0x61c] ss:$20 sps:$4 sm:$0xff]   ;;  %v24690_v19 = vld [vmem:[%s33093_s9 + $0x618] ss:$20 sps:$4 sm:$0xff]  }
 0x994   : > { %12888 = vmatpush1.bf16.msra.mxu0 %v24617_v44  ;;  %22145 = vmatpush3.bf16.msra.mxu1 %v24621_v55  ;;  %v24693_v44 = vld [vmem:[%s33093_s9 + $0x3a8] ss:$20 sps:$4 sm:$0xff]  }
 0x995   : > { %12889 = vmatprep.subr.bf16.mxu0 %v24624_v20  ;;  %22146 = vmatprep.subr.bf16.mxu1 %v24625_v15  ;;  %v24696_v55 = vld [vmem:[%s33093_s9 + $0x5f4] ss:$20 sps:$4 sm:$0xff]   ;;  %v24694_v20 = vld [vmem:[%s33093_s9 + $0x5f0] ss:$20 sps:$4 sm:$0xff]  }
 0x996   : > { %v24697_v15 = vld [vmem:[%s33093_s9 + $0x380] ss:$20 sps:$4 sm:$0xff]  }
 0x998   : > { %12890 = vmatpush1.bf16.msra.mxu0 %v24622_v10  ;;  %22147 = vmatpush3.bf16.msra.mxu1 %v24626_v62  ;;  %v24700_v10 = vld [vmem:[%s33093_s9 + $0x5cc] ss:$20 sps:$4 sm:$0xff]   ;;  %v24698_v62 = vld [vmem:[%s33093_s9 + $0x5c8] ss:$20 sps:$4 sm:$0xff]  }
 0x999   : > { %12891 = vmatprep.subr.bf16.mxu0 %v24629_v29  ;;  %22148 = vmatprep.subr.bf16.mxu1 %v24630_v30  ;;  %v24701_v29 = vld [vmem:[%s33093_s9 + $0x358] ss:$20 sps:$4 sm:$0xff]  }
 0x99a   : > { %v24704_v30 = vld [vmem:[%s33093_s9 + $0x5a4] ss:$20 sps:$4 sm:$0xff]  }
 0x99c   : > { %12892 = vmatpush1.bf16.msra.mxu0 %v24627_v35  ;;  %22149 = vmatpush3.bf16.msra.mxu1 %v24631_v2  ;;  %v24702_v35 = vld [vmem:[%s33093_s9 + $0x5a0] ss:$20 sps:$4 sm:$0xff]   ;;  %v24705_v2 = vld [vmem:[%s33093_s9 + $0x330] ss:$20 sps:$4 sm:$0xff]  }
 0x99d   : > { %12893 = vmatprep.subr.bf16.mxu0 %v24634_v37  ;;  %22150 = vmatprep.subr.bf16.mxu1 %v24635_v59  ;;  %v24708_v37 = vld [vmem:[%s33093_s9 + $0x57c] ss:$20 sps:$4 sm:$0xff]   ;;  %v24706_v59 = vld [vmem:[%s33093_s9 + $0x578] ss:$20 sps:$4 sm:$0xff]  }
 0x9a0   : > { %12894 = vmatpush1.bf16.msra.mxu0 %v24632_v13  ;;  %22151 = vmatpush3.bf16.msra.mxu1 %v24636_v8  ;;  %v24709_v13 = vld [vmem:[%s33093_s9 + $0x308] ss:$20 sps:$4 sm:$0xff]  }
 0x9a1   : > { %12895 = vmatprep.subr.bf16.mxu0 %v24639_v27  ;;  %22152 = vmatprep.subr.bf16.mxu1 %v24640_v32  ;;  %v24712_v8 = vld [vmem:[%s33093_s9 + $0x554] ss:$20 sps:$4 sm:$0xff]   ;;  %v24710_v27 = vld [vmem:[%s33093_s9 + $0x550] ss:$20 sps:$4 sm:$0xff]  }
 0x9a2   : > { %v24713_v32 = vld [vmem:[%s33093_s9 + $0x2e0] ss:$20 sps:$4 sm:$0xff]  }
 0x9a4   : > { %12896 = vmatpush1.bf16.msra.mxu0 %v24637_v34  ;;  %22153 = vmatpush3.bf16.msra.mxu1 %v24641_v16  ;;  %v24716_v34 = vld [vmem:[%s33093_s9 + $0x52c] ss:$20 sps:$4 sm:$0xff]   ;;  %v24714_v16 = vld [vmem:[%s33093_s9 + $0x528] ss:$20 sps:$4 sm:$0xff]  }
 0x9a5   : > { %12897 = vmatprep.subr.bf16.mxu0 %v24644_v21  ;;  %13869 = vmatprep.subr.bf16.mxu1 %v24647_v22  ;;  %v24717_v21 = vld [vmem:[%s33093_s9 + $0x2b8] ss:$20 sps:$4 sm:$0xff]  }
 0x9a6   : > { %v24720_v22 = vld [vmem:[%s33093_s9 + $0x504] ss:$20 sps:$4 sm:$0xff]  }
 0x9a7   : > { %12996 = vmatmul.mubr.bf16.vlgmr.msra.gmra.mxu1 %v30566_v52 }
 0x9a8   : > { %12898 = vmatpush2.bf16.msra.mxu0 %v24642_v43  ;;  %13870 = vmatpush1.bf16.msra.mxu1 %v24645_v14  ;;  %v24718_v43 = vld [vmem:[%s33093_s9 + $0x500] ss:$20 sps:$4 sm:$0xff]   ;;  %v24721_v14 = vld [vmem:[%s33093_s9 + $0x290] ss:$20 sps:$4 sm:$0xff]  }
 0x9a9   : > { %13901 = vmatprep.mubr.bf16.mxu1 %v30733_v47  ;;  %12899 = vmatprep.subr.bf16.mxu0 %v24650_v39  ;;  %v24724_v39 = vld [vmem:[%s33093_s9 + $0x75c] ss:$20 sps:$4 sm:$0xff]  }
 0x9aa   : > { %13871 = vmatprep.subr.bf16.mxu1 %v24653_v41  ;;  %v24727_v41 = vld [vmem:[%s33093_s9 + $0x764] ss:$20 sps:$4 sm:$0xff]  }
 0x9ac   : > { %12900 = vmatpush2.bf16.msra.mxu0 %v24648_v23  ;;  %13872 = vmatpush1.bf16.msra.mxu1 %v24651_v60  ;;  %v24722_v23 = vld [vmem:[%s33093_s9 + $0x758] ss:$20 sps:$4 sm:$0xff]   ;;  %v24725_v60 = vld [vmem:[%s33093_s9 + $0x760] ss:$20 sps:$4 sm:$0xff]  }
 0x9ad   : > { %12901 = vmatprep.subr.bf16.mxu0 %v24656_v54  ;;  %13873 = vmatprep.subr.bf16.mxu1 %v24659_v26  ;;  %v30910_v54 = vshrl.u32 %v30566_v52, 16  ;;  %v24730_v26 = vld [vmem:[%s33093_s9 + $0x734] ss:$20 sps:$4 sm:$0xff]  }
 0x9b0   : > { %12902 = vmatpush2.bf16.msra.mxu0 %v24654_v49  ;;  %13874 = vmatpush1.bf16.msra.mxu1 %v24657_v6  ;;  %v24733_v49 = vld [vmem:[%s33093_s9 + $0x73c] ss:$20 sps:$4 sm:$0xff]  }
 0x9b1   : > { %12903 = vmatprep.subr.bf16.mxu0 %v24662_v57  ;;  %13875 = vmatprep.subr.bf16.mxu1 %v24665_v58  ;;  %v24728_v6 = vld [vmem:[%s33093_s9 + $0x730] ss:$20 sps:$4 sm:$0xff]   ;;  %v24731_v57 = vld [vmem:[%s33093_s9 + $0x738] ss:$20 sps:$4 sm:$0xff]  }
 0x9b2   : > { %v24736_v58 = vld [vmem:[%s33093_s9 + $0x70c] ss:$20 sps:$4 sm:$0xff]  }
 0x9b4   : > { %12904 = vmatpush2.bf16.msra.mxu0 %v24660_v36  ;;  %13876 = vmatpush1.bf16.msra.mxu1 %v24663_v51  ;;  %v24739_v36 = vld [vmem:[%s33093_s9 + $0x714] ss:$20 sps:$4 sm:$0xff]  }
 0x9b5   : > { %12905 = vmatprep.subr.bf16.mxu0 %v24668_v40  ;;  %13877 = vmatprep.subr.bf16.mxu1 %v24671_v38  ;;  %v24734_v51 = vld [vmem:[%s33093_s9 + $0x708] ss:$20 sps:$4 sm:$0xff]   ;;  %v24737_v40 = vld [vmem:[%s33093_s9 + $0x710] ss:$20 sps:$4 sm:$0xff]  }
 0x9b6   : > { %v24742_v38 = vld [vmem:[%s33093_s9 + $0x6e4] ss:$20 sps:$4 sm:$0xff]  }
 0x9b8   : > { %12906 = vmatpush2.bf16.msra.mxu0 %v24666_v48  ;;  %13878 = vmatpush1.bf16.msra.mxu1 %v24669_v24  ;;  %v24745_v48 = vld [vmem:[%s33093_s9 + $0x6ec] ss:$20 sps:$4 sm:$0xff]  }
 0x9b9   : > { %12907 = vmatprep.subr.bf16.mxu0 %v24674_v45  ;;  %13879 = vmatprep.subr.bf16.mxu1 %v24677_v25  ;;  %v24740_v24 = vld [vmem:[%s33093_s9 + $0x6e0] ss:$20 sps:$4 sm:$0xff]   ;;  %v24743_v45 = vld [vmem:[%s33093_s9 + $0x6e8] ss:$20 sps:$4 sm:$0xff]  }
 0x9ba   : > { %v24748_v25 = vld [vmem:[%s33093_s9 + $0x6bc] ss:$20 sps:$4 sm:$0xff]  }
 0x9bc   : > { %12908 = vmatpush2.bf16.msra.mxu0 %v24672_v1  ;;  %13880 = vmatpush1.bf16.msra.mxu1 %v24675_v53  ;;  %v24751_v1 = vld [vmem:[%s33093_s9 + $0x6c4] ss:$20 sps:$4 sm:$0xff]  }
 0x9bd   : > { %12909 = vmatprep.subr.bf16.mxu0 %v24680_v11  ;;  %13881 = vmatprep.subr.bf16.mxu1 %v24683_v63  ;;  %v24746_v53 = vld [vmem:[%s33093_s9 + $0x6b8] ss:$20 sps:$4 sm:$0xff]   ;;  %v24749_v11 = vld [vmem:[%s33093_s9 + $0x6c0] ss:$20 sps:$4 sm:$0xff]  }
 0x9be   : > { %v24754_v63 = vld [vmem:[%s33093_s9 + $0x694] ss:$20 sps:$4 sm:$0xff]  }
 0x9c0   : > { %12910 = vmatpush2.bf16.msra.mxu0 %v24678_v18  ;;  %13882 = vmatpush1.bf16.msra.mxu1 %v24681_v28  ;;  %v24757_v18 = vld [vmem:[%s33093_s9 + $0x69c] ss:$20 sps:$4 sm:$0xff]  }
 0x9c1   : > { %12911 = vmatprep.subr.bf16.mxu0 %v24686_v17  ;;  %13883 = vmatprep.subr.bf16.mxu1 %v24689_v4  ;;  %v24752_v28 = vld [vmem:[%s33093_s9 + $0x690] ss:$20 sps:$4 sm:$0xff]   ;;  %v24755_v17 = vld [vmem:[%s33093_s9 + $0x698] ss:$20 sps:$4 sm:$0xff]  }
 0x9c2   : > { %v24760_v4 = vld [vmem:[%s33093_s9 + $0x66c] ss:$20 sps:$4 sm:$0xff]  }
 0x9c4   : > { %12912 = vmatpush2.bf16.msra.mxu0 %v24684_v46  ;;  %13884 = vmatpush1.bf16.msra.mxu1 %v24687_v31  ;;  %v24763_v46 = vld [vmem:[%s33093_s9 + $0x674] ss:$20 sps:$4 sm:$0xff]  }
 0x9c5   : > { %22424 = vmatprep.subr.bf16.mxu0 %v25627_v3  ;;  %13885 = vmatprep.subr.bf16.mxu1 %v24692_v5  ;;  %v24758_v31 = vld [vmem:[%s33093_s9 + $0x668] ss:$20 sps:$4 sm:$0xff]   ;;  %v24761_v5 = vld [vmem:[%s33093_s9 + $0x670] ss:$20 sps:$4 sm:$0xff]  }
 0x9c7   : > { %12914 = vmatmul.mubr.bf16.vlgmr.msra.gmra.mxu0 %v30566_v52 }
 0x9c8   : > { %22425 = vmatpush3.bf16.msra.mxu0 %v24693_v44  ;;  %13886 = vmatpush2.bf16.msra.mxu1 %v24690_v19  ;;  %v24766_v19 = vld [vmem:[%s33093_s9 + $0x644] ss:$20 sps:$4 sm:$0xff]   ;;  %v24769_v44 = vld [vmem:[%s33093_s9 + $0x64c] ss:$20 sps:$4 sm:$0xff]  }
 0x9c9   : > { %22426 = vmatprep.subr.bf16.mxu0 %v25627_v3  ;;  %13887 = vmatprep.subr.bf16.mxu1 %v24696_v55  ;;  %v24764_v55 = vld [vmem:[%s33093_s9 + $0x640] ss:$20 sps:$4 sm:$0xff]  }
 0x9ca   : > { %22440 = vmatprep.mubr.msk.bf16.mxu0 %vm25628_vm5, %v25627_v3 }
 0x9cc   : > { %22427 = vmatpush3.bf16.msra.mxu0 %v24697_v15  ;;  %13888 = vmatpush2.bf16.msra.mxu1 %v24694_v20  ;;  %v24767_v20 = vld [vmem:[%s33093_s9 + $0x648] ss:$20 sps:$4 sm:$0xff]   ;;  %v24772_v15 = vld [vmem:[%s33093_s9 + $0x4e4] ss:$20 sps:$4 sm:$0xff]  }
 0x9cd   : > { %22428 = vmatprep.subr.bf16.mxu0 %v25627_v3  ;;  %13889 = vmatprep.subr.bf16.mxu1 %v24700_v10  ;;  %v24773_v10 = vld [vmem:[%s33093_s9 + $0x628] ss:$20 sps:$4 sm:$0xff]  }
 0x9d0   : > { %22429 = vmatpush3.bf16.msra.mxu0 %v24701_v29  ;;  %13890 = vmatpush2.bf16.msra.mxu1 %v24698_v62  ;;  %v24770_v62 = vld [vmem:[%s33093_s9 + $0x4e0] ss:$20 sps:$4 sm:$0xff]   ;;  %v31010_v29 = vshrl.u32 %v30623_v0, 16 }
 0x9d1   : > { %22430 = vmatprep.subr.bf16.mxu0 %v25627_v3  ;;  %13891 = vmatprep.subr.bf16.mxu1 %v24704_v30  ;;  %v24774_v30 = vld [vmem:[%s33093_s9 + $0x4e8] ss:$20 sps:$4 sm:$0xff]  }
 0x9d4   : > { %22431 = vmatpush3.bf16.msra.mxu0 %v24705_v2  ;;  %13892 = vmatpush2.bf16.msra.mxu1 %v24702_v35  ;;  %v24777_v35 = vld [vmem:[%s33093_s9 + $0x4bc] ss:$20 sps:$4 sm:$0xff]   ;;  %v24778_v2 = vld [vmem:[%s33093_s9 + $0x600] ss:$20 sps:$4 sm:$0xff]  }
 0x9d5   : > { %22432 = vmatprep.subr.bf16.mxu0 %v25627_v3  ;;  %13893 = vmatprep.subr.bf16.mxu1 %v24708_v37  ;;  %v24775_v37 = vld [vmem:[%s33093_s9 + $0x4b8] ss:$20 sps:$4 sm:$0xff]  }
 0x9d8   : > { %22433 = vmatpush3.bf16.msra.mxu0 %v24709_v13  ;;  %13894 = vmatpush2.bf16.msra.mxu1 %v24706_v59  ;;  %v24779_v59 = vld [vmem:[%s33093_s9 + $0x4c0] ss:$20 sps:$4 sm:$0xff]  }
 0x9d9   : > { %22434 = vmatprep.subr.bf16.mxu0 %v25627_v3  ;;  %13895 = vmatprep.subr.bf16.mxu1 %v24712_v8  ;;  %v24782_v13 = vld [vmem:[%s33093_s9 + $0x494] ss:$20 sps:$4 sm:$0xff]   ;;  %v24783_v8 = vld [vmem:[%s33093_s9 + $0x5d8] ss:$20 sps:$4 sm:$0xff]  }
 0x9dc   : > { %22435 = vmatpush3.bf16.msra.mxu0 %v24713_v32  ;;  %13896 = vmatpush2.bf16.msra.mxu1 %v24710_v27  ;;  %v24780_v27 = vld [vmem:[%s33093_s9 + $0x490] ss:$20 sps:$4 sm:$0xff]   ;;  %v24784_v32 = vld [vmem:[%s33093_s9 + $0x498] ss:$20 sps:$4 sm:$0xff]  }
 0x9dd   : > { %22436 = vmatprep.subr.bf16.mxu0 %v25627_v3  ;;  %13897 = vmatprep.subr.bf16.mxu1 %v24716_v34  ;;  %v24787_v34 = vld [vmem:[%s33093_s9 + $0x46c] ss:$20 sps:$4 sm:$0xff]  }
 0x9e0   : > { %22437 = vmatpush3.bf16.msra.mxu0 %v24717_v21  ;;  %13898 = vmatpush2.bf16.msra.mxu1 %v24714_v16  ;;  %v24788_v16 = vld [vmem:[%s33093_s9 + $0x5b0] ss:$20 sps:$4 sm:$0xff]   ;;  %v24785_v21 = vld [vmem:[%s33093_s9 + $0x468] ss:$20 sps:$4 sm:$0xff]  }
 0x9e1   : > { %22438 = vmatprep.subr.bf16.mxu0 %v25627_v3  ;;  %13899 = vmatprep.subr.bf16.mxu1 %v24720_v22  ;;  %v24789_v22 = vld [vmem:[%s33093_s9 + $0x470] ss:$20 sps:$4 sm:$0xff]  }
 0x9e4   : > { %22439 = vmatpush3.bf16.msra.mxu0 %v24721_v14  ;;  %13900 = vmatpush2.bf16.msra.mxu1 %v24718_v43  ;;  %v24792_v43 = vld [vmem:[%s33093_s9 + $0x444] ss:$20 sps:$4 sm:$0xff]   ;;  %v24793_v14 = vld [vmem:[%s33093_s9 + $0x588] ss:$20 sps:$4 sm:$0xff]  }
 0x9e5   : > { %13910 = vmatprep.subr.bf16.mxu0 %v24724_v39  ;;  %13992 = vmatprep.subr.bf16.mxu1 %v24727_v41  ;;  %v24790_v39 = vld [vmem:[%s33093_s9 + $0x440] ss:$20 sps:$4 sm:$0xff]   ;;  %v24794_v41 = vld [vmem:[%s33093_s9 + $0x448] ss:$20 sps:$4 sm:$0xff]  }
 0x9e7   : > { %22441 = vmatmul.mubr.bf16.vlgmr.msra.gmra.mxu0 %v30623_v0  ;;  %13902 = vmatmul.mubr.bf16.vlgmr.msra.gmra.mxu1 %v30910_v54 }
 0x9e8   : > { %13911 = vmatpush1.bf16.msra.mxu0 %v24722_v23  ;;  %13993 = vmatpush1.bf16.msra.mxu1 %v24725_v60  ;;  %v24797_v23 = vld [vmem:[%s33093_s9 + $0x41c] ss:$20 sps:$4 sm:$0xff]   ;;  %v24798_v60 = vld [vmem:[%s33093_s9 + $0x560] ss:$20 sps:$4 sm:$0xff]  }
 0x9e9   : > { %13912 = vmatprep.subr.bf16.mxu0 %v24730_v26  ;;  %13994 = vmatprep.subr.bf16.mxu1 %v24733_v49  ;;  %v24795_v26 = vld [vmem:[%s33093_s9 + $0x418] ss:$20 sps:$4 sm:$0xff]   ;;  %v24799_v49 = vld [vmem:[%s33093_s9 + $0x420] ss:$20 sps:$4 sm:$0xff]  }
 0x9ea   : > { %13942 = vmatprep.mubr.bf16.mxu0 %v33155_v7  ;;  %14024 = vmatprep.mubr.bf16.mxu1 %v33155_v7 }
 0x9ec   : > { %13913 = vmatpush1.bf16.msra.mxu0 %v24728_v6  ;;  %13995 = vmatpush1.bf16.msra.mxu1 %v24731_v57  ;;  %v24802_v6 = vld [vmem:[%s33093_s9 + $0x3f4] ss:$20 sps:$4 sm:$0xff]   ;;  %v24803_v57 = vld [vmem:[%s33093_s9 + $0x538] ss:$20 sps:$4 sm:$0xff]  }
 0x9ed   : > { %13914 = vmatprep.subr.bf16.mxu0 %v24736_v58  ;;  %13996 = vmatprep.subr.bf16.mxu1 %v24739_v36  ;;  %v24800_v58 = vld [vmem:[%s33093_s9 + $0x3f0] ss:$20 sps:$4 sm:$0xff]   ;;  %v24804_v36 = vld [vmem:[%s33093_s9 + $0x3f8] ss:$20 sps:$4 sm:$0xff]  }
 0x9f0   : > { %13915 = vmatpush1.bf16.msra.mxu0 %v24734_v51  ;;  %13997 = vmatpush1.bf16.msra.mxu1 %v24737_v40  ;;  %v24807_v51 = vld [vmem:[%s33093_s9 + $0x3cc] ss:$20 sps:$4 sm:$0xff]   ;;  %v24808_v40 = vld [vmem:[%s33093_s9 + $0x510] ss:$20 sps:$4 sm:$0xff]  }
 0x9f1   : > { %13916 = vmatprep.subr.bf16.mxu0 %v24742_v38  ;;  %13998 = vmatprep.subr.bf16.mxu1 %v24745_v48  ;;  %v24805_v38 = vld [vmem:[%s33093_s9 + $0x3c8] ss:$20 sps:$4 sm:$0xff]   ;;  %v24809_v48 = vld [vmem:[%s33093_s9 + $0x3d0] ss:$20 sps:$4 sm:$0xff]  }
 0x9f4   : > { %13917 = vmatpush1.bf16.msra.mxu0 %v24740_v24  ;;  %13999 = vmatpush1.bf16.msra.mxu1 %v24743_v45  ;;  %v24812_v24 = vld [vmem:[%s33093_s9 + $0x624] ss:$20 sps:$4 sm:$0xff]   ;;  %v24815_v45 = vld [vmem:[%s33093_s9 + $0x89c] ss:$20 sps:$4 sm:$0xff]  }
 0x9f5   : > { %13918 = vmatprep.subr.bf16.mxu0 %v24748_v25  ;;  %14000 = vmatprep.subr.bf16.mxu1 %v24751_v1  ;;  %v24810_v25 = vld [vmem:[%s33093_s9 + $0x620] ss:$20 sps:$4 sm:$0xff]   ;;  %v24813_v1 = vld [vmem:[%s33093_s9 + $0x898] ss:$20 sps:$4 sm:$0xff]  }
 0x9f8   : > { %13919 = vmatpush1.bf16.msra.mxu0 %v24746_v53  ;;  %14001 = vmatpush1.bf16.msra.mxu1 %v24749_v11  ;;  %v24818_v11 = vld [vmem:[%s33093_s9 + $0x5fc] ss:$20 sps:$4 sm:$0xff]  }
 0x9f9   : > { %13920 = vmatprep.subr.bf16.mxu0 %v24754_v63  ;;  %14002 = vmatprep.subr.bf16.mxu1 %v24757_v18  ;;  %v24821_v63 = vld [vmem:[%s33093_s9 + $0x874] ss:$20 sps:$4 sm:$0xff]   ;;  %v31124_v18 = vrot.slane %v30561_v9, 1 }
 0x9fc   : > { %13921 = vmatpush1.bf16.msra.mxu0 %v24752_v28  ;;  %14003 = vmatpush1.bf16.msra.mxu1 %v24755_v17  ;;  %v24816_v17 = vld [vmem:[%s33093_s9 + $0x5f8] ss:$20 sps:$4 sm:$0xff]  }
 0x9fd   : > { %13922 = vmatprep.subr.bf16.mxu0 %v24760_v4  ;;  %14004 = vmatprep.subr.bf16.mxu1 %v24763_v46  ;;  %v24819_v4 = vld [vmem:[%s33093_s9 + $0x870] ss:$20 sps:$4 sm:$0xff]   ;;  %v24824_v46 = vld [vmem:[%s33093_s9 + $0x5d4] ss:$20 sps:$4 sm:$0xff]  }
 0xa00   : > { %13923 = vmatpush1.bf16.msra.mxu0 %v24758_v31  ;;  %14005 = vmatpush1.bf16.msra.mxu1 %v24761_v5  ;;  %v24827_v5 = vld [vmem:[%s33093_s9 + $0x84c] ss:$20 sps:$4 sm:$0xff]  }
 0xa01   : > { %13924 = vmatprep.subr.bf16.mxu0 %v24766_v19  ;;  %14006 = vmatprep.subr.bf16.mxu1 %v24769_v44  ;;  %v24822_v44 = vld [vmem:[%s33093_s9 + $0x5d0] ss:$20 sps:$4 sm:$0xff]  }
 0xa04   : > { %13925 = vmatpush1.bf16.msra.mxu0 %v24764_v55  ;;  %14007 = vmatpush1.bf16.msra.mxu1 %v24767_v20  ;;  %v24825_v55 = vld [vmem:[%s33093_s9 + $0x848] ss:$20 sps:$4 sm:$0xff]   ;;  %v24830_v20 = vld [vmem:[%s33093_s9 + $0x5ac] ss:$20 sps:$4 sm:$0xff]  }
 0xa05   : > { %13951 = vmatprep.subr.bf16.mxu0 %v24772_v15  ;;  %22169 = vmatprep.subr.bf16.mxu1 %v24773_v10  ;;  %v24833_v15 = vld [vmem:[%s33093_s9 + $0x824] ss:$20 sps:$4 sm:$0xff]   ;;  %v24828_v10 = vld [vmem:[%s33093_s9 + $0x5a8] ss:$20 sps:$4 sm:$0xff]  }
 0xa07   : > { %13943 = vmatmul.mubr.bf16.vlgmr.msra.gmra.mxu0 %v31010_v29  ;;  %14025 = vmatmul.mubr.bf16.vlgmr.msra.gmra.mxu1 %v31010_v29 }
 0xa08   : > { %13952 = vmatpush1.bf16.msra.mxu0 %v24770_v62  ;;  %13983 = vmatprep.mubr.bf16.mxu0 %v30733_v47  ;;  %v24831_v62 = vld [vmem:[%s33093_s9 + $0x820] ss:$20 sps:$4 sm:$0xff]  }
 0xa09   : > { %22170 = vmatpush3.bf16.msra.mxu1 %v24774_v30  ;;  %14065 = vmatprep.mubr.bf16.mxu1 %v30733_v47  ;;  %v24836_v30 = vld [vmem:[%s33093_s9 + $0x584] ss:$20 sps:$4 sm:$0xff]  }
 0xa0a   : > { %13953 = vmatprep.subr.bf16.mxu0 %v24777_v35  ;;  %22171 = vmatprep.subr.bf16.mxu1 %v24778_v2  ;;  %v24839_v35 = vld [vmem:[%s33093_s9 + $0x7fc] ss:$20 sps:$4 sm:$0xff]   ;;  %v24834_v2 = vld [vmem:[%s33093_s9 + $0x580] ss:$20 sps:$4 sm:$0xff]  }
 0xa0c   : > { %13954 = vmatpush1.bf16.msra.mxu0 %v24775_v37  ;;  %v24837_v37 = vld [vmem:[%s33093_s9 + $0x7f8] ss:$20 sps:$4 sm:$0xff]  }
 0xa0d   : > { %22172 = vmatpush3.bf16.msra.mxu1 %v24779_v59  ;;  %13955 = vmatprep.subr.bf16.mxu0 %v24782_v13  ;;  %v24842_v59 = vld [vmem:[%s33093_s9 + $0x55c] ss:$20 sps:$4 sm:$0xff]   ;;  %v24845_v13 = vld [vmem:[%s33093_s9 + $0x7d4] ss:$20 sps:$4 sm:$0xff]  }
 0xa0e   : > { %22173 = vmatprep.subr.bf16.mxu1 %v24783_v8  ;;  %v24840_v8 = vld [vmem:[%s33093_s9 + $0x558] ss:$20 sps:$4 sm:$0xff]  }
 0xa10   : > { %13956 = vmatpush1.bf16.msra.mxu0 %v24780_v27  ;;  %v24843_v27 = vld [vmem:[%s33093_s9 + $0x7d0] ss:$20 sps:$4 sm:$0xff]  }
 0xa11   : > { %22174 = vmatpush3.bf16.msra.mxu1 %v24784_v32  ;;  %13957 = vmatprep.subr.bf16.mxu0 %v24787_v34  ;;  %v24848_v32 = vld [vmem:[%s33093_s9 + $0x534] ss:$20 sps:$4 sm:$0xff]   ;;  %v24851_v34 = vld [vmem:[%s33093_s9 + $0x7ac] ss:$20 sps:$4 sm:$0xff]  }
 0xa12   : > { %22175 = vmatprep.subr.bf16.mxu1 %v24788_v16  ;;  %v24846_v16 = vld [vmem:[%s33093_s9 + $0x530] ss:$20 sps:$4 sm:$0xff]  }
 0xa14   : > { %13958 = vmatpush1.bf16.msra.mxu0 %v24785_v21  ;;  %v24849_v21 = vld [vmem:[%s33093_s9 + $0x7a8] ss:$20 sps:$4 sm:$0xff]  }
 0xa15   : > { %22176 = vmatpush3.bf16.msra.mxu1 %v24789_v22  ;;  %13959 = vmatprep.subr.bf16.mxu0 %v24792_v43  ;;  %v24854_v22 = vld [vmem:[%s33093_s9 + $0x50c] ss:$20 sps:$4 sm:$0xff]   ;;  %v24857_v43 = vld [vmem:[%s33093_s9 + $0x784] ss:$20 sps:$4 sm:$0xff]  }
 0xa16   : > { %22177 = vmatprep.subr.bf16.mxu1 %v24793_v14  ;;  %v24852_v14 = vld [vmem:[%s33093_s9 + $0x508] ss:$20 sps:$4 sm:$0xff]  }
 0xa18   : > { %13960 = vmatpush1.bf16.msra.mxu0 %v24790_v39  ;;  %v24855_v39 = vld [vmem:[%s33093_s9 + $0x780] ss:$20 sps:$4 sm:$0xff]  }
 0xa19   : > { %22178 = vmatpush3.bf16.msra.mxu1 %v24794_v41  ;;  %13961 = vmatprep.subr.bf16.mxu0 %v24797_v23  ;;  %v25629_v41 = vmov 1966171168  }
 0xa1a   : > { %22179 = vmatprep.subr.bf16.mxu1 %v24798_v60  ;;  %v13051_v23 = vunpack.c.l.s4 %v25629_v41  ;;  %v24860_v60 = vld [vmem:[%s33093_s9 + $0x9dc] ss:$20 sps:$4 sm:$0xff]   ;;  %v24899_v41 = vld [vmem:[%s33093_s9 + $0xaf8] ss:$20 sps:$4 sm:$0xff]  }
 0xa1c   : > { %13962 = vmatpush1.bf16.msra.mxu0 %v24795_v26  ;;  %v24861_v26 = vld [vmem:[%s33093_s9 + $0x768] ss:$20 sps:$4 sm:$0xff]  }
 0xa1d   : > { %22180 = vmatpush3.bf16.msra.mxu1 %v24799_v49  ;;  %13963 = vmatprep.subr.bf16.mxu0 %v24802_v6  ;;  %v24858_v49 = vld [vmem:[%s33093_s9 + $0x9d8] ss:$20 sps:$4 sm:$0xff]   ;;  %v13052_v6 = vunpack.c.0.s8 %v13051_v23 }
 0xa1e   : > { %22181 = vmatprep.subr.bf16.mxu1 %v24803_v57  ;;  %v24864_v57 = vld [vmem:[%s33093_s9 + $0x9b4] ss:$20 sps:$4 sm:$0xff]   ;;  %v24904_v23 = vld [vmem:[%s33093_s9 + $0xacc] ss:$20 sps:$4 sm:$0xff]  }
 0xa20   : > { %13964 = vmatpush1.bf16.msra.mxu0 %v24800_v58 }
 0xa21   : > { %22182 = vmatpush3.bf16.msra.mxu1 %v24804_v36  ;;  %13965 = vmatprep.subr.bf16.mxu0 %v24807_v51 }
 0xa22   : > { %22183 = vmatprep.subr.bf16.mxu1 %v24808_v40  ;;  %v24865_v40 = vld [vmem:[%s33093_s9 + $0x740] ss:$20 sps:$4 sm:$0xff]  }
 0xa24   : > { %13966 = vmatpush1.bf16.msra.mxu0 %v24805_v38 }
 0xa25   : > { %22184 = vmatpush3.bf16.msra.mxu1 %v24809_v48  ;;  %13967 = vmatprep.subr.bf16.mxu0 %v24812_v24  ;;  %v24862_v24 = vld [vmem:[%s33093_s9 + $0x9b0] ss:$20 sps:$4 sm:$0xff]  }
 0xa26   : > { %v31115_v53 = vpop.f32.mrf.mxu1  ;;  %14936 = vmatprep.subr.bf16.mxu1 %v24815_v45  ;;  %v31237_v45 = vsub.s32 %v13052_v6, %v26050_v56  ;;  %v24866_v56 = vld [vmem:[%s33093_s9 + $0x988] ss:$20 sps:$4 sm:$0xff]  }
 0xa27   : > { %v24902_v6 = vld [vmem:[%s33093_s9 + $0xac8] ss:$20 sps:$4 sm:$0xff]  }
 0xa28   : > { %14066 = vmatmul.mubr.bf16.vlgmr.msra.gmra.mxu1 %v30910_v54  ;;  %13968 = vmatpush2.bf16.msra.mxu0 %v24810_v25  ;;  %v31127_v28 = vpop.f32.mrf.mxu1 }
 0xa29   : > { %14937 = vmatpush1.bf16.msra.mxu1 %v24813_v1  ;;  %14968 = vmatprep.mubr.bf16.mxu1 %v31124_v18  ;;  %v24868_v1 = vld [vmem:[%s33093_s9 + $0x98c] ss:$20 sps:$4 sm:$0xff]  }
 0xa2a   : > { %v12837_v31 = vpop.f32.mrf.mxu1  ;;  %13969 = vmatprep.subr.bf16.mxu0 %v24818_v11  ;;  %14938 = vmatprep.subr.bf16.mxu1 %v24821_v63 }
 0xa2b   : > { %v24872_v31 = vld [vmem:[%s33093_s9 + $0x964] ss:$20 sps:$4 sm:$0xff]  }
 0xa2c   : > { %13970 = vmatpush2.bf16.msra.mxu0 %v24816_v17  ;;  %v12838_v19 = vpop.f32.mrf.mxu1  ;;  %v24869_v17 = vld [vmem:[%s33093_s9 + $0x718] ss:$20 sps:$4 sm:$0xff]  }
 0xa2d   : > { %14939 = vmatpush1.bf16.msra.mxu1 %v24819_v4  ;;  %13971 = vmatprep.subr.bf16.mxu0 %v24824_v46  ;;  %v24870_v19 = vld [vmem:[%s33093_s9 + $0x960] ss:$20 sps:$4 sm:$0xff]  }
 0xa2e   : > { %14940 = vmatprep.subr.bf16.mxu1 %v24827_v5  ;;  %v24873_v5 = vld [vmem:[%s33093_s9 + $0x6f0] ss:$20 sps:$4 sm:$0xff]  }
 0xa30   : > { %13972 = vmatpush2.bf16.msra.mxu0 %v24822_v44  ;;  %v24876_v44 = vld [vmem:[%s33093_s9 + $0x93c] ss:$20 sps:$4 sm:$0xff]  }
 0xa31   : > { %14941 = vmatpush1.bf16.msra.mxu1 %v24825_v55  ;;  %13973 = vmatprep.subr.bf16.mxu0 %v24830_v20  ;;  %v24877_v55 = vld [vmem:[%s33093_s9 + $0x6c8] ss:$20 sps:$4 sm:$0xff]   ;;  %v24874_v20 = vld [vmem:[%s33093_s9 + $0x938] ss:$20 sps:$4 sm:$0xff]  }
 0xa32   : > { %14942 = vmatprep.subr.bf16.mxu1 %v24833_v15  ;;  %v24880_v15 = vld [vmem:[%s33093_s9 + $0x914] ss:$20 sps:$4 sm:$0xff]  }
 0xa34   : > { %13974 = vmatpush2.bf16.msra.mxu0 %v24828_v10  ;;  %v24881_v10 = vld [vmem:[%s33093_s9 + $0x6a0] ss:$20 sps:$4 sm:$0xff]  }
 0xa35   : > { %14943 = vmatpush1.bf16.msra.mxu1 %v24831_v62  ;;  %13975 = vmatprep.subr.bf16.mxu0 %v24836_v30  ;;  %v24878_v62 = vld [vmem:[%s33093_s9 + $0x910] ss:$20 sps:$4 sm:$0xff]   ;;  %v24884_v30 = vld [vmem:[%s33093_s9 + $0x8ec] ss:$20 sps:$4 sm:$0xff]  }
 0xa36   : > { %14944 = vmatprep.subr.bf16.mxu1 %v24839_v35  ;;  %v24885_v35 = vld [vmem:[%s33093_s9 + $0x678] ss:$20 sps:$4 sm:$0xff]  }
 0xa38   : > { %13976 = vmatpush2.bf16.msra.mxu0 %v24834_v2  ;;  %v24882_v2 = vld [vmem:[%s33093_s9 + $0x8e8] ss:$20 sps:$4 sm:$0xff]  }
 0xa39   : > { %14945 = vmatpush1.bf16.msra.mxu1 %v24837_v37  ;;  %13977 = vmatprep.subr.bf16.mxu0 %v24842_v59  ;;  %v24888_v37 = vld [vmem:[%s33093_s9 + $0x8c4] ss:$20 sps:$4 sm:$0xff]  }
 0xa3a   : > { %14946 = vmatprep.subr.bf16.mxu1 %v24845_v13  ;;  %v24889_v59 = vld [vmem:[%s33093_s9 + $0x650] ss:$20 sps:$4 sm:$0xff]   ;;  %v24886_v13 = vld [vmem:[%s33093_s9 + $0x8c0] ss:$20 sps:$4 sm:$0xff]  }
 0xa3c   : > { %13978 = vmatpush2.bf16.msra.mxu0 %v24840_v8  ;;  %v24892_v8 = vld [vmem:[%s33093_s9 + $0xb1c] ss:$20 sps:$4 sm:$0xff]  }
 0xa3d   : > { %14947 = vmatpush1.bf16.msra.mxu1 %v24843_v27  ;;  %13979 = vmatprep.subr.bf16.mxu0 %v24848_v32  ;;  %v24895_v27 = vld [vmem:[%s33093_s9 + $0xb24] ss:$20 sps:$4 sm:$0xff]  }
 0xa3e   : > { %14948 = vmatprep.subr.bf16.mxu1 %v24851_v34  ;;  %v24890_v32 = vld [vmem:[%s33093_s9 + $0xb18] ss:$20 sps:$4 sm:$0xff]   ;;  %v24893_v34 = vld [vmem:[%s33093_s9 + $0xb20] ss:$20 sps:$4 sm:$0xff]  }
 0xa40   : > { %13980 = vmatpush2.bf16.msra.mxu0 %v24846_v16  ;;  %v24898_v16 = vld [vmem:[%s33093_s9 + $0xaf4] ss:$20 sps:$4 sm:$0xff]  }
 0xa41   : > { %14949 = vmatpush1.bf16.msra.mxu1 %v24849_v21  ;;  %13981 = vmatprep.subr.bf16.mxu0 %v24854_v22  ;;  %v31319_v21 = vrot.slane %v30566_v52, 1  ;;  %v24901_v22 = vld [vmem:[%s33093_s9 + $0xafc] ss:$20 sps:$4 sm:$0xff]  }
 0xa42   : > { %14950 = vmatprep.subr.bf16.mxu1 %v24857_v43 }
 0xa44   : > { %13982 = vmatpush2.bf16.msra.mxu0 %v24852_v14  ;;  %v24896_v14 = vld [vmem:[%s33093_s9 + $0xaf0] ss:$20 sps:$4 sm:$0xff]  }
 0xa45   : > { %14951 = vmatpush1.bf16.msra.mxu1 %v24855_v39  ;;  %22444 = vmatprep.subr.bf16.mxu0 %v25627_v3 }
 0xa46   : > { %14952 = vmatprep.subr.bf16.mxu1 %v24860_v60 }
 0xa47   : > { %13984 = vmatmul.mubr.bf16.vlgmr.msra.gmra.mxu0 %v30910_v54  ;;  %v12874_v58 = vpop.f32.mrf.mxu0  ;;  %v31222_v36 = vpop.f32.mrf.mxu1 }
 0xa48   : > { %v12875_v51 = vadd.f32 %v12874_v58, %v31115_v53  ;;  %22445 = vmatpush3.bf16.msra.mxu0 %v24861_v26  ;;  %22460 = vmatprep.mubr.msk.bf16.mxu0 %vm25628_vm5, %v25627_v3  ;;  %v24907_v26 = vld [vmem:[%s33093_s9 + $0xad4] ss:$20 sps:$4 sm:$0xff]   ;;  %v24905_v58 = vld [vmem:[%s33093_s9 + $0xad0] ss:$20 sps:$4 sm:$0xff]  }
 0xa49   : > { %14953 = vmatpush2.bf16.msra.mxu1 %v24858_v49  ;;  %v12876_v38 = vpop.f32.mrf.mxu0  ;;  %v31230_v48 = vpop.f32.mrf.mxu1  ;;  %22446 = vmatprep.subr.bf16.mxu0 %v25627_v3 }
 0xa4a   : > { %v12877_v25 = vadd.f32 %v12876_v38, %v31127_v28  ;;  %14954 = vmatprep.subr.bf16.mxu1 %v24864_v57  ;;  %v24908_v38 = vld [vmem:[%s33093_s9 + $0xaa0] ss:$20 sps:$4 sm:$0xff]  }
 0xa4b   : > { %v12878_v53 = vpop.f32.mrf.mxu0  ;;  %v12960_v11 = vpop.f32.mrf.mxu1 }
 0xa4c   : > { %v13048_v63 = vcombine.low %v12875_v51, %v12877_v25  ;;  %22447 = vmatpush3.bf16.msra.mxu0 %v24865_v40  ;;  %v24910_v51 = vld [vmem:[%s33093_s9 + $0xaa4] ss:$20 sps:$4 sm:$0xff]   ;;  %v24913_v40 = vld [vmem:[%s33093_s9 + $0xaac] ss:$20 sps:$4 sm:$0xff]   ;;  %v24916_v25 = vld [vmem:[%s33093_s9 + $0xa7c] ss:$20 sps:$4 sm:$0xff]  }
 0xa4d   : > { %14955 = vmatpush2.bf16.msra.mxu1 %v24862_v24  ;;  %v12879_v4 = vpop.f32.mrf.mxu0  ;;  %v12961_v46 = vpop.f32.mrf.mxu1  ;;  %22448 = vmatprep.subr.bf16.mxu0 %v25627_v3  ;;  %v24911_v24 = vld [vmem:[%s33093_s9 + $0xaa8] ss:$20 sps:$4 sm:$0xff]   ;;  %v24914_v53 = vld [vmem:[%s33093_s9 + $0xa78] ss:$20 sps:$4 sm:$0xff]   ;;  %v24917_v11 = vld [vmem:[%s33093_s9 + $0xa80] ss:$20 sps:$4 sm:$0xff]  }
 0xa4e   : > { %v31251_v28 = vrot.slane %v13048_v63, %v31237_v45  ;;  %14956 = vmatprep.subr.bf16.mxu1 %v24868_v1  ;;  %v24919_v1 = vld [vmem:[%s33093_s9 + $0xa84] ss:$20 sps:$4 sm:$0xff]   ;;  %v24922_v63 = vld [vmem:[%s33093_s9 + $0xa54] ss:$20 sps:$4 sm:$0xff]  }
 0xa4f   : > { %v24920_v4 = vld [vmem:[%s33093_s9 + $0xa50] ss:$20 sps:$4 sm:$0xff]   ;;  %v24923_v46 = vld [vmem:[%s33093_s9 + $0xa58] ss:$20 sps:$4 sm:$0xff]  }
 0xa50   : > { %22449 = vmatpush3.bf16.msra.mxu0 %v24869_v17  ;;  %v24925_v17 = vld [vmem:[%s33093_s9 + $0xa5c] ss:$20 sps:$4 sm:$0xff]  }
 0xa51   : > { %14957 = vmatpush2.bf16.msra.mxu1 %v24866_v56  ;;  %22450 = vmatprep.subr.bf16.mxu0 %v25627_v3  ;;  %v24928_v56 = vld [vmem:[%s33093_s9 + $0xa2c] ss:$20 sps:$4 sm:$0xff]  }
 0xa52   : > { %14958 = vmatprep.subr.bf16.mxu1 %v24872_v31  ;;  %v24931_v31 = vld [vmem:[%s33093_s9 + $0xa34] ss:$20 sps:$4 sm:$0xff]  }
 0xa54   : > { %22451 = vmatpush3.bf16.msra.mxu0 %v24873_v5  ;;  %v24926_v5 = vld [vmem:[%s33093_s9 + $0xa28] ss:$20 sps:$4 sm:$0xff]  }
 0xa55   : > { %14959 = vmatpush2.bf16.msra.mxu1 %v24870_v19  ;;  %22452 = vmatprep.subr.bf16.mxu0 %v25627_v3  ;;  %v24929_v19 = vld [vmem:[%s33093_s9 + $0xa30] ss:$20 sps:$4 sm:$0xff]  }
 0xa56   : > { %14960 = vmatprep.subr.bf16.mxu1 %v24876_v44  ;;  %v24934_v44 = vld [vmem:[%s33093_s9 + $0xa04] ss:$20 sps:$4 sm:$0xff]  }
 0xa58   : > { %22453 = vmatpush3.bf16.msra.mxu0 %v24877_v55  ;;  %v24937_v55 = vld [vmem:[%s33093_s9 + $0xa0c] ss:$20 sps:$4 sm:$0xff]  }
 0xa59   : > { %14961 = vmatpush2.bf16.msra.mxu1 %v24874_v20  ;;  %22454 = vmatprep.subr.bf16.mxu0 %v25627_v3  ;;  %v24932_v20 = vld [vmem:[%s33093_s9 + $0xa00] ss:$20 sps:$4 sm:$0xff]  }
 0xa5a   : > { %14962 = vmatprep.subr.bf16.mxu1 %v24880_v15  ;;  %v24935_v15 = vld [vmem:[%s33093_s9 + $0xa08] ss:$20 sps:$4 sm:$0xff]  }
 0xa5c   : > { %22455 = vmatpush3.bf16.msra.mxu0 %v24881_v10  ;;  %v24940_v10 = vld [vmem:[%s33093_s9 + $0x8a4] ss:$20 sps:$4 sm:$0xff]  }
 0xa5d   : > { %14963 = vmatpush2.bf16.msra.mxu1 %v24878_v62  ;;  %22456 = vmatprep.subr.bf16.mxu0 %v25627_v3  ;;  %v24941_v62 = vld [vmem:[%s33093_s9 + $0x9e8] ss:$20 sps:$4 sm:$0xff]  }
 0xa5e   : > { %14964 = vmatprep.subr.bf16.mxu1 %v24884_v30  ;;  %v24938_v30 = vld [vmem:[%s33093_s9 + $0x8a0] ss:$20 sps:$4 sm:$0xff]  }
 0xa60   : > { %22457 = vmatpush3.bf16.msra.mxu0 %v24885_v35  ;;  %v31418_v35 = vrot.slane %v30623_v0, 1 }
 0xa61   : > { %14965 = vmatpush2.bf16.msra.mxu1 %v24882_v2  ;;  %22458 = vmatprep.subr.bf16.mxu0 %v25627_v3  ;;  %v24942_v2 = vld [vmem:[%s33093_s9 + $0x8a8] ss:$20 sps:$4 sm:$0xff]  }
 0xa62   : > { %14966 = vmatprep.subr.bf16.mxu1 %v24888_v37  ;;  %v24945_v37 = vld [vmem:[%s33093_s9 + $0x87c] ss:$20 sps:$4 sm:$0xff]  }
 0xa64   : > { %22459 = vmatpush3.bf16.msra.mxu0 %v24889_v59 }
 0xa65   : > { %14967 = vmatpush2.bf16.msra.mxu1 %v24886_v13  ;;  %14977 = vmatprep.subr.bf16.mxu0 %v24892_v8  ;;  %v24946_v13 = vld [vmem:[%s33093_s9 + $0x9c0] ss:$20 sps:$4 sm:$0xff]  }
 0xa66   : > { %15059 = vmatprep.subr.bf16.mxu1 %v24895_v27  ;;  %v24943_v27 = vld [vmem:[%s33093_s9 + $0x878] ss:$20 sps:$4 sm:$0xff]  }
 0xa67   : > { %v22154_v43 = vpop.f32.mrf.mxu1  ;;  %22461 = vmatmul.mubr.bf16.vlgmr.msra.gmra.mxu0 %v31010_v29 }
 0xa68   : > { %14969 = vmatmul.mubr.bf16.vlgmr.msra.gmra.mxu1 %v31319_v21  ;;  %14978 = vmatpush1.bf16.msra.mxu0 %v24890_v32 }
 0xa69   : > { %15060 = vmatpush1.bf16.msra.mxu1 %v24893_v34  ;;  %v22155_v39 = vpop.f32.mrf.mxu1  ;;  %14979 = vmatprep.subr.bf16.mxu0 %v24898_v16  ;;  %v24947_v34 = vld [vmem:[%s33093_s9 + $0x880] ss:$20 sps:$4 sm:$0xff]  }
 0xa6a   : > { %v31335_v60 = vadd.f32 %v22155_v39, %v22154_v43  ;;  %15061 = vmatprep.subr.bf16.mxu1 %v24901_v22  ;;  %15009 = vmatprep.mubr.bf16.mxu0 %v33155_v7  ;;  %v24950_v16 = vld [vmem:[%s33093_s9 + $0x854] ss:$20 sps:$4 sm:$0xff]   ;;  %v24951_v22 = vld [vmem:[%s33093_s9 + $0x998] ss:$20 sps:$4 sm:$0xff]   ;;  %v24948_v39 = vld [vmem:[%s33093_s9 + $0x850] ss:$20 sps:$4 sm:$0xff]  }
 0xa6b   : > { %v22157_v49 = vpop.f32.mrf.mxu1  ;;  %15091 = vmatprep.mubr.bf16.mxu1 %v33155_v7 }
 0xa6c   : > { %14980 = vmatpush1.bf16.msra.mxu0 %v24896_v14 }
 0xa6d   : > { %15062 = vmatpush1.bf16.msra.mxu1 %v24899_v41  ;;  %v22158_v57 = vpop.f32.mrf.mxu1  ;;  %14981 = vmatprep.subr.bf16.mxu0 %v24904_v23 }
 0xa6e   : > { %15063 = vmatprep.subr.bf16.mxu1 %v24907_v26  ;;  %v24956_v26 = vld [vmem:[%s33093_s9 + $0x970] ss:$20 sps:$4 sm:$0xff]  }
 0xa6f   : > { %v24957_v57 = vld [vmem:[%s33093_s9 + $0x830] ss:$20 sps:$4 sm:$0xff]  }
 0xa70   : > { %14982 = vmatpush1.bf16.msra.mxu0 %v24902_v6  ;;  %v24953_v6 = vld [vmem:[%s33093_s9 + $0x828] ss:$20 sps:$4 sm:$0xff]  }
 0xa71   : > { %15064 = vmatpush1.bf16.msra.mxu1 %v24905_v58  ;;  %14983 = vmatprep.subr.bf16.mxu0 %v24910_v51  ;;  %v24960_v58 = vld [vmem:[%s33093_s9 + $0x804] ss:$20 sps:$4 sm:$0xff]  }
 0xa72   : > { %15065 = vmatprep.subr.bf16.mxu1 %v24913_v40  ;;  %v24958_v40 = vld [vmem:[%s33093_s9 + $0x800] ss:$20 sps:$4 sm:$0xff]  }
 0xa74   : > { %14984 = vmatpush1.bf16.msra.mxu0 %v24908_v38  ;;  %v24962_v38 = vld [vmem:[%s33093_s9 + $0x808] ss:$20 sps:$4 sm:$0xff]  }
 0xa75   : > { %15066 = vmatpush1.bf16.msra.mxu1 %v24911_v24  ;;  %14985 = vmatprep.subr.bf16.mxu0 %v24916_v25  ;;  %v24965_v24 = vld [vmem:[%s33093_s9 + $0x7dc] ss:$20 sps:$4 sm:$0xff]   ;;  %v24966_v25 = vld [vmem:[%s33093_s9 + $0x920] ss:$20 sps:$4 sm:$0xff]  }
 0xa76   : > { %15067 = vmatprep.subr.bf16.mxu1 %v24919_v1  ;;  %v24963_v1 = vld [vmem:[%s33093_s9 + $0x7d8] ss:$20 sps:$4 sm:$0xff]  }
 0xa78   : > { %14986 = vmatpush1.bf16.msra.mxu0 %v24914_v53  ;;  %v24967_v53 = vld [vmem:[%s33093_s9 + $0x7e0] ss:$20 sps:$4 sm:$0xff]  }
 0xa79   : > { %15068 = vmatpush1.bf16.msra.mxu1 %v24917_v11  ;;  %14987 = vmatprep.subr.bf16.mxu0 %v24922_v63  ;;  %v24970_v11 = vld [vmem:[%s33093_s9 + $0x7b4] ss:$20 sps:$4 sm:$0xff]   ;;  %v24971_v63 = vld [vmem:[%s33093_s9 + $0x8f8] ss:$20 sps:$4 sm:$0xff]  }
 0xa7a   : > { %15069 = vmatprep.subr.bf16.mxu1 %v24925_v17  ;;  %v24968_v17 = vld [vmem:[%s33093_s9 + $0x7b0] ss:$20 sps:$4 sm:$0xff]  }
 0xa7c   : > { %14988 = vmatpush1.bf16.msra.mxu0 %v24920_v4  ;;  %v24972_v4 = vld [vmem:[%s33093_s9 + $0x7b8] ss:$20 sps:$4 sm:$0xff]  }
 0xa7d   : > { %15070 = vmatpush1.bf16.msra.mxu1 %v24923_v46  ;;  %14989 = vmatprep.subr.bf16.mxu0 %v24928_v56  ;;  %v24975_v46 = vld [vmem:[%s33093_s9 + $0x78c] ss:$20 sps:$4 sm:$0xff]   ;;  %v24976_v56 = vld [vmem:[%s33093_s9 + $0x8d0] ss:$20 sps:$4 sm:$0xff]  }
 0xa7e   : > { %15071 = vmatprep.subr.bf16.mxu1 %v24931_v31  ;;  %v24973_v31 = vld [vmem:[%s33093_s9 + $0x788] ss:$20 sps:$4 sm:$0xff]  }
 0xa80   : > { %14990 = vmatpush1.bf16.msra.mxu0 %v24926_v5  ;;  %v24977_v5 = vld [vmem:[%s33093_s9 + $0x790] ss:$20 sps:$4 sm:$0xff]  }
 0xa81   : > { %15072 = vmatpush1.bf16.msra.mxu1 %v24929_v19  ;;  %14991 = vmatprep.subr.bf16.mxu0 %v24934_v44  ;;  %v24980_v19 = vld [vmem:[%s33093_s9 + $0x9e4] ss:$20 sps:$4 sm:$0xff]   ;;  %v24983_v44 = vld [vmem:[%s33093_s9 + $0xc5c] ss:$20 sps:$4 sm:$0xff]  }
 0xa82   : > { %15073 = vmatprep.subr.bf16.mxu1 %v24937_v55  ;;  %v24978_v55 = vld [vmem:[%s33093_s9 + $0x9e0] ss:$20 sps:$4 sm:$0xff]  }
 0xa84   : > { %14992 = vmatpush1.bf16.msra.mxu0 %v24932_v20  ;;  %v24981_v20 = vld [vmem:[%s33093_s9 + $0xc58] ss:$20 sps:$4 sm:$0xff]  }
 0xa85   : > { %15074 = vmatpush1.bf16.msra.mxu1 %v24935_v15  ;;  %15018 = vmatprep.subr.bf16.mxu0 %v24940_v10  ;;  %v24986_v15 = vld [vmem:[%s33093_s9 + $0x9bc] ss:$20 sps:$4 sm:$0xff]   ;;  %v24989_v10 = vld [vmem:[%s33093_s9 + $0xc34] ss:$20 sps:$4 sm:$0xff]  }
 0xa86   : > { %22200 = vmatprep.subr.bf16.mxu1 %v24941_v62 }
 0xa87   : > { %v12915_v59 = vpop.f32.mrf.mxu0  ;;  %15010 = vmatmul.mubr.bf16.vlgmr.msra.gmra.mxu0 %v31418_v35 }
 0xa88   : > { %v12957_v8 = vadd.f32 %v31222_v36, %v12915_v59  ;;  %15092 = vmatmul.mubr.bf16.vlgmr.msra.gmra.mxu1 %v31418_v35  ;;  %15019 = vmatpush1.bf16.msra.mxu0 %v24938_v30  ;;  %v24984_v59 = vld [vmem:[%s33093_s9 + $0x9b8] ss:$20 sps:$4 sm:$0xff]  }
 0xa89   : > { %15050 = vmatprep.mubr.bf16.mxu0 %v31124_v18  ;;  %22201 = vmatpush3.bf16.msra.mxu1 %v24942_v2  ;;  %v12917_v32 = vpop.f32.mrf.mxu0  ;;  %v31539_v2 = vrot.slane %v30733_v47, 1 }
 0xa8a   : > { %15132 = vmatprep.mubr.bf16.mxu1 %v31124_v18  ;;  %v12959_v36 = vadd.f32 %v31230_v48, %v12917_v32  ;;  %15020 = vmatprep.subr.bf16.mxu0 %v24945_v37  ;;  %v24952_v18 = vld [vmem:[%s33093_s9 + $0x858] ss:$20 sps:$4 sm:$0xff]  }
 0xa8b   : > { %v12919_v43 = vpop.f32.mrf.mxu0  ;;  %22202 = vmatprep.subr.bf16.mxu1 %v24946_v13  ;;  %v24955_v48 = vld [vmem:[%s33093_s9 + $0x82c] ss:$20 sps:$4 sm:$0xff]  }
 0xa8c   : > { %v13049_v14 = vcombine.low %v12957_v8, %v12959_v36  ;;  %15021 = vmatpush1.bf16.msra.mxu0 %v24943_v27  ;;  %v24987_v27 = vld [vmem:[%s33093_s9 + $0xc30] ss:$20 sps:$4 sm:$0xff]  }
 0xa8d   : > { %22203 = vmatpush3.bf16.msra.mxu1 %v24947_v34  ;;  %v12920_v41 = vpop.f32.mrf.mxu0  ;;  %15022 = vmatprep.subr.bf16.mxu0 %v24950_v16  ;;  %v24995_v34 = vld [vmem:[%s33093_s9 + $0xc0c] ss:$20 sps:$4 sm:$0xff]   ;;  %v24990_v43 = vld [vmem:[%s33093_s9 + $0x990] ss:$20 sps:$4 sm:$0xff]  }
 0xa8e   : > { %v13063_v23 = vrot.slane %v13049_v14, %v31237_v45  ;;  %22204 = vmatprep.subr.bf16.mxu1 %v24951_v22  ;;  %v24993_v41 = vld [vmem:[%s33093_s9 + $0xc08] ss:$20 sps:$4 sm:$0xff]  }
 0xa90   : > { %v13071_v49 = vcombine.low %v31251_v28, %v13063_v23  ;;  %15023 = vmatpush1.bf16.msra.mxu0 %v24948_v39  ;;  %v24961_v28 = vld [vmem:[%s33093_s9 + $0x948] ss:$20 sps:$4 sm:$0xff]   ;;  %v25001_v23 = vld [vmem:[%s33093_s9 + $0xbe4] ss:$20 sps:$4 sm:$0xff]  }
 0xa91   : > { %22205 = vmatpush3.bf16.msra.mxu1 %v24952_v18  ;;  %15024 = vmatprep.subr.bf16.mxu0 %v24955_v48  ;;  %v24998_v18 = vld [vmem:[%s33093_s9 + $0x96c] ss:$20 sps:$4 sm:$0xff]  }
 0xa92   : > { %22206 = vmatprep.subr.bf16.mxu1 %v24956_v26  ;;  %v31474_v51 = vrot.slane %v13071_v49, %v31237_v45  ;;  %v24996_v26 = vld [vmem:[%s33093_s9 + $0x968] ss:$20 sps:$4 sm:$0xff]   ;;  %v24999_v49 = vld [vmem:[%s33093_s9 + $0xbe0] ss:$20 sps:$4 sm:$0xff]  }
 0xa94   : > { %15025 = vmatpush1.bf16.msra.mxu0 %v24953_v6  ;;  %v25004_v6 = vld [vmem:[%s33093_s9 + $0x944] ss:$20 sps:$4 sm:$0xff]  }
 0xa95   : > { %22207 = vmatpush3.bf16.msra.mxu1 %v24957_v57  ;;  %15026 = vmatprep.subr.bf16.mxu0 %v24960_v58  ;;  %v25007_v57 = vld [vmem:[%s33093_s9 + $0xbbc] ss:$20 sps:$4 sm:$0xff]   ;;  %v25002_v58 = vld [vmem:[%s33093_s9 + $0x940] ss:$20 sps:$4 sm:$0xff]  }
 0xa96   : > { %22208 = vmatprep.subr.bf16.mxu1 %v24961_v28  ;;  %v25005_v28 = vld [vmem:[%s33093_s9 + $0xbb8] ss:$20 sps:$4 sm:$0xff]  }
 0xa98   : > { %15027 = vmatpush1.bf16.msra.mxu0 %v24958_v40  ;;  %v25010_v40 = vld [vmem:[%s33093_s9 + $0x91c] ss:$20 sps:$4 sm:$0xff]  }
 0xa99   : > { %22209 = vmatpush3.bf16.msra.mxu1 %v24962_v38  ;;  %15028 = vmatprep.subr.bf16.mxu0 %v24965_v24  ;;  %v25013_v38 = vld [vmem:[%s33093_s9 + $0xb94] ss:$20 sps:$4 sm:$0xff]   ;;  %v25008_v24 = vld [vmem:[%s33093_s9 + $0x918] ss:$20 sps:$4 sm:$0xff]  }
 0xa9a   : > { %22210 = vmatprep.subr.bf16.mxu1 %v24966_v25  ;;  %v25011_v25 = vld [vmem:[%s33093_s9 + $0xb90] ss:$20 sps:$4 sm:$0xff]  }
 0xa9c   : > { %15029 = vmatpush1.bf16.msra.mxu0 %v24963_v1  ;;  %v25016_v1 = vld [vmem:[%s33093_s9 + $0x8f4] ss:$20 sps:$4 sm:$0xff]  }
 0xa9d   : > { %22211 = vmatpush3.bf16.msra.mxu1 %v24967_v53  ;;  %15030 = vmatprep.subr.bf16.mxu0 %v24970_v11  ;;  %v25019_v53 = vld [vmem:[%s33093_s9 + $0xb6c] ss:$20 sps:$4 sm:$0xff]   ;;  %v25014_v11 = vld [vmem:[%s33093_s9 + $0x8f0] ss:$20 sps:$4 sm:$0xff]  }
 0xa9e   : > { %22212 = vmatprep.subr.bf16.mxu1 %v24971_v63  ;;  %v25017_v63 = vld [vmem:[%s33093_s9 + $0xb68] ss:$20 sps:$4 sm:$0xff]  }
 0xaa0   : > { %15031 = vmatpush1.bf16.msra.mxu0 %v24968_v17  ;;  %v25022_v17 = vld [vmem:[%s33093_s9 + $0x8cc] ss:$20 sps:$4 sm:$0xff]  }
 0xaa1   : > { %22213 = vmatpush3.bf16.msra.mxu1 %v24972_v4  ;;  %15032 = vmatprep.subr.bf16.mxu0 %v24975_v46  ;;  %v25025_v4 = vld [vmem:[%s33093_s9 + $0xb44] ss:$20 sps:$4 sm:$0xff]   ;;  %v25020_v46 = vld [vmem:[%s33093_s9 + $0x8c8] ss:$20 sps:$4 sm:$0xff]  }
 0xaa2   : > { %22214 = vmatprep.subr.bf16.mxu1 %v24976_v56  ;;  %v25023_v56 = vld [vmem:[%s33093_s9 + $0xb40] ss:$20 sps:$4 sm:$0xff]  }
 0xaa4   : > { %15033 = vmatpush1.bf16.msra.mxu0 %v24973_v31  ;;  %v25028_v31 = vld [vmem:[%s33093_s9 + $0xd9c] ss:$20 sps:$4 sm:$0xff]  }
 0xaa5   : > { %22215 = vmatpush3.bf16.msra.mxu1 %v24977_v5  ;;  %15034 = vmatprep.subr.bf16.mxu0 %v24980_v19  ;;  %v25029_v5 = vld [vmem:[%s33093_s9 + $0xb28] ss:$20 sps:$4 sm:$0xff]   ;;  %v25026_v19 = vld [vmem:[%s33093_s9 + $0xd98] ss:$20 sps:$4 sm:$0xff]  }
 0xaa6   : > { %16000 = vmatprep.subr.bf16.mxu1 %v24983_v44  ;;  %v25032_v44 = vld [vmem:[%s33093_s9 + $0xd74] ss:$20 sps:$4 sm:$0xff]  }
 0xaa7   : > { %v13037_v62 = vpop.f32.mrf.mxu0  ;;  %v31536_v30 = vpop.f32.mrf.mxu1 }
 0xaa8   : > { %v13038_v37 = vadd.f32 %v31335_v60, %v13037_v62  ;;  %15133 = vmatmul.mubr.bf16.vlgmr.msra.gmra.mxu1 %v31319_v21  ;;  %15035 = vmatpush2.bf16.msra.mxu0 %v24978_v55  ;;  %v24992_v60 = vld [vmem:[%s33093_s9 + $0x994] ss:$20 sps:$4 sm:$0xff]  }
 0xaa9   : > { %16001 = vmatpush1.bf16.msra.mxu1 %v24981_v20  ;;  %16032 = vmatprep.mubr.bf16.mxu1 %v31539_v2  ;;  %v22442_v13 = vpop.f32.mrf.mxu0  ;;  %v31547_v8 = vpop.f32.mrf.mxu1 }
 0xaaa   : > { %v13070_v32 = vrot.slane %v13038_v37, %v31237_v45  ;;  %15036 = vmatprep.subr.bf16.mxu0 %v24986_v15  ;;  %16002 = vmatprep.subr.bf16.mxu1 %v24989_v10  ;;  %v25033_v10 = vld [vmem:[%s33093_s9 + $0xb00] ss:$20 sps:$4 sm:$0xff]  }
 0xaab   : > { %v13040_v16 = vpop.f32.mrf.mxu0  ;;  %v13907_v36 = vpop.f32.mrf.mxu1 }
 0xaac   : > { %v31560_v22 = vrot.slane %v13070_v32, %v31237_v45  ;;  %15037 = vmatpush2.bf16.msra.mxu0 %v24984_v59  ;;  %v25036_v59 = vld [vmem:[%s33093_s9 + $0xd4c] ss:$20 sps:$4 sm:$0xff]  }
 0xaad   : > { %16003 = vmatpush1.bf16.msra.mxu1 %v24987_v27  ;;  %v22443_v14 = vpop.f32.mrf.mxu0  ;;  %v13908_v39 = vpop.f32.mrf.mxu1  ;;  %15038 = vmatprep.subr.bf16.mxu0 %v24992_v60  ;;  %v25037_v32 = vld [vmem:[%s33093_s9 + $0xad8] ss:$20 sps:$4 sm:$0xff]  }
 0xaae   : > { %v13086_v48 = vcombine.low %v31474_v51, %v31560_v22  ;;  %16004 = vmatprep.subr.bf16.mxu1 %v24995_v34  ;;  %v25041_v14 = vld [vmem:[%s33093_s9 + $0xab0] ss:$20 sps:$4 sm:$0xff]   ;;  %v25038_v39 = vld [vmem:[%s33093_s9 + $0xd20] ss:$20 sps:$4 sm:$0xff]  }
 0xaaf   : > { %v25167_v51 = vld [vmem:[%s33093_s9 + $0xfa0] ss:$20 sps:$4 sm:$0xff]   ;;  %v25172_v22 = vld [vmem:[%s33093_s9 + $0xd04] ss:$20 sps:$4 sm:$0xff]  }
 0xab0   : > { %15039 = vmatpush2.bf16.msra.mxu0 %v24990_v43  ;;  %v25040_v43 = vld [vmem:[%s33093_s9 + $0xd24] ss:$20 sps:$4 sm:$0xff]  }
 0xab1   : > { %16005 = vmatpush1.bf16.msra.mxu1 %v24993_v41  ;;  %15040 = vmatprep.subr.bf16.mxu0 %v24998_v18  ;;  %v25044_v41 = vld [vmem:[%s33093_s9 + $0xcfc] ss:$20 sps:$4 sm:$0xff]  }
 0xab2   : > { %16006 = vmatprep.subr.bf16.mxu1 %v25001_v23  ;;  %v25045_v18 = vld [vmem:[%s33093_s9 + $0xa88] ss:$20 sps:$4 sm:$0xff]   ;;  %v25042_v23 = vld [vmem:[%s33093_s9 + $0xcf8] ss:$20 sps:$4 sm:$0xff]  }
 0xab4   : > { %15041 = vmatpush2.bf16.msra.mxu0 %v24996_v26  ;;  %v25048_v26 = vld [vmem:[%s33093_s9 + $0xcd4] ss:$20 sps:$4 sm:$0xff]  }
 0xab5   : > { %16007 = vmatpush1.bf16.msra.mxu1 %v24999_v49  ;;  %15042 = vmatprep.subr.bf16.mxu0 %v25004_v6  ;;  %v25049_v49 = vld [vmem:[%s33093_s9 + $0xa60] ss:$20 sps:$4 sm:$0xff]   ;;  %v25046_v6 = vld [vmem:[%s33093_s9 + $0xcd0] ss:$20 sps:$4 sm:$0xff]  }
 0xab6   : > { %16008 = vmatprep.subr.bf16.mxu1 %v25007_v57  ;;  %v25052_v57 = vld [vmem:[%s33093_s9 + $0xcac] ss:$20 sps:$4 sm:$0xff]  }
 0xab8   : > { %15043 = vmatpush2.bf16.msra.mxu0 %v25002_v58  ;;  %v25053_v58 = vld [vmem:[%s33093_s9 + $0xa38] ss:$20 sps:$4 sm:$0xff]  }
 0xab9   : > { %16009 = vmatpush1.bf16.msra.mxu1 %v25005_v28  ;;  %15044 = vmatprep.subr.bf16.mxu0 %v25010_v40  ;;  %v25050_v28 = vld [vmem:[%s33093_s9 + $0xca8] ss:$20 sps:$4 sm:$0xff]   ;;  %v25056_v40 = vld [vmem:[%s33093_s9 + $0xc84] ss:$20 sps:$4 sm:$0xff]  }
 0xaba   : > { %16010 = vmatprep.subr.bf16.mxu1 %v25013_v38  ;;  %v25057_v38 = vld [vmem:[%s33093_s9 + $0xa10] ss:$20 sps:$4 sm:$0xff]  }
 0xabc   : > { %15045 = vmatpush2.bf16.msra.mxu0 %v25008_v24  ;;  %v25054_v24 = vld [vmem:[%s33093_s9 + $0xc80] ss:$20 sps:$4 sm:$0xff]  }
 0xabd   : > { %16011 = vmatpush1.bf16.msra.mxu1 %v25011_v25  ;;  %15046 = vmatprep.subr.bf16.mxu0 %v25016_v1  ;;  %v25060_v25 = vld [vmem:[%s33093_s9 + $0xedc] ss:$20 sps:$4 sm:$0xff]   ;;  %v25063_v1 = vld [vmem:[%s33093_s9 + $0xee4] ss:$20 sps:$4 sm:$0xff]  }
 0xabe   : > { %16012 = vmatprep.subr.bf16.mxu1 %v25019_v53  ;;  %v25058_v53 = vld [vmem:[%s33093_s9 + $0xed8] ss:$20 sps:$4 sm:$0xff]  }
 0xac0   : > { %15047 = vmatpush2.bf16.msra.mxu0 %v25014_v11  ;;  %v25061_v11 = vld [vmem:[%s33093_s9 + $0xee0] ss:$20 sps:$4 sm:$0xff]  }
 0xac1   : > { %16013 = vmatpush1.bf16.msra.mxu1 %v25017_v63  ;;  %15048 = vmatprep.subr.bf16.mxu0 %v25022_v17  ;;  %v25066_v63 = vld [vmem:[%s33093_s9 + $0xeb4] ss:$20 sps:$4 sm:$0xff]   ;;  %v31738_v17 = vrot.slane %v30910_v54, 1 }
 0xac2   : > { %16014 = vmatprep.subr.bf16.mxu1 %v25025_v4  ;;  %v25069_v4 = vld [vmem:[%s33093_s9 + $0xebc] ss:$20 sps:$4 sm:$0xff]  }
 0xac4   : > { %15049 = vmatpush2.bf16.msra.mxu0 %v25020_v46 }
 0xac5   : > { %16015 = vmatpush1.bf16.msra.mxu1 %v25023_v56  ;;  %22464 = vmatprep.subr.bf16.mxu0 %v25627_v3  ;;  %v25064_v56 = vld [vmem:[%s33093_s9 + $0xeb0] ss:$20 sps:$4 sm:$0xff]  }
 0xac6   : > { %16016 = vmatprep.subr.bf16.mxu1 %v25028_v31  ;;  %v25067_v31 = vld [vmem:[%s33093_s9 + $0xeb8] ss:$20 sps:$4 sm:$0xff]  }
 0xac7   : > { %v13944_v55 = vpop.f32.mrf.mxu0  ;;  %v31643_v20 = vpop.f32.mrf.mxu1  ;;  %15051 = vmatmul.mubr.bf16.vlgmr.msra.gmra.mxu0 %v31319_v21  ;;  %v25030_v21 = vld [vmem:[%s33093_s9 + $0xd70] ss:$20 sps:$4 sm:$0xff]  }
 0xac8   : > { %v13945_v15 = vadd.f32 %v13944_v55, %v31536_v30  ;;  %22465 = vmatpush3.bf16.msra.mxu0 %v25029_v5  ;;  %22480 = vmatprep.mubr.msk.bf16.mxu0 %vm25628_vm5, %v25627_v3  ;;  %v25072_v5 = vld [vmem:[%s33093_s9 + $0xe8c] ss:$20 sps:$4 sm:$0xff]  }
 0xac9   : > { %16017 = vmatpush2.bf16.msra.mxu1 %v25026_v19  ;;  %v13946_v62 = vpop.f32.mrf.mxu0  ;;  %v31652_v37 = vpop.f32.mrf.mxu1  ;;  %22466 = vmatprep.subr.bf16.mxu0 %v25627_v3 }
 0xaca   : > { %v13947_v30 = vadd.f32 %v13946_v62, %v31547_v8  ;;  %16018 = vmatprep.subr.bf16.mxu1 %v25032_v44  ;;  %v25034_v8 = vld [vmem:[%s33093_s9 + $0xd48] ss:$20 sps:$4 sm:$0xff]   ;;  %v25078_v62 = vld [vmem:[%s33093_s9 + $0xe64] ss:$20 sps:$4 sm:$0xff]  }
 0xacb   : > { %v13948_v13 = vpop.f32.mrf.mxu0  ;;  %v14030_v27 = vpop.f32.mrf.mxu1 }
 0xacc   : > { %v14118_v60 = vcombine.low %v13945_v15, %v13947_v30  ;;  %22467 = vmatpush3.bf16.msra.mxu0 %v25033_v10  ;;  %v25070_v15 = vld [vmem:[%s33093_s9 + $0xe88] ss:$20 sps:$4 sm:$0xff]   ;;  %v25073_v10 = vld [vmem:[%s33093_s9 + $0xe90] ss:$20 sps:$4 sm:$0xff]   ;;  %v25081_v30 = vld [vmem:[%s33093_s9 + $0xe6c] ss:$20 sps:$4 sm:$0xff]  }
 0xacd   : > { %16019 = vmatpush2.bf16.msra.mxu1 %v25030_v21  ;;  %v13949_v34 = vpop.f32.mrf.mxu0  ;;  %v14031_v16 = vpop.f32.mrf.mxu1  ;;  %22468 = vmatprep.subr.bf16.mxu0 %v25627_v3  ;;  %v25079_v13 = vld [vmem:[%s33093_s9 + $0xe68] ss:$20 sps:$4 sm:$0xff]  }
 0xace   : > { %v31670_v36 = vrot.slane %v14118_v60, %v31237_v45  ;;  %16020 = vmatprep.subr.bf16.mxu1 %v25036_v59  ;;  %v25076_v59 = vld [vmem:[%s33093_s9 + $0xe60] ss:$20 sps:$4 sm:$0xff]   ;;  %v25084_v27 = vld [vmem:[%s33093_s9 + $0xe3c] ss:$20 sps:$4 sm:$0xff]   ;;  %v25087_v60 = vld [vmem:[%s33093_s9 + $0xe44] ss:$20 sps:$4 sm:$0xff]  }
 0xacf   : > { %v25085_v34 = vld [vmem:[%s33093_s9 + $0xe40] ss:$20 sps:$4 sm:$0xff]  }
 0xad0   : > { %22469 = vmatpush3.bf16.msra.mxu0 %v25037_v32  ;;  %v25082_v32 = vld [vmem:[%s33093_s9 + $0xe38] ss:$20 sps:$4 sm:$0xff]   ;;  %v25090_v16 = vld [vmem:[%s33093_s9 + $0xe14] ss:$20 sps:$4 sm:$0xff]  }
 0xad1   : > { %16021 = vmatpush2.bf16.msra.mxu1 %v25034_v8  ;;  %22470 = vmatprep.subr.bf16.mxu0 %v25627_v3  ;;  %v25093_v8 = vld [vmem:[%s33093_s9 + $0xe1c] ss:$20 sps:$4 sm:$0xff]  }
 0xad2   : > { %16022 = vmatprep.subr.bf16.mxu1 %v25040_v43  ;;  %v25088_v43 = vld [vmem:[%s33093_s9 + $0xe10] ss:$20 sps:$4 sm:$0xff]  }
 0xad4   : > { %22471 = vmatpush3.bf16.msra.mxu0 %v25041_v14  ;;  %v25091_v14 = vld [vmem:[%s33093_s9 + $0xe18] ss:$20 sps:$4 sm:$0xff]  }
 0xad5   : > { %16023 = vmatpush2.bf16.msra.mxu1 %v25038_v39  ;;  %22472 = vmatprep.subr.bf16.mxu0 %v25627_v3  ;;  %v25096_v39 = vld [vmem:[%s33093_s9 + $0xdec] ss:$20 sps:$4 sm:$0xff]  }
 0xad6   : > { %16024 = vmatprep.subr.bf16.mxu1 %v25044_v41  ;;  %v25099_v41 = vld [vmem:[%s33093_s9 + $0xdf4] ss:$20 sps:$4 sm:$0xff]  }
 0xad8   : > { %22473 = vmatpush3.bf16.msra.mxu0 %v25045_v18  ;;  %v25094_v18 = vld [vmem:[%s33093_s9 + $0xde8] ss:$20 sps:$4 sm:$0xff]  }
 0xad9   : > { %16025 = vmatpush2.bf16.msra.mxu1 %v25042_v23  ;;  %22474 = vmatprep.subr.bf16.mxu0 %v25627_v3  ;;  %v25097_v23 = vld [vmem:[%s33093_s9 + $0xdf0] ss:$20 sps:$4 sm:$0xff]  }
 0xada   : > { %16026 = vmatprep.subr.bf16.mxu1 %v25048_v26  ;;  %v25102_v26 = vld [vmem:[%s33093_s9 + $0xdc4] ss:$20 sps:$4 sm:$0xff]  }
 0xadc   : > { %22475 = vmatpush3.bf16.msra.mxu0 %v25049_v49  ;;  %v25105_v49 = vld [vmem:[%s33093_s9 + $0xdcc] ss:$20 sps:$4 sm:$0xff]  }
 0xadd   : > { %16027 = vmatpush2.bf16.msra.mxu1 %v25046_v6  ;;  %22476 = vmatprep.subr.bf16.mxu0 %v25627_v3  ;;  %v25100_v6 = vld [vmem:[%s33093_s9 + $0xdc0] ss:$20 sps:$4 sm:$0xff]  }
 0xade   : > { %16028 = vmatprep.subr.bf16.mxu1 %v25052_v57  ;;  %v25103_v57 = vld [vmem:[%s33093_s9 + $0xdc8] ss:$20 sps:$4 sm:$0xff]  }
 0xae0   : > { %22477 = vmatpush3.bf16.msra.mxu0 %v25053_v58  ;;  %v25108_v58 = vld [vmem:[%s33093_s9 + $0xc64] ss:$20 sps:$4 sm:$0xff]  }
 0xae1   : > { %16029 = vmatpush2.bf16.msra.mxu1 %v25050_v28  ;;  %22478 = vmatprep.subr.bf16.mxu0 %v25627_v3  ;;  %v25109_v28 = vld [vmem:[%s33093_s9 + $0xda8] ss:$20 sps:$4 sm:$0xff]  }
 0xae2   : > { %16030 = vmatprep.subr.bf16.mxu1 %v25056_v40  ;;  %v25106_v40 = vld [vmem:[%s33093_s9 + $0xc60] ss:$20 sps:$4 sm:$0xff]  }
 0xae4   : > { %22479 = vmatpush3.bf16.msra.mxu0 %v25057_v38  ;;  %v31837_v38 = vrot.slane %v31010_v29, 1 }
 0xae5   : > { %16031 = vmatpush2.bf16.msra.mxu1 %v25054_v24  ;;  %16041 = vmatprep.subr.bf16.mxu0 %v25060_v25  ;;  %v25110_v24 = vld [vmem:[%s33093_s9 + $0xc68] ss:$20 sps:$4 sm:$0xff]  }
 0xae6   : > { %16123 = vmatprep.subr.bf16.mxu1 %v25063_v1  ;;  %v25113_v25 = vld [vmem:[%s33093_s9 + $0xc3c] ss:$20 sps:$4 sm:$0xff]  }
 0xae7   : > { %22481 = vmatmul.mubr.bf16.vlgmr.msra.gmra.mxu0 %v31418_v35  ;;  %v25075_v35 = vld [vmem:[%s33093_s9 + $0xe94] ss:$20 sps:$4 sm:$0xff]  }
 0xae8   : > { %v22185_v46 = vpop.f32.mrf.mxu1  ;;  %16033 = vmatmul.mubr.bf16.vlgmr.msra.gmra.mxu1 %v31738_v17  ;;  %16042 = vmatpush1.bf16.msra.mxu0 %v25058_v53  ;;  %v25114_v53 = vld [vmem:[%s33093_s9 + $0xd80] ss:$20 sps:$4 sm:$0xff]  }
 0xae9   : > { %16124 = vmatpush1.bf16.msra.mxu1 %v25061_v11  ;;  %16043 = vmatprep.subr.bf16.mxu0 %v25066_v63  ;;  %v25111_v63 = vld [vmem:[%s33093_s9 + $0xc38] ss:$20 sps:$4 sm:$0xff]  }
 0xaea   : > { %v22186_v19 = vpop.f32.mrf.mxu1  ;;  %16125 = vmatprep.subr.bf16.mxu1 %v25069_v4  ;;  %16073 = vmatprep.mubr.bf16.mxu0 %v33155_v7 }
 0xaeb   : > { %v31758_v44 = vadd.f32 %v22186_v19, %v22185_v46  ;;  %16155 = vmatprep.mubr.bf16.mxu1 %v33155_v7  ;;  %v25115_v46 = vld [vmem:[%s33093_s9 + $0xc40] ss:$20 sps:$4 sm:$0xff]  }
 0xaec   : > { %v22188_v55 = vpop.f32.mrf.mxu1  ;;  %16044 = vmatpush1.bf16.msra.mxu0 %v25064_v56  ;;  %v25118_v56 = vld [vmem:[%s33093_s9 + $0xc14] ss:$20 sps:$4 sm:$0xff]  }
 0xaed   : > { %16126 = vmatpush1.bf16.msra.mxu1 %v25067_v31  ;;  %16045 = vmatprep.subr.bf16.mxu0 %v25072_v5  ;;  %v25119_v31 = vld [vmem:[%s33093_s9 + $0xd58] ss:$20 sps:$4 sm:$0xff]  }
 0xaee   : > { %v22189_v21 = vpop.f32.mrf.mxu1  ;;  %16127 = vmatprep.subr.bf16.mxu1 %v25075_v35  ;;  %v25116_v35 = vld [vmem:[%s33093_s9 + $0xc10] ss:$20 sps:$4 sm:$0xff]  }
 0xaef   : > { %v25121_v21 = vld [vmem:[%s33093_s9 + $0xbe8] ss:$20 sps:$4 sm:$0xff]  }
 0xaf0   : > { %16046 = vmatpush1.bf16.msra.mxu0 %v25070_v15 }
 0xaf1   : > { %16128 = vmatpush1.bf16.msra.mxu1 %v25073_v10  ;;  %16047 = vmatprep.subr.bf16.mxu0 %v25078_v62  ;;  %v25124_v10 = vld [vmem:[%s33093_s9 + $0xd30] ss:$20 sps:$4 sm:$0xff]  }
 0xaf2   : > { %16129 = vmatprep.subr.bf16.mxu1 %v25081_v30  ;;  %v25125_v30 = vld [vmem:[%s33093_s9 + $0xbf0] ss:$20 sps:$4 sm:$0xff]  }
 0xaf4   : > { %16048 = vmatpush1.bf16.msra.mxu0 %v25076_v59  ;;  %v25128_v59 = vld [vmem:[%s33093_s9 + $0xbc4] ss:$20 sps:$4 sm:$0xff]  }
 0xaf5   : > { %16130 = vmatpush1.bf16.msra.mxu1 %v25079_v13  ;;  %16049 = vmatprep.subr.bf16.mxu0 %v25084_v27  ;;  %v25126_v27 = vld [vmem:[%s33093_s9 + $0xbc0] ss:$20 sps:$4 sm:$0xff]  }
 0xaf6   : > { %16131 = vmatprep.subr.bf16.mxu1 %v25087_v60  ;;  %v25130_v60 = vld [vmem:[%s33093_s9 + $0xbc8] ss:$20 sps:$4 sm:$0xff]  }
 0xaf8   : > { %16050 = vmatpush1.bf16.msra.mxu0 %v25082_v32  ;;  %v25133_v32 = vld [vmem:[%s33093_s9 + $0xb9c] ss:$20 sps:$4 sm:$0xff]  }
 0xaf9   : > { %16132 = vmatpush1.bf16.msra.mxu1 %v25085_v34  ;;  %16051 = vmatprep.subr.bf16.mxu0 %v25090_v16  ;;  %v25134_v34 = vld [vmem:[%s33093_s9 + $0xce0] ss:$20 sps:$4 sm:$0xff]   ;;  %v25131_v16 = vld [vmem:[%s33093_s9 + $0xb98] ss:$20 sps:$4 sm:$0xff]  }
 0xafa   : > { %16133 = vmatprep.subr.bf16.mxu1 %v25093_v8  ;;  %v25135_v8 = vld [vmem:[%s33093_s9 + $0xba0] ss:$20 sps:$4 sm:$0xff]  }
 0xafc   : > { %16052 = vmatpush1.bf16.msra.mxu0 %v25088_v43  ;;  %v25138_v43 = vld [vmem:[%s33093_s9 + $0xb74] ss:$20 sps:$4 sm:$0xff]  }
 0xafd   : > { %16134 = vmatpush1.bf16.msra.mxu1 %v25091_v14  ;;  %16053 = vmatprep.subr.bf16.mxu0 %v25096_v39  ;;  %v25139_v14 = vld [vmem:[%s33093_s9 + $0xcb8] ss:$20 sps:$4 sm:$0xff]   ;;  %v25136_v39 = vld [vmem:[%s33093_s9 + $0xb70] ss:$20 sps:$4 sm:$0xff]  }
 0xafe   : > { %16135 = vmatprep.subr.bf16.mxu1 %v25099_v41  ;;  %v25140_v41 = vld [vmem:[%s33093_s9 + $0xb78] ss:$20 sps:$4 sm:$0xff]  }
 0xb00   : > { %16054 = vmatpush1.bf16.msra.mxu0 %v25094_v18  ;;  %v25143_v18 = vld [vmem:[%s33093_s9 + $0xb4c] ss:$20 sps:$4 sm:$0xff]  }
 0xb01   : > { %16136 = vmatpush1.bf16.msra.mxu1 %v25097_v23  ;;  %16055 = vmatprep.subr.bf16.mxu0 %v25102_v26  ;;  %v25144_v23 = vld [vmem:[%s33093_s9 + $0xc90] ss:$20 sps:$4 sm:$0xff]   ;;  %v25141_v26 = vld [vmem:[%s33093_s9 + $0xb48] ss:$20 sps:$4 sm:$0xff]  }
 0xb02   : > { %16137 = vmatprep.subr.bf16.mxu1 %v25105_v49  ;;  %v25145_v49 = vld [vmem:[%s33093_s9 + $0xb50] ss:$20 sps:$4 sm:$0xff]  }
 0xb04   : > { %16056 = vmatpush1.bf16.msra.mxu0 %v25100_v6  ;;  %v25148_v6 = vld [vmem:[%s33093_s9 + $0xda4] ss:$20 sps:$4 sm:$0xff]  }
 0xb05   : > { %16138 = vmatpush1.bf16.msra.mxu1 %v25103_v57  ;;  %16082 = vmatprep.subr.bf16.mxu0 %v25108_v58  ;;  %v25151_v57 = vld [vmem:[%s33093_s9 + $0x101c] ss:$20 sps:$4 sm:$0xff]   ;;  %v25146_v58 = vld [vmem:[%s33093_s9 + $0xda0] ss:$20 sps:$4 sm:$0xff]  }
 0xb06   : > { %22231 = vmatprep.subr.bf16.mxu1 %v25109_v28  ;;  %v25149_v28 = vld [vmem:[%s33093_s9 + $0x1018] ss:$20 sps:$4 sm:$0xff]  }
 0xb07   : > { %v13985_v1 = vpop.f32.mrf.mxu0  ;;  %16074 = vmatmul.mubr.bf16.vlgmr.msra.gmra.mxu0 %v31837_v38 }
 0xb08   : > { %v14027_v11 = vadd.f32 %v31643_v20, %v13985_v1  ;;  %16156 = vmatmul.mubr.bf16.vlgmr.msra.gmra.mxu1 %v31837_v38  ;;  %16083 = vmatpush1.bf16.msra.mxu0 %v25106_v40  ;;  %v25154_v40 = vld [vmem:[%s33093_s9 + $0xd7c] ss:$20 sps:$4 sm:$0xff]   ;;  %v31956_v1 = vrot.slane %v30561_v9, 2 }
 0xb09   : > { %16114 = vmatprep.mubr.bf16.mxu0 %v31539_v2  ;;  %22232 = vmatpush3.bf16.msra.mxu1 %v25110_v24  ;;  %v13987_v4 = vpop.f32.mrf.mxu0  ;;  %v25157_v24 = vld [vmem:[%s33093_s9 + $0xff4] ss:$20 sps:$4 sm:$0xff]   ;;  %v25155_v9 = vld [vmem:[%s33093_s9 + $0xff0] ss:$20 sps:$4 sm:$0xff]  }
 0xb0a   : > { %16196 = vmatprep.mubr.bf16.mxu1 %v31539_v2  ;;  %v14029_v20 = vadd.f32 %v31652_v37, %v13987_v4  ;;  %16084 = vmatprep.subr.bf16.mxu0 %v25113_v25  ;;  %v25120_v2 = vld [vmem:[%s33093_s9 + $0xc18] ss:$20 sps:$4 sm:$0xff]  }
 0xb0b   : > { %v13989_v5 = vpop.f32.mrf.mxu0  ;;  %22233 = vmatprep.subr.bf16.mxu1 %v25114_v53  ;;  %v25123_v37 = vld [vmem:[%s33093_s9 + $0xbec] ss:$20 sps:$4 sm:$0xff]  }
 0xb0c   : > { %v14119_v19 = vcombine.low %v14027_v11, %v14029_v20  ;;  %16085 = vmatpush1.bf16.msra.mxu0 %v25111_v63  ;;  %v25152_v63 = vld [vmem:[%s33093_s9 + $0xd78] ss:$20 sps:$4 sm:$0xff]  }
 0xb0d   : > { %22234 = vmatpush3.bf16.msra.mxu1 %v25115_v46  ;;  %v13990_v55 = vpop.f32.mrf.mxu0  ;;  %16086 = vmatprep.subr.bf16.mxu0 %v25118_v56  ;;  %v25163_v20 = vld [vmem:[%s33093_s9 + $0xfcc] ss:$20 sps:$4 sm:$0xff]  }
 0xb0e   : > { %v14133_v15 = vrot.slane %v14119_v19, %v31237_v45  ;;  %22235 = vmatprep.subr.bf16.mxu1 %v25119_v31  ;;  %v12030_v31 = vld [vmem:[%s33094_s10] sm:$0x1f] }
 0xb0f   : > { %v25158_v55 = vld [vmem:[%s33093_s9 + $0xd50] ss:$20 sps:$4 sm:$0xff]  }
 0xb10   : > { %v14141_v62 = vcombine.low %v31670_v36, %v14133_v15  ;;  %16087 = vmatpush1.bf16.msra.mxu0 %v25116_v35  ;;  %v25129_v36 = vld [vmem:[%s33093_s9 + $0xd08] ss:$20 sps:$4 sm:$0xff]   ;;  %v25166_v15 = vld [vmem:[%s33093_s9 + $0xd2c] ss:$20 sps:$4 sm:$0xff]  }
 0xb11   : > { %22236 = vmatpush3.bf16.msra.mxu1 %v25120_v2  ;;  %16088 = vmatprep.subr.bf16.mxu0 %v25123_v37  ;;  %v25161_v37 = vld [vmem:[%s33093_s9 + $0xfc8] ss:$20 sps:$4 sm:$0xff]  }
 0xb12   : > { %22237 = vmatprep.subr.bf16.mxu1 %v25124_v10  ;;  %v31893_v13 = vrot.slane %v14141_v62, %v31237_v45  ;;  %v13088_v10 = vadd.f32 %v13086_v48, %v12030_v31  ;;  %v25175_v48 = vld [vmem:[%s33093_s9 + $0xf7c] ss:$20 sps:$4 sm:$0xff]  }
 0xb14   : > { %16089 = vmatpush1.bf16.msra.mxu0 %v25121_v21 }
 0xb15   : > { %22238 = vmatpush3.bf16.msra.mxu1 %v25125_v30  ;;  %16090 = vmatprep.subr.bf16.mxu0 %v25128_v59  ;;  %v25169_v30 = vld [vmem:[%s33093_s9 + $0xfa4] ss:$20 sps:$4 sm:$0xff]  }
 0xb16   : > { %22239 = vmatprep.subr.bf16.mxu1 %v25129_v36  ;;  %v25164_v36 = vld [vmem:[%s33093_s9 + $0xd28] ss:$20 sps:$4 sm:$0xff]  }
 0xb18   : > { %16091 = vmatpush1.bf16.msra.mxu0 %v25126_v27  ;;  %v25173_v27 = vld [vmem:[%s33093_s9 + $0xf78] ss:$20 sps:$4 sm:$0xff]  }
 0xb19   : > { %22240 = vmatpush3.bf16.msra.mxu1 %v25130_v60  ;;  %16092 = vmatprep.subr.bf16.mxu0 %v25133_v32  ;;  %v25178_v60 = vld [vmem:[%s33093_s9 + $0xcdc] ss:$20 sps:$4 sm:$0xff]   ;;  %v25181_v32 = vld [vmem:[%s33093_s9 + $0xf54] ss:$20 sps:$4 sm:$0xff]  }
 0xb1a   : > { %22241 = vmatprep.subr.bf16.mxu1 %v25134_v34  ;;  %v25176_v34 = vld [vmem:[%s33093_s9 + $0xcd8] ss:$20 sps:$4 sm:$0xff]  }
 0xb1c   : > { %16093 = vmatpush1.bf16.msra.mxu0 %v25131_v16  ;;  %v25179_v16 = vld [vmem:[%s33093_s9 + $0xf50] ss:$20 sps:$4 sm:$0xff]  }
 0xb1d   : > { %22242 = vmatpush3.bf16.msra.mxu1 %v25135_v8  ;;  %16094 = vmatprep.subr.bf16.mxu0 %v25138_v43  ;;  %v25184_v8 = vld [vmem:[%s33093_s9 + $0xcb4] ss:$20 sps:$4 sm:$0xff]   ;;  %v25187_v43 = vld [vmem:[%s33093_s9 + $0xf2c] ss:$20 sps:$4 sm:$0xff]  }
 0xb1e   : > { %22243 = vmatprep.subr.bf16.mxu1 %v25139_v14  ;;  %v25182_v14 = vld [vmem:[%s33093_s9 + $0xcb0] ss:$20 sps:$4 sm:$0xff]  }
 0xb20   : > { %16095 = vmatpush1.bf16.msra.mxu0 %v25136_v39  ;;  %v25185_v39 = vld [vmem:[%s33093_s9 + $0xf28] ss:$20 sps:$4 sm:$0xff]  }
 0xb21   : > { %22244 = vmatpush3.bf16.msra.mxu1 %v25140_v41  ;;  %16096 = vmatprep.subr.bf16.mxu0 %v25143_v18  ;;  %v25190_v41 = vld [vmem:[%s33093_s9 + $0xc8c] ss:$20 sps:$4 sm:$0xff]   ;;  %v25193_v18 = vld [vmem:[%s33093_s9 + $0xf04] ss:$20 sps:$4 sm:$0xff]  }
 0xb22   : > { %22245 = vmatprep.subr.bf16.mxu1 %v25144_v23  ;;  %v25188_v23 = vld [vmem:[%s33093_s9 + $0xc88] ss:$20 sps:$4 sm:$0xff]  }
 0xb24   : > { %16097 = vmatpush1.bf16.msra.mxu0 %v25141_v26  ;;  %v25191_v26 = vld [vmem:[%s33093_s9 + $0xf00] ss:$20 sps:$4 sm:$0xff]  }
 0xb25   : > { %22246 = vmatpush3.bf16.msra.mxu1 %v25145_v49  ;;  %16098 = vmatprep.subr.bf16.mxu0 %v25148_v6  ;;  %v25196_v49 = vld [vmem:[%s33093_s9 + $0x115c] ss:$20 sps:$4 sm:$0xff]  }
 0xb26   : > { %17064 = vmatprep.subr.bf16.mxu1 %v25151_v57  ;;  %v25197_v6 = vld [vmem:[%s33093_s9 + $0xee8] ss:$20 sps:$4 sm:$0xff]   ;;  %v25194_v57 = vld [vmem:[%s33093_s9 + $0x1158] ss:$20 sps:$4 sm:$0xff]  }
 0xb27   : > { %v14107_v25 = vpop.f32.mrf.mxu0 }
 0xb28   : > { %v14108_v53 = vadd.f32 %v31758_v44, %v14107_v25  ;;  %v31959_v11 = vpop.f32.mrf.mxu1  ;;  %16197 = vmatmul.mubr.bf16.vlgmr.msra.gmra.mxu1 %v31738_v17  ;;  %16099 = vmatpush2.bf16.msra.mxu0 %v25146_v58  ;;  %v25160_v44 = vld [vmem:[%s33093_s9 + $0xd54] ss:$20 sps:$4 sm:$0xff]  }
 0xb29   : > { %17065 = vmatpush1.bf16.msra.mxu1 %v25149_v28  ;;  %17096 = vmatprep.mubr.bf16.mxu1 %v31956_v1  ;;  %v22462_v4 = vpop.f32.mrf.mxu0  ;;  %v25200_v58 = vld [vmem:[%s33093_s9 + $0x1134] ss:$20 sps:$4 sm:$0xff]  }
 0xb2a   : > { %v14140_v46 = vrot.slane %v14108_v53, %v31237_v45  ;;  %v31973_v56 = vpop.f32.mrf.mxu1  ;;  %16100 = vmatprep.subr.bf16.mxu0 %v25154_v40  ;;  %17066 = vmatprep.subr.bf16.mxu1 %v25157_v24  ;;  %v25201_v25 = vld [vmem:[%s33093_s9 + $0xec0] ss:$20 sps:$4 sm:$0xff]  }
 0xb2b   : > { %v14110_v5 = vpop.f32.mrf.mxu0  ;;  %v25204_v4 = vld [vmem:[%s33093_s9 + $0x110c] ss:$20 sps:$4 sm:$0xff]  }
 0xb2c   : > { %v14155_v19 = vrot.slane %v14140_v46, %v31237_v45  ;;  %v14974_v35 = vpop.f32.mrf.mxu1  ;;  %16101 = vmatpush2.bf16.msra.mxu0 %v25152_v63 }
 0xb2d   : > { %17067 = vmatpush1.bf16.msra.mxu1 %v25155_v9  ;;  %v22463_v2 = vpop.f32.mrf.mxu0  ;;  %16102 = vmatprep.subr.bf16.mxu0 %v25160_v44  ;;  %v25208_v35 = vld [vmem:[%s33093_s9 + $0x10e4] ss:$20 sps:$4 sm:$0xff]  }
 0xb2e   : > { %v14156_v62 = vcombine.low %v31893_v13, %v14155_v19  ;;  %v14975_v21 = vpop.f32.mrf.mxu1  ;;  %17068 = vmatprep.subr.bf16.mxu1 %v25163_v20  ;;  %v25170_v13 = vld [vmem:[%s33093_s9 + $0xd00] ss:$20 sps:$4 sm:$0xff]   ;;  %v25205_v20 = vld [vmem:[%s33093_s9 + $0xe98] ss:$20 sps:$4 sm:$0xff]  }
 0xb2f   : > { %v25206_v2 = vld [vmem:[%s33093_s9 + $0x10e0] ss:$20 sps:$4 sm:$0xff]  }
 0xb30   : > { %v31998_v59 = vadd.f32 %v14156_v62, %v13088_v10  ;;  %16103 = vmatpush2.bf16.msra.mxu0 %v25158_v55  ;;  %v25209_v55 = vld [vmem:[%s33093_s9 + $0xe70] ss:$20 sps:$4 sm:$0xff]   ;;  %v25210_v10 = vld [vmem:[%s33093_s9 + $0x10b8] ss:$20 sps:$4 sm:$0xff]   ;;  %v25216_v62 = vld [vmem:[%s33093_s9 + $0x1094] ss:$20 sps:$4 sm:$0xff]  }
 0xb31   : > { %17069 = vmatpush1.bf16.msra.mxu1 %v25161_v37  ;;  %16104 = vmatprep.subr.bf16.mxu0 %v25166_v15  ;;  %v25212_v37 = vld [vmem:[%s33093_s9 + $0x10bc] ss:$20 sps:$4 sm:$0xff]   ;;  %v25217_v21 = vld [vmem:[%s33093_s9 + $0xe20] ss:$20 sps:$4 sm:$0xff]  }
 0xb32   : > { %17070 = vmatprep.subr.bf16.mxu1 %v25169_v30  ;;  %v25213_v15 = vld [vmem:[%s33093_s9 + $0xe48] ss:$20 sps:$4 sm:$0xff]   ;;  %v25214_v30 = vld [vmem:[%s33093_s9 + $0x1090] ss:$20 sps:$4 sm:$0xff]  }
 0xb34   : > { %16105 = vmatpush2.bf16.msra.mxu0 %v25164_v36  ;;  %v25220_v36 = vld [vmem:[%s33093_s9 + $0x106c] ss:$20 sps:$4 sm:$0xff]  }
 0xb35   : > { %17071 = vmatpush1.bf16.msra.mxu1 %v25167_v51  ;;  %16106 = vmatprep.subr.bf16.mxu0 %v25172_v22  ;;  %v25221_v51 = vld [vmem:[%s33093_s9 + $0xdf8] ss:$20 sps:$4 sm:$0xff]   ;;  %v25218_v22 = vld [vmem:[%s33093_s9 + $0x1068] ss:$20 sps:$4 sm:$0xff]  }
 0xb36   : > { %17072 = vmatprep.subr.bf16.mxu1 %v25175_v48  ;;  %v25224_v48 = vld [vmem:[%s33093_s9 + $0x1044] ss:$20 sps:$4 sm:$0xff]  }
 0xb38   : > { %16107 = vmatpush2.bf16.msra.mxu0 %v25170_v13  ;;  %v25225_v13 = vld [vmem:[%s33093_s9 + $0xdd0] ss:$20 sps:$4 sm:$0xff]  }
 0xb39   : > { %17073 = vmatpush1.bf16.msra.mxu1 %v25173_v27  ;;  %16108 = vmatprep.subr.bf16.mxu0 %v25178_v60  ;;  %v25222_v27 = vld [vmem:[%s33093_s9 + $0x1040] ss:$20 sps:$4 sm:$0xff]   ;;  %v25228_v60 = vld [vmem:[%s33093_s9 + $0x129c] ss:$20 sps:$4 sm:$0xff]  }
 0xb3a   : > { %17074 = vmatprep.subr.bf16.mxu1 %v25181_v32  ;;  %v25231_v32 = vld [vmem:[%s33093_s9 + $0x12a4] ss:$20 sps:$4 sm:$0xff]  }
 0xb3c   : > { %16109 = vmatpush2.bf16.msra.mxu0 %v25176_v34  ;;  %v25226_v34 = vld [vmem:[%s33093_s9 + $0x1298] ss:$20 sps:$4 sm:$0xff]  }
 0xb3d   : > { %17075 = vmatpush1.bf16.msra.mxu1 %v25179_v16  ;;  %16110 = vmatprep.subr.bf16.mxu0 %v25184_v8  ;;  %v25229_v16 = vld [vmem:[%s33093_s9 + $0x12a0] ss:$20 sps:$4 sm:$0xff]  }
 0xb3e   : > { %17076 = vmatprep.subr.bf16.mxu1 %v25187_v43  ;;  %v25234_v8 = vld [vmem:[%s33093_s9 + $0x1274] ss:$20 sps:$4 sm:$0xff]   ;;  %v32162_v43 = vrot.slane %v30566_v52, 2  ;;  %v25235_v52 = vld [vmem:[%s33093_s9 + $0x1278] ss:$20 sps:$4 sm:$0xff]  }
 0xb40   : > { %16111 = vmatpush2.bf16.msra.mxu0 %v25182_v14  ;;  %v25237_v14 = vld [vmem:[%s33093_s9 + $0x127c] ss:$20 sps:$4 sm:$0xff]  }
 0xb41   : > { %17077 = vmatpush1.bf16.msra.mxu1 %v25185_v39  ;;  %16112 = vmatprep.subr.bf16.mxu0 %v25190_v41  ;;  %v25232_v41 = vld [vmem:[%s33093_s9 + $0x1270] ss:$20 sps:$4 sm:$0xff]  }
 0xb42   : > { %17078 = vmatprep.subr.bf16.mxu1 %v25193_v18  ;;  %v25240_v18 = vld [vmem:[%s33093_s9 + $0x124c] ss:$20 sps:$4 sm:$0xff]  }
 0xb44   : > { %16113 = vmatpush2.bf16.msra.mxu0 %v25188_v23 }
 0xb45   : > { %17079 = vmatpush1.bf16.msra.mxu1 %v25191_v26  ;;  %22484 = vmatprep.subr.bf16.mxu0 %v25627_v3 }
 0xb46   : > { %17080 = vmatprep.subr.bf16.mxu1 %v25196_v49 }
 0xb47   : > { %v15011_v28 = vpop.f32.mrf.mxu0  ;;  %16115 = vmatmul.mubr.bf16.vlgmr.msra.gmra.mxu0 %v31738_v17  ;;  %v25198_v17 = vld [vmem:[%s33093_s9 + $0x1130] ss:$20 sps:$4 sm:$0xff]  }
 0xb48   : > { %v15012_v40 = vadd.f32 %v15011_v28, %v31959_v11  ;;  %v32069_v24 = vpop.f32.mrf.mxu1  ;;  %22485 = vmatpush3.bf16.msra.mxu0 %v25197_v6  ;;  %22500 = vmatprep.mubr.msk.bf16.mxu0 %vm25628_vm5, %v25627_v3  ;;  %v25238_v6 = vld [vmem:[%s33093_s9 + $0x1248] ss:$20 sps:$4 sm:$0xff]  }
 0xb49   : > { %17081 = vmatpush2.bf16.msra.mxu1 %v25194_v57  ;;  %v15013_v53 = vpop.f32.mrf.mxu0  ;;  %22486 = vmatprep.subr.bf16.mxu0 %v25627_v3  ;;  %v25241_v57 = vld [vmem:[%s33093_s9 + $0x1250] ss:$20 sps:$4 sm:$0xff]  }
 0xb4a   : > { %v15014_v11 = vadd.f32 %v15013_v53, %v31973_v56  ;;  %v32081_v63 = vpop.f32.mrf.mxu1  ;;  %17082 = vmatprep.subr.bf16.mxu1 %v25200_v58  ;;  %v25202_v56 = vld [vmem:[%s33093_s9 + $0x1108] ss:$20 sps:$4 sm:$0xff]   ;;  %v25246_v58 = vld [vmem:[%s33093_s9 + $0x1224] ss:$20 sps:$4 sm:$0xff]  }
 0xb4b   : > { %v15015_v9 = vpop.f32.mrf.mxu0  ;;  %v25247_v53 = vld [vmem:[%s33093_s9 + $0x1228] ss:$20 sps:$4 sm:$0xff]  }
 0xb4c   : > { %v15185_v44 = vcombine.low %v15012_v40, %v15014_v11  ;;  %v15097_v46 = vpop.f32.mrf.mxu1  ;;  %22487 = vmatpush3.bf16.msra.mxu0 %v25201_v25  ;;  %v25249_v40 = vld [vmem:[%s33093_s9 + $0x122c] ss:$20 sps:$4 sm:$0xff]   ;;  %v25255_v11 = vld [vmem:[%s33093_s9 + $0x1204] ss:$20 sps:$4 sm:$0xff]  }
 0xb4d   : > { %17083 = vmatpush2.bf16.msra.mxu1 %v25198_v17  ;;  %v15016_v31 = vpop.f32.mrf.mxu0  ;;  %22488 = vmatprep.subr.bf16.mxu0 %v25627_v3  ;;  %v25244_v25 = vld [vmem:[%s33093_s9 + $0x1220] ss:$20 sps:$4 sm:$0xff]   ;;  %v25252_v17 = vld [vmem:[%s33093_s9 + $0x11fc] ss:$20 sps:$4 sm:$0xff]  }
 0xb4e   : > { %v32094_v5 = vrot.slane %v15185_v44, %v31237_v45  ;;  %v15098_v19 = vpop.f32.mrf.mxu1  ;;  %17084 = vmatprep.subr.bf16.mxu1 %v25204_v4  ;;  %v25250_v4 = vld [vmem:[%s33093_s9 + $0x11f8] ss:$20 sps:$4 sm:$0xff]   ;;  %v25253_v9 = vld [vmem:[%s33093_s9 + $0x1200] ss:$20 sps:$4 sm:$0xff]   ;;  %v25261_v46 = vld [vmem:[%s33093_s9 + $0x11dc] ss:$20 sps:$4 sm:$0xff]  }
 0xb4f   : > { %v25258_v44 = vld [vmem:[%s33093_s9 + $0x11d4] ss:$20 sps:$4 sm:$0xff]   ;;  %v25259_v31 = vld [vmem:[%s33093_s9 + $0x11d8] ss:$20 sps:$4 sm:$0xff]  }
 0xb50   : > { %22489 = vmatpush3.bf16.msra.mxu0 %v25205_v20  ;;  %v25256_v20 = vld [vmem:[%s33093_s9 + $0x11d0] ss:$20 sps:$4 sm:$0xff]   ;;  %v25267_v19 = vld [vmem:[%s33093_s9 + $0x11b4] ss:$20 sps:$4 sm:$0xff]  }
 0xb51   : > { %17085 = vmatpush2.bf16.msra.mxu1 %v25202_v56  ;;  %22490 = vmatprep.subr.bf16.mxu0 %v25627_v3  ;;  %v25264_v56 = vld [vmem:[%s33093_s9 + $0x11ac] ss:$20 sps:$4 sm:$0xff]  }
 0xb52   : > { %17086 = vmatprep.subr.bf16.mxu1 %v25208_v35  ;;  %v25262_v35 = vld [vmem:[%s33093_s9 + $0x11a8] ss:$20 sps:$4 sm:$0xff]  }
 0xb54   : > { %22491 = vmatpush3.bf16.msra.mxu0 %v25209_v55  ;;  %v25265_v55 = vld [vmem:[%s33093_s9 + $0x11b0] ss:$20 sps:$4 sm:$0xff]  }
 0xb55   : > { %17087 = vmatpush2.bf16.msra.mxu1 %v25206_v2  ;;  %22492 = vmatprep.subr.bf16.mxu0 %v25627_v3  ;;  %v25270_v2 = vld [vmem:[%s33093_s9 + $0x1184] ss:$20 sps:$4 sm:$0xff]  }
 0xb56   : > { %17088 = vmatprep.subr.bf16.mxu1 %v25212_v37  ;;  %v25273_v37 = vld [vmem:[%s33093_s9 + $0x118c] ss:$20 sps:$4 sm:$0xff]  }
 0xb58   : > { %22493 = vmatpush3.bf16.msra.mxu0 %v25213_v15  ;;  %v25268_v15 = vld [vmem:[%s33093_s9 + $0x1180] ss:$20 sps:$4 sm:$0xff]  }
 0xb59   : > { %17089 = vmatpush2.bf16.msra.mxu1 %v25210_v10  ;;  %22494 = vmatprep.subr.bf16.mxu0 %v25627_v3  ;;  %v25271_v10 = vld [vmem:[%s33093_s9 + $0x1188] ss:$20 sps:$4 sm:$0xff]  }
 0xb5a   : > { %17090 = vmatprep.subr.bf16.mxu1 %v25216_v62  ;;  %v25276_v62 = vld [vmem:[%s33093_s9 + $0x1024] ss:$20 sps:$4 sm:$0xff]  }
 0xb5c   : > { %22495 = vmatpush3.bf16.msra.mxu0 %v25217_v21  ;;  %v25277_v21 = vld [vmem:[%s33093_s9 + $0x1168] ss:$20 sps:$4 sm:$0xff]  }
 0xb5d   : > { %17091 = vmatpush2.bf16.msra.mxu1 %v25214_v30  ;;  %22496 = vmatprep.subr.bf16.mxu0 %v25627_v3  ;;  %v25274_v30 = vld [vmem:[%s33093_s9 + $0x1020] ss:$20 sps:$4 sm:$0xff]  }
 0xb5e   : > { %17092 = vmatprep.subr.bf16.mxu1 %v25220_v36  ;;  %v32261_v36 = vrot.slane %v30623_v0, 2 }
 0xb60   : > { %22497 = vmatpush3.bf16.msra.mxu0 %v25221_v51  ;;  %v25278_v51 = vld [vmem:[%s33093_s9 + $0x1028] ss:$20 sps:$4 sm:$0xff]  }
 0xb61   : > { %17093 = vmatpush2.bf16.msra.mxu1 %v25218_v22  ;;  %22498 = vmatprep.subr.bf16.mxu0 %v25627_v3  ;;  %v25281_v22 = vld [vmem:[%s33093_s9 + $0xffc] ss:$20 sps:$4 sm:$0xff]  }
 0xb62   : > { %17094 = vmatprep.subr.bf16.mxu1 %v25224_v48 }
 0xb64   : > { %22499 = vmatpush3.bf16.msra.mxu0 %v25225_v13  ;;  %v25282_v13 = vld [vmem:[%s33093_s9 + $0x1140] ss:$20 sps:$4 sm:$0xff]  }
 0xb65   : > { %17095 = vmatpush2.bf16.msra.mxu1 %v25222_v27  ;;  %17105 = vmatprep.subr.bf16.mxu0 %v25228_v60  ;;  %v25279_v27 = vld [vmem:[%s33093_s9 + $0xff8] ss:$20 sps:$4 sm:$0xff]  }
 0xb66   : > { %17187 = vmatprep.subr.bf16.mxu1 %v25231_v32  ;;  %v25283_v32 = vld [vmem:[%s33093_s9 + $0x1000] ss:$20 sps:$4 sm:$0xff]  }
 0xb67   : > { %22501 = vmatmul.mubr.bf16.vlgmr.msra.gmra.mxu0 %v31837_v38  ;;  %v25243_v38 = vld [vmem:[%s33093_s9 + $0x1254] ss:$20 sps:$4 sm:$0xff]  }
 0xb68   : > { %v22216_v39 = vpop.f32.mrf.mxu1  ;;  %17097 = vmatmul.mubr.bf16.vlgmr.msra.gmra.mxu1 %v32162_v43  ;;  %17106 = vmatpush1.bf16.msra.mxu0 %v25226_v34  ;;  %v25286_v34 = vld [vmem:[%s33093_s9 + $0xfd4] ss:$20 sps:$4 sm:$0xff]  }
 0xb69   : > { %17188 = vmatpush1.bf16.msra.mxu1 %v25229_v16  ;;  %17107 = vmatprep.subr.bf16.mxu0 %v25234_v8  ;;  %v25287_v16 = vld [vmem:[%s33093_s9 + $0x1118] ss:$20 sps:$4 sm:$0xff]  }
 0xb6a   : > { %v22217_v23 = vpop.f32.mrf.mxu1  ;;  %17189 = vmatprep.subr.bf16.mxu1 %v25237_v14  ;;  %17137 = vmatprep.mubr.bf16.mxu0 %v33155_v7 }
 0xb6b   : > { %v32182_v26 = vadd.f32 %v22217_v23, %v22216_v39  ;;  %17219 = vmatprep.mubr.bf16.mxu1 %v33155_v7  ;;  %v25284_v39 = vld [vmem:[%s33093_s9 + $0xfd0] ss:$20 sps:$4 sm:$0xff]  }
 0xb6c   : > { %v22219_v49 = vpop.f32.mrf.mxu1  ;;  %17108 = vmatpush1.bf16.msra.mxu0 %v25232_v41 }
 0xb6d   : > { %17190 = vmatpush1.bf16.msra.mxu1 %v25235_v52  ;;  %17109 = vmatprep.subr.bf16.mxu0 %v25240_v18  ;;  %v25292_v18 = vld [vmem:[%s33093_s9 + $0x10f0] ss:$20 sps:$4 sm:$0xff]  }
 0xb6e   : > { %v22220_v28 = vpop.f32.mrf.mxu1  ;;  %17191 = vmatprep.subr.bf16.mxu1 %v25243_v38  ;;  %v25289_v38 = vld [vmem:[%s33093_s9 + $0xfa8] ss:$20 sps:$4 sm:$0xff]   ;;  %v25293_v49 = vld [vmem:[%s33093_s9 + $0xfb0] ss:$20 sps:$4 sm:$0xff]  }
 0xb6f   : > { %v25298_v28 = vld [vmem:[%s33093_s9 + $0xf88] ss:$20 sps:$4 sm:$0xff]  }
 0xb70   : > { %17110 = vmatpush1.bf16.msra.mxu0 %v25238_v6  ;;  %v25296_v6 = vld [vmem:[%s33093_s9 + $0xf84] ss:$20 sps:$4 sm:$0xff]  }
 0xb71   : > { %17192 = vmatpush1.bf16.msra.mxu1 %v25241_v57  ;;  %17111 = vmatprep.subr.bf16.mxu0 %v25246_v58  ;;  %v25294_v58 = vld [vmem:[%s33093_s9 + $0xf80] ss:$20 sps:$4 sm:$0xff]  }
 0xb72   : > { %17193 = vmatprep.subr.bf16.mxu1 %v25249_v40  ;;  %v25301_v40 = vld [vmem:[%s33093_s9 + $0xf5c] ss:$20 sps:$4 sm:$0xff]  }
 0xb74   : > { %17112 = vmatpush1.bf16.msra.mxu0 %v25244_v25  ;;  %v25302_v25 = vld [vmem:[%s33093_s9 + $0x10a0] ss:$20 sps:$4 sm:$0xff]  }
 0xb75   : > { %17194 = vmatpush1.bf16.msra.mxu1 %v25247_v53  ;;  %17113 = vmatprep.subr.bf16.mxu0 %v25252_v17  ;;  %v25299_v53 = vld [vmem:[%s33093_s9 + $0xf58] ss:$20 sps:$4 sm:$0xff]   ;;  %v25303_v17 = vld [vmem:[%s33093_s9 + $0xf60] ss:$20 sps:$4 sm:$0xff]  }
 0xb76   : > { %17195 = vmatprep.subr.bf16.mxu1 %v25255_v11  ;;  %v25306_v11 = vld [vmem:[%s33093_s9 + $0xf34] ss:$20 sps:$4 sm:$0xff]  }
 0xb78   : > { %17114 = vmatpush1.bf16.msra.mxu0 %v25250_v4  ;;  %v25307_v4 = vld [vmem:[%s33093_s9 + $0x1078] ss:$20 sps:$4 sm:$0xff]  }
 0xb79   : > { %17196 = vmatpush1.bf16.msra.mxu1 %v25253_v9  ;;  %17115 = vmatprep.subr.bf16.mxu0 %v25258_v44  ;;  %v25304_v9 = vld [vmem:[%s33093_s9 + $0xf30] ss:$20 sps:$4 sm:$0xff]   ;;  %v25308_v44 = vld [vmem:[%s33093_s9 + $0xf38] ss:$20 sps:$4 sm:$0xff]  }
 0xb7a   : > { %17197 = vmatprep.subr.bf16.mxu1 %v25261_v46  ;;  %v25311_v46 = vld [vmem:[%s33093_s9 + $0xf0c] ss:$20 sps:$4 sm:$0xff]  }
 0xb7c   : > { %17116 = vmatpush1.bf16.msra.mxu0 %v25256_v20  ;;  %v25312_v20 = vld [vmem:[%s33093_s9 + $0x1050] ss:$20 sps:$4 sm:$0xff]  }
 0xb7d   : > { %17198 = vmatpush1.bf16.msra.mxu1 %v25259_v31  ;;  %17117 = vmatprep.subr.bf16.mxu0 %v25264_v56  ;;  %v25309_v31 = vld [vmem:[%s33093_s9 + $0xf08] ss:$20 sps:$4 sm:$0xff]   ;;  %v25313_v56 = vld [vmem:[%s33093_s9 + $0xf10] ss:$20 sps:$4 sm:$0xff]  }
 0xb7e   : > { %17199 = vmatprep.subr.bf16.mxu1 %v25267_v19  ;;  %v25316_v19 = vld [vmem:[%s33093_s9 + $0x1164] ss:$20 sps:$4 sm:$0xff]  }
 0xb80   : > { %17118 = vmatpush1.bf16.msra.mxu0 %v25262_v35  ;;  %v25319_v35 = vld [vmem:[%s33093_s9 + $0x13dc] ss:$20 sps:$4 sm:$0xff]  }
 0xb81   : > { %17200 = vmatpush1.bf16.msra.mxu1 %v25265_v55  ;;  %17119 = vmatprep.subr.bf16.mxu0 %v25270_v2  ;;  %v25314_v55 = vld [vmem:[%s33093_s9 + $0x1160] ss:$20 sps:$4 sm:$0xff]   ;;  %v25317_v2 = vld [vmem:[%s33093_s9 + $0x13d8] ss:$20 sps:$4 sm:$0xff]  }
 0xb82   : > { %17201 = vmatprep.subr.bf16.mxu1 %v25273_v37  ;;  %v25322_v37 = vld [vmem:[%s33093_s9 + $0x113c] ss:$20 sps:$4 sm:$0xff]  }
 0xb84   : > { %17120 = vmatpush1.bf16.msra.mxu0 %v25268_v15  ;;  %v25325_v15 = vld [vmem:[%s33093_s9 + $0x13b4] ss:$20 sps:$4 sm:$0xff]  }
 0xb85   : > { %17202 = vmatpush1.bf16.msra.mxu1 %v25271_v10  ;;  %17146 = vmatprep.subr.bf16.mxu0 %v25276_v62  ;;  %v32380_v62 = vrot.slane %v30733_v47, 2  ;;  %v25323_v47 = vld [vmem:[%s33093_s9 + $0x13b0] ss:$20 sps:$4 sm:$0xff]  }
 0xb86   : > { %22262 = vmatprep.subr.bf16.mxu1 %v25277_v21 }
 0xb87   : > { %v15052_v48 = vpop.f32.mrf.mxu0  ;;  %17138 = vmatmul.mubr.bf16.vlgmr.msra.gmra.mxu0 %v32261_v36 }
 0xb88   : > { %v15094_v0 = vadd.f32 %v32069_v24, %v15052_v48  ;;  %17220 = vmatmul.mubr.bf16.vlgmr.msra.gmra.mxu1 %v32261_v36  ;;  %17147 = vmatpush1.bf16.msra.mxu0 %v25274_v30 }
 0xb89   : > { %17178 = vmatprep.mubr.bf16.mxu0 %v31956_v1  ;;  %22263 = vmatpush3.bf16.msra.mxu1 %v25278_v51  ;;  %v15054_v60 = vpop.f32.mrf.mxu0  ;;  %v25320_v51 = vld [vmem:[%s33093_s9 + $0x1138] ss:$20 sps:$4 sm:$0xff]  }
 0xb8a   : > { %17260 = vmatprep.mubr.bf16.mxu1 %v31956_v1  ;;  %v15096_v24 = vadd.f32 %v32081_v63, %v15054_v60  ;;  %17148 = vmatprep.subr.bf16.mxu0 %v25281_v22  ;;  %v25288_v1 = vld [vmem:[%s33093_s9 + $0xfd8] ss:$20 sps:$4 sm:$0xff]  }
 0xb8b   : > { %v15056_v8 = vpop.f32.mrf.mxu0  ;;  %22264 = vmatprep.subr.bf16.mxu1 %v25282_v13  ;;  %v25291_v63 = vld [vmem:[%s33093_s9 + $0xfac] ss:$20 sps:$4 sm:$0xff]  }
 0xb8c   : > { %v15186_v14 = vcombine.low %v15094_v0, %v15096_v24  ;;  %17149 = vmatpush1.bf16.msra.mxu0 %v25279_v27  ;;  %v25331_v0 = vld [vmem:[%s33093_s9 + $0x138c] ss:$20 sps:$4 sm:$0xff]  }
 0xb8d   : > { %22265 = vmatpush3.bf16.msra.mxu1 %v25283_v32  ;;  %v15057_v41 = vpop.f32.mrf.mxu0  ;;  %17150 = vmatprep.subr.bf16.mxu0 %v25286_v34  ;;  %v25326_v34 = vld [vmem:[%s33093_s9 + $0x1110] ss:$20 sps:$4 sm:$0xff]   ;;  %v25334_v8 = vld [vmem:[%s33093_s9 + $0x10ec] ss:$20 sps:$4 sm:$0xff]  }
 0xb8e   : > { %v15200_v52 = vrot.slane %v15186_v14, %v31237_v45  ;;  %22266 = vmatprep.subr.bf16.mxu1 %v25287_v16  ;;  %v25329_v16 = vld [vmem:[%s33093_s9 + $0x1388] ss:$20 sps:$4 sm:$0xff]   ;;  %v25337_v41 = vld [vmem:[%s33093_s9 + $0x1364] ss:$20 sps:$4 sm:$0xff]  }
 0xb90   : > { %v15208_v23 = vcombine.low %v32094_v5, %v15200_v52  ;;  %17151 = vmatpush1.bf16.msra.mxu0 %v25284_v39  ;;  %v25297_v5 = vld [vmem:[%s33093_s9 + $0x10c8] ss:$20 sps:$4 sm:$0xff]   ;;  %v25335_v52 = vld [vmem:[%s33093_s9 + $0x1360] ss:$20 sps:$4 sm:$0xff]  }
 0xb91   : > { %22267 = vmatpush3.bf16.msra.mxu1 %v25288_v1  ;;  %17152 = vmatprep.subr.bf16.mxu0 %v25291_v63  ;;  %v25332_v63 = vld [vmem:[%s33093_s9 + $0x10e8] ss:$20 sps:$4 sm:$0xff]  }
 0xb92   : > { %22268 = vmatprep.subr.bf16.mxu1 %v25292_v18  ;;  %v32317_v57 = vrot.slane %v15208_v23, %v31237_v45  ;;  %v25340_v18 = vld [vmem:[%s33093_s9 + $0x10c4] ss:$20 sps:$4 sm:$0xff]   ;;  %v25338_v23 = vld [vmem:[%s33093_s9 + $0x10c0] ss:$20 sps:$4 sm:$0xff]  }
 0xb94   : > { %17153 = vmatpush1.bf16.msra.mxu0 %v25289_v38  ;;  %v25341_v38 = vld [vmem:[%s33093_s9 + $0x1338] ss:$20 sps:$4 sm:$0xff]  }
 0xb95   : > { %22269 = vmatpush3.bf16.msra.mxu1 %v25293_v49  ;;  %17154 = vmatprep.subr.bf16.mxu0 %v25296_v6  ;;  %v25346_v49 = vld [vmem:[%s33093_s9 + $0x109c] ss:$20 sps:$4 sm:$0xff]   ;;  %v25349_v6 = vld [vmem:[%s33093_s9 + $0x1314] ss:$20 sps:$4 sm:$0xff]  }
 0xb96   : > { %22270 = vmatprep.subr.bf16.mxu1 %v25297_v5  ;;  %v25344_v5 = vld [vmem:[%s33093_s9 + $0x1098] ss:$20 sps:$4 sm:$0xff]  }
 0xb98   : > { %17155 = vmatpush1.bf16.msra.mxu0 %v25294_v58  ;;  %v25352_v58 = vld [vmem:[%s33093_s9 + $0x1074] ss:$20 sps:$4 sm:$0xff]  }
 0xb99   : > { %22271 = vmatpush3.bf16.msra.mxu1 %v25298_v28  ;;  %17156 = vmatprep.subr.bf16.mxu0 %v25301_v40  ;;  %v25355_v28 = vld [vmem:[%s33093_s9 + $0x12ec] ss:$20 sps:$4 sm:$0xff]   ;;  %v25350_v40 = vld [vmem:[%s33093_s9 + $0x1070] ss:$20 sps:$4 sm:$0xff]  }
 0xb9a   : > { %22272 = vmatprep.subr.bf16.mxu1 %v25302_v25  ;;  %v25353_v25 = vld [vmem:[%s33093_s9 + $0x12e8] ss:$20 sps:$4 sm:$0xff]  }
 0xb9c   : > { %17157 = vmatpush1.bf16.msra.mxu0 %v25299_v53  ;;  %v25358_v53 = vld [vmem:[%s33093_s9 + $0x104c] ss:$20 sps:$4 sm:$0xff]  }
 0xb9d   : > { %22273 = vmatpush3.bf16.msra.mxu1 %v25303_v17  ;;  %17158 = vmatprep.subr.bf16.mxu0 %v25306_v11  ;;  %v25361_v17 = vld [vmem:[%s33093_s9 + $0x12c4] ss:$20 sps:$4 sm:$0xff]   ;;  %v25356_v11 = vld [vmem:[%s33093_s9 + $0x1048] ss:$20 sps:$4 sm:$0xff]  }
 0xb9e   : > { %22274 = vmatprep.subr.bf16.mxu1 %v25307_v4  ;;  %v25359_v4 = vld [vmem:[%s33093_s9 + $0x12c0] ss:$20 sps:$4 sm:$0xff]  }
 0xba0   : > { %17159 = vmatpush1.bf16.msra.mxu0 %v25304_v9  ;;  %v25364_v9 = vld [vmem:[%s33093_s9 + $0x151c] ss:$20 sps:$4 sm:$0xff]  }
 0xba1   : > { %22275 = vmatpush3.bf16.msra.mxu1 %v25308_v44  ;;  %17160 = vmatprep.subr.bf16.mxu0 %v25311_v46  ;;  %v25365_v44 = vld [vmem:[%s33093_s9 + $0x12a8] ss:$20 sps:$4 sm:$0xff]   ;;  %v25362_v46 = vld [vmem:[%s33093_s9 + $0x1518] ss:$20 sps:$4 sm:$0xff]  }
 0xba2   : > { %22276 = vmatprep.subr.bf16.mxu1 %v25312_v20  ;;  %v25368_v20 = vld [vmem:[%s33093_s9 + $0x14f4] ss:$20 sps:$4 sm:$0xff]  }
 0xba4   : > { %17161 = vmatpush1.bf16.msra.mxu0 %v25309_v31 }
 0xba5   : > { %22277 = vmatpush3.bf16.msra.mxu1 %v25313_v56  ;;  %17162 = vmatprep.subr.bf16.mxu0 %v25316_v19 }
 0xba6   : > { %18128 = vmatprep.subr.bf16.mxu1 %v25319_v35  ;;  %v25369_v35 = vld [vmem:[%s33093_s9 + $0x1280] ss:$20 sps:$4 sm:$0xff]  }
 0xba7   : > { %v15174_v10 = vpop.f32.mrf.mxu0 }
 0xba8   : > { %v15175_v21 = vadd.f32 %v32182_v26, %v15174_v10  ;;  %v32383_v30 = vpop.f32.mrf.mxu1  ;;  %17261 = vmatmul.mubr.bf16.vlgmr.msra.gmra.mxu1 %v32162_v43  ;;  %17163 = vmatpush2.bf16.msra.mxu0 %v25314_v55  ;;  %v25328_v26 = vld [vmem:[%s33093_s9 + $0x1114] ss:$20 sps:$4 sm:$0xff]  }
 0xba9   : > { %18129 = vmatpush1.bf16.msra.mxu1 %v25317_v2  ;;  %18160 = vmatprep.mubr.bf16.mxu1 %v32380_v62  ;;  %v22482_v22 = vpop.f32.mrf.mxu0 }
 0xbaa   : > { %v15207_v48 = vrot.slane %v15175_v21, %v31237_v45  ;;  %v32397_v13 = vpop.f32.mrf.mxu1  ;;  %17164 = vmatprep.subr.bf16.mxu0 %v25322_v37  ;;  %18130 = vmatprep.subr.bf16.mxu1 %v25325_v15  ;;  %v25372_v15 = vld [vmem:[%s33093_s9 + $0x14cc] ss:$20 sps:$4 sm:$0xff]  }
 0xbab   : > { %v15177_v27 = vpop.f32.mrf.mxu0 }
 0xbac   : > { %v15222_v60 = vrot.slane %v15207_v48, %v31237_v45  ;;  %v16038_v32 = vpop.f32.mrf.mxu1  ;;  %17165 = vmatpush2.bf16.msra.mxu0 %v25320_v51  ;;  %v25373_v51 = vld [vmem:[%s33093_s9 + $0x1258] ss:$20 sps:$4 sm:$0xff]   ;;  %v25374_v27 = vld [vmem:[%s33093_s9 + $0x14a0] ss:$20 sps:$4 sm:$0xff]  }
 0xbad   : > { %18131 = vmatpush1.bf16.msra.mxu1 %v25323_v47  ;;  %v22483_v24 = vpop.f32.mrf.mxu0  ;;  %17166 = vmatprep.subr.bf16.mxu0 %v25328_v26  ;;  %v25370_v47 = vld [vmem:[%s33093_s9 + $0x14c8] ss:$20 sps:$4 sm:$0xff]  }
 0xbae   : > { %v15223_v14 = vcombine.low %v32317_v57, %v15222_v60  ;;  %v16039_v39 = vpop.f32.mrf.mxu1  ;;  %18132 = vmatprep.subr.bf16.mxu1 %v25331_v0  ;;  %v25347_v57 = vld [vmem:[%s33093_s9 + $0x1310] ss:$20 sps:$4 sm:$0xff]   ;;  %v25381_v32 = vld [vmem:[%s33093_s9 + $0x1208] ss:$20 sps:$4 sm:$0xff]  }
 0xbaf   : > { %v25377_v0 = vld [vmem:[%s33093_s9 + $0x1230] ss:$20 sps:$4 sm:$0xff]   ;;  %v25384_v24 = vld [vmem:[%s33093_s9 + $0x1454] ss:$20 sps:$4 sm:$0xff]   ;;  %v25389_v39 = vld [vmem:[%s33093_s9 + $0x11b8] ss:$20 sps:$4 sm:$0xff]  }
 0xbb0   : > { %v32417_v1 = vadd.f32 %v15223_v14, %v31998_v59  ;;  %17167 = vmatpush2.bf16.msra.mxu0 %v25326_v34  ;;  %v25343_v59 = vld [vmem:[%s33093_s9 + $0x133c] ss:$20 sps:$4 sm:$0xff]   ;;  %v25378_v34 = vld [vmem:[%s33093_s9 + $0x1478] ss:$20 sps:$4 sm:$0xff]  }
 0xbb1   : > { %18133 = vmatpush1.bf16.msra.mxu1 %v25329_v16  ;;  %17168 = vmatprep.subr.bf16.mxu0 %v25334_v8  ;;  %v25380_v60 = vld [vmem:[%s33093_s9 + $0x147c] ss:$20 sps:$4 sm:$0xff]   ;;  %v25385_v16 = vld [vmem:[%s33093_s9 + $0x11e0] ss:$20 sps:$4 sm:$0xff]  }
 0xbb2   : > { %18134 = vmatprep.subr.bf16.mxu1 %v25337_v41  ;;  %v25382_v8 = vld [vmem:[%s33093_s9 + $0x1450] ss:$20 sps:$4 sm:$0xff]   ;;  %v25388_v14 = vld [vmem:[%s33093_s9 + $0x142c] ss:$20 sps:$4 sm:$0xff]   ;;  %v25386_v41 = vld [vmem:[%s33093_s9 + $0x1428] ss:$20 sps:$4 sm:$0xff]  }
 0xbb4   : > { %17169 = vmatpush2.bf16.msra.mxu0 %v25332_v63  ;;  %v25392_v63 = vld [vmem:[%s33093_s9 + $0x1404] ss:$20 sps:$4 sm:$0xff]  }
 0xbb5   : > { %18135 = vmatpush1.bf16.msra.mxu1 %v25335_v52  ;;  %17170 = vmatprep.subr.bf16.mxu0 %v25340_v18  ;;  %v25393_v52 = vld [vmem:[%s33093_s9 + $0x1190] ss:$20 sps:$4 sm:$0xff]   ;;  %v25390_v18 = vld [vmem:[%s33093_s9 + $0x1400] ss:$20 sps:$4 sm:$0xff]  }
 0xbb6   : > { %18136 = vmatprep.subr.bf16.mxu1 %v25343_v59  ;;  %v25396_v59 = vld [vmem:[%s33093_s9 + $0x165c] ss:$20 sps:$4 sm:$0xff]  }
 0xbb8   : > { %17171 = vmatpush2.bf16.msra.mxu0 %v25338_v23  ;;  %v25399_v23 = vld [vmem:[%s33093_s9 + $0x1664] ss:$20 sps:$4 sm:$0xff]  }
 0xbb9   : > { %18137 = vmatpush1.bf16.msra.mxu1 %v25341_v38  ;;  %17172 = vmatprep.subr.bf16.mxu0 %v25346_v49  ;;  %v25394_v38 = vld [vmem:[%s33093_s9 + $0x1658] ss:$20 sps:$4 sm:$0xff]   ;;  %v25397_v49 = vld [vmem:[%s33093_s9 + $0x1660] ss:$20 sps:$4 sm:$0xff]  }
 0xbba   : > { %18138 = vmatprep.subr.bf16.mxu1 %v25349_v6  ;;  %v25402_v6 = vld [vmem:[%s33093_s9 + $0x1634] ss:$20 sps:$4 sm:$0xff]  }
 0xbbc   : > { %17173 = vmatpush2.bf16.msra.mxu0 %v25344_v5  ;;  %v32581_v5 = vrot.slane %v30910_v54, 2  ;;  %v25403_v54 = vld [vmem:[%s33093_s9 + $0x1638] ss:$20 sps:$4 sm:$0xff]  }
 0xbbd   : > { %18139 = vmatpush1.bf16.msra.mxu1 %v25347_v57  ;;  %17174 = vmatprep.subr.bf16.mxu0 %v25352_v58  ;;  %v25405_v57 = vld [vmem:[%s33093_s9 + $0x163c] ss:$20 sps:$4 sm:$0xff]  }
 0xbbe   : > { %18140 = vmatprep.subr.bf16.mxu1 %v25355_v28  ;;  %v25400_v28 = vld [vmem:[%s33093_s9 + $0x1630] ss:$20 sps:$4 sm:$0xff]  }
 0xbc0   : > { %17175 = vmatpush2.bf16.msra.mxu0 %v25350_v40  ;;  %v25408_v40 = vld [vmem:[%s33093_s9 + $0x160c] ss:$20 sps:$4 sm:$0xff]  }
 0xbc1   : > { %18141 = vmatpush1.bf16.msra.mxu1 %v25353_v25  ;;  %17176 = vmatprep.subr.bf16.mxu0 %v25358_v53 }
 0xbc2   : > { %18142 = vmatprep.subr.bf16.mxu1 %v25361_v17 }
 0xbc4   : > { %17177 = vmatpush2.bf16.msra.mxu0 %v25356_v11  ;;  %v25406_v11 = vld [vmem:[%s33093_s9 + $0x1608] ss:$20 sps:$4 sm:$0xff]  }
 0xbc5   : > { %18143 = vmatpush1.bf16.msra.mxu1 %v25359_v4  ;;  %22504 = vmatprep.subr.bf16.mxu0 %v25627_v3  ;;  %v25409_v4 = vld [vmem:[%s33093_s9 + $0x1610] ss:$20 sps:$4 sm:$0xff]  }
 0xbc6   : > { %18144 = vmatprep.subr.bf16.mxu1 %v25364_v9  ;;  %v25414_v9 = vld [vmem:[%s33093_s9 + $0x15e4] ss:$20 sps:$4 sm:$0xff]  }
 0xbc7   : > { %v16075_v31 = vpop.f32.mrf.mxu0  ;;  %17179 = vmatmul.mubr.bf16.vlgmr.msra.gmra.mxu0 %v32162_v43  ;;  %v25366_v43 = vld [vmem:[%s33093_s9 + $0x14f0] ss:$20 sps:$4 sm:$0xff]  }
 0xbc8   : > { %v16076_v56 = vadd.f32 %v16075_v31, %v32383_v30  ;;  %v32488_v19 = vpop.f32.mrf.mxu1  ;;  %22505 = vmatpush3.bf16.msra.mxu0 %v25365_v44  ;;  %22520 = vmatprep.mubr.msk.bf16.mxu0 %vm25628_vm5, %v25627_v3  ;;  %v25420_v31 = vld [vmem:[%s33093_s9 + $0x15bc] ss:$20 sps:$4 sm:$0xff]  }
 0xbc9   : > { %18145 = vmatpush2.bf16.msra.mxu1 %v25362_v46  ;;  %v16077_v55 = vpop.f32.mrf.mxu0  ;;  %22506 = vmatprep.subr.bf16.mxu0 %v25627_v3  ;;  %v25412_v46 = vld [vmem:[%s33093_s9 + $0x15e0] ss:$20 sps:$4 sm:$0xff]  }
 0xbca   : > { %v16078_v2 = vadd.f32 %v16077_v55, %v32397_v13  ;;  %v32500_v37 = vpop.f32.mrf.mxu1  ;;  %18146 = vmatprep.subr.bf16.mxu1 %v25368_v20  ;;  %v25376_v13 = vld [vmem:[%s33093_s9 + $0x14a4] ss:$20 sps:$4 sm:$0xff]   ;;  %v25415_v20 = vld [vmem:[%s33093_s9 + $0x15e8] ss:$20 sps:$4 sm:$0xff]   ;;  %v25421_v55 = vld [vmem:[%s33093_s9 + $0x15c0] ss:$20 sps:$4 sm:$0xff]  }
 0xbcb   : > { %v16079_v10 = vpop.f32.mrf.mxu0 }
 0xbcc   : > { %v16249_v21 = vcombine.low %v16076_v56, %v16078_v2  ;;  %v16161_v30 = vpop.f32.mrf.mxu1  ;;  %22507 = vmatpush3.bf16.msra.mxu0 %v25369_v35  ;;  %v25423_v56 = vld [vmem:[%s33093_s9 + $0x15c4] ss:$20 sps:$4 sm:$0xff]   ;;  %v25429_v2 = vld [vmem:[%s33093_s9 + $0x159c] ss:$20 sps:$4 sm:$0xff]  }
 0xbcd   : > { %18147 = vmatpush2.bf16.msra.mxu1 %v25366_v43  ;;  %v16080_v22 = vpop.f32.mrf.mxu0  ;;  %22508 = vmatprep.subr.bf16.mxu0 %v25627_v3  ;;  %v25418_v35 = vld [vmem:[%s33093_s9 + $0x15b8] ss:$20 sps:$4 sm:$0xff]   ;;  %v25426_v43 = vld [vmem:[%s33093_s9 + $0x1594] ss:$20 sps:$4 sm:$0xff]  }
 0xbce   : > { %v32513_v26 = vrot.slane %v16249_v21, %v31237_v45  ;;  %v16162_v48 = vpop.f32.mrf.mxu1  ;;  %18148 = vmatprep.subr.bf16.mxu1 %v25372_v15  ;;  %v25424_v15 = vld [vmem:[%s33093_s9 + $0x1590] ss:$20 sps:$4 sm:$0xff]   ;;  %v25427_v10 = vld [vmem:[%s33093_s9 + $0x1598] ss:$20 sps:$4 sm:$0xff]   ;;  %v25435_v30 = vld [vmem:[%s33093_s9 + $0x1574] ss:$20 sps:$4 sm:$0xff]  }
 0xbcf   : > { %v25432_v21 = vld [vmem:[%s33093_s9 + $0x156c] ss:$20 sps:$4 sm:$0xff]   ;;  %v25433_v22 = vld [vmem:[%s33093_s9 + $0x1570] ss:$20 sps:$4 sm:$0xff]  }
 0xbd0   : > { %22509 = vmatpush3.bf16.msra.mxu0 %v25373_v51  ;;  %v25430_v51 = vld [vmem:[%s33093_s9 + $0x1568] ss:$20 sps:$4 sm:$0xff]   ;;  %v25441_v48 = vld [vmem:[%s33093_s9 + $0x154c] ss:$20 sps:$4 sm:$0xff]  }
 0xbd1   : > { %18149 = vmatpush2.bf16.msra.mxu1 %v25370_v47  ;;  %22510 = vmatprep.subr.bf16.mxu0 %v25627_v3  ;;  %v25438_v47 = vld [vmem:[%s33093_s9 + $0x1544] ss:$20 sps:$4 sm:$0xff]  }
 0xbd2   : > { %18150 = vmatprep.subr.bf16.mxu1 %v25376_v13  ;;  %v25436_v13 = vld [vmem:[%s33093_s9 + $0x1540] ss:$20 sps:$4 sm:$0xff]  }
 0xbd4   : > { %22511 = vmatpush3.bf16.msra.mxu0 %v25377_v0  ;;  %v25439_v0 = vld [vmem:[%s33093_s9 + $0x1548] ss:$20 sps:$4 sm:$0xff]  }
 0xbd5   : > { %18151 = vmatpush2.bf16.msra.mxu1 %v25374_v27  ;;  %22512 = vmatprep.subr.bf16.mxu0 %v25627_v3  ;;  %v25444_v27 = vld [vmem:[%s33093_s9 + $0x13e4] ss:$20 sps:$4 sm:$0xff]  }
 0xbd6   : > { %18152 = vmatprep.subr.bf16.mxu1 %v25380_v60  ;;  %v25445_v60 = vld [vmem:[%s33093_s9 + $0x1528] ss:$20 sps:$4 sm:$0xff]  }
 0xbd8   : > { %22513 = vmatpush3.bf16.msra.mxu0 %v25381_v32  ;;  %v25442_v32 = vld [vmem:[%s33093_s9 + $0x13e0] ss:$20 sps:$4 sm:$0xff]  }
 0xbd9   : > { %18153 = vmatpush2.bf16.msra.mxu1 %v25378_v34  ;;  %22514 = vmatprep.subr.bf16.mxu0 %v25627_v3  ;;  %v32680_v34 = vrot.slane %v31010_v29, 2 }
 0xbda   : > { %18154 = vmatprep.subr.bf16.mxu1 %v25384_v24  ;;  %v25446_v24 = vld [vmem:[%s33093_s9 + $0x13e8] ss:$20 sps:$4 sm:$0xff]  }
 0xbdc   : > { %22515 = vmatpush3.bf16.msra.mxu0 %v25385_v16  ;;  %v25449_v16 = vld [vmem:[%s33093_s9 + $0x13bc] ss:$20 sps:$4 sm:$0xff]  }
 0xbdd   : > { %18155 = vmatpush2.bf16.msra.mxu1 %v25382_v8  ;;  %22516 = vmatprep.subr.bf16.mxu0 %v25627_v3 }
 0xbde   : > { %18156 = vmatprep.subr.bf16.mxu1 %v25388_v14  ;;  %v25450_v14 = vld [vmem:[%s33093_s9 + $0x1500] ss:$20 sps:$4 sm:$0xff]  }
 0xbe0   : > { %22517 = vmatpush3.bf16.msra.mxu0 %v25389_v39  ;;  %v25447_v39 = vld [vmem:[%s33093_s9 + $0x13b8] ss:$20 sps:$4 sm:$0xff]  }
 0xbe1   : > { %18157 = vmatpush2.bf16.msra.mxu1 %v25386_v41  ;;  %22518 = vmatprep.subr.bf16.mxu0 %v25627_v3 }
 0xbe2   : > { %18158 = vmatprep.subr.bf16.mxu1 %v25392_v63  ;;  %v25451_v63 = vld [vmem:[%s33093_s9 + $0x13c0] ss:$20 sps:$4 sm:$0xff]  }
 0xbe4   : > { %22519 = vmatpush3.bf16.msra.mxu0 %v25393_v52  ;;  %v25454_v52 = vld [vmem:[%s33093_s9 + $0x1394] ss:$20 sps:$4 sm:$0xff]  }
 0xbe5   : > { %18159 = vmatpush2.bf16.msra.mxu1 %v25390_v18  ;;  %18169 = vmatprep.subr.bf16.mxu0 %v25396_v59  ;;  %v25455_v18 = vld [vmem:[%s33093_s9 + $0x14d8] ss:$20 sps:$4 sm:$0xff]  }
 0xbe6   : > { %18251 = vmatprep.subr.bf16.mxu1 %v25399_v23 }
 0xbe7   : > { %22521 = vmatmul.mubr.bf16.vlgmr.msra.gmra.mxu0 %v32261_v36  ;;  %v25411_v36 = vld [vmem:[%s33093_s9 + $0x1614] ss:$20 sps:$4 sm:$0xff]  }
 0xbe8   : > { %v22247_v58 = vpop.f32.mrf.mxu1  ;;  %18161 = vmatmul.mubr.bf16.vlgmr.msra.gmra.mxu1 %v32581_v5  ;;  %18170 = vmatpush1.bf16.msra.mxu0 %v25394_v38  ;;  %v25452_v38 = vld [vmem:[%s33093_s9 + $0x1390] ss:$20 sps:$4 sm:$0xff]  }
 0xbe9   : > { %18252 = vmatpush1.bf16.msra.mxu1 %v25397_v49  ;;  %18171 = vmatprep.subr.bf16.mxu0 %v25402_v6 }
 0xbea   : > { %v22248_v25 = vpop.f32.mrf.mxu1  ;;  %18253 = vmatprep.subr.bf16.mxu1 %v25405_v57  ;;  %18201 = vmatprep.mubr.bf16.mxu0 %v33155_v7  ;;  %v25460_v57 = vld [vmem:[%s33093_s9 + $0x14b0] ss:$20 sps:$4 sm:$0xff]  }
 0xbeb   : > { %v32601_v53 = vadd.f32 %v22248_v25, %v22247_v58  ;;  %18283 = vmatprep.mubr.bf16.mxu1 %v33155_v7  ;;  %v25417_v7 = vld [vmem:[%s33093_s9 + $0x15ec] ss:$20 sps:$4 sm:$0xff]  }
 0xbec   : > { %v22250_v17 = vpop.f32.mrf.mxu1  ;;  %18172 = vmatpush1.bf16.msra.mxu0 %v25400_v28  ;;  %v25457_v28 = vld [vmem:[%s33093_s9 + $0x1368] ss:$20 sps:$4 sm:$0xff]  }
 0xbed   : > { %18254 = vmatpush1.bf16.msra.mxu1 %v25403_v54  ;;  %18173 = vmatprep.subr.bf16.mxu0 %v25408_v40  ;;  %v25461_v54 = vld [vmem:[%s33093_s9 + $0x1370] ss:$20 sps:$4 sm:$0xff]   ;;  %v25466_v17 = vld [vmem:[%s33093_s9 + $0x1348] ss:$20 sps:$4 sm:$0xff]  }
 0xbee   : > { %v22251_v44 = vpop.f32.mrf.mxu1  ;;  %18255 = vmatprep.subr.bf16.mxu1 %v25411_v36  ;;  %v25464_v40 = vld [vmem:[%s33093_s9 + $0x1344] ss:$20 sps:$4 sm:$0xff]   ;;  %v25462_v36 = vld [vmem:[%s33093_s9 + $0x1340] ss:$20 sps:$4 sm:$0xff]  }
 0xbef   : > { %v25471_v44 = vld [vmem:[%s33093_s9 + $0x1320] ss:$20 sps:$4 sm:$0xff]  }
 0xbf0   : > { %18174 = vmatpush1.bf16.msra.mxu0 %v25406_v11  ;;  %v25469_v11 = vld [vmem:[%s33093_s9 + $0x131c] ss:$20 sps:$4 sm:$0xff]  }
 0xbf1   : > { %18256 = vmatpush1.bf16.msra.mxu1 %v25409_v4  ;;  %18175 = vmatprep.subr.bf16.mxu0 %v25414_v9  ;;  %v25470_v4 = vld [vmem:[%s33093_s9 + $0x1460] ss:$20 sps:$4 sm:$0xff]   ;;  %v25467_v9 = vld [vmem:[%s33093_s9 + $0x1318] ss:$20 sps:$4 sm:$0xff]  }
 0xbf2   : > { %18257 = vmatprep.subr.bf16.mxu1 %v25417_v7  ;;  %v25474_v7 = vld [vmem:[%s33093_s9 + $0x12f4] ss:$20 sps:$4 sm:$0xff]  }
 0xbf4   : > { %18176 = vmatpush1.bf16.msra.mxu0 %v25412_v46  ;;  %v25475_v46 = vld [vmem:[%s33093_s9 + $0x1438] ss:$20 sps:$4 sm:$0xff]  }
 0xbf5   : > { %18258 = vmatpush1.bf16.msra.mxu1 %v25415_v20  ;;  %18177 = vmatprep.subr.bf16.mxu0 %v25420_v31  ;;  %v25472_v20 = vld [vmem:[%s33093_s9 + $0x12f0] ss:$20 sps:$4 sm:$0xff]   ;;  %v25476_v31 = vld [vmem:[%s33093_s9 + $0x12f8] ss:$20 sps:$4 sm:$0xff]  }
 0xbf6   : > { %18259 = vmatprep.subr.bf16.mxu1 %v25423_v56  ;;  %v25479_v56 = vld [vmem:[%s33093_s9 + $0x12cc] ss:$20 sps:$4 sm:$0xff]  }
 0xbf8   : > { %18178 = vmatpush1.bf16.msra.mxu0 %v25418_v35  ;;  %v25480_v35 = vld [vmem:[%s33093_s9 + $0x1410] ss:$20 sps:$4 sm:$0xff]  }
 0xbf9   : > { %18260 = vmatpush1.bf16.msra.mxu1 %v25421_v55  ;;  %18179 = vmatprep.subr.bf16.mxu0 %v25426_v43  ;;  %v25477_v55 = vld [vmem:[%s33093_s9 + $0x12c8] ss:$20 sps:$4 sm:$0xff]   ;;  %v25481_v43 = vld [vmem:[%s33093_s9 + $0x12d0] ss:$20 sps:$4 sm:$0xff]  }
 0xbfa   : > { %18261 = vmatprep.subr.bf16.mxu1 %v25429_v2  ;;  %v25484_v2 = vld [vmem:[%s33093_s9 + $0x1524] ss:$20 sps:$4 sm:$0xff]  }
 0xbfc   : > { %18180 = vmatpush1.bf16.msra.mxu0 %v25424_v15  ;;  %v25482_v15 = vld [vmem:[%s33093_s9 + $0x1520] ss:$20 sps:$4 sm:$0xff]  }
 0xbfd   : > { %18262 = vmatpush1.bf16.msra.mxu1 %v25427_v10  ;;  %18181 = vmatprep.subr.bf16.mxu0 %v25432_v21  ;;  %v25487_v10 = vld [vmem:[%s33093_s9 + $0x14fc] ss:$20 sps:$4 sm:$0xff]  }
 0xbfe   : > { %18263 = vmatprep.subr.bf16.mxu1 %v25435_v30 }
 0xc00   : > { %18182 = vmatpush1.bf16.msra.mxu0 %v25430_v51 }
 0xc01   : > { %18264 = vmatpush1.bf16.msra.mxu1 %v25433_v22  ;;  %18183 = vmatprep.subr.bf16.mxu0 %v25438_v47  ;;  %v25485_v22 = vld [vmem:[%s33093_s9 + $0x14f8] ss:$20 sps:$4 sm:$0xff]  }
 0xc02   : > { %18265 = vmatprep.subr.bf16.mxu1 %v25441_v48  ;;  %v25490_v48 = vld [vmem:[%s33093_s9 + $0x14d4] ss:$20 sps:$4 sm:$0xff]  }
 0xc04   : > { %18184 = vmatpush1.bf16.msra.mxu0 %v25436_v13 }
 0xc05   : > { %18266 = vmatpush1.bf16.msra.mxu1 %v25439_v0  ;;  %18210 = vmatprep.subr.bf16.mxu0 %v25444_v27 }
 0xc06   : > { %22293 = vmatprep.subr.bf16.mxu1 %v25445_v60 }
 0xc07   : > { %v16116_v8 = vpop.f32.mrf.mxu0  ;;  %18202 = vmatmul.mubr.bf16.vlgmr.msra.gmra.mxu0 %v32680_v34 }
 0xc08   : > { %v16158_v29 = vadd.f32 %v32488_v19, %v16116_v8  ;;  %18284 = vmatmul.mubr.bf16.vlgmr.msra.gmra.mxu1 %v32680_v34  ;;  %18211 = vmatpush1.bf16.msra.mxu0 %v25442_v32  ;;  %v25488_v32 = vld [vmem:[%s33093_s9 + $0x14d0] ss:$20 sps:$4 sm:$0xff]  }
 0xc09   : > { %18242 = vmatprep.mubr.bf16.mxu0 %v32380_v62  ;;  %22294 = vmatpush3.bf16.msra.mxu1 %v25446_v24  ;;  %v16118_v41 = vpop.f32.mrf.mxu0 }
 0xc0a   : > { %18324 = vmatprep.mubr.bf16.mxu1 %v32380_v62  ;;  %v16160_v19 = vadd.f32 %v32500_v37, %v16118_v41  ;;  %18212 = vmatprep.subr.bf16.mxu0 %v25449_v16  ;;  %v25456_v62 = vld [vmem:[%s33093_s9 + $0x1398] ss:$20 sps:$4 sm:$0xff]  }
 0xc0b   : > { %v16120_v59 = vpop.f32.mrf.mxu0  ;;  %22295 = vmatprep.subr.bf16.mxu1 %v25450_v14  ;;  %v25459_v37 = vld [vmem:[%s33093_s9 + $0x136c] ss:$20 sps:$4 sm:$0xff]   ;;  %v25496_v41 = vld [vmem:[%s33093_s9 + $0x1484] ss:$20 sps:$4 sm:$0xff]  }
 0xc0c   : > { %v16250_v23 = vcombine.low %v16158_v29, %v16160_v19  ;;  %18213 = vmatpush1.bf16.msra.mxu0 %v25447_v39  ;;  %v25493_v16 = vld [vmem:[%s33093_s9 + $0x14ac] ss:$20 sps:$4 sm:$0xff]   ;;  %v25491_v39 = vld [vmem:[%s33093_s9 + $0x14a8] ss:$20 sps:$4 sm:$0xff]  }
 0xc0d   : > { %22296 = vmatpush3.bf16.msra.mxu1 %v25451_v63  ;;  %v16121_v49 = vpop.f32.mrf.mxu0  ;;  %18214 = vmatprep.subr.bf16.mxu0 %v25454_v52  ;;  %v25494_v63 = vld [vmem:[%s33093_s9 + $0x1480] ss:$20 sps:$4 sm:$0xff]   ;;  %v25497_v52 = vld [vmem:[%s33093_s9 + $0x1458] ss:$20 sps:$4 sm:$0xff]  }
 0xc0e   : > { %v16264_v6 = vrot.slane %v16250_v23, %v31237_v45  ;;  %22297 = vmatprep.subr.bf16.mxu1 %v25455_v18  ;;  %v25502_v19 = vld [vmem:[%s33093_s9 + $0x1434] ss:$20 sps:$4 sm:$0xff]   ;;  %v25500_v18 = vld [vmem:[%s33093_s9 + $0x1430] ss:$20 sps:$4 sm:$0xff]   ;;  %v25505_v59 = vld [vmem:[%s33093_s9 + $0x140c] ss:$20 sps:$4 sm:$0xff]  }
 0xc0f   : > { %v25503_v23 = vld [vmem:[%s33093_s9 + $0x1408] ss:$20 sps:$4 sm:$0xff]  }
 0xc10   : > { %v16272_v58 = vcombine.low %v32513_v26, %v16264_v6  ;;  %18215 = vmatpush1.bf16.msra.mxu0 %v25452_v38  ;;  %v25465_v26 = vld [vmem:[%s33093_s9 + $0x1488] ss:$20 sps:$4 sm:$0xff]   ;;  %v25507_v6 = vld [vmem:[%s33093_s9 + $0x1640] ss:$20 sps:$4 sm:$0xff]  }
 0xc11   : > { %22298 = vmatpush3.bf16.msra.mxu1 %v25456_v62  ;;  %18216 = vmatprep.subr.bf16.mxu0 %v25459_v37  ;;  %v25506_v38 = vld [vmem:[%s33093_s9 + $0x1668] ss:$20 sps:$4 sm:$0xff]  }
 0xc12   : > { %22299 = vmatprep.subr.bf16.mxu1 %v25460_v57  ;;  %v16279_v25 = vrot.slane %v16272_v58, %v31237_v45 }
 0xc14   : > { %18217 = vmatpush1.bf16.msra.mxu0 %v25457_v28 }
 0xc15   : > { %22300 = vmatpush3.bf16.msra.mxu1 %v25461_v54  ;;  %18218 = vmatprep.subr.bf16.mxu0 %v25464_v40 }
 0xc16   : > { %22301 = vmatprep.subr.bf16.mxu1 %v25465_v26 }
 0xc18   : > { %18219 = vmatpush1.bf16.msra.mxu0 %v25462_v36 }
 0xc19   : > { %22302 = vmatpush3.bf16.msra.mxu1 %v25466_v17  ;;  %18220 = vmatprep.subr.bf16.mxu0 %v25469_v11  ;;  %v25509_v11 = vld [vmem:[%s33093_s9 + $0x15f0] ss:$20 sps:$4 sm:$0xff]  }
 0xc1a   : > { %22303 = vmatprep.subr.bf16.mxu1 %v25470_v4  ;;  %v25510_v4 = vld [vmem:[%s33093_s9 + $0x15c8] ss:$20 sps:$4 sm:$0xff]  }
 0xc1c   : > { %18221 = vmatpush1.bf16.msra.mxu0 %v25467_v9  ;;  %v25511_v9 = vld [vmem:[%s33093_s9 + $0x15a0] ss:$20 sps:$4 sm:$0xff]  }
 0xc1d   : > { %22304 = vmatpush3.bf16.msra.mxu1 %v25471_v44  ;;  %18222 = vmatprep.subr.bf16.mxu0 %v25474_v7  ;;  %v25512_v44 = vld [vmem:[%s33093_s9 + $0x1578] ss:$20 sps:$4 sm:$0xff]   ;;  %v25513_v7 = vld [vmem:[%s33093_s9 + $0x1550] ss:$20 sps:$4 sm:$0xff]  }
 0xc1e   : > { %22305 = vmatprep.subr.bf16.mxu1 %v25475_v46 }
 0xc20   : > { %18223 = vmatpush1.bf16.msra.mxu0 %v25472_v20 }
 0xc21   : > { %22306 = vmatpush3.bf16.msra.mxu1 %v25476_v31  ;;  %18224 = vmatprep.subr.bf16.mxu0 %v25479_v56 }
 0xc22   : > { %22307 = vmatprep.subr.bf16.mxu1 %v25480_v35 }
 0xc24   : > { %18225 = vmatpush1.bf16.msra.mxu0 %v25477_v55 }
 0xc25   : > { %22308 = vmatpush3.bf16.msra.mxu1 %v25481_v43  ;;  %18226 = vmatprep.subr.bf16.mxu0 %v25484_v2 }
 0xc27   : > { %v16238_v21 = vpop.f32.mrf.mxu0 }
 0xc28   : > { %v16239_v30 = vadd.f32 %v32601_v53, %v16238_v21  ;;  %v17098_v51 = vpop.f32.mrf.mxu1  ;;  %18325 = vmatmul.mubr.bf16.vlgmr.msra.gmra.mxu1 %v32581_v5  ;;  %18227 = vmatpush2.bf16.msra.mxu0 %v25482_v15 }
 0xc29   : > { %v22502_v47 = vpop.f32.mrf.mxu0  ;;  %18228 = vmatprep.subr.bf16.mxu0 %v25487_v10 }
 0xc2a   : > { %v16271_v13 = vrot.slane %v16239_v30, %v31237_v45  ;;  %v17100_v0 = vpop.f32.mrf.mxu1  ;;  %v25514_v47 = vld [vmem:[%s33095_s11 + $0x78] sm:$0xff]  }
 0xc2b   : > { %v16241_v27 = vpop.f32.mrf.mxu0  ;;  %22324 = vmatprep.subr.bf16.mxu1 %v25514_v47 }
 0xc2c   : > { %v16286_v53 = vrot.slane %v16271_v13, %v31237_v45  ;;  %v17102_v60 = vpop.f32.mrf.mxu1  ;;  %18229 = vmatpush2.bf16.msra.mxu0 %v25485_v22  ;;  %v25517_v13 = vld [vmem:[%s33095_s11 + $0xb8] sm:$0xff]  }
 0xc2d   : > { %v22503_v24 = vpop.f32.mrf.mxu0  ;;  %18230 = vmatprep.subr.bf16.mxu0 %v25490_v48  ;;  %v25516_v48 = vld [vmem:[%s33095_s11 + $0xf8] sm:$0xff]   ;;  %v25519_v60 = vld [vmem:[%s33095_s11 + $0x30] sm:$0xff]  }
 0xc2e   : > { %v16287_v8 = vcombine.low %v16279_v25, %v16286_v53  ;;  %v17103_v14 = vpop.f32.mrf.mxu1  ;;  %v25520_v53 = vld [vmem:[%s33095_s11 + $0xf0] sm:$0xff]   ;;  %v25522_v24 = vld [vmem:[%s33095_s11 + $0x68] sm:$0xff]  }
 0xc2f   : > { %v25525_v14 = vld [vmem:[%s33095_s11 + $0xa8] sm:$0xff]  }
 0xc30   : > { %v32804_v29 = vadd.f32 %v16287_v8, %v32417_v1  ;;  %18231 = vmatpush2.bf16.msra.mxu0 %v25488_v32  ;;  %v25499_v1 = vld [vmem:[%s33093_s9 + $0x145c] ss:$20 sps:$4 sm:$0xff]   ;;  %v25523_v8 = vld [vmem:[%s33095_s11 + $0x28] sm:$0xff]  }
 0xc31   : > { %18232 = vmatprep.subr.bf16.mxu0 %v25493_v16  ;;  %v25521_v32 = vld [vmem:[%s33095_s11 + $0xb0] sm:$0xff]   ;;  %v25524_v16 = vld [vmem:[%s33095_s11 + $0xe8] sm:$0xff]  }
 0xc34   : > { %18233 = vmatpush2.bf16.msra.mxu0 %v25491_v39  ;;  %v25526_v39 = vld [vmem:[%s33095_s11 + $0x60] sm:$0xff]  }
 0xc35   : > { %18234 = vmatprep.subr.bf16.mxu0 %v25496_v41  ;;  %v25528_v41 = vld [vmem:[%s33095_s11 + $0xe0] sm:$0xff]  }
 0xc38   : > { %18235 = vmatpush2.bf16.msra.mxu0 %v25494_v63  ;;  %v25527_v63 = vld [vmem:[%s33095_s11 + $0x20] sm:$0xff]  }
 0xc39   : > { %18236 = vmatprep.subr.bf16.mxu0 %v25499_v1  ;;  %v25529_v1 = vld [vmem:[%s33095_s11 + $0xa0] sm:$0xff]  }
 0xc3c   : > { %18237 = vmatpush2.bf16.msra.mxu0 %v25497_v52  ;;  %v25530_v52 = vld [vmem:[%s33095_s11 + $0x58] sm:$0xff]  }
 0xc3d   : > { %18238 = vmatprep.subr.bf16.mxu0 %v25502_v19 }
 0xc40   : > { %18239 = vmatpush2.bf16.msra.mxu0 %v25500_v18  ;;  %v25531_v18 = vld [vmem:[%s33095_s11 + $0x18] sm:$0xff]  }
 0xc41   : > { %18240 = vmatprep.subr.bf16.mxu0 %v25505_v59  ;;  %v25532_v59 = vld [vmem:[%s33095_s11 + $0xd8] sm:$0xff]  }
 0xc44   : > { %18241 = vmatpush2.bf16.msra.mxu0 %v25503_v23 }
 0xc45   : > { %22524 = vmatprep.subr.bf16.mxu0 %v25627_v3 }
 0xc47   : > { %v17139_v49 = vpop.f32.mrf.mxu0  ;;  %18243 = vmatmul.mubr.bf16.vlgmr.msra.gmra.mxu0 %v32581_v5  ;;  %v25508_v5 = vld [vmem:[%s33093_s9 + $0x1618] ss:$20 sps:$4 sm:$0xff]  }
 0xc48   : > { %v17140_v62 = vadd.f32 %v17139_v49, %v17098_v51  ;;  %v17221_v37 = vpop.f32.mrf.mxu1  ;;  %22525 = vmatpush3.bf16.msra.mxu0 %v25506_v38  ;;  %22540 = vmatprep.mubr.msk.bf16.mxu0 %vm25628_vm5, %v25627_v3  ;;  %v25533_v49 = vld [vmem:[%s33095_s11 + $0x98] sm:$0xff]  }
 0xc49   : > { %v17141_v57 = vpop.f32.mrf.mxu0  ;;  %22526 = vmatprep.subr.bf16.mxu0 %v25627_v3 }
 0xc4a   : > { %v17142_v58 = vadd.f32 %v17141_v57, %v17100_v0  ;;  %v17223_v28 = vpop.f32.mrf.mxu1  ;;  %v25518_v0 = vld [vmem:[%s33095_s11 + $0x70] sm:$0xff]  }
 0xc4b   : > { %v17143_v54 = vpop.f32.mrf.mxu0  ;;  %v25534_v57 = vld [vmem:[%s33095_s11 + $0x50] sm:$0xff]  }
 0xc4c   : > { %v17313_v40 = vcombine.low %v17140_v62, %v17142_v58  ;;  %v17225_v26 = vpop.f32.mrf.mxu1  ;;  %22527 = vmatpush3.bf16.msra.mxu0 %v25507_v6  ;;  %v25536_v54 = vld [vmem:[%s33095_s11 + $0xd0] sm:$0xff]  }
 0xc4d   : > { %v17144_v25 = vpop.f32.mrf.mxu0  ;;  %22528 = vmatprep.subr.bf16.mxu0 %v25627_v3 }
 0xc4e   : > { %v17321_v36 = vrot.slane %v17313_v40, %v31237_v45  ;;  %v17226_v17 = vpop.f32.mrf.mxu1 }
 0xc50   : > { %22529 = vmatpush3.bf16.msra.mxu0 %v25508_v5  ;;  %v25537_v5 = vld [vmem:[%s33095_s11 + $0x90] sm:$0xff]  }
 0xc51   : > { %22530 = vmatprep.subr.bf16.mxu0 %v25627_v3 }
 0xc54   : > { %22531 = vmatpush3.bf16.msra.mxu0 %v25509_v11  ;;  %v25538_v11 = vld [vmem:[%s33095_s11 + $0x48] sm:$0xff]  }
 0xc55   : > { %22532 = vmatprep.subr.bf16.mxu0 %v25627_v3 }
 0xc58   : > { %22533 = vmatpush3.bf16.msra.mxu0 %v25510_v4  ;;  %v25539_v4 = vld [vmem:[%s33095_s11 + $0x8] sm:$0xff]  }
 0xc59   : > { %22534 = vmatprep.subr.bf16.mxu0 %v25627_v3 }
 0xc5c   : > { %22535 = vmatpush3.bf16.msra.mxu0 %v25511_v9  ;;  %v25540_v9 = vld [vmem:[%s33095_s11 + $0xc8] sm:$0xff]  }
 0xc5d   : > { %22536 = vmatprep.subr.bf16.mxu0 %v25627_v3 }
 0xc60   : > { %22537 = vmatpush3.bf16.msra.mxu0 %v25512_v44 }
 0xc61   : > { %22538 = vmatprep.subr.bf16.mxu0 %v25627_v3 }
 0xc64   : > { %22539 = vmatpush3.bf16.msra.mxu0 %v25513_v7  ;;  %v25541_v7 = vld [vmem:[%s33095_s11 + $0x88] sm:$0xff]  }
 0xc65   : > { %22346 = vmatprep.subr.bf16.mxu0 %v25516_v48 }
 0xc67   : > { %22541 = vmatmul.mubr.bf16.vlgmr.msra.gmra.mxu0 %v32680_v34  ;;  %v25515_v34 = vld [vmem:[%s33095_s11 + $0x38] sm:$0xff]  }
 0xc68   : > { %v22278_v46 = vpop.f32.mrf.mxu1  ;;  %22325 = vmatpush3.bf16.msra.mxu1 %v25515_v34  ;;  %22347 = vmatpush3.bf16.msra.mxu0 %v25517_v13 }
 0xc69   : > { %22326 = vmatprep.subr.bf16.mxu1 %v25518_v0  ;;  %22348 = vmatprep.subr.bf16.mxu0 %v25520_v53 }
 0xc6a   : > { %v22279_v20 = vpop.f32.mrf.mxu1 }
 0xc6b   : > { %v22280_v31 = vadd.f32 %v22279_v20, %v22278_v46  ;;  %v25542_v46 = vld [vmem:[%s33095_s11 + $0x40] sm:$0xff]  }
 0xc6c   : > { %v22281_v56 = vpop.f32.mrf.mxu1  ;;  %22327 = vmatpush3.bf16.msra.mxu1 %v25519_v60  ;;  %22349 = vmatpush3.bf16.msra.mxu0 %v25521_v32  ;;  %v25543_v20 = vld [vmem:[%s33095_s11] sm:$0xff]  }
 0xc6d   : > { %22328 = vmatprep.subr.bf16.mxu1 %v25522_v24  ;;  %22350 = vmatprep.subr.bf16.mxu0 %v25524_v16 }
 0xc6e   : > { %v22282_v35 = vpop.f32.mrf.mxu1 }
 0xc70   : > { %22329 = vmatpush3.bf16.msra.mxu1 %v25523_v8  ;;  %22351 = vmatpush3.bf16.msra.mxu0 %v25525_v14 }
 0xc71   : > { %22330 = vmatprep.subr.bf16.mxu1 %v25526_v39  ;;  %22352 = vmatprep.subr.bf16.mxu0 %v25528_v41 }
 0xc74   : > { %22331 = vmatpush3.bf16.msra.mxu1 %v25527_v63  ;;  %22353 = vmatpush3.bf16.msra.mxu0 %v25529_v1 }
 0xc75   : > { %22332 = vmatprep.subr.bf16.mxu1 %v25530_v52  ;;  %22354 = vmatprep.subr.bf16.mxu0 %v25532_v59 }
 0xc78   : > { %22333 = vmatpush3.bf16.msra.mxu1 %v25531_v18  ;;  %22355 = vmatpush3.bf16.msra.mxu0 %v25533_v49 }
 0xc79   : > { %22334 = vmatprep.subr.bf16.mxu1 %v25534_v57  ;;  %22356 = vmatprep.subr.bf16.mxu0 %v25536_v54 }
 0xc7c   : > { %22357 = vmatpush3.bf16.msra.mxu0 %v25537_v5 }
 0xc7d   : > { %22358 = vmatprep.subr.bf16.mxu0 %v25540_v9  ;;  %v25553_v9 = vld [vmem:[%s33097_s13 + $0x30] sm:$0xff]  }
 0xc80   : > { %22359 = vmatpush3.bf16.msra.mxu0 %v25541_v7  ;;  %v25556_v7 = vld [vmem:[%s33097_s13 + $0x18] sm:$0xff]  }
 0xc87   : > { %v17180_v55 = vpop.f32.mrf.mxu0 }
 0xc88   : > { %v17222_v43 = vadd.f32 %v17221_v37, %v17180_v55 }
 0xc89   : > { %v17182_v2 = vpop.f32.mrf.mxu0 }
 0xc8a   : > { %v17224_v15 = vadd.f32 %v17223_v28, %v17182_v2  ;;  %v25535_v28 = vld [vmem:[%s33095_s11 + $0x10] sm:$0xff]  }
 0xc8b   : > { %v17184_v10 = vpop.f32.mrf.mxu0  ;;  %22335 = vmatpush3.bf16.msra.mxu1 %v25535_v28 }
 0xc8c   : > { %v17314_v21 = vcombine.low %v17222_v43, %v17224_v15  ;;  %22336 = vmatprep.subr.bf16.mxu1 %v25538_v11 }
 0xc8d   : > { %v17185_v30 = vpop.f32.mrf.mxu0 }
 0xc8e   : > { %v17328_v51 = vrot.slane %v17314_v21, %v31237_v45 }
 0xc8f   : > { %22337 = vmatpush3.bf16.msra.mxu1 %v25539_v4 }
 0xc90   : > { %v17336_v22 = vcombine.low %v17321_v36, %v17328_v51  ;;  %22338 = vmatprep.subr.bf16.mxu1 %v25542_v46  ;;  %v25557_v46 = vld [vmem:[%s33097_s13 + $0x10] sm:$0xff]  }
 0xc92   : > { %v17343_v27 = vrot.slane %v17336_v22, %v31237_v45 }
 0xc93   : > { %22339 = vmatpush3.bf16.msra.mxu1 %v25543_v20  ;;  %v25558_v20 = vld [vmem:[%s33097_s13 + $0x8] sm:$0xff]  }
 0xc94   : > { %22544 = vmatprep.subr.bf16.mxu1 %v25627_v3 }
 0xca7   : > { %v17302_v19 = vpop.f32.mrf.mxu0 }
 0xca8   : > { %v17303_v23 = vadd.f32 %v22280_v31, %v17302_v19  ;;  %v18162_v38 = vpop.f32.mrf.mxu1  ;;  %v25544_v31 = vld [vmem:[%s33095_s11 + $0xc0] sm:$0xff]  }
 0xca9   : > { %v22522_v62 = vpop.f32.mrf.mxu0  ;;  %22360 = vmatprep.subr.bf16.mxu0 %v25544_v31  ;;  %v25559_v31 = vld [vmem:[%s33097_s13] sm:$0xff]  }
 0xcaa   : > { %v17335_v37 = vrot.slane %v17303_v23, %v31237_v45  ;;  %v18164_v6 = vpop.f32.mrf.mxu1 }
 0xcab   : > { %v17305_v58 = vpop.f32.mrf.mxu0 }
 0xcac   : > { %v17350_v40 = vrot.slane %v17335_v37, %v31237_v45  ;;  %v18166_v26 = vpop.f32.mrf.mxu1  ;;  %v25546_v37 = vld [vmem:[%s33095_s11 + $0x128] ss:$0 sps:$4 sm:$0xff]  }
 0xcad   : > { %v22523_v25 = vpop.f32.mrf.mxu0 }
 0xcae   : > { %v17351_v36 = vcombine.low %v17343_v27, %v17350_v40  ;;  %v18167_v17 = vpop.f32.mrf.mxu1  ;;  %v18756_v25 = vsel %vm18754_vm8, %v25546_v37, 0 }
 0xcaf   : > { %v25551_v17 = vld [vmem:[%s33095_s11 + $0x100] sm:$0xff]  }
 0xcb0   : > { %v17353_v44 = vadd.f32 %v17351_v36, %v32804_v29  ;;  %v25545_v29 = vld [vmem:[%s33095_s11 + $0x80] sm:$0xff]  }
 0xcb1   : > { %22361 = vmatpush3.bf16.msra.mxu0 %v25545_v29 }
 0xcb2   : > { %22560 = vmatprep.subr.bf16.mxu0 %v25627_v3 }
 0xcc7   : > { %v18203_v56 = vpop.f32.mrf.mxu0 }
 0xcc8   : > { %v18204_v35 = vadd.f32 %v18203_v56, %v18162_v38  ;;  %v18285_v55 = vpop.f32.mrf.mxu1 }
 0xcc9   : > { %v18205_v43 = vpop.f32.mrf.mxu0 }
 0xcca   : > { %v18206_v2 = vadd.f32 %v18205_v43, %v18164_v6  ;;  %v18287_v15 = vpop.f32.mrf.mxu1 }
 0xccb   : > { %v18207_v10 = vpop.f32.mrf.mxu0 }
 0xccc   : > { %v18377_v21 = vcombine.low %v18204_v35, %v18206_v2  ;;  %v18289_v30 = vpop.f32.mrf.mxu1 }
 0xccd   : > { %v18208_v51 = vpop.f32.mrf.mxu0  ;;  %v18524_v30 = vld [vmem:[%s33096_s12] sm:$0x1] }
 0xcce   : > { %v18385_v22 = vrot.slane %v18377_v21, %v31237_v45  ;;  %v18290_v47 = vpop.f32.mrf.mxu1 }
 0xce8   : > { %v22309_v34 = vpop.f32.mrf.mxu1 }
 0xcea   : > { %v22310_v48 = vpop.f32.mrf.mxu1 }
 0xceb   : > { %v22311_v63 = vadd.f32 %v22310_v48, %v22309_v34 }
 0xcec   : > { %v22312_v13 = vpop.f32.mrf.mxu1 }
 0xcee   : > { %v22313_v0 = vpop.f32.mrf.mxu1 }
 0xd07   : > { %v18244_v27 = vpop.f32.mrf.mxu0 }
 0xd08   : > { %v18286_v60 = vadd.f32 %v18285_v55, %v18244_v27 }
 0xd09   : > { %v18246_v53 = vpop.f32.mrf.mxu0 }
 0xd0a   : > { %v18288_v32 = vadd.f32 %v18287_v15, %v18246_v53  ;;  %v18894_v53 = vld [vmem:[%s33098_s14] sm:$0x1] }
 0xd0b   : > { %v18248_v24 = vpop.f32.mrf.mxu0 }
 0xd0c   : > { %v18378_v16 = vcombine.low %v18286_v60, %v18288_v32 }
 0xd0d   : > { %v18249_v8 = vpop.f32.mrf.mxu0 }
 0xd0e   : > { %v18392_v14 = vrot.slane %v18378_v16, %v31237_v45 }
 0xd10   : > { %v18400_v39 = vcombine.low %v18385_v22, %v18392_v14 }
 0xd12   : > { %v18407_v41 = vrot.slane %v18400_v39, %v31237_v45 }
 0xd27   : > { %v18366_v1 = vpop.f32.mrf.mxu0 }
 0xd28   : > { %v18367_v52 = vadd.f32 %v22311_v63, %v18366_v1 }
 0xd29   : > { %v22542_v19 = vpop.f32.mrf.mxu0 }
 0xd2a   : > { %v18399_v18 = vrot.slane %v18367_v52, %v31237_v45 }
 0xd2b   : > { %v18369_v59 = vpop.f32.mrf.mxu0 }
 0xd2c   : > { %v18414_v23 = vrot.slane %v18399_v18, %v31237_v45  ;;  %v25552_v45 = vld [vmem:[%s33097_s13 + $0x38] ss:$0 sps:$4 sm:$0xff]  }
 0xd2d   : > { %v22543_v38 = vpop.f32.mrf.mxu0  ;;  %v18945_v36 = vsel %vm18754_vm8, %v25552_v45, 0 }
 0xd2e   : > { %v18415_v49 = vcombine.low %v18407_v41, %v18414_v23 }
 0xd30   : > { %v18417_v62 = vadd.f32 %v18415_v49, %v17353_v44  ;;  %v25554_v44 = vld [vmem:[%s33097_s13 + $0x28] sm:$0xff]  }
 0xd32   : > { %v18501_v6 = vrot.slane %v18417_v62, %v33161_v61  ;;  %v18509_v57 = vrot.slane %v18417_v62, %v33163_v50  ;;  %v18497_v58 = vrot.slane %v18417_v62, %v33160_v33  ;;  %v18505_v28 = vrot.slane %v18417_v62, %v33162_v12  ;;  %v25547_v33 = vld [vmem:[%s33095_s11 + $0x120] sm:$0xff]   ;;  %v25548_v61 = vld [vmem:[%s33095_s11 + $0x118] sm:$0xff]   ;;  %v25549_v12 = vld [vmem:[%s33095_s11 + $0x110] sm:$0xff]  }
 0xd33   : > { %v25550_v50 = vld [vmem:[%s33095_s11 + $0x108] sm:$0xff]   ;;  %v18513_v11 = vrot.slane %v18417_v62, %v33164_v42  ;;  %v25555_v42 = vld [vmem:[%s33097_s13 + $0x20] sm:$0xff]  }
 0xd34   : > { %v18520_v54 = vpack.c.bf16 %v18501_v6, %v18501_v6  ;;  %v18522_v40 = vpack.c.bf16 %v18509_v57, %v18509_v57  ;;  %v18519_v26 = vpack.c.bf16 %v18497_v58, %v18497_v58  ;;  %v18521_v5 = vpack.c.bf16 %v18505_v28, %v18505_v28 }
 0xd35   : > { %v18523_v4 = vpack.c.bf16 %v18513_v11, %v18513_v11 }
 0xd36   : > { %18790 = vmatprep.mubr.bf16.mxu1 %v18520_v54  ;;  %18830 = vmatprep.mubr.bf16.mxu0 %v18522_v40 }
 0xd37   : > { %18791 = vmatmul.mubr.bf16.vlgmr.msra.gmra.mxu1 %v18519_v26  ;;  %18831 = vmatmul.mubr.bf16.vlgmr.msra.gmra.mxu0 %v18521_v5 }
 0xd38   : > { %22545 = vmatpush3.bf16.msra.mxu1 %v18756_v25  ;;  %22556 = vmatprep.mubr.msk.bf16.mxu1 %vm25628_vm5, %v25627_v3 }
 0xd39   : > { %22546 = vmatprep.subr.bf16.mxu1 %v25627_v3  ;;  %22561 = vmatpush3.bf16.msra.mxu0 %v18945_v36 }
 0xd3a   : > { %22562 = vmatprep.subr.bf16.mxu0 %v25627_v3  ;;  %22576 = vmatprep.mubr.msk.bf16.mxu0 %vm25628_vm5, %v25627_v3 }
 0xd3c   : > { %22547 = vmatpush3.bf16.msra.mxu1 %v25547_v33 }
 0xd3d   : > { %22548 = vmatprep.subr.bf16.mxu1 %v25627_v3  ;;  %22563 = vmatpush3.bf16.msra.mxu0 %v25553_v9 }
 0xd3e   : > { %22564 = vmatprep.subr.bf16.mxu0 %v25627_v3 }
 0xd40   : > { %22549 = vmatpush3.bf16.msra.mxu1 %v25548_v61 }
 0xd41   : > { %22550 = vmatprep.subr.bf16.mxu1 %v25627_v3  ;;  %22565 = vmatpush3.bf16.msra.mxu0 %v25554_v44 }
 0xd42   : > { %22566 = vmatprep.subr.bf16.mxu0 %v25627_v3 }
 0xd44   : > { %22551 = vmatpush3.bf16.msra.mxu1 %v25549_v12 }
 0xd45   : > { %22552 = vmatprep.subr.bf16.mxu1 %v25627_v3  ;;  %22567 = vmatpush3.bf16.msra.mxu0 %v25555_v42 }
 0xd46   : > { %22568 = vmatprep.subr.bf16.mxu0 %v25627_v3 }
 0xd48   : > { %22553 = vmatpush3.bf16.msra.mxu1 %v25550_v50 }
 0xd49   : > { %22554 = vmatprep.subr.bf16.mxu1 %v25627_v3  ;;  %22569 = vmatpush3.bf16.msra.mxu0 %v25556_v7 }
 0xd4a   : > { %22570 = vmatprep.subr.bf16.mxu0 %v25627_v3 }
 0xd4c   : > { %22555 = vmatpush3.bf16.msra.mxu1 %v25551_v17 }
 0xd4d   : > { %22571 = vmatpush3.bf16.msra.mxu0 %v25557_v46 }
 0xd4e   : > { %22572 = vmatprep.subr.bf16.mxu0 %v25627_v3 }
 0xd4f   : > { %22557 = vmatmul.mubr.msk.bf16.vlgmr.msra.gmra.mxu1 %vm18750_vm9, %v18523_v4 }
 0xd51   : > { %22573 = vmatpush3.bf16.msra.mxu0 %v25558_v20 }
 0xd52   : > { %22574 = vmatprep.subr.bf16.mxu0 %v25627_v3 }
 0xd55   : > { %22575 = vmatpush3.bf16.msra.mxu0 %v25559_v31 }
 0xdf7   : > { %v22340_v29 = vpop.f32.mrf.mxu1  ;;  %v22362_v56 = vpop.f32.mrf.mxu0 }
 0xdf9   : > { %v22341_v35 = vpop.f32.mrf.mxu1  ;;  %v22363_v55 = vpop.f32.mrf.mxu0 }
 0xdfa   : > { %v22342_v21 = vadd.f32 %v22341_v35, %v22340_v29  ;;  %v22364_v3 = vadd.f32 %v22363_v55, %v22362_v56 }
 0xdfb   : > { %v22343_v43 = vpop.f32.mrf.mxu1  ;;  %v22365_v2 = vpop.f32.mrf.mxu0 }
 0xdfc   : > { %v18793_v51 = vadd.f32 %v22342_v21, %v18524_v30 }
 0xdfd   : > { %v22344_v15 = vpop.f32.mrf.mxu1  ;;  %v22366_v10 = vpop.f32.mrf.mxu0 }
 0xdfe   : > { %v18833_v22 = vadd.f32 %v22364_v3, %v18793_v51 }
 0xe0f   : > { %v18872_v47 = vpop.f32.mrf.mxu1 }
 0xe10   : > { %v18873_v34 = vadd.f32 %v18872_v47, %v18833_v22 }
 0xe11   : > { %v22558_v48 = vpop.f32.mrf.mxu1 }
 0xe12   : > { %v18893_v13 = vpack.c.bf16 %v18873_v34, %v18873_v34 }
 0xe13   : > { %v18875_v0 = vpop.f32.mrf.mxu1 }
 0xe14   : > { %22577 = vmatmul.mubr.msk.bf16.vlgmr.msra.gmra.mxu0 %vm18940_vm10, %v18893_v13 }
 0xe15   : > { %v22559_v27 = vpop.f32.mrf.mxu1 }
 0xed4   : > { %v18981_v60 = vpop.f32.mrf.mxu0 }
 0xed5   : > { %v18982_v32 = vadd.f32 %v18981_v60, %v18894_v53 }
 0xed6   : > { %v22578_v24 = vpop.f32.mrf.mxu0 }
 0xed7   : > { %v18988_v16 = vsel %vm18987_vm11, %v18982_v32, -inf }
 0xed8   : > { %18989 = vmax.xlane.f32.xlu0 %v18988_v16  ;;  %v18984_v8 = vpop.f32.mrf.mxu0 }
 0xeda   : > { %v22579_v14 = vpop.f32.mrf.mxu0 }
 0xf61   : > { %v18990_v39 = vpop.xlane.xlu0 %18989 }
 0xf62   : > { %v18991_v41 = vsub.f32 %v18982_v32, %v18990_v39 }
 0xf64   : > { %v18992_v63 = vmul.f32 1.442695, %v18991_v41 }
 0xf66   : > { %25560 = vpow2.f32 %v18992_v63 }
 0xf73   : > { %v25561_v1 = vpop.eup %25560 }
 0xf74   : > { %v18994_v52 = vsel %vm18987_vm11, %v25561_v1, 0.0 }
 0xf75   : > { %18995 = vadd.xlane.f32.xlu0 %v18994_v52 }
 0xffe   : > { %v18996_v19 = vpop.xlane.xlu0 %18995 }
 0xfff   : > { %25562 = vlog2.f32 %v18996_v19 }
0x100c   : > { %v25563_v18 = vpop.eup %25562 }
0x100d   : > { %v18998_v59 = vmul.f32 0.6931472, %v25563_v18 }
0x100f   : > { %v18999_v23 = vsub.f32 %v18991_v41, %v18998_v59 }
0x1011   : > { %19000 = vst.msk [vmem:[%s486_s16] sm:$0x1] %vm18987_vm11, %v18999_v23 }
0x1012   : > { %25577 = shalt.err (!%p25574_p3)
}
0x1013   : > { %s25578_s24 = scalar_lea.hbm %s19012_s27, 16  ;;  %s25582_s16 = scalar_lea.hbm %s33099_s15, 32 }
0x1014   : > { %p25579_p4 = scmp.ne.s32.totalorder %s19012_s27, %s25578_s24  ;;  %p25583_p9 = scmp.lt.s32.totalorder %s19012_s27, %s33099_s15 }
0x1015   : > { %p25584_p10 = scmp.lt.s32.totalorder %s25582_s16, %s25578_s24 }
0x1016   : > { %p25580_p7 = pnand %p25579_p4, %p25749_p5 }
0x1017   : > { %p25585_p11 = por %p25584_p10, %p25583_p9 }
0x1018   : > { %p25581_p8 = pneg %p25580_p7 }
0x101a   : > { %p25586_p12 = pnand %p25585_p11, %p25581_p8 }
0x101c   : > { %25589 = shalt.err (!%p25586_p12)
}
0x101d   : > { %22587 = dma.vmem_to_hbm [thread:$0]  (%p25749_p5), %s19015_s20, 16, %s19012_s27, %s19002_s29  }
0x101e PF: > { %s33166_s17 = sld [smem:[#allocation5_spill]]  ;;  %p22593_p13 = scmp.ge.s32.totalorder %s25624_s21, 2 }
0x1020   : > { %p22590_p0 = pnand %p22593_p13, %p25753_p6 }
0x1022   : > { %p22591_p1 = pneg %p22590_p0 }
0x1024   : > { %s19026_s25 = sand.u32 1, %s33166_s17  }
0x1025   : > { %s19027_s22 = scalar_lea.sflag [#allocation3], %s19026_s25 }
0x1026   : > { %25607 = dma.done.wait (%p22591_p1), %s19027_s22, 16  }
0x1027   : > { %25609 = vsyncadd (%p22591_p1), %s19027_s22, 4294967280  ;;  %s33168_s21 = sld [smem:[#allocation7_spill]]  ;;  %s33171_s18 = smov %s25616_s19 }
0x1028   : > { %s33169_s0 = sld [smem:[#allocation6_spill]] }
0x1029   : > { %s33170_s20 = sld [smem:[#allocation8_spill]] }
0x102d   : > { %p25_p2 = scmp.ge.s32.totalorder %s33168_s21, 4  }
0x102e   : > { %s33172_s19 = smov %s33169_s0 }
0x102f   :  { %27 = sbr.rel (!%p25_p2) target bundleno = 5 (0x5), region = 123 }
0x1034   :  { %19031 = vsyncpa [#allocation3], 1 }
0x1035   :  { %19033 = vsyncpa [#allocation3 + $0x1], 1 }

</bundles_post_ra>
